<compile_context>
chip_gen: v5e
topology: v5e:2x2
jax: 0.10.0
libtpu: 0.0.40
codegen_flags: <defaults>
</compile_context>

<pallas_src>
import functools

import jax
import jax.numpy as jnp
from jax.experimental import pallas as pl
from jax.experimental.pallas import tpu as pltpu


def _mlp_kernel(x_ref, w1_ref, b1_ref, w2_ref, b2_ref, w3_ref, b3_ref, o_ref):
    # bf16 operands on the MXU, f32 accumulation, f32 bias adds.
    x = x_ref[...]
    h1 = jnp.dot(x, w1_ref[...], preferred_element_type=jnp.float32) + b1_ref[...]
    h1 = jnp.maximum(h1, 0.0).astype(jnp.bfloat16)
    h2 = jnp.dot(h1, w2_ref[...], preferred_element_type=jnp.float32) + b2_ref[...]
    h2 = jnp.maximum(h2, 0.0).astype(jnp.bfloat16)
    o_ref[...] = (
        jnp.dot(h2, w3_ref[...], preferred_element_type=jnp.float32) + b3_ref[...]
    ).astype(o_ref.dtype)


def _choose_block_m(batch):
    """Batch tile: big enough to feed the MXU, >=2 grid steps when possible."""
    if batch < 16:
        return batch                      # single full-extent tile
    bm = min(256, batch // 2)             # at least 2 steps for v7x's 2 TCs
    return max(8, (bm // 8) * 8)          # keep sublane (8) alignment


@functools.partial(jax.jit, static_argnames=("block_m",))
def mlp_forward(x, w1, b1, w2, b2, w3, b3, *, block_m=None):
    B, D = x.shape
    H = w1.shape[1]
    O = w3.shape[1]
    O_pad = pl.cdiv(O, 128) * 128         # lane-dense output (unmasked stores)

    if block_m is None:
        block_m = _choose_block_m(B)

    bf16, f32 = jnp.bfloat16, jnp.float32
    x_b = x.astype(bf16)
    w1_b = w1.astype(bf16)
    w2_b = w2.astype(bf16)
    w3_p = jnp.zeros((H, O_pad), bf16).at[:, :O].set(w3.astype(bf16))
    b1_f = b1.astype(f32)
    b2_f = b2.astype(f32)
    b3_p = jnp.zeros((1, O_pad), f32).at[:, :O].set(b3.astype(f32))

    grid = (pl.cdiv(B, block_m),)
    full = lambda i: (0, 0)  # weights/biases resident across the batch grid

    cost = pl.CostEstimate(
        flops=2 * B * (D * H + H * H + H * O_pad),
        transcendentals=0,
        bytes_accessed=(
            B * D * 2                       # x (bf16)
            + (D * H + H * H + H * O_pad) * 2  # weights (bf16)
            + (2 * H + O_pad) * 4           # biases (f32)
            + B * O_pad * 4                 # output (f32)
        ),
    )

    out = pl.pallas_call(
        _mlp_kernel,
        out_shape=jax.ShapeDtypeStruct((B, O_pad), jnp.float32),
        grid_spec=pltpu.PrefetchScalarGridSpec(
            num_scalar_prefetch=0,
            grid=grid,
            in_specs=[
                pl.BlockSpec((block_m, D), lambda i: (i, 0)),
                pl.BlockSpec((D, H), full),
                pl.BlockSpec((1, H), full),
                pl.BlockSpec((H, H), full),
                pl.BlockSpec((1, H), full),
                pl.BlockSpec((H, O_pad), full),
                pl.BlockSpec((1, O_pad), full),
            ],
            out_specs=pl.BlockSpec((block_m, O_pad), lambda i: (i, 0)),
        ),
        compiler_params=pltpu.CompilerParams(
            dimension_semantics=("parallel",),
            vmem_limit_bytes=32 * 1024 * 1024,
        ),
        cost_estimate=cost,
    )(x_b, w1_b, b1_f, w2_b, b2_f, w3_p, b3_p)

    return out[:, :O]


def init_params(key, img_size, output_size):
    """Deterministic init mimicking nn.Linear's U(-1/sqrt(fan_in), 1/sqrt(fan_in))."""
    d_in = img_size * img_size
    d_hid = 4 * img_size * img_size
    ks = jax.random.split(key, 6)

    def lin(kw, kb, fan_in, fan_out):
        bound = 1.0 / jnp.sqrt(fan_in)
        w = jax.random.uniform(kw, (fan_in, fan_out), jnp.float32, -bound, bound)
        b = jax.random.uniform(kb, (1, fan_out), jnp.float32, -bound, bound)
        return w, b

    w1, b1 = lin(ks[0], ks[1], d_in, d_hid)
    w2, b2 = lin(ks[2], ks[3], d_hid, d_hid)
    w3, b3 = lin(ks[4], ks[5], d_hid, output_size)
    return w1, b1, w2, b2, w3, b3


def mlp_reference(x, w1, b1, w2, b2, w3, b3):
    """Precision-matched reference: bf16 operands, f32 accumulation / bias."""
    h1 = jnp.dot(x, w1, preferred_element_type=jnp.float32) + b1
    h1 = jnp.maximum(h1, 0.0).astype(jnp.bfloat16)
    h2 = jnp.dot(h1, w2, preferred_element_type=jnp.float32) + b2
    h2 = jnp.maximum(h2, 0.0).astype(jnp.bfloat16)
    return jnp.dot(h2, w3, preferred_element_type=jnp.float32) + b3


if __name__ == "__main__":
    img_size = 16          # -> in_features = 256, hidden = 1024
    output_size = 10
    batch = 256            # -> block_m = 128, grid = (2,): both v7x TCs get work

    key = jax.random.PRNGKey(0)
    kx, kp = jax.random.split(key)
    x = jax.random.normal(kx, (batch, img_size * img_size), jnp.float32)
    params = init_params(kp, img_size, output_size)

    out = jax.block_until_ready(mlp_forward(x, *params))

    w1, b1, w2, b2, w3, b3 = params
    ref = mlp_reference(
        x.astype(jnp.bfloat16),
        w1.astype(jnp.bfloat16), b1,
        w2.astype(jnp.bfloat16), b2,
        w3.astype(jnp.bfloat16), b3,
    )

    assert out.shape == (batch, output_size)
    assert jnp.allclose(out, ref, atol=2e-2, rtol=2e-2), "mismatch vs reference"

    print("KERNEL_OK")
</pallas_src>

<mosaic_0001>
module attributes {stable_mosaic.version = 11 : i64} {
  func.func @_mlp_kernel(%arg0: i32, %arg1: memref<128x256xbf16, #tpu.memory_space<vmem>>, %arg2: memref<256x1024xbf16, #tpu.memory_space<vmem>>, %arg3: memref<1x1024xf32, #tpu.memory_space<vmem>>, %arg4: memref<1024x1024xbf16, #tpu.memory_space<vmem>>, %arg5: memref<1x1024xf32, #tpu.memory_space<vmem>>, %arg6: memref<1024x128xbf16, #tpu.memory_space<vmem>>, %arg7: memref<1x128xf32, #tpu.memory_space<vmem>>, %arg8: memref<128x128xf32, #tpu.memory_space<vmem>>) attributes {dimension_semantics = [#tpu.dimension_semantics<parallel>], iteration_bounds = array<i64: 2>, scalar_prefetch = 0 : i64, scratch_operands = 0 : i64, tpu.core_type = #tpu.core_type<tc>, window_params = [{transform_indices = @transform_0, window_bounds = array<i64: 128, 256>}, {pipeline_mode = #tpu.pipeline_mode<synchronous>, transform_indices = @transform_1, window_bounds = array<i64: 256, 1024>}, {pipeline_mode = #tpu.pipeline_mode<synchronous>, transform_indices = @transform_2, window_bounds = array<i64: 1, 1024>}, {pipeline_mode = #tpu.pipeline_mode<synchronous>, transform_indices = @transform_3, window_bounds = array<i64: 1024, 1024>}, {pipeline_mode = #tpu.pipeline_mode<synchronous>, transform_indices = @transform_4, window_bounds = array<i64: 1, 1024>}, {pipeline_mode = #tpu.pipeline_mode<synchronous>, transform_indices = @transform_5, window_bounds = array<i64: 1024, 128>}, {pipeline_mode = #tpu.pipeline_mode<synchronous>, transform_indices = @transform_6, window_bounds = array<i64: 1, 128>}, {transform_indices = @transform_7, window_bounds = array<i64: 128, 128>}]} {
    %c0 = arith.constant 0 : index
    %c0_0 = arith.constant 0 : index
    %0 = vector.load %arg1[%c0, %c0_0] : memref<128x256xbf16, #tpu.memory_space<vmem>>, vector<128x256xbf16>
    %c0_1 = arith.constant 0 : index
    %c0_2 = arith.constant 0 : index
    %1 = vector.load %arg2[%c0_1, %c0_2] : memref<256x1024xbf16, #tpu.memory_space<vmem>>, vector<256x1024xbf16>
    %cst = arith.constant dense<0.000000e+00> : vector<128x1024xf32>
    %2 = tpu.matmul %0, %1, %cst {dimension_numbers = #tpu.dot_dimension_numbers<[1], [0], [0], [1], [0, 0, 1, 1], [], []>} : vector<128x256xbf16>, vector<256x1024xbf16>, vector<128x1024xf32> -> vector<128x1024xf32>
    %c0_3 = arith.constant 0 : index
    %c0_4 = arith.constant 0 : index
    %3 = vector.load %arg3[%c0_3, %c0_4] : memref<1x1024xf32, #tpu.memory_space<vmem>>, vector<1x1024xf32>
    %4 = vector.broadcast %3 : vector<1x1024xf32> to vector<128x1024xf32>
    %5 = arith.addf %2, %4 : vector<128x1024xf32>
    %cst_5 = arith.constant 0.000000e+00 : f32
    %6 = vector.broadcast %cst_5 : f32 to vector<128x1024xf32>
    %7 = arith.maximumf %5, %6 : vector<128x1024xf32>
    %8 = arith.truncf %7 : vector<128x1024xf32> to vector<128x1024xbf16>
    %c0_6 = arith.constant 0 : index
    %c0_7 = arith.constant 0 : index
    %9 = vector.load %arg4[%c0_6, %c0_7] : memref<1024x1024xbf16, #tpu.memory_space<vmem>>, vector<1024x1024xbf16>
    %cst_8 = arith.constant dense<0.000000e+00> : vector<128x1024xf32>
    %10 = tpu.matmul %8, %9, %cst_8 {dimension_numbers = #tpu.dot_dimension_numbers<[1], [0], [0], [1], [0, 0, 1, 1], [], []>} : vector<128x1024xbf16>, vector<1024x1024xbf16>, vector<128x1024xf32> -> vector<128x1024xf32>
    %c0_9 = arith.constant 0 : index
    %c0_10 = arith.constant 0 : index
    %11 = vector.load %arg5[%c0_9, %c0_10] : memref<1x1024xf32, #tpu.memory_space<vmem>>, vector<1x1024xf32>
    %12 = vector.broadcast %11 : vector<1x1024xf32> to vector<128x1024xf32>
    %13 = arith.addf %10, %12 : vector<128x1024xf32>
    %cst_11 = arith.constant 0.000000e+00 : f32
    %14 = vector.broadcast %cst_11 : f32 to vector<128x1024xf32>
    %15 = arith.maximumf %13, %14 : vector<128x1024xf32>
    %16 = arith.truncf %15 : vector<128x1024xf32> to vector<128x1024xbf16>
    %c0_12 = arith.constant 0 : index
    %c0_13 = arith.constant 0 : index
    %17 = vector.load %arg6[%c0_12, %c0_13] : memref<1024x128xbf16, #tpu.memory_space<vmem>>, vector<1024x128xbf16>
    %cst_14 = arith.constant dense<0.000000e+00> : vector<128x128xf32>
    %18 = tpu.matmul %16, %17, %cst_14 {dimension_numbers = #tpu.dot_dimension_numbers<[1], [0], [0], [1], [0, 0, 1, 1], [], []>} : vector<128x1024xbf16>, vector<1024x128xbf16>, vector<128x128xf32> -> vector<128x128xf32>
    %c0_15 = arith.constant 0 : index
    %c0_16 = arith.constant 0 : index
    %19 = vector.load %arg7[%c0_15, %c0_16] : memref<1x128xf32, #tpu.memory_space<vmem>>, vector<1x128xf32>
    %20 = vector.broadcast %19 : vector<1x128xf32> to vector<128x128xf32>
    %21 = arith.addf %18, %20 : vector<128x128xf32>
    %c0_17 = arith.constant 0 : index
    %c0_18 = arith.constant 0 : index
    %22 = vector.load %arg8[%c0_17, %c0_18] : memref<128x128xf32, #tpu.memory_space<vmem>>, vector<128x128xf32>
    tpu.vector_store %arg8[%c0_17, %c0_18], %21 {strides = array<i32>} : memref<128x128xf32, #tpu.memory_space<vmem>>, vector<128x128xf32>,
    return
  }
  func.func @transform_0(%arg0: i32) -> (i32, i32) {
    %c0_i32 = arith.constant 0 : i32
    %c0_i32_0 = arith.constant 0 : i32
    return %arg0, %c0_i32 : i32, i32
  }
  func.func @transform_1(%arg0: i32) -> (i32, i32) {
    %c0_i32 = arith.constant 0 : i32
    %c0_i32_0 = arith.constant 0 : i32
    %c0_i32_1 = arith.constant 0 : i32
    return %c0_i32, %c0_i32_0 : i32, i32
  }
  func.func @transform_2(%arg0: i32) -> (i32, i32) {
    %c0_i32 = arith.constant 0 : i32
    %c0_i32_0 = arith.constant 0 : i32
    %c0_i32_1 = arith.constant 0 : i32
    return %c0_i32, %c0_i32_0 : i32, i32
  }
  func.func @transform_3(%arg0: i32) -> (i32, i32) {
    %c0_i32 = arith.constant 0 : i32
    %c0_i32_0 = arith.constant 0 : i32
    %c0_i32_1 = arith.constant 0 : i32
    return %c0_i32, %c0_i32_0 : i32, i32
  }
  func.func @transform_4(%arg0: i32) -> (i32, i32) {
    %c0_i32 = arith.constant 0 : i32
    %c0_i32_0 = arith.constant 0 : i32
    %c0_i32_1 = arith.constant 0 : i32
    return %c0_i32, %c0_i32_0 : i32, i32
  }
  func.func @transform_5(%arg0: i32) -> (i32, i32) {
    %c0_i32 = arith.constant 0 : i32
    %c0_i32_0 = arith.constant 0 : i32
    %c0_i32_1 = arith.constant 0 : i32
    return %c0_i32, %c0_i32_0 : i32, i32
  }
  func.func @transform_6(%arg0: i32) -> (i32, i32) {
    %c0_i32 = arith.constant 0 : i32
    %c0_i32_0 = arith.constant 0 : i32
    %c0_i32_1 = arith.constant 0 : i32
    return %c0_i32, %c0_i32_0 : i32, i32
  }
  func.func @transform_7(%arg0: i32) -> (i32, i32) {
    %c0_i32 = arith.constant 0 : i32
    %c0_i32_0 = arith.constant 0 : i32
    return %arg0, %c0_i32 : i32, i32
  }
}

</mosaic_0001>

<bundles_post_ra>
// kernel: mlp_forward.1
= control target key start
LH: loop header
LB: loop body
LE: loop exit
PB: predicated region body
PF: predicated region fallthrough
CT: control target
= control target key end

     0   :  { %s13219_s24 = smov 0   ;;  %s19104_s0 = inlined_call_operand.vmem [shape: bf16[256,256], index: 0, kind: input, shape index: {}]   ;;  %s19105_s1 = inlined_call_operand.vmem [shape: bf16[256,1024], index: 1, kind: input, shape index: {}]   ;;  %s19106_s2 = inlined_call_operand.vmem [shape: f32[1,1024], index: 2, kind: input, shape index: {}]   ;;  %s19107_s3 = inlined_call_operand.vmem [shape: bf16[1024,1024], index: 3, kind: input, shape index: {}]   ;;  %s19108_s4 = inlined_call_operand.vmem [shape: f32[1,1024], index: 4, kind: input, shape index: {}]   ;;  %s19109_s5 = inlined_call_operand.vmem [shape: bf16[1024,128], index: 5, kind: input, shape index: {}]   ;;  %s19110_s6 = inlined_call_operand.vmem [shape: f32[1,128], index: 6, kind: input, shape index: {}]   ;;  %s19111_s7 = inlined_call_operand.vmem [shape: f32[256,128], index: 7, kind: output, shape index: {}]  }
   0x1 LB: > { %s9541_s25 = sadd.s32 4294967295, %s13177_s24   ;;  %p9545_p0 = scmp.ge.s32.totalorder %s13177_s24, 1  ;;  %s13177_s24 = sphi %s13219_s24, %s17_s24  }
   0x2   : > { %p239_p1 = scmp.lt.s32.totalorder %s13177_s24, 3 }
   0x4   : > { %p240_p2 = pnand %p9545_p0, %p239_p1 }
   0x6   : > { %243 = sbr.rel (%p240_p2) target bundleno = 2991 (0xbaf), region = 48 }
   0xb   : > { %v9841_v0 = vld [vmem:[%s19105_s1 + $0x1c0] sm:$0xf]  ;;  %v12506_v5 = vld [vmem:[%s19105_s1 + $0x1c4] sm:$0xf]  ;;  %s9546_s29 = sshll.u32 %s9541_s25, 4 }
   0xc   : > { %v12510_v1 = vld [vmem:[%s19105_s1 + $0x1dc] sm:$0xf0]  ;;  %v9843_v6 = vld [vmem:[%s19105_s1 + $0x1e0] sm:$0xf0]  ;;  %p273_p3 = scmp.lt.s32.totalorder %s9546_s29, 31 }
   0xd   : > { %v10097_v2 = vld [vmem:[%s19105_s1 + $0x3c0] sm:$0xf]  ;;  %v9842_v3 = vor.u32 %v12510_v1, %v9841_v0  ;;  %v9846_v8 = vor.u32 %v12506_v5, %v9843_v6  ;;  %v12570_v9 = vld [vmem:[%s19105_s1 + $0x3c4] sm:$0xf] }
   0xe   : > { %v12574_v4 = vld [vmem:[%s19105_s1 + $0x3dc] sm:$0xf0]  ;;  %v10099_v10 = vld [vmem:[%s19105_s1 + $0x3e0] sm:$0xf0]  ;;  %s19589_s29 = smov (!%p273_p3, %s9546_s29), 31 }
   0xf   : > { %v10098_v7 = vor.u32 %v12574_v4, %v10097_v2  ;;  %v9809_v11 = vld [vmem:[%s19105_s1 + $0x180] sm:$0xf]  ;;  %1167 = vmatpush.bf16.msra.mxu0 %v9842_v3  ;;  %v10102_v12 = vor.u32 %v12570_v9, %v10099_v10  ;;  %1265 = vmatpush.bf16.msra.mxu2 %v9846_v8  ;;  %v12498_v18 = vld [vmem:[%s19105_s1 + $0x184] sm:$0xf]  ;;  %s12433_s28 = sshll.u32 %s19589_s29, 3 }
  0x10   : > { %v12502_v13 = vld [vmem:[%s19105_s1 + $0x19c] sm:$0xf0]  ;;  %v9811_v19 = vld [vmem:[%s19105_s1 + $0x1a0] sm:$0xf0]  ;;  %s13435_s13 = scalar_lea.vmem %s19104_s0, %s12433_s28  ;;  %s19068_s20 = scalar_lea.vmem %s19111_s7, %s12433_s28 }
  0x11   : > { %v10065_v14 = vld [vmem:[%s19105_s1 + $0x380] sm:$0xf]  ;;  %1216 = vmatpush.bf16.msra.mxu1 %v10098_v7  ;;  %v9810_v16 = vor.u32 %v12502_v13, %v9809_v11  ;;  %v12562_v20 = vld [vmem:[%s19105_s1 + $0x384] sm:$0xf]  ;;  %1314 = vmatpush.bf16.msra.mxu3 %v10102_v12  ;;  %v9814_v21 = vor.u32 %v12498_v18, %v9811_v19 }
  0x12   : > { %v12566_v15 = vld [vmem:[%s19105_s1 + $0x39c] sm:$0xf0]  ;;  %v10067_v22 = vld [vmem:[%s19105_s1 + $0x3a0] sm:$0xf0] }
  0x13   : > { %v10066_v17 = vor.u32 %v12566_v15, %v10065_v14  ;;  %v9777_v23 = vld [vmem:[%s19105_s1 + $0x140] sm:$0xf]  ;;  %v10070_v25 = vor.u32 %v12562_v20, %v10067_v22  ;;  %v12490_v28 = vld [vmem:[%s19105_s1 + $0x144] sm:$0xf]  ;;  %1168 = vmatpush.bf16.msra.mxu0 %v9810_v16  ;;  %1266 = vmatpush.bf16.msra.mxu2 %v9814_v21 }
  0x14   : > { %v12494_v24 = vld [vmem:[%s19105_s1 + $0x15c] sm:$0xf0]  ;;  %v9779_v30 = vld [vmem:[%s19105_s1 + $0x160] sm:$0xf0] }
  0x15   : > { %v10033_v26 = vld [vmem:[%s19105_s1 + $0x340] sm:$0xf]  ;;  %v9778_v29 = vor.u32 %v12494_v24, %v9777_v23  ;;  %v12554_v31 = vld [vmem:[%s19105_s1 + $0x344] sm:$0xf]  ;;  %1217 = vmatpush.bf16.msra.mxu1 %v10066_v17  ;;  %v9782_v34 = vor.u32 %v12490_v28, %v9779_v30  ;;  %1315 = vmatpush.bf16.msra.mxu3 %v10070_v25  ;;  %v12507_v28 = vld [vmem:[%s19105_s1 + $0x1cc] sm:$0xf] }
  0x16   : > { %v12558_v27 = vld [vmem:[%s19105_s1 + $0x35c] sm:$0xf0]  ;;  %v10035_v32 = vld [vmem:[%s19105_s1 + $0x360] sm:$0xf0] }
  0x17   : > { %v10034_v33 = vor.u32 %v12558_v27, %v10033_v26  ;;  %v9745_v35 = vld [vmem:[%s19105_s1 + $0x100] sm:$0xf]  ;;  %v10038_v38 = vor.u32 %v12554_v31, %v10035_v32  ;;  %v12482_v40 = vld [vmem:[%s19105_s1 + $0x104] sm:$0xf]  ;;  %1169 = vmatpush.bf16.msra.mxu0 %v9778_v29  ;;  %1267 = vmatpush.bf16.msra.mxu2 %v9782_v34  ;;  %v9851_v29 = vld [vmem:[%s19105_s1 + $0x1e8] sm:$0xf0] }
  0x18   : > { %v12486_v36 = vld [vmem:[%s19105_s1 + $0x11c] sm:$0xf0]  ;;  %v9747_v41 = vld [vmem:[%s19105_s1 + $0x120] sm:$0xf0]  ;;  %v9849_v31 = vld [vmem:[%s19105_s1 + $0x1c8] sm:$0xf] }
  0x19   : > { %v10001_v37 = vld [vmem:[%s19105_s1 + $0x300] sm:$0xf]  ;;  %v12546_v42 = vld [vmem:[%s19105_s1 + $0x304] sm:$0xf]  ;;  %v9746_v44 = vor.u32 %v12486_v36, %v9745_v35  ;;  %1218 = vmatpush.bf16.msra.mxu1 %v10034_v33  ;;  %v9750_v46 = vor.u32 %v12482_v40, %v9747_v41  ;;  %1316 = vmatpush.bf16.msra.mxu3 %v10038_v38  ;;  %v12571_v32 = vld [vmem:[%s19105_s1 + $0x3cc] sm:$0xf]  ;;  %v9854_v41 = vor.u32 %v12507_v28, %v9851_v29 }
  0x1a   : > { %v12550_v39 = vld [vmem:[%s19105_s1 + $0x31c] sm:$0xf0]  ;;  %v10003_v43 = vld [vmem:[%s19105_s1 + $0x320] sm:$0xf0]  ;;  %v10107_v33 = vld [vmem:[%s19105_s1 + $0x3e8] sm:$0xf0] }
  0x1b   : > { %v10002_v45 = vor.u32 %v12550_v39, %v10001_v37  ;;  %v9713_v47 = vld [vmem:[%s19105_s1 + $0xc0] sm:$0xf]  ;;  %v10006_v50 = vor.u32 %v12546_v42, %v10003_v43  ;;  %v12474_v52 = vld [vmem:[%s19105_s1 + $0xc4] sm:$0xf]  ;;  %1170 = vmatpush.bf16.msra.mxu0 %v9746_v44  ;;  %1268 = vmatpush.bf16.msra.mxu2 %v9750_v46  ;;  %v12435_v37 = vld [vmem:[%s13435_s13 + $0x4] sm:$0xf0] }
  0x1c   : > { %v12478_v48 = vld [vmem:[%s19105_s1 + $0xdc] sm:$0xf0]  ;;  %v9715_v53 = vld [vmem:[%s19105_s1 + $0xe0] sm:$0xf0]  ;;  %v9555_v40 = vld [vmem:[%s13435_s13 + $0x8] sm:$0xf0] }
  0x1d   : > { %v9969_v49 = vld [vmem:[%s19105_s1 + $0x2c0] sm:$0xf]  ;;  %v12538_v54 = vld [vmem:[%s19105_s1 + $0x2c4] sm:$0xf]  ;;  %v9714_v56 = vor.u32 %v12478_v48, %v9713_v47  ;;  %1219 = vmatpush.bf16.msra.mxu1 %v10002_v45  ;;  %v9718_v58 = vor.u32 %v12474_v52, %v9715_v53  ;;  %1317 = vmatpush.bf16.msra.mxu3 %v10006_v50  ;;  %v12511_v42 = vld [vmem:[%s19105_s1 + $0x1e4] sm:$0xf0]  ;;  %v10110_v45 = vor.u32 %v12571_v32, %v10107_v33 }
  0x1e   : > { %v12542_v51 = vld [vmem:[%s19105_s1 + $0x2dc] sm:$0xf0]  ;;  %v9971_v55 = vld [vmem:[%s19105_s1 + $0x2e0] sm:$0xf0]  ;;  %v10105_v43 = vld [vmem:[%s19105_s1 + $0x3c8] sm:$0xf]  ;;  %v9850_v52 = vor.u32 %v12511_v42, %v9849_v31 }
  0x1f   : > { %v9970_v57 = vor.u32 %v12542_v51, %v9969_v49  ;;  %v9681_v59 = vld [vmem:[%s19105_s1 + $0x80] sm:$0xf]  ;;  %v9974_v62 = vor.u32 %v12538_v54, %v9971_v55  ;;  %v12466_v0 = vld [vmem:[%s19105_s1 + $0x84] sm:$0xf]  ;;  %1171 = vmatpush.bf16.msra.mxu0 %v9714_v56  ;;  %1269 = vmatpush.bf16.msra.mxu2 %v9718_v58  ;;  %v12575_v46 = vld [vmem:[%s19105_s1 + $0x3e4] sm:$0xf0] }
  0x20   : > { %v12470_v60 = vld [vmem:[%s19105_s1 + $0x9c] sm:$0xf0]  ;;  %v9683_v1 = vld [vmem:[%s19105_s1 + $0xa0] sm:$0xf0]  ;;  %v12499_v47 = vld [vmem:[%s19105_s1 + $0x18c] sm:$0xf]  ;;  %v10106_v53 = vor.u32 %v12575_v46, %v10105_v43 }
  0x21   : > { %v9937_v61 = vld [vmem:[%s19105_s1 + $0x280] sm:$0xf]  ;;  %v12530_v2 = vld [vmem:[%s19105_s1 + $0x284] sm:$0xf]  ;;  %v9682_v4 = vor.u32 %v12470_v60, %v9681_v59  ;;  %1220 = vmatpush.bf16.msra.mxu1 %v9970_v57  ;;  %v9686_v7 = vor.u32 %v12466_v0, %v9683_v1  ;;  %1318 = vmatpush.bf16.msra.mxu3 %v9974_v62  ;;  %v9819_v48 = vld [vmem:[%s19105_s1 + $0x1a8] sm:$0xf0] }
  0x22   : > { %v12534_v63 = vld [vmem:[%s19105_s1 + $0x29c] sm:$0xf0]  ;;  %v9939_v3 = vld [vmem:[%s19105_s1 + $0x2a0] sm:$0xf0]  ;;  %v12563_v50 = vld [vmem:[%s19105_s1 + $0x38c] sm:$0xf]  ;;  %v9822_v54 = vor.u32 %v12499_v47, %v9819_v48 }
  0x23   : > { %v9649_v5 = vld [vmem:[%s19105_s1 + $0x40] sm:$0xf]  ;;  %v9938_v6 = vor.u32 %v12534_v63, %v9937_v61  ;;  %v9942_v11 = vor.u32 %v12530_v2, %v9939_v3  ;;  %v12458_v12 = vld [vmem:[%s19105_s1 + $0x44] sm:$0xf]  ;;  %1172 = vmatpush.bf16.msra.mxu0 %v9682_v4  ;;  %1270 = vmatpush.bf16.msra.mxu2 %v9686_v7  ;;  %v10075_v51 = vld [vmem:[%s19105_s1 + $0x3a8] sm:$0xf0] }
  0x24   : > { %v12462_v8 = vld [vmem:[%s19105_s1 + $0x5c] sm:$0xf0]  ;;  %v9651_v13 = vld [vmem:[%s19105_s1 + $0x60] sm:$0xf0]  ;;  %v9817_v55 = vld [vmem:[%s19105_s1 + $0x188] sm:$0xf]  ;;  %v10078_v57 = vor.u32 %v12563_v50, %v10075_v51 }
  0x25   : > { %v9905_v9 = vld [vmem:[%s19105_s1 + $0x240] sm:$0xf]  ;;  %v12522_v14 = vld [vmem:[%s19105_s1 + $0x244] sm:$0xf]  ;;  %v9650_v16 = vor.u32 %v12462_v8, %v9649_v5  ;;  %1221 = vmatpush.bf16.msra.mxu1 %v9938_v6  ;;  %v9654_v21 = vor.u32 %v12458_v12, %v9651_v13  ;;  %1319 = vmatpush.bf16.msra.mxu3 %v9942_v11  ;;  %v12503_v56 = vld [vmem:[%s19105_s1 + $0x1a4] sm:$0xf0] }
  0x26   : > { %v12526_v10 = vld [vmem:[%s19105_s1 + $0x25c] sm:$0xf0]  ;;  %v9907_v15 = vld [vmem:[%s19105_s1 + $0x260] sm:$0xf0]  ;;  %v10073_v58 = vld [vmem:[%s19105_s1 + $0x388] sm:$0xf]  ;;  %v9818_v60 = vor.u32 %v12503_v56, %v9817_v55 }
  0x27   : > { %v9617_v17 = vld [vmem:[%s19105_s1] sm:$0xf]  ;;  %v9906_v20 = vor.u32 %v12526_v10, %v9905_v9  ;;  %v12450_v23 = vld [vmem:[%s19105_s1 + $0x4] sm:$0xf]  ;;  %v9910_v24 = vor.u32 %v12522_v14, %v9907_v15  ;;  %1173 = vmatpush.bf16.msra.mxu0 %v9650_v16  ;;  %1271 = vmatpush.bf16.msra.mxu2 %v9654_v21  ;;  %v12567_v59 = vld [vmem:[%s19105_s1 + $0x3a4] sm:$0xf0] }
  0x28   : > { %v12454_v18 = vld [vmem:[%s19105_s1 + $0x1c] sm:$0xf0]  ;;  %v9619_v25 = vld [vmem:[%s19105_s1 + $0x20] sm:$0xf0]  ;;  %v12491_v61 = vld [vmem:[%s19105_s1 + $0x14c] sm:$0xf]  ;;  %v10074_v0 = vor.u32 %v12567_v59, %v10073_v58 }
  0x29   : > { %v9873_v19 = vld [vmem:[%s19105_s1 + $0x200] sm:$0xf]  ;;  %v12514_v26 = vld [vmem:[%s19105_s1 + $0x204] sm:$0xf]  ;;  %v9618_v30 = vor.u32 %v12454_v18, %v9617_v17  ;;  %1222 = vmatpush.bf16.msra.mxu1 %v9906_v20  ;;  %v9622_v35 = vor.u32 %v12450_v23, %v9619_v25  ;;  %1320 = vmatpush.bf16.msra.mxu3 %v9910_v24  ;;  %v9787_v62 = vld [vmem:[%s19105_s1 + $0x168] sm:$0xf0] }
  0x2a   : > { %v12518_v22 = vld [vmem:[%s19105_s1 + $0x21c] sm:$0xf0]  ;;  %v9875_v27 = vld [vmem:[%s19105_s1 + $0x220] sm:$0xf0]  ;;  %v9785_v63 = vld [vmem:[%s19105_s1 + $0x148] sm:$0xf]  ;;  %v9790_v1 = vor.u32 %v12491_v61, %v9787_v62 }
  0x2b   : > { %v9874_v34 = vor.u32 %v12518_v22, %v9873_v19  ;;  %v9553_v36 = vld [vmem:[%s13435_s13] sm:$0xf]  ;;  %v12434_v38 = vld [vmem:[%s13435_s13 + $0x4] sm:$0xf]  ;;  %v9878_v39 = vor.u32 %v12514_v26, %v9875_v27  ;;  %1174 = vmatpush.bf16.msra.mxu0 %v9618_v30  ;;  %1272 = vmatpush.bf16.msra.mxu2 %v9622_v35  ;;  %v12495_v2 = vld [vmem:[%s19105_s1 + $0x164] sm:$0xf0] }
  0x2c   : > { %v13456_v44 = vor.u32 %v12435_v37, %v9553_v36  ;;  %v13467_v49 = vor.u32 %v12434_v38, %v9555_v40  ;;  %v12555_v3 = vld [vmem:[%s19105_s1 + $0x34c] sm:$0xf]  ;;  %v10041_v6 = vld [vmem:[%s19105_s1 + $0x348] sm:$0xf]  ;;  %v9786_v8 = vor.u32 %v12495_v2, %v9785_v63  ;;  %v9561_v10 = vld [vmem:[%s13435_s13 + $0x10] sm:$0xf] }
  0x2d   : > { %1223 = vmatpush.bf16.msra.mxu1 %v9874_v34  ;;  %1321 = vmatpush.bf16.msra.mxu3 %v9878_v39  ;;  %v10043_v4 = vld [vmem:[%s19105_s1 + $0x368] sm:$0xf0]  ;;  %v12559_v7 = vld [vmem:[%s19105_s1 + $0x364] sm:$0xf0]  ;;  %v12437_v11 = vld [vmem:[%s13435_s13 + $0x14] sm:$0xf0] }
  0x2e   : > { %1175 = vmatmul.bf16.vlgmr.msra.gmra.mxu0 %v13456_v44  ;;  %1273 = vmatmul.bf16.vlgmr.msra.gmra.mxu2 %v13456_v44  ;;  %v10046_v5 = vor.u32 %v12555_v3, %v10043_v4  ;;  %v10042_v9 = vor.u32 %v12559_v7, %v10041_v6  ;;  %v12436_v12 = vld [vmem:[%s13435_s13 + $0x14] sm:$0xf]  ;;  %v9563_v13 = vld [vmem:[%s13435_s13 + $0x18] sm:$0xf0]  ;;  %v13519_v14 = vor.u32 %v12437_v11, %v9561_v10  ;;  %v12483_v16 = vld [vmem:[%s19105_s1 + $0x10c] sm:$0xf] }
  0x2f   : > { %1461 = vmatpush.bf16.msrb.mxu2 %v9854_v41  ;;  %1363 = vmatpush.bf16.msrb.mxu0 %v9850_v52  ;;  %v13521_v15 = vor.u32 %v12436_v12, %v9563_v13  ;;  %v9755_v17 = vld [vmem:[%s19105_s1 + $0x128] sm:$0xf0]  ;;  %v9753_v18 = vld [vmem:[%s19105_s1 + $0x108] sm:$0xf]  ;;  %v9569_v28 = vld [vmem:[%s13435_s13 + $0x20] sm:$0xf] }
  0x30   : > { %1224 = vmatmul.bf16.vlgmr.msra.gmra.mxu1 %v13467_v49  ;;  %1322 = vmatmul.bf16.vlgmr.msra.gmra.mxu3 %v13467_v49  ;;  %v9758_v19 = vor.u32 %v12483_v16, %v9755_v17  ;;  %v12487_v20 = vld [vmem:[%s19105_s1 + $0x124] sm:$0xf0]  ;;  %v12547_v21 = vld [vmem:[%s19105_s1 + $0x30c] sm:$0xf]  ;;  %v12438_v30 = vld [vmem:[%s13435_s13 + $0x24] sm:$0xf] }
  0x31   : > { %1510 = vmatpush.bf16.msrb.mxu3 %v10110_v45  ;;  %1412 = vmatpush.bf16.msrb.mxu1 %v10106_v53  ;;  %v10011_v22 = vld [vmem:[%s19105_s1 + $0x328] sm:$0xf0]  ;;  %v9754_v23 = vor.u32 %v12487_v20, %v9753_v18  ;;  %v10009_v25 = vld [vmem:[%s19105_s1 + $0x308] sm:$0xf]  ;;  %v9577_v47 = vld [vmem:[%s13435_s13 + $0x30] sm:$0xf] }
  0x32   : > { %v10014_v24 = vor.u32 %v12547_v21, %v10011_v22  ;;  %v12551_v26 = vld [vmem:[%s19105_s1 + $0x324] sm:$0xf0]  ;;  %v9571_v31 = vld [vmem:[%s13435_s13 + $0x28] sm:$0xf0]  ;;  %v12441_v48 = vld [vmem:[%s13435_s13 + $0x34] sm:$0xf0] }
  0x33   : > { %1462 = vmatpush.bf16.msrb.mxu2 %v9822_v54  ;;  %1364 = vmatpush.bf16.msrb.mxu0 %v9818_v60  ;;  %v10010_v27 = vor.u32 %v12551_v26, %v10009_v25  ;;  %v12439_v29 = vld [vmem:[%s13435_s13 + $0x24] sm:$0xf0]  ;;  %v13557_v33 = vor.u32 %v12438_v30, %v9571_v31  ;;  %v12475_v34 = vld [vmem:[%s19105_s1 + $0xcc] sm:$0xf]  ;;  %v12440_v50 = vld [vmem:[%s13435_s13 + $0x34] sm:$0xf]  ;;  %v13591_v52 = vor.u32 %v12441_v48, %v9577_v47 }
  0x34   : > { %v13555_v32 = vor.u32 %v12439_v29, %v9569_v28  ;;  %v9723_v35 = vld [vmem:[%s19105_s1 + $0xe8] sm:$0xf0]  ;;  %v9721_v36 = vld [vmem:[%s19105_s1 + $0xc8] sm:$0xf]  ;;  %v9579_v51 = vld [vmem:[%s13435_s13 + $0x38] sm:$0xf0] }
  0x35   : > { %1511 = vmatpush.bf16.msrb.mxu3 %v10078_v57  ;;  %1413 = vmatpush.bf16.msrb.mxu1 %v10074_v0  ;;  %v9726_v37 = vor.u32 %v12475_v34, %v9723_v35  ;;  %v12479_v38 = vld [vmem:[%s19105_s1 + $0xe4] sm:$0xf0]  ;;  %v12539_v39 = vld [vmem:[%s19105_s1 + $0x2cc] sm:$0xf]  ;;  %v13593_v53 = vor.u32 %v12440_v50, %v9579_v51  ;;  %v9585_v2 = vld [vmem:[%s13435_s13 + $0x40] sm:$0xf] }
  0x36   : > { %v9979_v40 = vld [vmem:[%s19105_s1 + $0x2e8] sm:$0xf0]  ;;  %v9722_v41 = vor.u32 %v12479_v38, %v9721_v36  ;;  %v9977_v43 = vld [vmem:[%s19105_s1 + $0x2c8] sm:$0xf]  ;;  %v12442_v4 = vld [vmem:[%s13435_s13 + $0x44] sm:$0xf] }
  0x37   : > { %1463 = vmatpush.bf16.msrb.mxu2 %v9790_v1  ;;  %1365 = vmatpush.bf16.msrb.mxu0 %v9786_v8  ;;  %v9982_v42 = vor.u32 %v12539_v39, %v9979_v40  ;;  %v12543_v45 = vld [vmem:[%s19105_s1 + $0x2e4] sm:$0xf0]  ;;  %v12467_v54 = vld [vmem:[%s19105_s1 + $0x8c] sm:$0xf]  ;;  %v9593_v22 = vld [vmem:[%s13435_s13 + $0x50] sm:$0xf] }
  0x38   : > { %v9978_v46 = vor.u32 %v12543_v45, %v9977_v43  ;;  %v9691_v55 = vld [vmem:[%s19105_s1 + $0xa8] sm:$0xf0]  ;;  %v9689_v56 = vld [vmem:[%s19105_s1 + $0x88] sm:$0xf]  ;;  %v9595_v25 = vld [vmem:[%s13435_s13 + $0x58] sm:$0xf0] }
  0x39   : > { %1512 = vmatpush.bf16.msrb.mxu3 %v10046_v5  ;;  %1414 = vmatpush.bf16.msrb.mxu1 %v10042_v9  ;;  %v9694_v57 = vor.u32 %v12467_v54, %v9691_v55  ;;  %v12471_v58 = vld [vmem:[%s19105_s1 + $0xa4] sm:$0xf0]  ;;  %v12531_v59 = vld [vmem:[%s19105_s1 + $0x28c] sm:$0xf]  ;;  %v12446_v45 = vld [vmem:[%s13435_s13 + $0x64] sm:$0xf] }
  0x3a   : > { %v9947_v60 = vld [vmem:[%s19105_s1 + $0x2a8] sm:$0xf0]  ;;  %v9690_v61 = vor.u32 %v12471_v58, %v9689_v56  ;;  %v9945_v63 = vld [vmem:[%s19105_s1 + $0x288] sm:$0xf]  ;;  %v12508_v50 = vld [vmem:[%s19105_s1 + $0x1d4] sm:$0xf] }
  0x3b   : > { %1464 = vmatpush.bf16.msrb.mxu2 %v9758_v19  ;;  %1366 = vmatpush.bf16.msrb.mxu0 %v9754_v23  ;;  %v9950_v62 = vor.u32 %v12531_v59, %v9947_v60  ;;  %v12535_v0 = vld [vmem:[%s19105_s1 + $0x2a4] sm:$0xf0]  ;;  %v9587_v5 = vld [vmem:[%s13435_s13 + $0x48] sm:$0xf0]  ;;  %v12445_v23 = vld [vmem:[%s13435_s13 + $0x54] sm:$0xf0] }
  0x3c   : > { %v9946_v1 = vor.u32 %v12535_v0, %v9945_v63  ;;  %v12443_v3 = vld [vmem:[%s13435_s13 + $0x44] sm:$0xf0]  ;;  %v13629_v7 = vor.u32 %v12442_v4, %v9587_v5  ;;  %v12459_v8 = vld [vmem:[%s19105_s1 + $0x4c] sm:$0xf]  ;;  %v13663_v26 = vor.u32 %v12445_v23, %v9593_v22  ;;  %v9859_v51 = vld [vmem:[%s19105_s1 + $0x1f0] sm:$0xf0] }
  0x3d   : > { %1513 = vmatpush.bf16.msrb.mxu3 %v10014_v24  ;;  %1415 = vmatpush.bf16.msrb.mxu1 %v10010_v27  ;;  %v13627_v6 = vor.u32 %v12443_v3, %v9585_v2  ;;  %v9659_v9 = vld [vmem:[%s19105_s1 + $0x68] sm:$0xf0]  ;;  %v9657_v10 = vld [vmem:[%s19105_s1 + $0x48] sm:$0xf]  ;;  %v12444_v24 = vld [vmem:[%s13435_s13 + $0x54] sm:$0xf]  ;;  %v9862_v55 = vor.u32 %v12508_v50, %v9859_v51 }
  0x3e   : > { %1180 = vmatmul.bf16.gmra.mxu0 %v13519_v14  ;;  %1278 = vmatmul.bf16.gmra.mxu2 %v13519_v14  ;;  %v9662_v11 = vor.u32 %v12459_v8, %v9659_v9  ;;  %v12463_v12 = vld [vmem:[%s19105_s1 + $0x64] sm:$0xf0]  ;;  %v12523_v13 = vld [vmem:[%s19105_s1 + $0x24c] sm:$0xf]  ;;  %v13665_v27 = vor.u32 %v12444_v24, %v9595_v25  ;;  %v9857_v54 = vld [vmem:[%s19105_s1 + $0x1d0] sm:$0xf] }
  0x3f   : > { %1465 = vmatpush.bf16.msrb.mxu2 %v9726_v37  ;;  %1367 = vmatpush.bf16.msrb.mxu0 %v9722_v41  ;;  %v9915_v16 = vld [vmem:[%s19105_s1 + $0x268] sm:$0xf0]  ;;  %v9658_v17 = vor.u32 %v12463_v12, %v9657_v10  ;;  %v9913_v19 = vld [vmem:[%s19105_s1 + $0x248] sm:$0xf]  ;;  %v12512_v56 = vld [vmem:[%s19105_s1 + $0x1ec] sm:$0xf0] }
  0x40   : > { %1229 = vmatmul.bf16.gmra.mxu1 %v13521_v15  ;;  %1327 = vmatmul.bf16.gmra.mxu3 %v13521_v15  ;;  %v9918_v18 = vor.u32 %v12523_v13, %v9915_v16  ;;  %v12527_v20 = vld [vmem:[%s19105_s1 + $0x264] sm:$0xf0]  ;;  %v12451_v28 = vld [vmem:[%s19105_s1 + $0xc] sm:$0xf]  ;;  %v10115_v58 = vld [vmem:[%s19105_s1 + $0x3f0] sm:$0xf0]  ;;  %v9858_v59 = vor.u32 %v12512_v56, %v9857_v54 }
  0x41   : > { %1514 = vmatpush.bf16.msrb.mxu3 %v9982_v42  ;;  %1416 = vmatpush.bf16.msrb.mxu1 %v9978_v46  ;;  %v9914_v21 = vor.u32 %v12527_v20, %v9913_v19  ;;  %v9627_v29 = vld [vmem:[%s19105_s1 + $0x28] sm:$0xf0]  ;;  %v9625_v30 = vld [vmem:[%s19105_s1 + $0x8] sm:$0xf]  ;;  %v9601_v42 = vld [vmem:[%s13435_s13 + $0x60] sm:$0xf] }
  0x42   : > { %v9630_v31 = vor.u32 %v12451_v28, %v9627_v29  ;;  %v12455_v34 = vld [vmem:[%s19105_s1 + $0x24] sm:$0xf0]  ;;  %v12515_v35 = vld [vmem:[%s19105_s1 + $0x20c] sm:$0xf]  ;;  %v10113_v63 = vld [vmem:[%s19105_s1 + $0x3d0] sm:$0xf] }
  0x43   : > { %1466 = vmatpush.bf16.msrb.mxu2 %v9694_v57  ;;  %1368 = vmatpush.bf16.msrb.mxu0 %v9690_v61  ;;  %v9883_v36 = vld [vmem:[%s19105_s1 + $0x228] sm:$0xf0]  ;;  %v9626_v37 = vor.u32 %v12455_v34, %v9625_v30  ;;  %v9881_v39 = vld [vmem:[%s19105_s1 + $0x208] sm:$0xf]  ;;  %v12572_v57 = vld [vmem:[%s19105_s1 + $0x3d4] sm:$0xf] }
  0x44   : > { %v9886_v38 = vor.u32 %v12515_v35, %v9883_v36  ;;  %v12519_v40 = vld [vmem:[%s19105_s1 + $0x224] sm:$0xf0]  ;;  %v9603_v46 = vld [vmem:[%s13435_s13 + $0x68] sm:$0xf0]  ;;  %v10118_v60 = vor.u32 %v12572_v57, %v10115_v58  ;;  %v9609_v61 = vld [vmem:[%s13435_s13 + $0x70] sm:$0xf] }
  0x45   : > { %1515 = vmatpush.bf16.msrb.mxu3 %v9950_v62  ;;  %1417 = vmatpush.bf16.msrb.mxu1 %v9946_v1  ;;  %v9882_v41 = vor.u32 %v12519_v40, %v9881_v39  ;;  %v12447_v43 = vld [vmem:[%s13435_s13 + $0x64] sm:$0xf0]  ;;  %v13701_v48 = vor.u32 %v12446_v45, %v9603_v46  ;;  %v12449_v62 = vld [vmem:[%s13435_s13 + $0x74] sm:$0xf0]  ;;  %v12576_v0 = vld [vmem:[%s19105_s1 + $0x3ec] sm:$0xf0] }
  0x46   : > { %v13699_v47 = vor.u32 %v12447_v43, %v9601_v42  ;;  %v12448_v1 = vld [vmem:[%s13435_s13 + $0x74] sm:$0xf]  ;;  %v9611_v2 = vld [vmem:[%s13435_s13 + $0x78] sm:$0xf0]  ;;  %v10114_v3 = vor.u32 %v12576_v0, %v10113_v63  ;;  %v13735_v4 = vor.u32 %v12449_v62, %v9609_v61  ;;  %v9825_v10 = vld [vmem:[%s19105_s1 + $0x190] sm:$0xf] }
  0x47   : > { %1467 = vmatpush.bf16.msrb.mxu2 %v9662_v11  ;;  %1369 = vmatpush.bf16.msrb.mxu0 %v9658_v17  ;;  %v13737_v5 = vor.u32 %v12448_v1, %v9611_v2  ;;  %v12500_v8 = vld [vmem:[%s19105_s1 + $0x194] sm:$0xf]  ;;  %v12504_v12 = vld [vmem:[%s19105_s1 + $0x1ac] sm:$0xf0]  ;;  %v13764_v19 = vld [vmem:[%s19106_s2] sm:$0xff] }
  0x48   : > { %v9827_v9 = vld [vmem:[%s19105_s1 + $0x1b0] sm:$0xf0]  ;;  %v9826_v17 = vor.u32 %v12504_v12, %v9825_v10  ;;  %v10081_v20 = vld [vmem:[%s19105_s1 + $0x390] sm:$0xf]  ;;  %v13773_v22 = vperm.slane %v13764_v19, 0  ;;  %v13780_v30 = vperm.slane %v13764_v19, 1 }
  0x49   : > { %1516 = vmatpush.bf16.msrb.mxu3 %v9918_v18  ;;  %1418 = vmatpush.bf16.msrb.mxu1 %v9914_v21  ;;  %v9830_v11 = vor.u32 %v12500_v8, %v9827_v9  ;;  %v12564_v13 = vld [vmem:[%s19105_s1 + $0x394] sm:$0xf]  ;;  %v12568_v21 = vld [vmem:[%s19105_s1 + $0x3ac] sm:$0xf0] }
  0x4a   : > { %v10083_v16 = vld [vmem:[%s19105_s1 + $0x3b0] sm:$0xf0]  ;;  %v10082_v23 = vor.u32 %v12568_v21, %v10081_v20  ;;  %v9793_v35 = vld [vmem:[%s19105_s1 + $0x150] sm:$0xf] }
  0x4b   : > { %1468 = vmatpush.bf16.msrb.mxu2 %v9630_v31  ;;  %1370 = vmatpush.bf16.msrb.mxu0 %v9626_v37  ;;  %v10086_v18 = vor.u32 %v12564_v13, %v10083_v16  ;;  %v12492_v31 = vld [vmem:[%s19105_s1 + $0x154] sm:$0xf]  ;;  %v10049_v56 = vld [vmem:[%s19105_s1 + $0x350] sm:$0xf] }
  0x4c   : > { %v9795_v34 = vld [vmem:[%s19105_s1 + $0x170] sm:$0xf0]  ;;  %v12560_v57 = vld [vmem:[%s19105_s1 + $0x36c] sm:$0xf0] }
  0x4d   : > { %1517 = vmatpush.bf16.msrb.mxu3 %v9886_v38  ;;  %1419 = vmatpush.bf16.msrb.mxu1 %v9882_v41  ;;  %v9798_v37 = vor.u32 %v12492_v31, %v9795_v34  ;;  %v12496_v38 = vld [vmem:[%s19105_s1 + $0x16c] sm:$0xf0]  ;;  %v12556_v39 = vld [vmem:[%s19105_s1 + $0x354] sm:$0xf] }
  0x4e   : > { %1185 = vmatmul.bf16.gmra.mxu0 %v13555_v32  ;;  %1283 = vmatmul.bf16.gmra.mxu2 %v13555_v32  ;;  %v10051_v40 = vld [vmem:[%s19105_s1 + $0x370] sm:$0xf0]  ;;  %v9794_v45 = vor.u32 %v12496_v38, %v9793_v35  ;;  %v12488_v21 = vld [vmem:[%s19105_s1 + $0x12c] sm:$0xf0] }
  0x4f   : > { %1657 = vmatpush.bf16.msra.mxu2 %v9862_v55  ;;  %1559 = vmatpush.bf16.msra.mxu0 %v9858_v59  ;;  %v10054_v46 = vor.u32 %v12556_v39, %v10051_v40  ;;  %v12484_v13 = vld [vmem:[%s19105_s1 + $0x114] sm:$0xf]  ;;  %v10017_v39 = vld [vmem:[%s19105_s1 + $0x310] sm:$0xf] }
  0x50   : > { %1234 = vmatmul.bf16.gmra.mxu1 %v13557_v33  ;;  %1332 = vmatmul.bf16.gmra.mxu3 %v13557_v33  ;;  %v9763_v16 = vld [vmem:[%s19105_s1 + $0x130] sm:$0xf0]  ;;  %v12552_v40 = vld [vmem:[%s19105_s1 + $0x32c] sm:$0xf0] }
  0x51   : > { %1706 = vmatpush.bf16.msra.mxu3 %v10118_v60  ;;  %1608 = vmatpush.bf16.msra.mxu1 %v10114_v3  ;;  %v10050_v60 = vor.u32 %v12560_v57, %v10049_v56  ;;  %v9766_v20 = vor.u32 %v12484_v13, %v9763_v16 }
  0x53   : > { %1658 = vmatpush.bf16.msra.mxu2 %v9830_v11  ;;  %1560 = vmatpush.bf16.msra.mxu0 %v9826_v17  ;;  %v9761_v17 = vld [vmem:[%s19105_s1 + $0x110] sm:$0xf] }
  0x54   : > { %v9762_v31 = vor.u32 %v12488_v21, %v9761_v17 }
  0x55   : > { %1707 = vmatpush.bf16.msra.mxu3 %v10086_v18  ;;  %1609 = vmatpush.bf16.msra.mxu1 %v10082_v23  ;;  %v12548_v23 = vld [vmem:[%s19105_s1 + $0x314] sm:$0xf] }
  0x57   : > { %1659 = vmatpush.bf16.msra.mxu2 %v9798_v37  ;;  %1561 = vmatpush.bf16.msra.mxu0 %v9794_v45 }
  0x59   : > { %1708 = vmatpush.bf16.msra.mxu3 %v10054_v46  ;;  %1610 = vmatpush.bf16.msra.mxu1 %v10050_v60 }
  0x5b   : > { %1660 = vmatpush.bf16.msra.mxu2 %v9766_v20  ;;  %1562 = vmatpush.bf16.msra.mxu0 %v9762_v31 }
  0x5e   : > { %1190 = vmatmul.bf16.gmra.mxu0 %v13591_v52  ;;  %1288 = vmatmul.bf16.gmra.mxu2 %v13591_v52 }
  0x60   : > { %1239 = vmatmul.bf16.gmra.mxu1 %v13593_v53  ;;  %1337 = vmatmul.bf16.gmra.mxu3 %v13593_v53 }
  0x6e   : > { %1195 = vmatmul.bf16.gmra.mxu0 %v13627_v6  ;;  %1293 = vmatmul.bf16.gmra.mxu2 %v13627_v6 }
  0x70   : > { %1244 = vmatmul.bf16.gmra.mxu1 %v13629_v7  ;;  %1342 = vmatmul.bf16.gmra.mxu3 %v13629_v7 }
  0x7e   : > { %1200 = vmatmul.bf16.gmra.mxu0 %v13663_v26  ;;  %1298 = vmatmul.bf16.gmra.mxu2 %v13663_v26 }
  0x80   : > { %1249 = vmatmul.bf16.gmra.mxu1 %v13665_v27  ;;  %1347 = vmatmul.bf16.gmra.mxu3 %v13665_v27 }
  0x8e   : > { %1205 = vmatmul.bf16.gmra.mxu0 %v13699_v47  ;;  %1303 = vmatmul.bf16.gmra.mxu2 %v13699_v47 }
  0x90   : > { %1254 = vmatmul.bf16.gmra.mxu1 %v13701_v48  ;;  %1352 = vmatmul.bf16.gmra.mxu3 %v13701_v48 }
  0x9e   : > { %1210 = vmatmul.bf16.gmra.mxu0 %v13735_v4  ;;  %1308 = vmatmul.bf16.gmra.mxu2 %v13735_v4 }
  0xa0   : > { %1259 = vmatmul.bf16.gmra.mxu1 %v13737_v5  ;;  %1357 = vmatmul.bf16.gmra.mxu3 %v13737_v5 }
  0xab   : > { %v1176_v24 = vpop.f32.mrf.mxu0 }
  0xac   : > { %v1177_v25 = vadd.f32 %v1176_v24, %v13773_v22  ;;  %v10019_v24 = vld [vmem:[%s19105_s1 + $0x330] sm:$0xf0] }
  0xad   : > { %v1225_v28 = vpop.f32.mrf.mxu1  ;;  %v10022_v34 = vor.u32 %v12548_v23, %v10019_v24 }
  0xae   : > { %v1226_v29 = vadd.f32 %v1225_v28, %v1177_v25  ;;  %1371 = vmatmul.bf16.vlgmr.msrb.gmra.mxu0 %v13456_v44  ;;  %1469 = vmatmul.bf16.vlgmr.msrb.gmra.mxu2 %v13456_v44 }
  0xaf   : > { %1709 = vmatpush.bf16.msra.mxu3 %v10022_v34 }
  0xb0   : > { %1420 = vmatmul.bf16.vlgmr.msrb.gmra.mxu1 %v13467_v49  ;;  %1518 = vmatmul.bf16.vlgmr.msrb.gmra.mxu3 %v13467_v49  ;;  %v1951_v58 = vmax.f32 %v1226_v29, 0.0 }
  0xb1   : > { %v1274_v36 = vpop.f32.mrf.mxu2 }
  0xb2   : > { %v1275_v41 = vadd.f32 %v1274_v36, %v13780_v30 }
  0xb3   : > { %v1323_v42 = vpop.f32.mrf.mxu3  ;;  %v1178_v43 = vpop.f32.mrf.mxu0 }
  0xb4   : > { %v1179_v50 = vadd.f32 %v1178_v43, %v13773_v22  ;;  %v1324_v54 = vadd.f32 %v1323_v42, %v1275_v41  ;;  %v10018_v43 = vor.u32 %v12552_v40, %v10017_v39 }
  0xb5   : > { %v1227_v51 = vpop.f32.mrf.mxu1 }
  0xb6   : > { %v1228_v55 = vadd.f32 %v1227_v51, %v1179_v50  ;;  %v1952_v10 = vmax.f32 %v1324_v54, 0.0  ;;  %1611 = vmatpush.bf16.msra.mxu1 %v10018_v43 }
  0xb8   : > { %v1959_v59 = vmax.f32 %v1228_v55, 0.0 }
  0xb9   : > { %v1276_v62 = vpop.f32.mrf.mxu2 }
  0xba   : > { %v13809_v61 = vpack.c.bf16 %v1959_v59, %v1951_v58  ;;  %v1277_v63 = vadd.f32 %v1276_v62, %v13780_v30 }
  0xbb   : > { %v1325_v0 = vpop.f32.mrf.mxu3  ;;  %v1181_v1 = vpop.f32.mrf.mxu0 }
  0xbc   : > { %v1182_v2 = vadd.f32 %v1181_v1, %v13773_v22  ;;  %v1326_v8 = vadd.f32 %v1325_v0, %v1277_v63  ;;  %v12476_v63 = vld [vmem:[%s19105_s1 + $0xd4] sm:$0xf]  ;;  %v9729_v1 = vld [vmem:[%s19105_s1 + $0xd0] sm:$0xf] }
  0xbd   : > { %v1230_v3 = vpop.f32.mrf.mxu1  ;;  %v9731_v0 = vld [vmem:[%s19105_s1 + $0xf0] sm:$0xf0] }
  0xbe   : > { %v1231_v9 = vadd.f32 %v1230_v3, %v1182_v2  ;;  %1376 = vmatmul.bf16.gmra.mxu0 %v13519_v14  ;;  %v1960_v11 = vmax.f32 %v1326_v8, 0.0  ;;  %1474 = vmatmul.bf16.gmra.mxu2 %v13519_v14  ;;  %v9734_v3 = vor.u32 %v12476_v63, %v9731_v0  ;;  %v12480_v8 = vld [vmem:[%s19105_s1 + $0xec] sm:$0xf0]  ;;  %v9955_v63 = vld [vmem:[%s19105_s1 + $0x2b0] sm:$0xf0] }
  0xbf   : > { %v9730_v17 = vor.u32 %v12480_v8, %v9729_v1 }
  0xc0   : > { %1425 = vmatmul.bf16.gmra.mxu1 %v13521_v15  ;;  %1523 = vmatmul.bf16.gmra.mxu3 %v13521_v15  ;;  %v13817_v12 = vpack.c.bf16 %v1960_v11, %v1952_v10  ;;  %v1967_v41 = vmax.f32 %v1231_v9, 0.0  ;;  %v12540_v9 = vld [vmem:[%s19105_s1 + $0x2d4] sm:$0xf] }
  0xc1   : > { %v1279_v18 = vpop.f32.mrf.mxu2  ;;  %v9987_v10 = vld [vmem:[%s19105_s1 + $0x2f0] sm:$0xf0]  ;;  %1661 = vmatpush.bf16.msra.mxu2 %v9734_v3  ;;  %1563 = vmatpush.bf16.msra.mxu0 %v9730_v17  ;;  %v12536_v17 = vld [vmem:[%s19105_s1 + $0x2ac] sm:$0xf0] }
  0xc2   : > { %v1280_v25 = vadd.f32 %v1279_v18, %v13780_v30  ;;  %v9990_v18 = vor.u32 %v12540_v9, %v9987_v10 }
  0xc3   : > { %v1328_v28 = vpop.f32.mrf.mxu3  ;;  %v1183_v29 = vpop.f32.mrf.mxu0 }
  0xc4   : > { %v1184_v35 = vadd.f32 %v1183_v29, %v13773_v22  ;;  %v1329_v37 = vadd.f32 %v1328_v28, %v1280_v25  ;;  %1710 = vmatpush.bf16.msra.mxu3 %v9990_v18  ;;  %v9985_v25 = vld [vmem:[%s19105_s1 + $0x2d0] sm:$0xf] }
  0xc5   : > { %v1232_v36 = vpop.f32.mrf.mxu1  ;;  %v12544_v28 = vld [vmem:[%s19105_s1 + $0x2ec] sm:$0xf0] }
  0xc6   : > { %v1233_v38 = vadd.f32 %v1232_v36, %v1184_v35  ;;  %v1968_v59 = vmax.f32 %v1329_v37, 0.0  ;;  %v9986_v34 = vor.u32 %v12544_v28, %v9985_v25 }
  0xc8   : > { %v1975_v42 = vmax.f32 %v1233_v38, 0.0  ;;  %1612 = vmatpush.bf16.msra.mxu1 %v9986_v34 }
  0xc9   : > { %v1281_v46 = vpop.f32.mrf.mxu2 }
  0xca   : > { %v13845_v45 = vpack.c.bf16 %v1975_v42, %v1967_v41  ;;  %v1282_v50 = vadd.f32 %v1281_v46, %v13780_v30 }
  0xcb   : > { %v1330_v51 = vpop.f32.mrf.mxu3  ;;  %v1186_v54 = vpop.f32.mrf.mxu0 }
  0xcc   : > { %v1187_v55 = vadd.f32 %v1186_v54, %v13773_v22  ;;  %v1331_v57 = vadd.f32 %v1330_v51, %v1282_v50  ;;  %v12468_v54 = vld [vmem:[%s19105_s1 + $0x94] sm:$0xf] }
  0xcd   : > { %v1235_v56 = vpop.f32.mrf.mxu1 }
  0xce   : > { %v1236_v58 = vadd.f32 %v1235_v56, %v1187_v55  ;;  %1381 = vmatmul.bf16.gmra.mxu0 %v13555_v32  ;;  %v1976_v60 = vmax.f32 %v1331_v57, 0.0  ;;  %1479 = vmatmul.bf16.gmra.mxu2 %v13555_v32  ;;  %v9699_v55 = vld [vmem:[%s19105_s1 + $0xb0] sm:$0xf0]  ;;  %v9697_v56 = vld [vmem:[%s19105_s1 + $0x90] sm:$0xf] }
  0xd0   : > { %1430 = vmatmul.bf16.gmra.mxu1 %v13557_v33  ;;  %1528 = vmatmul.bf16.gmra.mxu3 %v13557_v33  ;;  %v13853_v62 = vpack.c.bf16 %v1976_v60, %v1968_v59  ;;  %v1983_v29 = vmax.f32 %v1236_v58, 0.0  ;;  %v9702_v58 = vor.u32 %v12468_v54, %v9699_v55  ;;  %v12472_v59 = vld [vmem:[%s19105_s1 + $0xac] sm:$0xf0]  ;;  %v12532_v60 = vld [vmem:[%s19105_s1 + $0x294] sm:$0xf] }
  0xd1   : > { %v1284_v2 = vpop.f32.mrf.mxu2  ;;  %v9698_v3 = vor.u32 %v12472_v59, %v9697_v56  ;;  %v9958_v8 = vor.u32 %v12532_v60, %v9955_v63  ;;  %v12464_v54 = vld [vmem:[%s19105_s1 + $0x6c] sm:$0xf0]  ;;  %v12524_v55 = vld [vmem:[%s19105_s1 + $0x254] sm:$0xf] }
  0xd2   : > { %v1285_v11 = vadd.f32 %v1284_v2, %v13780_v30  ;;  %1662 = vmatpush.bf16.msra.mxu2 %v9702_v58  ;;  %v9923_v56 = vld [vmem:[%s19105_s1 + $0x270] sm:$0xf0] }
  0xd3   : > { %v1333_v13 = vpop.f32.mrf.mxu3  ;;  %v1188_v16 = vpop.f32.mrf.mxu0  ;;  %1564 = vmatpush.bf16.msra.mxu0 %v9698_v3  ;;  %1711 = vmatpush.bf16.msra.mxu3 %v9958_v8  ;;  %v9926_v63 = vor.u32 %v12524_v55, %v9923_v56  ;;  %v9921_v8 = vld [vmem:[%s19105_s1 + $0x250] sm:$0xf] }
  0xd4   : > { %v1189_v20 = vadd.f32 %v1188_v16, %v13773_v22  ;;  %v1334_v23 = vadd.f32 %v1333_v13, %v1285_v11  ;;  %v9953_v16 = vld [vmem:[%s19105_s1 + $0x290] sm:$0xf] }
  0xd5   : > { %v1237_v21 = vpop.f32.mrf.mxu1 }
  0xd6   : > { %v1238_v24 = vadd.f32 %v1237_v21, %v1189_v20  ;;  %v1984_v46 = vmax.f32 %v1334_v23, 0.0  ;;  %v9954_v21 = vor.u32 %v12536_v17, %v9953_v16 }
  0xd7   : > { %1712 = vmatpush.bf16.msra.mxu3 %v9926_v63 }
  0xd8   : > { %v1991_v31 = vmax.f32 %v1238_v24, 0.0  ;;  %1613 = vmatpush.bf16.msra.mxu1 %v9954_v21 }
  0xd9   : > { %v1286_v36 = vpop.f32.mrf.mxu2 }
  0xda   : > { %v13881_v35 = vpack.c.bf16 %v1991_v31, %v1983_v29  ;;  %v1287_v37 = vadd.f32 %v1286_v36, %v13780_v30 }
  0xdb   : > { %v1335_v38 = vpop.f32.mrf.mxu3  ;;  %v1191_v39 = vpop.f32.mrf.mxu0 }
  0xdc   : > { %v1192_v40 = vadd.f32 %v1191_v39, %v13773_v22  ;;  %v1336_v42 = vadd.f32 %v1335_v38, %v1287_v37 }
  0xdd   : > { %v1240_v41 = vpop.f32.mrf.mxu1 }
  0xde   : > { %v1241_v43 = vadd.f32 %v1240_v41, %v1192_v40  ;;  %1386 = vmatmul.bf16.gmra.mxu0 %v13591_v52  ;;  %v1992_v50 = vmax.f32 %v1336_v42, 0.0  ;;  %1484 = vmatmul.bf16.gmra.mxu2 %v13591_v52  ;;  %v12460_v41 = vld [vmem:[%s19105_s1 + $0x54] sm:$0xf] }
  0xdf   : > { %v9667_v42 = vld [vmem:[%s19105_s1 + $0x70] sm:$0xf0] }
  0xe0   : > { %1435 = vmatmul.bf16.gmra.mxu1 %v13593_v53  ;;  %1533 = vmatmul.bf16.gmra.mxu3 %v13593_v53  ;;  %v13889_v51 = vpack.c.bf16 %v1992_v50, %v1984_v46  ;;  %v1999_v18 = vmax.f32 %v1241_v43, 0.0  ;;  %v9665_v43 = vld [vmem:[%s19105_s1 + $0x50] sm:$0xf]  ;;  %v9670_v50 = vor.u32 %v12460_v41, %v9667_v42 }
  0xe1   : > { %v1289_v57 = vpop.f32.mrf.mxu2  ;;  %v9666_v60 = vor.u32 %v12464_v54, %v9665_v43  ;;  %v12456_v43 = vld [vmem:[%s19105_s1 + $0x2c] sm:$0xf0] }
  0xe2   : > { %19212 = vst [vmem:[#allocation2_spill] sm:$0xff] %v13889_v51  ;;  %v1290_v0 = vadd.f32 %v1289_v57, %v13780_v30  ;;  %1663 = vmatpush.bf16.msra.mxu2 %v9670_v50  ;;  %v9891_v50 = vld [vmem:[%s19105_s1 + $0x230] sm:$0xf0] }
  0xe3   : > { %v1338_v1 = vpop.f32.mrf.mxu3  ;;  %v1193_v2 = vpop.f32.mrf.mxu0  ;;  %1565 = vmatpush.bf16.msra.mxu0 %v9666_v60 }
  0xe4   : > { %v1194_v9 = vadd.f32 %v1193_v2, %v13773_v22  ;;  %v1339_v11 = vadd.f32 %v1338_v1, %v1290_v0 }
  0xe5   : > { %v1242_v10 = vpop.f32.mrf.mxu1 }
  0xe6   : > { %v1243_v13 = vadd.f32 %v1242_v10, %v1194_v9  ;;  %v2000_v38 = vmax.f32 %v1339_v11, 0.0  ;;  %v12528_v9 = vld [vmem:[%s19105_s1 + $0x26c] sm:$0xf0] }
  0xe8   : > { %v2007_v20 = vmax.f32 %v1243_v13, 0.0  ;;  %v9922_v13 = vor.u32 %v12528_v9, %v9921_v8 }
  0xe9   : > { %v1291_v24 = vpop.f32.mrf.mxu2 }
  0xea   : > { %v13917_v23 = vpack.c.bf16 %v2007_v20, %v1999_v18  ;;  %v1292_v25 = vadd.f32 %v1291_v24, %v13780_v30  ;;  %1614 = vmatpush.bf16.msra.mxu1 %v9922_v13 }
  0xeb   : > { %v1340_v28 = vpop.f32.mrf.mxu3  ;;  %v1196_v29 = vpop.f32.mrf.mxu0 }
  0xec   : > { %v1197_v31 = vadd.f32 %v1196_v29, %v13773_v22  ;;  %v1341_v36 = vadd.f32 %v1340_v28, %v1292_v25 }
  0xed   : > { %v1245_v34 = vpop.f32.mrf.mxu1 }
  0xee   : > { %v1246_v37 = vadd.f32 %v1245_v34, %v1197_v31  ;;  %1391 = vmatmul.bf16.gmra.mxu0 %v13627_v6  ;;  %v2008_v39 = vmax.f32 %v1341_v36, 0.0  ;;  %1489 = vmatmul.bf16.gmra.mxu2 %v13627_v6 }
  0xf0   : > { %1440 = vmatmul.bf16.gmra.mxu1 %v13629_v7  ;;  %1538 = vmatmul.bf16.gmra.mxu3 %v13629_v7  ;;  %v13925_v40 = vpack.c.bf16 %v2008_v39, %v2000_v38  ;;  %v2015_v10 = vmax.f32 %v1246_v37, 0.0  ;;  %v12452_v37 = vld [vmem:[%s19105_s1 + $0x14] sm:$0xf]  ;;  %v9633_v39 = vld [vmem:[%s19105_s1 + $0x10] sm:$0xf] }
  0xf1   : > { %v1294_v46 = vpop.f32.mrf.mxu2  ;;  %v9635_v38 = vld [vmem:[%s19105_s1 + $0x30] sm:$0xf0] }
  0xf2   : > { %v1295_v57 = vadd.f32 %v1294_v46, %v13780_v30  ;;  %v9638_v42 = vor.u32 %v12452_v37, %v9635_v38  ;;  %v12516_v46 = vld [vmem:[%s19105_s1 + $0x214] sm:$0xf]  ;;  %v9867_v37 = vld [vmem:[%s19105_s1 + $0x1f8] sm:$0xf0]  ;;  %v9865_v38 = vld [vmem:[%s19105_s1 + $0x1d8] sm:$0xf] }
  0xf3   : > { %v1343_v58 = vpop.f32.mrf.mxu3  ;;  %v1198_v59 = vpop.f32.mrf.mxu0 }
  0xf4   : > { %v1199_v0 = vadd.f32 %v1198_v59, %v13773_v22  ;;  %v1344_v2 = vadd.f32 %v1343_v58, %v1295_v57  ;;  %v9634_v57 = vor.u32 %v12456_v43, %v9633_v39  ;;  %v9894_v58 = vor.u32 %v12516_v46, %v9891_v50  ;;  %1664 = vmatpush.bf16.msra.mxu2 %v9638_v42  ;;  %v12513_v42 = vld [vmem:[%s19105_s1 + $0x1f4] sm:$0xf0]  ;;  %v12573_v43 = vld [vmem:[%s19105_s1 + $0x3dc] sm:$0xf] }
  0xf5   : > { %v1247_v1 = vpop.f32.mrf.mxu1  ;;  %v10123_v46 = vld [vmem:[%s19105_s1 + $0x3f8] sm:$0xf0] }
  0xf6   : > { %v1248_v3 = vadd.f32 %v1247_v1, %v1199_v0  ;;  %v2016_v31 = vmax.f32 %v1344_v2, 0.0  ;;  %1566 = vmatpush.bf16.msra.mxu0 %v9634_v57  ;;  %1713 = vmatpush.bf16.msra.mxu3 %v9894_v58  ;;  %v9889_v1 = vld [vmem:[%s19105_s1 + $0x210] sm:$0xf]  ;;  %v10126_v57 = vor.u32 %v12573_v43, %v10123_v46  ;;  %v12505_v43 = vld [vmem:[%s19105_s1 + $0x1b4] sm:$0xf0] }
  0xf7   : > { %v12520_v2 = vld [vmem:[%s19105_s1 + $0x22c] sm:$0xf0]  ;;  %v12565_v46 = vld [vmem:[%s19105_s1 + $0x39c] sm:$0xf] }
  0xf8   : > { %v2023_v11 = vmax.f32 %v1248_v3, 0.0  ;;  %v9890_v9 = vor.u32 %v12520_v2, %v9889_v1  ;;  %v12577_v1 = vld [vmem:[%s19105_s1 + $0x3f4] sm:$0xf0] }
  0xf9   : > { %v1296_v17 = vpop.f32.mrf.mxu2 }
  0xfa   : > { %v13953_v16 = vpack.c.bf16 %v2023_v11, %v2015_v10  ;;  %v1297_v18 = vadd.f32 %v1296_v17, %v13780_v30  ;;  %1615 = vmatpush.bf16.msra.mxu1 %v9890_v9  ;;  %1902 = vmatpush.bf16.msrb.mxu3 %v10126_v57 }
  0xfb   : > { %v1345_v20 = vpop.f32.mrf.mxu3  ;;  %v1201_v21 = vpop.f32.mrf.mxu0 }
  0xfc   : > { %v1202_v24 = vadd.f32 %v1201_v21, %v13773_v22  ;;  %v1346_v28 = vadd.f32 %v1345_v20, %v1297_v18 }
  0xfd   : > { %v1250_v25 = vpop.f32.mrf.mxu1 }
  0xfe   : > { %v1251_v29 = vadd.f32 %v1250_v25, %v1202_v24  ;;  %1396 = vmatmul.bf16.gmra.mxu0 %v13663_v26  ;;  %v2024_v34 = vmax.f32 %v1346_v28, 0.0  ;;  %1494 = vmatmul.bf16.gmra.mxu2 %v13663_v26 }
 0x100   : > { %1445 = vmatmul.bf16.gmra.mxu1 %v13665_v27  ;;  %1543 = vmatmul.bf16.gmra.mxu3 %v13665_v27  ;;  %v13961_v36 = vpack.c.bf16 %v2024_v34, %v2016_v31  ;;  %v2031_v3 = vmax.f32 %v1251_v29, 0.0  ;;  %v12509_v34 = vld [vmem:[%s19105_s1 + $0x1dc] sm:$0xf] }
 0x101   : > { %v1299_v41 = vpop.f32.mrf.mxu2 }
 0x102   : > { %v1300_v54 = vadd.f32 %v1299_v41, %v13780_v30  ;;  %v9870_v41 = vor.u32 %v12509_v34, %v9867_v37  ;;  %v12501_v37 = vld [vmem:[%s19105_s1 + $0x19c] sm:$0xf] }
 0x103   : > { %v1348_v55 = vpop.f32.mrf.mxu3  ;;  %v1203_v56 = vpop.f32.mrf.mxu0 }
 0x104   : > { %v1204_v59 = vadd.f32 %v1203_v56, %v13773_v22  ;;  %v1349_v63 = vadd.f32 %v1348_v55, %v1300_v54  ;;  %v9866_v56 = vor.u32 %v12513_v42, %v9865_v38  ;;  %1853 = vmatpush.bf16.msrb.mxu2 %v9870_v41  ;;  %v9835_v38 = vld [vmem:[%s19105_s1 + $0x1b8] sm:$0xf0] }
 0x105   : > { %v1252_v60 = vpop.f32.mrf.mxu1  ;;  %v9838_v42 = vor.u32 %v12501_v37, %v9835_v38 }
 0x106   : > { %v1253_v0 = vadd.f32 %v1252_v60, %v1204_v59  ;;  %v2032_v28 = vmax.f32 %v1349_v63, 0.0  ;;  %1755 = vmatpush.bf16.msrb.mxu0 %v9866_v56 }
 0x108   : > { %v2039_v8 = vmax.f32 %v1253_v0, 0.0  ;;  %v10121_v0 = vld [vmem:[%s19105_s1 + $0x3d8] sm:$0xf]  ;;  %1854 = vmatpush.bf16.msrb.mxu2 %v9838_v42  ;;  %v9803_v42 = vld [vmem:[%s19105_s1 + $0x178] sm:$0xf0] }
 0x109   : > { %v1301_v11 = vpop.f32.mrf.mxu2 }
 0x10a   : > { %v13989_v10 = vpack.c.bf16 %v2039_v8, %v2031_v3  ;;  %v1302_v13 = vadd.f32 %v1301_v11, %v13780_v30  ;;  %v10122_v8 = vor.u32 %v12577_v1, %v10121_v0  ;;  %v10089_v1 = vld [vmem:[%s19105_s1 + $0x398] sm:$0xf] }
 0x10b   : > { %v1350_v17 = vpop.f32.mrf.mxu3  ;;  %v1206_v18 = vpop.f32.mrf.mxu0 }
 0x10c   : > { %v1207_v20 = vadd.f32 %v1206_v18, %v13773_v22  ;;  %v1351_v24 = vadd.f32 %v1350_v17, %v1302_v13  ;;  %1804 = vmatpush.bf16.msrb.mxu1 %v10122_v8 }
 0x10d   : > { %v1255_v21 = vpop.f32.mrf.mxu1 }
 0x10e   : > { %v1256_v25 = vadd.f32 %v1255_v21, %v1207_v20  ;;  %1401 = vmatmul.bf16.gmra.mxu0 %v13699_v47  ;;  %v2040_v31 = vmax.f32 %v1351_v24, 0.0  ;;  %1499 = vmatmul.bf16.gmra.mxu2 %v13699_v47 }
 0x110   : > { %1450 = vmatmul.bf16.gmra.mxu1 %v13701_v48  ;;  %1548 = vmatmul.bf16.gmra.mxu3 %v13701_v48  ;;  %v13997_v29 = vpack.c.bf16 %v2040_v31, %v2032_v28  ;;  %v2047_v2 = vmax.f32 %v1256_v25, 0.0 }
 0x111   : > { %v1304_v39 = vpop.f32.mrf.mxu2 }
 0x112   : > { %19213 = vst [vmem:[#allocation3_spill] sm:$0xff] %v13997_v29  ;;  %v1305_v50 = vadd.f32 %v1304_v39, %v13780_v30  ;;  %v9833_v39 = vld [vmem:[%s19105_s1 + $0x198] sm:$0xf] }
 0x113   : > { %v1353_v54 = vpop.f32.mrf.mxu3  ;;  %v1208_v55 = vpop.f32.mrf.mxu0  ;;  %v9834_v57 = vor.u32 %v12505_v43, %v9833_v39  ;;  %v14072_v39 = vperm.slane %v13764_v19, 3  ;;  %v9801_v43 = vld [vmem:[%s19105_s1 + $0x158] sm:$0xf] }
 0x114   : > { %v1209_v58 = vadd.f32 %v1208_v55, %v13773_v22  ;;  %v1354_v60 = vadd.f32 %v1353_v54, %v1305_v50  ;;  %v10091_v50 = vld [vmem:[%s19105_s1 + $0x3b8] sm:$0xf0] }
 0x115   : > { %v1257_v59 = vpop.f32.mrf.mxu1  ;;  %1756 = vmatpush.bf16.msrb.mxu0 %v9834_v57 }
 0x116   : > { %v1258_v63 = vadd.f32 %v1257_v59, %v1209_v58  ;;  %v2048_v31 = vmax.f32 %v1354_v60, 0.0  ;;  %v10094_v58 = vor.u32 %v12565_v46, %v10091_v50 }
 0x118   : > { %v2055_v3 = vmax.f32 %v1258_v63, 0.0  ;;  %1903 = vmatpush.bf16.msrb.mxu3 %v10094_v58 }
 0x119   : > { %v1306_v11 = vpop.f32.mrf.mxu2 }
 0x11a   : > { %v14025_v9 = vpack.c.bf16 %v2055_v3, %v2047_v2  ;;  %v1307_v13 = vadd.f32 %v1306_v11, %v13780_v30  ;;  %v12569_v2 = vld [vmem:[%s19105_s1 + $0x3b4] sm:$0xf0]  ;;  %v14062_v11 = vperm.slane %v13764_v19, 2 }
 0x11b   : > { %v1355_v17 = vpop.f32.mrf.mxu3  ;;  %v1211_v18 = vpop.f32.mrf.mxu0  ;;  %v12497_v19 = vld [vmem:[%s19105_s1 + $0x174] sm:$0xf0] }
 0x11c   : > { %19214 = vst [vmem:[#allocation4_spill] sm:$0xff] %v14025_v9  ;;  %v1212_v20 = vadd.f32 %v1211_v18, %v13773_v22  ;;  %v1356_v24 = vadd.f32 %v1355_v17, %v1307_v13 }
 0x11d   : > { %v1260_v21 = vpop.f32.mrf.mxu1 }
 0x11e   : > { %v1261_v28 = vadd.f32 %v1260_v21, %v1212_v20  ;;  %1406 = vmatmul.bf16.gmra.mxu0 %v13735_v4  ;;  %v2056_v34 = vmax.f32 %v1356_v24, 0.0  ;;  %1504 = vmatmul.bf16.gmra.mxu2 %v13735_v4 }
 0x120   : > { %1455 = vmatmul.bf16.gmra.mxu1 %v13737_v5  ;;  %1553 = vmatmul.bf16.gmra.mxu3 %v13737_v5  ;;  %v14033_v25 = vpack.c.bf16 %v2056_v34, %v2048_v31  ;;  %v2063_v3 = vmax.f32 %v1261_v28, 0.0 }
 0x121   : > { %v1309_v41 = vpop.f32.mrf.mxu2 }
 0x122   : > { %19215 = vst [vmem:[#allocation5_spill] sm:$0xff] %v14033_v25  ;;  %v1310_v54 = vadd.f32 %v1309_v41, %v13780_v30  ;;  %v12493_v41 = vld [vmem:[%s19105_s1 + $0x15c] sm:$0xf] }
 0x123   : > { %v1358_v55 = vpop.f32.mrf.mxu3  ;;  %v1213_v56 = vpop.f32.mrf.mxu0  ;;  %v9806_v50 = vor.u32 %v12493_v41, %v9803_v42 }
 0x124   : > { %v1214_v59 = vadd.f32 %v1213_v56, %v13773_v22  ;;  %v1359_v63 = vadd.f32 %v1358_v55, %v1310_v54  ;;  %v10090_v22 = vor.u32 %v12569_v2, %v10089_v1  ;;  %v12557_v54 = vld [vmem:[%s19105_s1 + $0x35c] sm:$0xf] }
 0x125   : > { %v1262_v60 = vpop.f32.mrf.mxu1  ;;  %v10059_v55 = vld [vmem:[%s19105_s1 + $0x378] sm:$0xf0]  ;;  %1855 = vmatpush.bf16.msrb.mxu2 %v9806_v50 }
 0x126   : > { %v1263_v0 = vadd.f32 %v1262_v60, %v1214_v59  ;;  %1805 = vmatpush.bf16.msrb.mxu1 %v10090_v22  ;;  %v2064_v28 = vmax.f32 %v1359_v63, 0.0  ;;  %v9802_v59 = vor.u32 %v12497_v19, %v9801_v43  ;;  %v10062_v60 = vor.u32 %v12557_v54, %v10059_v55  ;;  %v12485_v50 = vld [vmem:[%s19105_s1 + $0x11c] sm:$0xf]  ;;  %v9769_v54 = vld [vmem:[%s19105_s1 + $0x118] sm:$0xf] }
 0x127   : > { %v9771_v19 = vld [vmem:[%s19105_s1 + $0x138] sm:$0xf0] }
 0x128   : > { %v2071_v8 = vmax.f32 %v1263_v0, 0.0  ;;  %1757 = vmatpush.bf16.msrb.mxu0 %v9802_v59  ;;  %1904 = vmatpush.bf16.msrb.mxu3 %v10062_v60  ;;  %v10027_v59 = vld [vmem:[%s19105_s1 + $0x338] sm:$0xf0] }
 0x129   : > { %v1311_v17 = vpop.f32.mrf.mxu2 }
 0x12a   : > { %v14064_v13 = vpack.c.bf16 %v2071_v8, %v2063_v3  ;;  %v1312_v18 = vadd.f32 %v1311_v17, %v13780_v30  ;;  %v10057_v3 = vld [vmem:[%s19105_s1 + $0x358] sm:$0xf] }
 0x12b   : > { %v1360_v20 = vpop.f32.mrf.mxu3  ;;  %v1372_v21 = vpop.f32.mrf.mxu0  ;;  %v12561_v8 = vld [vmem:[%s19105_s1 + $0x374] sm:$0xf0] }
 0x12c   : > { %19216 = vst [vmem:[#allocation6_spill] sm:$0xff] %v14064_v13  ;;  %v1373_v24 = vadd.f32 %v1372_v21, %v14062_v11  ;;  %v1361_v34 = vadd.f32 %v1360_v20, %v1312_v18  ;;  %v10058_v18 = vor.u32 %v12561_v8, %v10057_v3 }
 0x12d   : > { %v1421_v31 = vpop.f32.mrf.mxu1 }
 0x12e   : > { %v1422_v37 = vadd.f32 %v1421_v31, %v1373_v24  ;;  %1567 = vmatmul.bf16.vlgmr.msra.gmra.mxu0 %v13456_v44  ;;  %v2072_v38 = vmax.f32 %v1361_v34, 0.0  ;;  %1665 = vmatmul.bf16.vlgmr.msra.gmra.mxu2 %v13456_v44 }
 0x12f   : > { %1806 = vmatpush.bf16.msrb.mxu1 %v10058_v18  ;;  %v10025_v18 = vld [vmem:[%s19105_s1 + $0x318] sm:$0xf] }
 0x130   : > { %1616 = vmatmul.bf16.vlgmr.msra.gmra.mxu1 %v13467_v49  ;;  %1714 = vmatmul.bf16.vlgmr.msra.gmra.mxu3 %v13467_v49  ;;  %v14075_v30 = vpack.c.bf16 %v2072_v38, %v2064_v28  ;;  %v1953_v22 = vmax.f32 %v1422_v37, 0.0 }
 0x131   : > { %v1470_v46 = vpop.f32.mrf.mxu2 }
 0x132   : > { %19217 = vst [vmem:[#allocation7_spill] sm:$0xff] %v14075_v30  ;;  %v1471_v56 = vadd.f32 %v1470_v46, %v14072_v39 }
 0x133   : > { %v1519_v57 = vpop.f32.mrf.mxu3  ;;  %v1374_v58 = vpop.f32.mrf.mxu0 }
 0x134   : > { %v1375_v63 = vadd.f32 %v1374_v58, %v14062_v11  ;;  %v1520_v1 = vadd.f32 %v1519_v57, %v1471_v56  ;;  %v9774_v56 = vor.u32 %v12485_v50, %v9771_v19  ;;  %v12489_v57 = vld [vmem:[%s19105_s1 + $0x134] sm:$0xf0]  ;;  %v12549_v58 = vld [vmem:[%s19105_s1 + $0x31c] sm:$0xf] }
 0x135   : > { %v1423_v0 = vpop.f32.mrf.mxu1 }
 0x136   : > { %v1424_v2 = vadd.f32 %v1423_v0, %v1375_v63  ;;  %v1954_v43 = vmax.f32 %v1520_v1, 0.0  ;;  %v9770_v1 = vor.u32 %v12489_v57, %v9769_v54  ;;  %1856 = vmatpush.bf16.msrb.mxu2 %v9774_v56 }
 0x138   : > { %v1961_v17 = vmax.f32 %v1424_v2, 0.0  ;;  %v10030_v2 = vor.u32 %v12549_v58, %v10027_v59  ;;  %1758 = vmatpush.bf16.msrb.mxu0 %v9770_v1  ;;  %v12477_v58 = vld [vmem:[%s19105_s1 + $0xdc] sm:$0xf]  ;;  %v12481_v1 = vld [vmem:[%s19105_s1 + $0xf4] sm:$0xf0] }
 0x139   : > { %v1472_v21 = vpop.f32.mrf.mxu2  ;;  %v9739_v59 = vld [vmem:[%s19105_s1 + $0xf8] sm:$0xf0] }
 0x13a   : > { %v14103_v20 = vpack.c.bf16 %v1961_v17, %v1953_v22  ;;  %v1473_v24 = vadd.f32 %v1472_v21, %v14072_v39  ;;  %1905 = vmatpush.bf16.msrb.mxu3 %v10030_v2  ;;  %v12553_v21 = vld [vmem:[%s19105_s1 + $0x334] sm:$0xf0]  ;;  %v12541_v2 = vld [vmem:[%s19105_s1 + $0x2dc] sm:$0xf] }
 0x13b   : > { %v1521_v31 = vpop.f32.mrf.mxu3  ;;  %v1377_v34 = vpop.f32.mrf.mxu0 }
 0x13c   : > { %v1378_v28 = vadd.f32 %v1377_v34, %v14062_v11  ;;  %v1522_v41 = vadd.f32 %v1521_v31, %v1473_v24  ;;  %v10026_v34 = vor.u32 %v12553_v21, %v10025_v18 }
 0x13d   : > { %v1426_v38 = vpop.f32.mrf.mxu1 }
 0x13e   : > { %v1427_v42 = vadd.f32 %v1426_v38, %v1378_v28  ;;  %1572 = vmatmul.bf16.gmra.mxu0 %v13519_v14  ;;  %v1962_v46 = vmax.f32 %v1522_v41, 0.0  ;;  %1670 = vmatmul.bf16.gmra.mxu2 %v13519_v14 }
 0x13f   : > { %1807 = vmatpush.bf16.msrb.mxu1 %v10026_v34 }
 0x140   : > { %1621 = vmatmul.bf16.gmra.mxu1 %v13521_v15  ;;  %1719 = vmatmul.bf16.gmra.mxu3 %v13521_v15  ;;  %v14111_v37 = vpack.c.bf16 %v1962_v46, %v1954_v43  ;;  %v1969_v24 = vmax.f32 %v1427_v42, 0.0 }
 0x141   : > { %v1475_v55 = vpop.f32.mrf.mxu2 }
 0x142   : > { %19218 = vst [vmem:[#allocation8_spill] sm:$0xff] %v14111_v37  ;;  %v1476_v60 = vadd.f32 %v1475_v55, %v14072_v39 }
 0x143   : > { %v1524_v63 = vpop.f32.mrf.mxu3  ;;  %v1379_v0 = vpop.f32.mrf.mxu0 }
 0x144   : > { %v1380_v3 = vadd.f32 %v1379_v0, %v14062_v11  ;;  %v1525_v22 = vadd.f32 %v1524_v63, %v1476_v60  ;;  %v9737_v60 = vld [vmem:[%s19105_s1 + $0xd8] sm:$0xf]  ;;  %v9742_v0 = vor.u32 %v12477_v58, %v9739_v59 }
 0x145   : > { %v1428_v8 = vpop.f32.mrf.mxu1  ;;  %v9738_v18 = vor.u32 %v12481_v1, %v9737_v60 }
 0x146   : > { %v1429_v17 = vadd.f32 %v1428_v8, %v1380_v3  ;;  %v1970_v56 = vmax.f32 %v1525_v22, 0.0  ;;  %v9995_v3 = vld [vmem:[%s19105_s1 + $0x2f8] sm:$0xf0]  ;;  %1857 = vmatpush.bf16.msrb.mxu2 %v9742_v0 }
 0x147   : > { %v9998_v21 = vor.u32 %v12541_v2, %v9995_v3  ;;  %1759 = vmatpush.bf16.msrb.mxu0 %v9738_v18 }
 0x148   : > { %v1977_v31 = vmax.f32 %v1429_v17, 0.0 }
 0x149   : > { %v1477_v38 = vpop.f32.mrf.mxu2  ;;  %1906 = vmatpush.bf16.msrb.mxu3 %v9998_v21 }
 0x14a   : > { %v14139_v28 = vpack.c.bf16 %v1977_v31, %v1969_v24  ;;  %v1478_v41 = vadd.f32 %v1477_v38, %v14072_v39 }
 0x14b   : > { %v1526_v43 = vpop.f32.mrf.mxu3  ;;  %v1382_v46 = vpop.f32.mrf.mxu0 }
 0x14c   : > { %19219 = vst [vmem:[#allocation9_spill] sm:$0xff] %v14139_v28  ;;  %v1383_v50 = vadd.f32 %v1382_v46, %v14062_v11  ;;  %v1527_v54 = vadd.f32 %v1526_v43, %v1478_v41  ;;  %v9993_v41 = vld [vmem:[%s19105_s1 + $0x2d8] sm:$0xf] }
 0x14d   : > { %v1431_v19 = vpop.f32.mrf.mxu1  ;;  %v12545_v43 = vld [vmem:[%s19105_s1 + $0x2f4] sm:$0xf0] }
 0x14e   : > { %v1432_v55 = vadd.f32 %v1431_v19, %v1383_v50  ;;  %1577 = vmatmul.bf16.gmra.mxu0 %v13555_v32  ;;  %v1978_v57 = vmax.f32 %v1527_v54, 0.0  ;;  %1675 = vmatmul.bf16.gmra.mxu2 %v13555_v32  ;;  %v9994_v19 = vor.u32 %v12545_v43, %v9993_v41 }
 0x150   : > { %1626 = vmatmul.bf16.gmra.mxu1 %v13557_v33  ;;  %1724 = vmatmul.bf16.gmra.mxu3 %v13557_v33  ;;  %v14147_v42 = vpack.c.bf16 %v1978_v57, %v1970_v56  ;;  %v1985_v46 = vmax.f32 %v1432_v55, 0.0 }
 0x151   : > { %v1480_v63 = vpop.f32.mrf.mxu2  ;;  %1808 = vmatpush.bf16.msrb.mxu1 %v9994_v19 }
 0x152   : > { %19220 = vst [vmem:[#allocation10_spill] sm:$0xff] %v14147_v42  ;;  %v1481_v8 = vadd.f32 %v1480_v63, %v14072_v39 }
 0x153   : > { %v1529_v22 = vpop.f32.mrf.mxu3  ;;  %v1384_v17 = vpop.f32.mrf.mxu0 }
 0x154   : > { %v1385_v24 = vadd.f32 %v1384_v17, %v14062_v11  ;;  %v1530_v34 = vadd.f32 %v1529_v22, %v1481_v8  ;;  %v12469_v8 = vld [vmem:[%s19105_s1 + $0x9c] sm:$0xf]  ;;  %v9705_v17 = vld [vmem:[%s19105_s1 + $0x98] sm:$0xf] }
 0x155   : > { %v1433_v31 = vpop.f32.mrf.mxu1  ;;  %v9707_v22 = vld [vmem:[%s19105_s1 + $0xb8] sm:$0xf0] }
 0x156   : > { %v1434_v38 = vadd.f32 %v1433_v31, %v1385_v24  ;;  %v1986_v2 = vmax.f32 %v1530_v34, 0.0  ;;  %v9710_v21 = vor.u32 %v12469_v8, %v9707_v22  ;;  %v12473_v24 = vld [vmem:[%s19105_s1 + $0xb4] sm:$0xf0]  ;;  %v12533_v31 = vld [vmem:[%s19105_s1 + $0x29c] sm:$0xf] }
 0x157   : > { %v9963_v34 = vld [vmem:[%s19105_s1 + $0x2b8] sm:$0xf0] }
 0x158   : > { %v1993_v50 = vmax.f32 %v1434_v38, 0.0  ;;  %1858 = vmatpush.bf16.msrb.mxu2 %v9710_v21 }
 0x159   : > { %v1482_v56 = vpop.f32.mrf.mxu2 }
 0x15a   : > { %v14175_v54 = vpack.c.bf16 %v1993_v50, %v1985_v46  ;;  %v1483_v57 = vadd.f32 %v1482_v56, %v14072_v39  ;;  %v9706_v46 = vor.u32 %v12473_v24, %v9705_v17  ;;  %v9966_v50 = vor.u32 %v12533_v31, %v9963_v34 }
 0x15b   : > { %v1531_v58 = vpop.f32.mrf.mxu3  ;;  %v1387_v59 = vpop.f32.mrf.mxu0 }
 0x15c   : > { %19221 = vst [vmem:[#allocation11_spill] sm:$0xff] %v14175_v54  ;;  %v1388_v60 = vadd.f32 %v1387_v59, %v14062_v11  ;;  %v1532_v0 = vadd.f32 %v1531_v58, %v1483_v57  ;;  %1760 = vmatpush.bf16.msrb.mxu0 %v9706_v46  ;;  %1907 = vmatpush.bf16.msrb.mxu3 %v9966_v50  ;;  %v9961_v59 = vld [vmem:[%s19105_s1 + $0x298] sm:$0xf]  ;;  %v9675_v46 = vld [vmem:[%s19105_s1 + $0x78] sm:$0xf0] }
 0x15d   : > { %v1436_v63 = vpop.f32.mrf.mxu1  ;;  %v9673_v50 = vld [vmem:[%s19105_s1 + $0x58] sm:$0xf] }
 0x15e   : > { %v1437_v1 = vadd.f32 %v1436_v63, %v1388_v60  ;;  %1582 = vmatmul.bf16.gmra.mxu0 %v13591_v52  ;;  %v1994_v3 = vmax.f32 %v1532_v0, 0.0  ;;  %1680 = vmatmul.bf16.gmra.mxu2 %v13591_v52  ;;  %v12537_v60 = vld [vmem:[%s19105_s1 + $0x2b4] sm:$0xf0] }
 0x160   : > { %1631 = vmatmul.bf16.gmra.mxu1 %v13593_v53  ;;  %1729 = vmatmul.bf16.gmra.mxu3 %v13593_v53  ;;  %v14183_v55 = vpack.c.bf16 %v1994_v3, %v1986_v2  ;;  %v2001_v63 = vmax.f32 %v1437_v1, 0.0  ;;  %v9962_v2 = vor.u32 %v12537_v60, %v9961_v59  ;;  %v9931_v59 = vld [vmem:[%s19105_s1 + $0x278] sm:$0xf0] }
 0x161   : > { %v1485_v18 = vpop.f32.mrf.mxu2 }
 0x162   : > { %19222 = vst [vmem:[#allocation12_spill] sm:$0xff] %v14183_v55  ;;  %v1486_v38 = vadd.f32 %v1485_v18, %v14072_v39  ;;  %1809 = vmatpush.bf16.msrb.mxu1 %v9962_v2 }
 0x163   : > { %v1534_v41 = vpop.f32.mrf.mxu3  ;;  %v1389_v43 = vpop.f32.mrf.mxu0 }
 0x164   : > { %v1390_v19 = vadd.f32 %v1389_v43, %v14062_v11  ;;  %v1535_v57 = vadd.f32 %v1534_v41, %v1486_v38  ;;  %v12461_v43 = vld [vmem:[%s19105_s1 + $0x5c] sm:$0xf] }
 0x165   : > { %v1438_v56 = vpop.f32.mrf.mxu1 }
 0x166   : > { %v1439_v58 = vadd.f32 %v1438_v56, %v1390_v19  ;;  %v2002_v38 = vmax.f32 %v1535_v57, 0.0  ;;  %v9678_v56 = vor.u32 %v12461_v43, %v9675_v46  ;;  %v12465_v57 = vld [vmem:[%s19105_s1 + $0x74] sm:$0xf0] }
 0x167   : > { %v9674_v2 = vor.u32 %v12465_v57, %v9673_v50 }
 0x168   : > { %v2009_v0 = vmax.f32 %v1439_v58, 0.0  ;;  %v12525_v58 = vld [vmem:[%s19105_s1 + $0x25c] sm:$0xf]  ;;  %1859 = vmatpush.bf16.msrb.mxu2 %v9678_v56 }
 0x169   : > { %v1487_v8 = vpop.f32.mrf.mxu2  ;;  %1761 = vmatpush.bf16.msrb.mxu0 %v9674_v2 }
 0x16a   : > { %v14211_v3 = vpack.c.bf16 %v2009_v0, %v2001_v63  ;;  %v1488_v22 = vadd.f32 %v1487_v8, %v14072_v39  ;;  %v9934_v8 = vor.u32 %v12525_v58, %v9931_v59 }
 0x16b   : > { %v1536_v17 = vpop.f32.mrf.mxu3  ;;  %v1392_v18 = vpop.f32.mrf.mxu0 }
 0x16c   : > { %19223 = vst [vmem:[#allocation13_spill] sm:$0xff] %v14211_v3  ;;  %v1393_v21 = vadd.f32 %v1392_v18, %v14062_v11  ;;  %v1537_v31 = vadd.f32 %v1536_v17, %v1488_v22  ;;  %1908 = vmatpush.bf16.msrb.mxu3 %v9934_v8  ;;  %v12453_v8 = vld [vmem:[%s19105_s1 + $0x1c] sm:$0xf] }
 0x16d   : > { %v1441_v24 = vpop.f32.mrf.mxu1 }
 0x16e   : > { %v1442_v34 = vadd.f32 %v1441_v24, %v1393_v21  ;;  %1587 = vmatmul.bf16.gmra.mxu0 %v13627_v6  ;;  %v2010_v41 = vmax.f32 %v1537_v31, 0.0  ;;  %1685 = vmatmul.bf16.gmra.mxu2 %v13627_v6  ;;  %v9929_v24 = vld [vmem:[%s19105_s1 + $0x258] sm:$0xf] }
 0x16f   : > { %v12529_v31 = vld [vmem:[%s19105_s1 + $0x274] sm:$0xf0] }
 0x170   : > { %1636 = vmatmul.bf16.gmra.mxu1 %v13629_v7  ;;  %1734 = vmatmul.bf16.gmra.mxu3 %v13629_v7  ;;  %v14219_v1 = vpack.c.bf16 %v2010_v41, %v2002_v38  ;;  %v2017_v38 = vmax.f32 %v1442_v34, 0.0  ;;  %v9930_v43 = vor.u32 %v12529_v31, %v9929_v24  ;;  %v12457_v24 = vld [vmem:[%s19105_s1 + $0x34] sm:$0xf0]  ;;  %v12517_v31 = vld [vmem:[%s19105_s1 + $0x21c] sm:$0xf] }
 0x171   : > { %v1490_v19 = vpop.f32.mrf.mxu2 }
 0x172   : > { %19224 = vst [vmem:[#allocation14_spill] sm:$0xff] %v14219_v1  ;;  %v1491_v60 = vadd.f32 %v1490_v19, %v14072_v39  ;;  %1810 = vmatpush.bf16.msrb.mxu1 %v9930_v43 }
 0x173   : > { %v1539_v63 = vpop.f32.mrf.mxu3  ;;  %v1394_v0 = vpop.f32.mrf.mxu0 }
 0x174   : > { %v1395_v22 = vadd.f32 %v1394_v0, %v14062_v11  ;;  %v1540_v18 = vadd.f32 %v1539_v63, %v1491_v60 }
 0x175   : > { %v1443_v17 = vpop.f32.mrf.mxu1 }
 0x176   : > { %v1444_v21 = vadd.f32 %v1443_v17, %v1395_v22  ;;  %v2018_v0 = vmax.f32 %v1540_v18, 0.0  ;;  %v9643_v22 = vld [vmem:[%s19105_s1 + $0x38] sm:$0xf0]  ;;  %v9641_v17 = vld [vmem:[%s19105_s1 + $0x18] sm:$0xf] }
 0x178   : > { %v2025_v41 = vmax.f32 %v1444_v21, 0.0  ;;  %v9646_v21 = vor.u32 %v12453_v8, %v9643_v22 }
 0x179   : > { %v1492_v50 = vpop.f32.mrf.mxu2 }
 0x17a   : > { %v14247_v46 = vpack.c.bf16 %v2025_v41, %v2017_v38  ;;  %v1493_v19 = vadd.f32 %v1492_v50, %v14072_v39  ;;  %v9899_v38 = vld [vmem:[%s19105_s1 + $0x238] sm:$0xf0]  ;;  %1860 = vmatpush.bf16.msrb.mxu2 %v9646_v21 }
 0x17b   : > { %v1541_v56 = vpop.f32.mrf.mxu3  ;;  %v1397_v57 = vpop.f32.mrf.mxu0 }
 0x17c   : > { %19225 = vst [vmem:[#allocation15_spill] sm:$0xff] %v14247_v46  ;;  %v1398_v58 = vadd.f32 %v1397_v57, %v14062_v11  ;;  %v1542_v60 = vadd.f32 %v1541_v56, %v1493_v19  ;;  %v9642_v19 = vor.u32 %v12457_v24, %v9641_v17  ;;  %v9902_v56 = vor.u32 %v12517_v31, %v9899_v38 }
 0x17d   : > { %v1446_v59 = vpop.f32.mrf.mxu1 }
 0x17e   : > { %v1447_v63 = vadd.f32 %v1446_v59, %v1398_v58  ;;  %1592 = vmatmul.bf16.gmra.mxu0 %v13663_v26  ;;  %v2026_v2 = vmax.f32 %v1542_v60, 0.0  ;;  %1690 = vmatmul.bf16.gmra.mxu2 %v13663_v26 }
 0x17f   : > { %1762 = vmatpush.bf16.msrb.mxu0 %v9642_v19  ;;  %1909 = vmatpush.bf16.msrb.mxu3 %v9902_v56 }
 0x180   : > { %1641 = vmatmul.bf16.gmra.mxu1 %v13665_v27  ;;  %1739 = vmatmul.bf16.gmra.mxu3 %v13665_v27  ;;  %v14255_v34 = vpack.c.bf16 %v2026_v2, %v2018_v0  ;;  %v9897_v0 = vld [vmem:[%s19105_s1 + $0x218] sm:$0xf]  ;;  %v2033_v8 = vmax.f32 %v1447_v63, 0.0 }
 0x181   : > { %v1495_v18 = vpop.f32.mrf.mxu2  ;;  %v12521_v2 = vld [vmem:[%s19105_s1 + $0x234] sm:$0xf0] }
 0x182   : > { %19226 = vst [vmem:[#allocation16_spill] sm:$0xff] %v14255_v34  ;;  %v1496_v41 = vadd.f32 %v1495_v18, %v14072_v39  ;;  %v9898_v17 = vor.u32 %v12521_v2, %v9897_v0 }
 0x183   : > { %v1544_v43 = vpop.f32.mrf.mxu3  ;;  %v1399_v50 = vpop.f32.mrf.mxu0 }
 0x184   : > { %v1400_v57 = vadd.f32 %v1399_v50, %v14062_v11  ;;  %v1545_v59 = vadd.f32 %v1544_v43, %v1496_v41  ;;  %1811 = vmatpush.bf16.msrb.mxu1 %v9898_v17  ;;  %v12830_v17 = vld [vmem:[%s19107_s3 + $0x7dc] sm:$0xf0] }
 0x185   : > { %v1448_v58 = vpop.f32.mrf.mxu1 }
 0x186   : > { %v1449_v60 = vadd.f32 %v1448_v58, %v1400_v57  ;;  %v2034_v56 = vmax.f32 %v1545_v59, 0.0  ;;  %v10865_v58 = vld [vmem:[%s19107_s3 + $0x5c0] sm:$0xf] }
 0x187   : > { %v10353_v59 = vld [vmem:[%s19107_s3 + $0x1c0] sm:$0xf] }
 0x188   : > { %v2041_v22 = vmax.f32 %v1449_v60, 0.0  ;;  %v12766_v60 = vld [vmem:[%s19107_s3 + $0x5dc] sm:$0xf0] }
 0x189   : > { %v1497_v24 = vpop.f32.mrf.mxu2  ;;  %v10866_v2 = vor.u32 %v12766_v60, %v10865_v58  ;;  %v10609_v58 = vld [vmem:[%s19107_s3 + $0x3c0] sm:$0xf] }
 0x18a   : > { %v14283_v18 = vpack.c.bf16 %v2041_v22, %v2033_v8  ;;  %v1498_v21 = vadd.f32 %v1497_v24, %v14072_v39  ;;  %v12638_v8 = vld [vmem:[%s19107_s3 + $0x1dc] sm:$0xf0] }
 0x18b   : > { %v1546_v31 = vpop.f32.mrf.mxu3  ;;  %v1402_v38 = vpop.f32.mrf.mxu0  ;;  %v11121_v22 = vld [vmem:[%s19107_s3 + $0x7c0] sm:$0xf]  ;;  %5331 = vmatpush.bf16.msra.mxu2 %v10866_v2 }
 0x18c   : > { %19227 = vst [vmem:[#allocation17_spill] sm:$0xff] %v14283_v18  ;;  %v1403_v41 = vadd.f32 %v1402_v38, %v14062_v11  ;;  %v1547_v50 = vadd.f32 %v1546_v31, %v1498_v21  ;;  %v10354_v38 = vor.u32 %v12638_v8, %v10353_v59  ;;  %v12702_v60 = vld [vmem:[%s19107_s3 + $0x3dc] sm:$0xf0] }
 0x18d   : > { %v1451_v43 = vpop.f32.mrf.mxu1  ;;  %v10610_v59 = vor.u32 %v12702_v60, %v10609_v58 }
 0x18e   : > { %v1452_v19 = vadd.f32 %v1451_v43, %v1403_v41  ;;  %1597 = vmatmul.bf16.gmra.mxu0 %v13699_v47  ;;  %v2042_v57 = vmax.f32 %v1547_v50, 0.0  ;;  %1695 = vmatmul.bf16.gmra.mxu2 %v13699_v47  ;;  %v11122_v41 = vor.u32 %v12830_v17, %v11121_v22 }
 0x18f   : > { %5233 = vmatpush.bf16.msra.mxu0 %v10354_v38  ;;  %5282 = vmatpush.bf16.msra.mxu1 %v10610_v59  ;;  %v11089_v59 = vld [vmem:[%s19107_s3 + $0x780] sm:$0xf] }
 0x190   : > { %1646 = vmatmul.bf16.gmra.mxu1 %v13701_v48  ;;  %1744 = vmatmul.bf16.gmra.mxu3 %v13701_v48  ;;  %v14291_v63 = vpack.c.bf16 %v2042_v57, %v2034_v56 }
 0x191   : > { %v1500_v0 = vpop.f32.mrf.mxu2  ;;  %5380 = vmatpush.bf16.msra.mxu3 %v11122_v41 }
 0x192   : > { %19228 = vst [vmem:[#allocation18_spill] sm:$0xff] %v14291_v63  ;;  %v1501_v24 = vadd.f32 %v1500_v0, %v14072_v39  ;;  %v2049_v0 = vmax.f32 %v1452_v19, 0.0  ;;  %v10833_v19 = vld [vmem:[%s19107_s3 + $0x580] sm:$0xf] }
 0x193   : > { %v1549_v21 = vpop.f32.mrf.mxu3  ;;  %v1404_v31 = vpop.f32.mrf.mxu0 }
 0x194   : > { %v1405_v43 = vadd.f32 %v1404_v31, %v14062_v11  ;;  %v1550_v56 = vadd.f32 %v1549_v21, %v1501_v24 }
 0x195   : > { %v1453_v50 = vpop.f32.mrf.mxu1 }
 0x196   : > { %v1454_v57 = vadd.f32 %v1453_v50, %v1405_v43  ;;  %v2050_v43 = vmax.f32 %v1550_v56, 0.0  ;;  %v10321_v56 = vld [vmem:[%s19107_s3 + $0x180] sm:$0xf] }
 0x198   : > { %v2057_v30 = vmax.f32 %v1454_v57, 0.0  ;;  %v12758_v57 = vld [vmem:[%s19107_s3 + $0x59c] sm:$0xf0] }
 0x199   : > { %v1502_v22 = vpop.f32.mrf.mxu2  ;;  %v10834_v60 = vor.u32 %v12758_v57, %v10833_v19  ;;  %v10577_v57 = vld [vmem:[%s19107_s3 + $0x380] sm:$0xf] }
 0x19a   : > { %v14319_v8 = vpack.c.bf16 %v2057_v30, %v2049_v0  ;;  %v1503_v2 = vadd.f32 %v1502_v22, %v14072_v39  ;;  %v12630_v0 = vld [vmem:[%s19107_s3 + $0x19c] sm:$0xf0] }
 0x19b   : > { %v1551_v17 = vpop.f32.mrf.mxu3  ;;  %v1407_v24 = vpop.f32.mrf.mxu0  ;;  %v12822_v22 = vld [vmem:[%s19107_s3 + $0x79c] sm:$0xf0]  ;;  %5332 = vmatpush.bf16.msra.mxu2 %v10834_v60 }
 0x19c   : > { %19229 = vst [vmem:[#allocation19_spill] sm:$0xff] %v14319_v8  ;;  %v1408_v21 = vadd.f32 %v1407_v24, %v14062_v11  ;;  %v1552_v38 = vadd.f32 %v1551_v17, %v1503_v2 }
 0x19d   : > { %v1456_v31 = vpop.f32.mrf.mxu1 }
 0x19e   : > { %v1457_v41 = vadd.f32 %v1456_v31, %v1408_v21  ;;  %1602 = vmatmul.bf16.gmra.mxu0 %v13735_v4  ;;  %v2058_v50 = vmax.f32 %v1552_v38, 0.0  ;;  %1700 = vmatmul.bf16.gmra.mxu2 %v13735_v4  ;;  %v10322_v21 = vor.u32 %v12630_v0, %v10321_v56  ;;  %v11090_v31 = vor.u32 %v12822_v22, %v11089_v59 }
 0x1a0   : > { %1651 = vmatmul.bf16.gmra.mxu1 %v13737_v5  ;;  %1749 = vmatmul.bf16.gmra.mxu3 %v13737_v5  ;;  %v14327_v30 = vpack.c.bf16 %v2058_v50, %v2050_v43  ;;  %v2065_v13 = vmax.f32 %v1457_v41, 0.0 }
 0x1a1   : > { %v1505_v58 = vpop.f32.mrf.mxu2  ;;  %5234 = vmatpush.bf16.msra.mxu0 %v10322_v21  ;;  %5381 = vmatpush.bf16.msra.mxu3 %v11090_v31 }
 0x1a2   : > { %19230 = vst [vmem:[#allocation20_spill] sm:$0xff] %v14327_v30  ;;  %v1506_v2 = vadd.f32 %v1505_v58, %v14072_v39  ;;  %v12694_v58 = vld [vmem:[%s19107_s3 + $0x39c] sm:$0xf0] }
 0x1a3   : > { %v1554_v17 = vpop.f32.mrf.mxu3  ;;  %v1409_v24 = vpop.f32.mrf.mxu0  ;;  %v10578_v60 = vor.u32 %v12694_v58, %v10577_v57  ;;  %v11057_v58 = vld [vmem:[%s19107_s3 + $0x740] sm:$0xf] }
 0x1a4   : > { %v1410_v38 = vadd.f32 %v1409_v24, %v14062_v11  ;;  %v1555_v50 = vadd.f32 %v1554_v17, %v1506_v2  ;;  %v14358_v11 = vld [vmem:[%s19106_s2] sm:$0xff] }
 0x1a5   : > { %v1458_v43 = vpop.f32.mrf.mxu1  ;;  %v14361_v56 = vperm.slane %v14358_v11, 4  ;;  %5283 = vmatpush.bf16.msra.mxu1 %v10578_v60  ;;  %v12814_v60 = vld [vmem:[%s19107_s3 + $0x75c] sm:$0xf0] }
 0x1a6   : > { %v1459_v19 = vadd.f32 %v1458_v43, %v1410_v38  ;;  %v2066_v38 = vmax.f32 %v1555_v50, 0.0  ;;  %v12750_v50 = vld [vmem:[%s19107_s3 + $0x55c] sm:$0xf0] }
 0x1a8   : > { %v2073_v30 = vmax.f32 %v1459_v19, 0.0  ;;  %v10289_v19 = vld [vmem:[%s19107_s3 + $0x140] sm:$0xf] }
 0x1a9   : > { %v1507_v59 = vpop.f32.mrf.mxu2 }
 0x1aa   : > { %v14363_v0 = vpack.c.bf16 %v2073_v30, %v2065_v13  ;;  %v1508_v22 = vadd.f32 %v1507_v59, %v14072_v39  ;;  %v14371_v13 = vperm.slane %v14358_v11, 5  ;;  %v10801_v30 = vld [vmem:[%s19107_s3 + $0x540] sm:$0xf] }
 0x1ab   : > { %v1556_v2 = vpop.f32.mrf.mxu3  ;;  %v1568_v17 = vpop.f32.mrf.mxu0  ;;  %v10802_v57 = vor.u32 %v12750_v50, %v10801_v30  ;;  %v10545_v30 = vld [vmem:[%s19107_s3 + $0x340] sm:$0xf] }
 0x1ac   : > { %19231 = vst [vmem:[#allocation21_spill] sm:$0xff] %v14363_v0  ;;  %v1569_v41 = vadd.f32 %v1568_v17, %v14361_v56  ;;  %v1557_v21 = vadd.f32 %v1556_v2, %v1508_v22  ;;  %v12686_v50 = vld [vmem:[%s19107_s3 + $0x35c] sm:$0xf0] }
 0x1ad   : > { %v1617_v24 = vpop.f32.mrf.mxu1  ;;  %5333 = vmatpush.bf16.msra.mxu2 %v10802_v57 }
 0x1ae   : > { %v1618_v31 = vadd.f32 %v1617_v24, %v1569_v41  ;;  %1763 = vmatmul.bf16.vlgmr.msrb.gmra.mxu0 %v13456_v44  ;;  %v2074_v43 = vmax.f32 %v1557_v21, 0.0  ;;  %1861 = vmatmul.bf16.vlgmr.msrb.gmra.mxu2 %v13456_v44  ;;  %v11058_v41 = vor.u32 %v12814_v60, %v11057_v58 }
 0x1b0   : > { %1812 = vmatmul.bf16.vlgmr.msrb.gmra.mxu1 %v13467_v49  ;;  %1910 = vmatmul.bf16.vlgmr.msrb.gmra.mxu3 %v13467_v49  ;;  %v14374_v39 = vpack.c.bf16 %v2074_v43, %v2066_v38  ;;  %v12622_v49 = vld [vmem:[%s19107_s3 + $0x15c] sm:$0xf0] }
 0x1b1   : > { %v1666_v44 = vpop.f32.mrf.mxu2  ;;  %v10290_v17 = vor.u32 %v12622_v49, %v10289_v19  ;;  %5382 = vmatpush.bf16.msra.mxu3 %v11058_v41  ;;  %v10546_v19 = vor.u32 %v12686_v50, %v10545_v30 }
 0x1b2   : > { %19232 = vst [vmem:[#allocation22_spill] sm:$0xff] %v14374_v39  ;;  %v1667_v59 = vadd.f32 %v1666_v44, %v14371_v13  ;;  %v1955_v44 = vmax.f32 %v1618_v31, 0.0 }
 0x1b3   : > { %v1715_v22 = vpop.f32.mrf.mxu3  ;;  %v1570_v2 = vpop.f32.mrf.mxu0  ;;  %5235 = vmatpush.bf16.msra.mxu0 %v10290_v17  ;;  %5284 = vmatpush.bf16.msra.mxu1 %v10546_v19 }
 0x1b4   : > { %v1571_v24 = vadd.f32 %v1570_v2, %v14361_v56  ;;  %v1716_v38 = vadd.f32 %v1715_v22, %v1667_v59 }
 0x1b5   : > { %v1619_v21 = vpop.f32.mrf.mxu1 }
 0x1b6   : > { %v1620_v43 = vadd.f32 %v1619_v21, %v1571_v24  ;;  %v1956_v24 = vmax.f32 %v1716_v38, 0.0  ;;  %v10257_v38 = vld [vmem:[%s19107_s3 + $0x100] sm:$0xf] }
 0x1b8   : > { %v1963_v39 = vmax.f32 %v1620_v43, 0.0  ;;  %v12742_v43 = vld [vmem:[%s19107_s3 + $0x51c] sm:$0xf0] }
 0x1b9   : > { %v1668_v58 = vpop.f32.mrf.mxu2 }
 0x1ba   : > { %v14402_v49 = vpack.c.bf16 %v1963_v39, %v1955_v44  ;;  %v1669_v57 = vadd.f32 %v1668_v58, %v14371_v13  ;;  %v10769_v39 = vld [vmem:[%s19107_s3 + $0x500] sm:$0xf] }
 0x1bb   : > { %v1717_v60 = vpop.f32.mrf.mxu3  ;;  %v1573_v59 = vpop.f32.mrf.mxu0  ;;  %v10770_v50 = vor.u32 %v12742_v43, %v10769_v39  ;;  %v12806_v44 = vld [vmem:[%s19107_s3 + $0x71c] sm:$0xf0] }
 0x1bc   : > { %v1574_v22 = vadd.f32 %v1573_v59, %v14361_v56  ;;  %v1718_v17 = vadd.f32 %v1717_v60, %v1669_v57  ;;  %v12678_v39 = vld [vmem:[%s19107_s3 + $0x31c] sm:$0xf0] }
 0x1bd   : > { %v1622_v2 = vpop.f32.mrf.mxu1  ;;  %5334 = vmatpush.bf16.msra.mxu2 %v10770_v50 }
 0x1be   : > { %v1623_v41 = vadd.f32 %v1622_v2, %v1574_v22  ;;  %1768 = vmatmul.bf16.gmra.mxu0 %v13519_v14  ;;  %v1964_v21 = vmax.f32 %v1718_v17, 0.0  ;;  %1866 = vmatmul.bf16.gmra.mxu2 %v13519_v14  ;;  %v12614_v14 = vld [vmem:[%s19107_s3 + $0x11c] sm:$0xf0] }
 0x1bf   : > { %v10258_v60 = vor.u32 %v12614_v14, %v10257_v38 }
 0x1c0   : > { %1817 = vmatmul.bf16.gmra.mxu1 %v13521_v15  ;;  %1915 = vmatmul.bf16.gmra.mxu3 %v13521_v15  ;;  %v14410_v31 = vpack.c.bf16 %v1964_v21, %v1956_v24  ;;  %v11025_v15 = vld [vmem:[%s19107_s3 + $0x700] sm:$0xf]  ;;  %v1971_v43 = vmax.f32 %v1623_v41, 0.0 }
 0x1c1   : > { %v1671_v30 = vpop.f32.mrf.mxu2  ;;  %v11026_v59 = vor.u32 %v12806_v44, %v11025_v15  ;;  %5236 = vmatpush.bf16.msra.mxu0 %v10258_v60  ;;  %v10513_v21 = vld [vmem:[%s19107_s3 + $0x300] sm:$0xf] }
 0x1c2   : > { %19233 = vst [vmem:[#allocation23_spill] sm:$0xff] %v14410_v31  ;;  %v1672_v19 = vadd.f32 %v1671_v30, %v14371_v13  ;;  %v10514_v38 = vor.u32 %v12678_v39, %v10513_v21  ;;  %v12734_v21 = vld [vmem:[%s19107_s3 + $0x4dc] sm:$0xf0] }
 0x1c3   : > { %v1720_v58 = vpop.f32.mrf.mxu3  ;;  %v1575_v57 = vpop.f32.mrf.mxu0  ;;  %5383 = vmatpush.bf16.msra.mxu3 %v11026_v59 }
 0x1c4   : > { %v1576_v22 = vadd.f32 %v1575_v57, %v14361_v56  ;;  %v1721_v17 = vadd.f32 %v1720_v58, %v1672_v19  ;;  %5285 = vmatpush.bf16.msra.mxu1 %v10514_v38 }
 0x1c5   : > { %v1624_v2 = vpop.f32.mrf.mxu1 }
 0x1c6   : > { %v1625_v24 = vadd.f32 %v1624_v2, %v1576_v22  ;;  %v1972_v22 = vmax.f32 %v1721_v17, 0.0  ;;  %v10225_v17 = vld [vmem:[%s19107_s3 + $0xc0] sm:$0xf] }
 0x1c8   : > { %v1979_v30 = vmax.f32 %v1625_v24, 0.0  ;;  %v10737_v24 = vld [vmem:[%s19107_s3 + $0x4c0] sm:$0xf] }
 0x1c9   : > { %v1673_v15 = vpop.f32.mrf.mxu2 }
 0x1ca   : > { %v14438_v14 = vpack.c.bf16 %v1979_v30, %v1971_v43  ;;  %v1674_v50 = vadd.f32 %v1673_v15, %v14371_v13  ;;  %v10738_v43 = vor.u32 %v12734_v21, %v10737_v24  ;;  %v12798_v30 = vld [vmem:[%s19107_s3 + $0x6dc] sm:$0xf0] }
 0x1cb   : > { %v1722_v44 = vpop.f32.mrf.mxu3  ;;  %v1578_v19 = vpop.f32.mrf.mxu0  ;;  %v12670_v24 = vld [vmem:[%s19107_s3 + $0x2dc] sm:$0xf0] }
 0x1cc   : > { %19234 = vst [vmem:[#allocation24_spill] sm:$0xff] %v14438_v14  ;;  %v1579_v58 = vadd.f32 %v1578_v19, %v14361_v56  ;;  %v1723_v60 = vadd.f32 %v1722_v44, %v1674_v50  ;;  %5335 = vmatpush.bf16.msra.mxu2 %v10738_v43 }
 0x1cd   : > { %v1627_v57 = vpop.f32.mrf.mxu1 }
 0x1ce   : > { %v1628_v59 = vadd.f32 %v1627_v57, %v1579_v58  ;;  %1773 = vmatmul.bf16.gmra.mxu0 %v13555_v32  ;;  %v1980_v2 = vmax.f32 %v1723_v60, 0.0  ;;  %1871 = vmatmul.bf16.gmra.mxu2 %v13555_v32  ;;  %v12606_v32 = vld [vmem:[%s19107_s3 + $0xdc] sm:$0xf0] }
 0x1cf   : > { %v10226_v44 = vor.u32 %v12606_v32, %v10225_v17 }
 0x1d0   : > { %1822 = vmatmul.bf16.gmra.mxu1 %v13557_v33  ;;  %1920 = vmatmul.bf16.gmra.mxu3 %v13557_v33  ;;  %v14446_v41 = vpack.c.bf16 %v1980_v2, %v1972_v22  ;;  %v10993_v33 = vld [vmem:[%s19107_s3 + $0x6c0] sm:$0xf]  ;;  %v1987_v21 = vmax.f32 %v1628_v59, 0.0 }
 0x1d1   : > { %v1676_v39 = vpop.f32.mrf.mxu2  ;;  %v10994_v19 = vor.u32 %v12798_v30, %v10993_v33  ;;  %5237 = vmatpush.bf16.msra.mxu0 %v10226_v44  ;;  %v10481_v2 = vld [vmem:[%s19107_s3 + $0x2c0] sm:$0xf] }
 0x1d2   : > { %19235 = vst [vmem:[#allocation25_spill] sm:$0xff] %v14446_v41  ;;  %v1677_v38 = vadd.f32 %v1676_v39, %v14371_v13  ;;  %v10482_v17 = vor.u32 %v12670_v24, %v10481_v2  ;;  %v12726_v2 = vld [vmem:[%s19107_s3 + $0x49c] sm:$0xf0] }
 0x1d3   : > { %v1725_v15 = vpop.f32.mrf.mxu3  ;;  %v1580_v50 = vpop.f32.mrf.mxu0  ;;  %5384 = vmatpush.bf16.msra.mxu3 %v10994_v19 }
 0x1d4   : > { %v1581_v58 = vadd.f32 %v1580_v50, %v14361_v56  ;;  %v1726_v60 = vadd.f32 %v1725_v15, %v1677_v38  ;;  %5286 = vmatpush.bf16.msra.mxu1 %v10482_v17 }
 0x1d5   : > { %v1629_v57 = vpop.f32.mrf.mxu1 }
 0x1d6   : > { %v1630_v22 = vadd.f32 %v1629_v57, %v1581_v58  ;;  %v1988_v58 = vmax.f32 %v1726_v60, 0.0  ;;  %v10193_v60 = vld [vmem:[%s19107_s3 + $0x80] sm:$0xf] }
 0x1d8   : > { %v1995_v39 = vmax.f32 %v1630_v22, 0.0  ;;  %v10705_v22 = vld [vmem:[%s19107_s3 + $0x480] sm:$0xf] }
 0x1d9   : > { %v1678_v33 = vpop.f32.mrf.mxu2 }
 0x1da   : > { %v14474_v32 = vpack.c.bf16 %v1995_v39, %v1987_v21  ;;  %v1679_v43 = vadd.f32 %v1678_v33, %v14371_v13  ;;  %v10706_v21 = vor.u32 %v12726_v2, %v10705_v22  ;;  %v12790_v39 = vld [vmem:[%s19107_s3 + $0x69c] sm:$0xf0] }
 0x1db   : > { %v1727_v30 = vpop.f32.mrf.mxu3  ;;  %v1583_v38 = vpop.f32.mrf.mxu0  ;;  %v12662_v22 = vld [vmem:[%s19107_s3 + $0x29c] sm:$0xf0] }
 0x1dc   : > { %19236 = vst [vmem:[#allocation26_spill] sm:$0xff] %v14474_v32  ;;  %v1584_v15 = vadd.f32 %v1583_v38, %v14361_v56  ;;  %v1728_v44 = vadd.f32 %v1727_v30, %v1679_v43  ;;  %5336 = vmatpush.bf16.msra.mxu2 %v10706_v21 }
 0x1dd   : > { %v1632_v50 = vpop.f32.mrf.mxu1 }
 0x1de   : > { %v1633_v19 = vadd.f32 %v1632_v50, %v1584_v15  ;;  %1778 = vmatmul.bf16.gmra.mxu0 %v13591_v52  ;;  %v1996_v57 = vmax.f32 %v1728_v44, 0.0  ;;  %1876 = vmatmul.bf16.gmra.mxu2 %v13591_v52  ;;  %v12598_v52 = vld [vmem:[%s19107_s3 + $0x9c] sm:$0xf0] }
 0x1df   : > { %v10194_v30 = vor.u32 %v12598_v52, %v10193_v60 }
 0x1e0   : > { %1827 = vmatmul.bf16.gmra.mxu1 %v13593_v53  ;;  %1925 = vmatmul.bf16.gmra.mxu3 %v13593_v53  ;;  %v14482_v59 = vpack.c.bf16 %v1996_v57, %v1988_v58  ;;  %v10961_v53 = vld [vmem:[%s19107_s3 + $0x680] sm:$0xf]  ;;  %v2003_v2 = vmax.f32 %v1633_v19, 0.0 }
 0x1e1   : > { %v1681_v24 = vpop.f32.mrf.mxu2  ;;  %v10962_v38 = vor.u32 %v12790_v39, %v10961_v53  ;;  %5238 = vmatpush.bf16.msra.mxu0 %v10194_v30  ;;  %v10449_v57 = vld [vmem:[%s19107_s3 + $0x280] sm:$0xf] }
 0x1e2   : > { %19237 = vst [vmem:[#allocation27_spill] sm:$0xff] %v14482_v59  ;;  %v1682_v17 = vadd.f32 %v1681_v24, %v14371_v13  ;;  %v10450_v60 = vor.u32 %v12662_v22, %v10449_v57  ;;  %v12718_v57 = vld [vmem:[%s19107_s3 + $0x45c] sm:$0xf0] }
 0x1e3   : > { %v1730_v33 = vpop.f32.mrf.mxu3  ;;  %v1585_v43 = vpop.f32.mrf.mxu0  ;;  %5385 = vmatpush.bf16.msra.mxu3 %v10962_v38 }
 0x1e4   : > { %v1586_v15 = vadd.f32 %v1585_v43, %v14361_v56  ;;  %v1731_v44 = vadd.f32 %v1730_v33, %v1682_v17  ;;  %5287 = vmatpush.bf16.msra.mxu1 %v10450_v60 }
 0x1e5   : > { %v1634_v50 = vpop.f32.mrf.mxu1 }
 0x1e6   : > { %v1635_v58 = vadd.f32 %v1634_v50, %v1586_v15  ;;  %v2004_v15 = vmax.f32 %v1731_v44, 0.0  ;;  %v10161_v44 = vld [vmem:[%s19107_s3 + $0x40] sm:$0xf] }
 0x1e8   : > { %v2011_v24 = vmax.f32 %v1635_v58, 0.0  ;;  %v10673_v58 = vld [vmem:[%s19107_s3 + $0x440] sm:$0xf] }
 0x1e9   : > { %v1683_v53 = vpop.f32.mrf.mxu2 }
 0x1ea   : > { %v14510_v52 = vpack.c.bf16 %v2011_v24, %v2003_v2  ;;  %v1684_v21 = vadd.f32 %v1683_v53, %v14371_v13  ;;  %v10674_v2 = vor.u32 %v12718_v57, %v10673_v58  ;;  %v12782_v24 = vld [vmem:[%s19107_s3 + $0x65c] sm:$0xf0] }
 0x1eb   : > { %v1732_v39 = vpop.f32.mrf.mxu3  ;;  %v1588_v17 = vpop.f32.mrf.mxu0  ;;  %v12654_v58 = vld [vmem:[%s19107_s3 + $0x25c] sm:$0xf0] }
 0x1ec   : > { %19238 = vst [vmem:[#allocation28_spill] sm:$0xff] %v14510_v52  ;;  %v1589_v33 = vadd.f32 %v1588_v17, %v14361_v56  ;;  %v1733_v30 = vadd.f32 %v1732_v39, %v1684_v21  ;;  %5337 = vmatpush.bf16.msra.mxu2 %v10674_v2 }
 0x1ed   : > { %v1637_v43 = vpop.f32.mrf.mxu1 }
 0x1ee   : > { %v1638_v38 = vadd.f32 %v1637_v43, %v1589_v33  ;;  %1783 = vmatmul.bf16.gmra.mxu0 %v13627_v6  ;;  %v2012_v50 = vmax.f32 %v1733_v30, 0.0  ;;  %1881 = vmatmul.bf16.gmra.mxu2 %v13627_v6  ;;  %v12590_v6 = vld [vmem:[%s19107_s3 + $0x5c] sm:$0xf0] }
 0x1ef   : > { %v10162_v39 = vor.u32 %v12590_v6, %v10161_v44 }
 0x1f0   : > { %1832 = vmatmul.bf16.gmra.mxu1 %v13629_v7  ;;  %1930 = vmatmul.bf16.gmra.mxu3 %v13629_v7  ;;  %v14518_v19 = vpack.c.bf16 %v2012_v50, %v2004_v15  ;;  %v10929_v7 = vld [vmem:[%s19107_s3 + $0x640] sm:$0xf]  ;;  %v2019_v57 = vmax.f32 %v1638_v38, 0.0 }
 0x1f1   : > { %v1686_v22 = vpop.f32.mrf.mxu2  ;;  %v10930_v17 = vor.u32 %v12782_v24, %v10929_v7  ;;  %5239 = vmatpush.bf16.msra.mxu0 %v10162_v39  ;;  %v10417_v50 = vld [vmem:[%s19107_s3 + $0x240] sm:$0xf] }
 0x1f2   : > { %19239 = vst [vmem:[#allocation29_spill] sm:$0xff] %v14518_v19  ;;  %v1687_v60 = vadd.f32 %v1686_v22, %v14371_v13  ;;  %v10418_v44 = vor.u32 %v12654_v58, %v10417_v50  ;;  %v12710_v50 = vld [vmem:[%s19107_s3 + $0x41c] sm:$0xf0] }
 0x1f3   : > { %v1735_v53 = vpop.f32.mrf.mxu3  ;;  %v1590_v21 = vpop.f32.mrf.mxu0  ;;  %5386 = vmatpush.bf16.msra.mxu3 %v10930_v17 }
 0x1f4   : > { %v1591_v33 = vadd.f32 %v1590_v21, %v14361_v56  ;;  %v1736_v30 = vadd.f32 %v1735_v53, %v1687_v60  ;;  %5288 = vmatpush.bf16.msra.mxu1 %v10418_v44 }
 0x1f5   : > { %v1639_v43 = vpop.f32.mrf.mxu1 }
 0x1f6   : > { %v1640_v15 = vadd.f32 %v1639_v43, %v1591_v33  ;;  %v2020_v33 = vmax.f32 %v1736_v30, 0.0  ;;  %v10129_v30 = vld [vmem:[%s19107_s3] sm:$0xf] }
 0x1f8   : > { %v2027_v22 = vmax.f32 %v1640_v15, 0.0  ;;  %v10641_v15 = vld [vmem:[%s19107_s3 + $0x400] sm:$0xf] }
 0x1f9   : > { %v1688_v7 = vpop.f32.mrf.mxu2 }
 0x1fa   : > { %v14546_v6 = vpack.c.bf16 %v2027_v22, %v2019_v57  ;;  %v1689_v2 = vadd.f32 %v1688_v7, %v14371_v13  ;;  %v10642_v57 = vor.u32 %v12710_v50, %v10641_v15  ;;  %v12774_v22 = vld [vmem:[%s19107_s3 + $0x61c] sm:$0xf0] }
 0x1fb   : > { %v1737_v24 = vpop.f32.mrf.mxu3  ;;  %v1593_v60 = vpop.f32.mrf.mxu0  ;;  %v12646_v15 = vld [vmem:[%s19107_s3 + $0x21c] sm:$0xf0] }
 0x1fc   : > { %19240 = vst [vmem:[#allocation30_spill] sm:$0xff] %v14546_v6  ;;  %v1594_v53 = vadd.f32 %v1593_v60, %v14361_v56  ;;  %v1738_v39 = vadd.f32 %v1737_v24, %v1689_v2  ;;  %5338 = vmatpush.bf16.msra.mxu2 %v10642_v57 }
 0x1fd   : > { %v1642_v21 = vpop.f32.mrf.mxu1 }
 0x1fe   : > { %v1643_v17 = vadd.f32 %v1642_v21, %v1594_v53  ;;  %1788 = vmatmul.bf16.gmra.mxu0 %v13663_v26  ;;  %v2028_v43 = vmax.f32 %v1738_v39, 0.0  ;;  %1886 = vmatmul.bf16.gmra.mxu2 %v13663_v26  ;;  %v12582_v26 = vld [vmem:[%s19107_s3 + $0x1c] sm:$0xf0] }
 0x1ff   : > { %v10130_v24 = vor.u32 %v12582_v26, %v10129_v30 }
 0x200   : > { %1837 = vmatmul.bf16.gmra.mxu1 %v13665_v27  ;;  %1935 = vmatmul.bf16.gmra.mxu3 %v13665_v27  ;;  %v14554_v38 = vpack.c.bf16 %v2028_v43, %v2020_v33  ;;  %v10897_v27 = vld [vmem:[%s19107_s3 + $0x600] sm:$0xf]  ;;  %v2035_v50 = vmax.f32 %v1643_v17, 0.0 }
 0x201   : > { %v1691_v58 = vpop.f32.mrf.mxu2  ;;  %v10898_v60 = vor.u32 %v12774_v22, %v10897_v27  ;;  %5240 = vmatpush.bf16.msra.mxu0 %v10130_v24  ;;  %v10385_v43 = vld [vmem:[%s19107_s3 + $0x200] sm:$0xf] }
 0x202   : > { %19241 = vst [vmem:[#allocation31_spill] sm:$0xff] %v14554_v38  ;;  %v1692_v44 = vadd.f32 %v1691_v58, %v14371_v13  ;;  %v10386_v30 = vor.u32 %v12646_v15, %v10385_v43  ;;  %v13022_v43 = vld [vmem:[%s19107_s3 + $0xddc] sm:$0xf0] }
 0x203   : > { %v1740_v7 = vpop.f32.mrf.mxu3  ;;  %v1595_v2 = vpop.f32.mrf.mxu0  ;;  %5387 = vmatpush.bf16.msra.mxu3 %v10898_v60 }
 0x204   : > { %v1596_v53 = vadd.f32 %v1595_v2, %v14361_v56  ;;  %v1741_v39 = vadd.f32 %v1740_v7, %v1692_v44  ;;  %5289 = vmatpush.bf16.msra.mxu1 %v10386_v30 }
 0x205   : > { %v1644_v21 = vpop.f32.mrf.mxu1 }
 0x206   : > { %v1645_v33 = vadd.f32 %v1644_v21, %v1596_v53  ;;  %v2036_v53 = vmax.f32 %v1741_v39, 0.0  ;;  %v11377_v39 = vld [vmem:[%s19107_s3 + $0x9c0] sm:$0xf] }
 0x208   : > { %v2043_v58 = vmax.f32 %v1645_v33, 0.0  ;;  %v11889_v33 = vld [vmem:[%s19107_s3 + $0xdc0] sm:$0xf] }
 0x209   : > { %v1693_v27 = vpop.f32.mrf.mxu2 }
 0x20a   : > { %v14582_v26 = vpack.c.bf16 %v2043_v58, %v2035_v50  ;;  %v1694_v57 = vadd.f32 %v1693_v27, %v14371_v13  ;;  %v11890_v50 = vor.u32 %v13022_v43, %v11889_v33  ;;  %v13086_v58 = vld [vmem:[%s19107_s3 + $0xfdc] sm:$0xf0] }
 0x20b   : > { %v1742_v22 = vpop.f32.mrf.mxu3  ;;  %v1598_v44 = vpop.f32.mrf.mxu0  ;;  %v12958_v33 = vld [vmem:[%s19107_s3 + $0xbdc] sm:$0xf0] }
 0x20c   : > { %19242 = vst [vmem:[#allocation32_spill] sm:$0xff] %v14582_v26  ;;  %v1599_v7 = vadd.f32 %v1598_v44, %v14361_v56  ;;  %v1743_v24 = vadd.f32 %v1742_v22, %v1694_v57  ;;  %5527 = vmatpush.bf16.msrb.mxu2 %v11890_v50 }
 0x20d   : > { %v1647_v2 = vpop.f32.mrf.mxu1 }
 0x20e   : > { %v1648_v60 = vadd.f32 %v1647_v2, %v1599_v7  ;;  %1793 = vmatmul.bf16.gmra.mxu0 %v13699_v47  ;;  %v2044_v21 = vmax.f32 %v1743_v24, 0.0  ;;  %1891 = vmatmul.bf16.gmra.mxu2 %v13699_v47  ;;  %v12894_v47 = vld [vmem:[%s19107_s3 + $0x9dc] sm:$0xf0] }
 0x20f   : > { %v11378_v22 = vor.u32 %v12894_v47, %v11377_v39 }
 0x210   : > { %1842 = vmatmul.bf16.gmra.mxu1 %v13701_v48  ;;  %1940 = vmatmul.bf16.gmra.mxu3 %v13701_v48  ;;  %v14590_v17 = vpack.c.bf16 %v2044_v21, %v2036_v53  ;;  %v12145_v48 = vld [vmem:[%s19107_s3 + $0xfc0] sm:$0xf]  ;;  %v2051_v43 = vmax.f32 %v1648_v60, 0.0 }
 0x211   : > { %v1696_v15 = vpop.f32.mrf.mxu2  ;;  %v12146_v44 = vor.u32 %v13086_v58, %v12145_v48  ;;  %5429 = vmatpush.bf16.msrb.mxu0 %v11378_v22  ;;  %v11633_v21 = vld [vmem:[%s19107_s3 + $0xbc0] sm:$0xf] }
 0x212   : > { %19243 = vst [vmem:[#allocation33_spill] sm:$0xff] %v14590_v17  ;;  %v1697_v30 = vadd.f32 %v1696_v15, %v14371_v13  ;;  %v11634_v39 = vor.u32 %v12958_v33, %v11633_v21  ;;  %v13014_v21 = vld [vmem:[%s19107_s3 + $0xd9c] sm:$0xf0] }
 0x213   : > { %v1745_v27 = vpop.f32.mrf.mxu3  ;;  %v1600_v57 = vpop.f32.mrf.mxu0  ;;  %5576 = vmatpush.bf16.msrb.mxu3 %v12146_v44 }
 0x214   : > { %v1601_v7 = vadd.f32 %v1600_v57, %v14361_v56  ;;  %v1746_v24 = vadd.f32 %v1745_v27, %v1697_v30  ;;  %5478 = vmatpush.bf16.msrb.mxu1 %v11634_v39 }
 0x215   : > { %v1649_v2 = vpop.f32.mrf.mxu1 }
 0x216   : > { %v1650_v53 = vadd.f32 %v1649_v2, %v1601_v7  ;;  %v2052_v7 = vmax.f32 %v1746_v24, 0.0  ;;  %v11345_v24 = vld [vmem:[%s19107_s3 + $0x980] sm:$0xf] }
 0x218   : > { %v2059_v15 = vmax.f32 %v1650_v53, 0.0  ;;  %v11857_v53 = vld [vmem:[%s19107_s3 + $0xd80] sm:$0xf] }
 0x219   : > { %v1698_v48 = vpop.f32.mrf.mxu2 }
 0x21a   : > { %v14618_v47 = vpack.c.bf16 %v2059_v15, %v2051_v43  ;;  %v1699_v50 = vadd.f32 %v1698_v48, %v14371_v13  ;;  %v11858_v43 = vor.u32 %v13014_v21, %v11857_v53  ;;  %v13078_v15 = vld [vmem:[%s19107_s3 + $0xf9c] sm:$0xf0] }
 0x21b   : > { %v1747_v58 = vpop.f32.mrf.mxu3  ;;  %v1603_v30 = vpop.f32.mrf.mxu0  ;;  %v12950_v53 = vld [vmem:[%s19107_s3 + $0xb9c] sm:$0xf0] }
 0x21c   : > { %19244 = vst [vmem:[#allocation34_spill] sm:$0xff] %v14618_v47  ;;  %v1604_v27 = vadd.f32 %v1603_v30, %v14361_v56  ;;  %v1748_v22 = vadd.f32 %v1747_v58, %v1699_v50  ;;  %5528 = vmatpush.bf16.msrb.mxu2 %v11858_v43 }
 0x21d   : > { %v1652_v57 = vpop.f32.mrf.mxu1 }
 0x21e   : > { %v1653_v44 = vadd.f32 %v1652_v57, %v1604_v27  ;;  %1798 = vmatmul.bf16.gmra.mxu0 %v13735_v4  ;;  %v2060_v2 = vmax.f32 %v1748_v22, 0.0  ;;  %1896 = vmatmul.bf16.gmra.mxu2 %v13735_v4  ;;  %v12886_v4 = vld [vmem:[%s19107_s3 + $0x99c] sm:$0xf0] }
 0x21f   : > { %v11346_v58 = vor.u32 %v12886_v4, %v11345_v24  ;;  %v14655_v24 = vperm.slane %v14358_v11, 6 }
 0x220   : > { %1847 = vmatmul.bf16.gmra.mxu1 %v13737_v5  ;;  %1945 = vmatmul.bf16.gmra.mxu3 %v13737_v5  ;;  %v14626_v60 = vpack.c.bf16 %v2060_v2, %v2052_v7  ;;  %v12113_v5 = vld [vmem:[%s19107_s3 + $0xf80] sm:$0xf]  ;;  %v2067_v21 = vmax.f32 %v1653_v44, 0.0 }
 0x221   : > { %v1701_v33 = vpop.f32.mrf.mxu2  ;;  %v12114_v30 = vor.u32 %v13078_v15, %v12113_v5  ;;  %5430 = vmatpush.bf16.msrb.mxu0 %v11346_v58  ;;  %v11601_v2 = vld [vmem:[%s19107_s3 + $0xb80] sm:$0xf] }
 0x222   : > { %19245 = vst [vmem:[#allocation35_spill] sm:$0xff] %v14626_v60  ;;  %v1702_v39 = vadd.f32 %v1701_v33, %v14371_v13 }
 0x223   : > { %v1750_v48 = vpop.f32.mrf.mxu3  ;;  %v1605_v50 = vpop.f32.mrf.mxu0  ;;  %5577 = vmatpush.bf16.msrb.mxu3 %v12114_v30 }
 0x224   : > { %v1606_v27 = vadd.f32 %v1605_v50, %v14361_v56  ;;  %v1751_v22 = vadd.f32 %v1750_v48, %v1702_v39  ;;  %v11602_v56 = vor.u32 %v12950_v53, %v11601_v2  ;;  %v11313_v2 = vld [vmem:[%s19107_s3 + $0x940] sm:$0xf] }
 0x225   : > { %v1654_v57 = vpop.f32.mrf.mxu1 }
 0x226   : > { %v1655_v7 = vadd.f32 %v1654_v57, %v1606_v27  ;;  %5479 = vmatpush.bf16.msrb.mxu1 %v11602_v56  ;;  %v2068_v44 = vmax.f32 %v1751_v22, 0.0  ;;  %v14665_v57 = vperm.slane %v14358_v11, 7  ;;  %v13006_v22 = vld [vmem:[%s19107_s3 + $0xd5c] sm:$0xf0] }
 0x227   : > { %v12878_v11 = vld [vmem:[%s19107_s3 + $0x95c] sm:$0xf0] }
 0x228   : > { %v2075_v33 = vmax.f32 %v1655_v7, 0.0  ;;  %v11825_v7 = vld [vmem:[%s19107_s3 + $0xd40] sm:$0xf] }
 0x229   : > { %v1703_v43 = vpop.f32.mrf.mxu2  ;;  %v13070_v56 = vld [vmem:[%s19107_s3 + $0xf5c] sm:$0xf0] }
 0x22a   : > { %v14657_v4 = vpack.c.bf16 %v2075_v33, %v2067_v21  ;;  %v1704_v5 = vadd.f32 %v1703_v43, %v14371_v13  ;;  %v11826_v21 = vor.u32 %v13006_v22, %v11825_v7  ;;  %v12081_v33 = vld [vmem:[%s19107_s3 + $0xf40] sm:$0xf] }
 0x22b   : > { %v1752_v15 = vpop.f32.mrf.mxu3  ;;  %v1764_v39 = vpop.f32.mrf.mxu0  ;;  %v11569_v7 = vld [vmem:[%s19107_s3 + $0xb40] sm:$0xf] }
 0x22c   : > { %19246 = vst [vmem:[#allocation36_spill] sm:$0xff] %v14657_v4  ;;  %v1765_v48 = vadd.f32 %v1764_v39, %v14655_v24  ;;  %v1753_v58 = vadd.f32 %v1752_v15, %v1704_v5  ;;  %v11314_v39 = vor.u32 %v12878_v11, %v11313_v2  ;;  %5529 = vmatpush.bf16.msrb.mxu2 %v11826_v21  ;;  %v12942_v22 = vld [vmem:[%s19107_s3 + $0xb5c] sm:$0xf0] }
 0x22d   : > { %v1813_v50 = vpop.f32.mrf.mxu1  ;;  %v11570_v2 = vor.u32 %v12942_v22, %v11569_v7 }
 0x22e   : > { %v1814_v30 = vadd.f32 %v1813_v50, %v1765_v48  ;;  %5241 = vmatmul.bf16.vlgmr.msra.gmra.mxu0 %v13809_v61  ;;  %v2076_v27 = vmax.f32 %v1753_v58, 0.0  ;;  %5339 = vmatmul.bf16.vlgmr.msra.gmra.mxu2 %v14103_v20  ;;  %v12082_v48 = vor.u32 %v13070_v56, %v12081_v33 }
 0x22f   : > { %5431 = vmatpush.bf16.msrb.mxu0 %v11314_v39  ;;  %5480 = vmatpush.bf16.msrb.mxu1 %v11570_v2  ;;  %v12049_v2 = vld [vmem:[%s19107_s3 + $0xf00] sm:$0xf] }
 0x230   : > { %5290 = vmatmul.bf16.vlgmr.msra.gmra.mxu1 %v13817_v12  ;;  %5388 = vmatmul.bf16.vlgmr.msra.gmra.mxu3 %v14111_v37  ;;  %v14668_v13 = vpack.c.bf16 %v2076_v27, %v2068_v44 }
 0x231   : > { %v1862_v53 = vpop.f32.mrf.mxu2  ;;  %5578 = vmatpush.bf16.msrb.mxu3 %v12082_v48 }
 0x232   : > { %19247 = vst [vmem:[#allocation37_spill] sm:$0xff] %v14668_v13  ;;  %v1863_v43 = vadd.f32 %v1862_v53, %v14665_v57  ;;  %v1957_v53 = vmax.f32 %v1814_v30, 0.0  ;;  %v11793_v30 = vld [vmem:[%s19107_s3 + $0xd00] sm:$0xf] }
 0x233   : > { %v1911_v5 = vpop.f32.mrf.mxu3  ;;  %v1766_v15 = vpop.f32.mrf.mxu0 }
 0x234   : > { %v1767_v50 = vadd.f32 %v1766_v15, %v14655_v24  ;;  %v1912_v44 = vadd.f32 %v1911_v5, %v1863_v43 }
 0x235   : > { %v1815_v58 = vpop.f32.mrf.mxu1 }
 0x236   : > { %v1816_v27 = vadd.f32 %v1815_v58, %v1767_v50  ;;  %v1958_v50 = vmax.f32 %v1912_v44, 0.0  ;;  %v11281_v44 = vld [vmem:[%s19107_s3 + $0x900] sm:$0xf] }
 0x238   : > { %v1965_v37 = vmax.f32 %v1816_v27, 0.0  ;;  %v12998_v27 = vld [vmem:[%s19107_s3 + $0xd1c] sm:$0xf0] }
 0x239   : > { %v1864_v33 = vpop.f32.mrf.mxu2  ;;  %v11794_v22 = vor.u32 %v12998_v27, %v11793_v30  ;;  %v11537_v27 = vld [vmem:[%s19107_s3 + $0xb00] sm:$0xf] }
 0x23a   : > { %v14696_v11 = vpack.c.bf16 %v1965_v37, %v1957_v53  ;;  %v1865_v21 = vadd.f32 %v1864_v33, %v14665_v57  ;;  %v12870_v53 = vld [vmem:[%s19107_s3 + $0x91c] sm:$0xf0] }
 0x23b   : > { %v1913_v56 = vpop.f32.mrf.mxu3  ;;  %v1769_v43 = vpop.f32.mrf.mxu0  ;;  %v13062_v33 = vld [vmem:[%s19107_s3 + $0xf1c] sm:$0xf0]  ;;  %5530 = vmatpush.bf16.msrb.mxu2 %v11794_v22 }
 0x23c   : > { %19248 = vst [vmem:[#allocation38_spill] sm:$0xff] %v14696_v11  ;;  %v1770_v5 = vadd.f32 %v1769_v43, %v14655_v24  ;;  %v1914_v39 = vadd.f32 %v1913_v56, %v1865_v21 }
 0x23d   : > { %v1818_v15 = vpop.f32.mrf.mxu1 }
 0x23e   : > { %v1819_v48 = vadd.f32 %v1818_v15, %v1770_v5  ;;  %5246 = vmatmul.bf16.gmra.mxu0 %v13845_v45  ;;  %v1966_v58 = vmax.f32 %v1914_v39, 0.0  ;;  %5344 = vmatmul.bf16.gmra.mxu2 %v14139_v28  ;;  %v11282_v5 = vor.u32 %v12870_v53, %v11281_v44  ;;  %v12050_v15 = vor.u32 %v13062_v33, %v12049_v2 }
 0x240   : > { %5295 = vmatmul.bf16.gmra.mxu1 %v13853_v62  ;;  %5393 = vmatmul.bf16.gmra.mxu3 %v14147_v42  ;;  %v14704_v37 = vpack.c.bf16 %v1966_v58, %v1958_v50  ;;  %v1973_v42 = vmax.f32 %v1819_v48, 0.0  ;;  %v12990_v48 = vld [vmem:[%s19107_s3 + $0xcdc] sm:$0xf0] }
 0x241   : > { %v1867_v7 = vpop.f32.mrf.mxu2  ;;  %5432 = vmatpush.bf16.msrb.mxu0 %v11282_v5  ;;  %5579 = vmatpush.bf16.msrb.mxu3 %v12050_v15 }
 0x242   : > { %19249 = vst [vmem:[#allocation39_spill] sm:$0xff] %v14704_v37  ;;  %v1868_v21 = vadd.f32 %v1867_v7, %v14665_v57  ;;  %v12934_v7 = vld [vmem:[%s19107_s3 + $0xb1c] sm:$0xf0] }
 0x243   : > { %v1916_v56 = vpop.f32.mrf.mxu3  ;;  %v1771_v43 = vpop.f32.mrf.mxu0  ;;  %v11538_v44 = vor.u32 %v12934_v7, %v11537_v27  ;;  %v12862_v7 = vld [vmem:[%s19107_s3 + $0x8dc] sm:$0xf0] }
 0x244   : > { %v1772_v39 = vadd.f32 %v1771_v43, %v14655_v24  ;;  %v1917_v58 = vadd.f32 %v1916_v56, %v1868_v21 }
 0x245   : > { %v1820_v50 = vpop.f32.mrf.mxu1  ;;  %5481 = vmatpush.bf16.msrb.mxu1 %v11538_v44  ;;  %v12017_v44 = vld [vmem:[%s19107_s3 + $0xec0] sm:$0xf] }
 0x246   : > { %v1821_v30 = vadd.f32 %v1820_v50, %v1772_v39  ;;  %v1974_v39 = vmax.f32 %v1917_v58, 0.0  ;;  %v11249_v58 = vld [vmem:[%s19107_s3 + $0x8c0] sm:$0xf] }
 0x248   : > { %v1981_v28 = vmax.f32 %v1821_v30, 0.0 }
 0x249   : > { %v1869_v2 = vpop.f32.mrf.mxu2 }
 0x24a   : > { %v14732_v53 = vpack.c.bf16 %v1981_v28, %v1973_v42  ;;  %v1870_v22 = vadd.f32 %v1869_v2, %v14665_v57  ;;  %v11761_v42 = vld [vmem:[%s19107_s3 + $0xcc0] sm:$0xf] }
 0x24b   : > { %v1918_v33 = vpop.f32.mrf.mxu3  ;;  %v1774_v21 = vpop.f32.mrf.mxu0  ;;  %v11762_v27 = vor.u32 %v12990_v48, %v11761_v42  ;;  %v13054_v2 = vld [vmem:[%s19107_s3 + $0xedc] sm:$0xf0] }
 0x24c   : > { %19250 = vst [vmem:[#allocation40_spill] sm:$0xff] %v14732_v53  ;;  %v1775_v56 = vadd.f32 %v1774_v21, %v14655_v24  ;;  %v1919_v5 = vadd.f32 %v1918_v33, %v1870_v22  ;;  %v11505_v48 = vld [vmem:[%s19107_s3 + $0xac0] sm:$0xf] }
 0x24d   : > { %v1823_v43 = vpop.f32.mrf.mxu1  ;;  %5531 = vmatpush.bf16.msrb.mxu2 %v11762_v27 }
 0x24e   : > { %v1824_v15 = vadd.f32 %v1823_v43, %v1775_v56  ;;  %5251 = vmatmul.bf16.gmra.mxu0 %v13881_v35  ;;  %v1982_v50 = vmax.f32 %v1919_v5, 0.0  ;;  %5349 = vmatmul.bf16.gmra.mxu2 %v14175_v54  ;;  %v11250_v56 = vor.u32 %v12862_v7, %v11249_v58  ;;  %v12018_v43 = vor.u32 %v13054_v2, %v12017_v44 }
 0x250   : > { %5300 = vmatmul.bf16.gmra.mxu1 %v13889_v51  ;;  %5398 = vmatmul.bf16.gmra.mxu3 %v14183_v55  ;;  %v14740_v28 = vpack.c.bf16 %v1982_v50, %v1974_v39  ;;  %v1989_v55 = vmax.f32 %v1824_v15, 0.0  ;;  %v12982_v15 = vld [vmem:[%s19107_s3 + $0xc9c] sm:$0xf0] }
 0x251   : > { %v1872_v30 = vpop.f32.mrf.mxu2  ;;  %5433 = vmatpush.bf16.msrb.mxu0 %v11250_v56  ;;  %5580 = vmatpush.bf16.msrb.mxu3 %v12018_v43 }
 0x252   : > { %19251 = vst [vmem:[#allocation41_spill] sm:$0xff] %v14740_v28  ;;  %v1873_v22 = vadd.f32 %v1872_v30, %v14665_v57  ;;  %v12926_v30 = vld [vmem:[%s19107_s3 + $0xadc] sm:$0xf0] }
 0x253   : > { %v1921_v33 = vpop.f32.mrf.mxu3  ;;  %v1776_v21 = vpop.f32.mrf.mxu0  ;;  %v11506_v58 = vor.u32 %v12926_v30, %v11505_v48  ;;  %v12854_v30 = vld [vmem:[%s19107_s3 + $0x89c] sm:$0xf0] }
 0x254   : > { %v1777_v5 = vadd.f32 %v1776_v21, %v14655_v24  ;;  %v1922_v50 = vadd.f32 %v1921_v33, %v1873_v22 }
 0x255   : > { %v1825_v39 = vpop.f32.mrf.mxu1  ;;  %5482 = vmatpush.bf16.msrb.mxu1 %v11506_v58  ;;  %v11985_v58 = vld [vmem:[%s19107_s3 + $0xe80] sm:$0xf] }
 0x256   : > { %v1826_v42 = vadd.f32 %v1825_v39, %v1777_v5  ;;  %v1990_v5 = vmax.f32 %v1922_v50, 0.0  ;;  %v11217_v50 = vld [vmem:[%s19107_s3 + $0x880] sm:$0xf] }
 0x258   : > { %v1997_v54 = vmax.f32 %v1826_v42, 0.0 }
 0x259   : > { %v1874_v44 = vpop.f32.mrf.mxu2 }
 0x25a   : > { %v14768_v7 = vpack.c.bf16 %v1997_v54, %v1989_v55  ;;  %v1875_v27 = vadd.f32 %v1874_v44, %v14665_v57  ;;  %v11729_v55 = vld [vmem:[%s19107_s3 + $0xc80] sm:$0xf] }
 0x25b   : > { %v1923_v2 = vpop.f32.mrf.mxu3  ;;  %v1779_v22 = vpop.f32.mrf.mxu0  ;;  %v11730_v48 = vor.u32 %v12982_v15, %v11729_v55  ;;  %v13046_v44 = vld [vmem:[%s19107_s3 + $0xe9c] sm:$0xf0] }
 0x25c   : > { %19252 = vst [vmem:[#allocation42_spill] sm:$0xff] %v14768_v7  ;;  %v1780_v33 = vadd.f32 %v1779_v22, %v14655_v24  ;;  %v1924_v56 = vadd.f32 %v1923_v2, %v1875_v27  ;;  %v11473_v15 = vld [vmem:[%s19107_s3 + $0xa80] sm:$0xf] }
 0x25d   : > { %v1828_v21 = vpop.f32.mrf.mxu1  ;;  %5532 = vmatpush.bf16.msrb.mxu2 %v11730_v48 }
 0x25e   : > { %v1829_v43 = vadd.f32 %v1828_v21, %v1780_v33  ;;  %5256 = vmatmul.bf16.gmra.mxu0 %v13917_v23  ;;  %v1998_v39 = vmax.f32 %v1924_v56, 0.0  ;;  %5354 = vmatmul.bf16.gmra.mxu2 %v14211_v3  ;;  %v11218_v33 = vor.u32 %v12854_v30, %v11217_v50  ;;  %v11986_v21 = vor.u32 %v13046_v44, %v11985_v58 }
 0x260   : > { %5305 = vmatmul.bf16.gmra.mxu1 %v13925_v40  ;;  %5403 = vmatmul.bf16.gmra.mxu3 %v14219_v1  ;;  %v14776_v54 = vpack.c.bf16 %v1998_v39, %v1990_v5  ;;  %v2005_v1 = vmax.f32 %v1829_v43, 0.0  ;;  %v12974_v43 = vld [vmem:[%s19107_s3 + $0xc5c] sm:$0xf0] }
 0x261   : > { %v1877_v42 = vpop.f32.mrf.mxu2  ;;  %5434 = vmatpush.bf16.msrb.mxu0 %v11218_v33  ;;  %5581 = vmatpush.bf16.msrb.mxu3 %v11986_v21 }
 0x262   : > { %19253 = vst [vmem:[#allocation43_spill] sm:$0xff] %v14776_v54  ;;  %v1878_v27 = vadd.f32 %v1877_v42, %v14665_v57  ;;  %v12918_v42 = vld [vmem:[%s19107_s3 + $0xa9c] sm:$0xf0] }
 0x263   : > { %v1926_v2 = vpop.f32.mrf.mxu3  ;;  %v1781_v22 = vpop.f32.mrf.mxu0  ;;  %v11474_v50 = vor.u32 %v12918_v42, %v11473_v15  ;;  %v12846_v42 = vld [vmem:[%s19107_s3 + $0x85c] sm:$0xf0] }
 0x264   : > { %v1782_v56 = vadd.f32 %v1781_v22, %v14655_v24  ;;  %v1927_v39 = vadd.f32 %v1926_v2, %v1878_v27 }
 0x265   : > { %v1830_v5 = vpop.f32.mrf.mxu1  ;;  %5483 = vmatpush.bf16.msrb.mxu1 %v11474_v50  ;;  %v11953_v50 = vld [vmem:[%s19107_s3 + $0xe40] sm:$0xf] }
 0x266   : > { %v1831_v55 = vadd.f32 %v1830_v5, %v1782_v56  ;;  %v2006_v56 = vmax.f32 %v1927_v39, 0.0  ;;  %v11185_v39 = vld [vmem:[%s19107_s3 + $0x840] sm:$0xf] }
 0x268   : > { %v2013_v3 = vmax.f32 %v1831_v55, 0.0 }
 0x269   : > { %v1879_v58 = vpop.f32.mrf.mxu2 }
 0x26a   : > { %v14804_v30 = vpack.c.bf16 %v2013_v3, %v2005_v1  ;;  %v1880_v48 = vadd.f32 %v1879_v58, %v14665_v57  ;;  %v11697_v1 = vld [vmem:[%s19107_s3 + $0xc40] sm:$0xf] }
 0x26b   : > { %v1928_v44 = vpop.f32.mrf.mxu3  ;;  %v1784_v27 = vpop.f32.mrf.mxu0  ;;  %v11698_v15 = vor.u32 %v12974_v43, %v11697_v1  ;;  %v13038_v58 = vld [vmem:[%s19107_s3 + $0xe5c] sm:$0xf0] }
 0x26c   : > { %19254 = vst [vmem:[#allocation44_spill] sm:$0xff] %v14804_v30  ;;  %v1785_v2 = vadd.f32 %v1784_v27, %v14655_v24  ;;  %v1929_v33 = vadd.f32 %v1928_v44, %v1880_v48  ;;  %v11441_v43 = vld [vmem:[%s19107_s3 + $0xa40] sm:$0xf] }
 0x26d   : > { %v1833_v22 = vpop.f32.mrf.mxu1  ;;  %5533 = vmatpush.bf16.msrb.mxu2 %v11698_v15 }
 0x26e   : > { %v1834_v21 = vadd.f32 %v1833_v22, %v1785_v2  ;;  %5261 = vmatmul.bf16.gmra.mxu0 %v13953_v16  ;;  %v2014_v5 = vmax.f32 %v1929_v33, 0.0  ;;  %5359 = vmatmul.bf16.gmra.mxu2 %v14247_v46  ;;  %v11186_v2 = vor.u32 %v12846_v42, %v11185_v39  ;;  %v11954_v22 = vor.u32 %v13038_v58, %v11953_v50 }
 0x270   : > { %5310 = vmatmul.bf16.gmra.mxu1 %v13961_v36  ;;  %5408 = vmatmul.bf16.gmra.mxu3 %v14255_v34  ;;  %v14812_v3 = vpack.c.bf16 %v2014_v5, %v2006_v56  ;;  %v2021_v34 = vmax.f32 %v1834_v21, 0.0  ;;  %v12966_v21 = vld [vmem:[%s19107_s3 + $0xc1c] sm:$0xf0] }
 0x271   : > { %v1882_v55 = vpop.f32.mrf.mxu2  ;;  %5435 = vmatpush.bf16.msrb.mxu0 %v11186_v2  ;;  %5582 = vmatpush.bf16.msrb.mxu3 %v11954_v22 }
 0x272   : > { %19255 = vst [vmem:[#allocation45_spill] sm:$0xff] %v14812_v3  ;;  %v1883_v48 = vadd.f32 %v1882_v55, %v14665_v57  ;;  %v12910_v55 = vld [vmem:[%s19107_s3 + $0xa5c] sm:$0xf0] }
 0x273   : > { %v1931_v44 = vpop.f32.mrf.mxu3  ;;  %v1786_v27 = vpop.f32.mrf.mxu0  ;;  %v11442_v39 = vor.u32 %v12910_v55, %v11441_v43  ;;  %v12838_v55 = vld [vmem:[%s19107_s3 + $0x81c] sm:$0xf0] }
 0x274   : > { %v1787_v33 = vadd.f32 %v1786_v27, %v14655_v24  ;;  %v1932_v5 = vadd.f32 %v1931_v44, %v1883_v48 }
 0x275   : > { %v1835_v56 = vpop.f32.mrf.mxu1  ;;  %5484 = vmatpush.bf16.msrb.mxu1 %v11442_v39  ;;  %v11921_v39 = vld [vmem:[%s19107_s3 + $0xe00] sm:$0xf] }
 0x276   : > { %v1836_v1 = vadd.f32 %v1835_v56, %v1787_v33  ;;  %v2022_v33 = vmax.f32 %v1932_v5, 0.0  ;;  %v11153_v5 = vld [vmem:[%s19107_s3 + $0x800] sm:$0xf] }
 0x278   : > { %v2029_v46 = vmax.f32 %v1836_v1, 0.0 }
 0x279   : > { %v1884_v50 = vpop.f32.mrf.mxu2 }
 0x27a   : > { %v14840_v42 = vpack.c.bf16 %v2029_v46, %v2021_v34  ;;  %v1885_v15 = vadd.f32 %v1884_v50, %v14665_v57  ;;  %v11665_v34 = vld [vmem:[%s19107_s3 + $0xc00] sm:$0xf] }
 0x27b   : > { %v1933_v58 = vpop.f32.mrf.mxu3  ;;  %v1789_v48 = vpop.f32.mrf.mxu0  ;;  %v11666_v43 = vor.u32 %v12966_v21, %v11665_v34  ;;  %v13030_v50 = vld [vmem:[%s19107_s3 + $0xe1c] sm:$0xf0] }
 0x27c   : > { %19256 = vst [vmem:[#allocation46_spill] sm:$0xff] %v14840_v42  ;;  %v1790_v44 = vadd.f32 %v1789_v48, %v14655_v24  ;;  %v1934_v2 = vadd.f32 %v1933_v58, %v1885_v15  ;;  %v11409_v21 = vld [vmem:[%s19107_s3 + $0xa00] sm:$0xf] }
 0x27d   : > { %v1838_v27 = vpop.f32.mrf.mxu1  ;;  %5534 = vmatpush.bf16.msrb.mxu2 %v11666_v43 }
 0x27e   : > { %v1839_v22 = vadd.f32 %v1838_v27, %v1790_v44  ;;  %5266 = vmatmul.bf16.gmra.mxu0 %v13989_v10  ;;  %v2030_v56 = vmax.f32 %v1934_v2, 0.0  ;;  %5364 = vmatmul.bf16.gmra.mxu2 %v14283_v18  ;;  %v11154_v44 = vor.u32 %v12838_v55, %v11153_v5  ;;  %v11922_v27 = vor.u32 %v13030_v50, %v11921_v39 }
 0x280   : > { %5315 = vmatmul.bf16.gmra.mxu1 %v13997_v29  ;;  %5413 = vmatmul.bf16.gmra.mxu3 %v14291_v63  ;;  %v14848_v46 = vpack.c.bf16 %v2030_v56, %v2022_v33  ;;  %v2037_v63 = vmax.f32 %v1839_v22, 0.0  ;;  %v12762_v22 = vld [vmem:[%s19107_s3 + $0x5c4] sm:$0xf] }
 0x281   : > { %v1887_v1 = vpop.f32.mrf.mxu2  ;;  %5436 = vmatpush.bf16.msrb.mxu0 %v11154_v44  ;;  %5583 = vmatpush.bf16.msrb.mxu3 %v11922_v27 }
 0x282   : > { %19257 = vst [vmem:[#allocation47_spill] sm:$0xff] %v14848_v46  ;;  %v1888_v15 = vadd.f32 %v1887_v1, %v14665_v57  ;;  %v12902_v1 = vld [vmem:[%s19107_s3 + $0xa1c] sm:$0xf0] }
 0x283   : > { %v1936_v58 = vpop.f32.mrf.mxu3  ;;  %v1791_v48 = vpop.f32.mrf.mxu0  ;;  %v11410_v5 = vor.u32 %v12902_v1, %v11409_v21 }
 0x284   : > { %v1792_v2 = vadd.f32 %v1791_v48, %v14655_v24  ;;  %v1937_v56 = vadd.f32 %v1936_v58, %v1888_v15 }
 0x285   : > { %v1840_v33 = vpop.f32.mrf.mxu1  ;;  %5485 = vmatpush.bf16.msrb.mxu1 %v11410_v5  ;;  %v10355_v5 = vld [vmem:[%s19107_s3 + $0x1e0] sm:$0xf0] }
 0x286   : > { %v1841_v34 = vadd.f32 %v1840_v33, %v1792_v2  ;;  %v2038_v2 = vmax.f32 %v1937_v56, 0.0  ;;  %v12634_v56 = vld [vmem:[%s19107_s3 + $0x1c4] sm:$0xf] }
 0x288   : > { %v2045_v18 = vmax.f32 %v1841_v34, 0.0  ;;  %v10867_v34 = vld [vmem:[%s19107_s3 + $0x5e0] sm:$0xf0] }
 0x289   : > { %v1889_v39 = vpop.f32.mrf.mxu2  ;;  %v10870_v1 = vor.u32 %v12762_v22, %v10867_v34  ;;  %v12698_v34 = vld [vmem:[%s19107_s3 + $0x3c4] sm:$0xf] }
 0x28a   : > { %v14876_v55 = vpack.c.bf16 %v2045_v18, %v2037_v63  ;;  %v1890_v43 = vadd.f32 %v1889_v39, %v14665_v57  ;;  %v19259_v18 = vld [vmem:[#allocation20_spill] sm:$0xff]  ;;  %v12826_v39 = vld [vmem:[%s19107_s3 + $0x7c4] sm:$0xf] }
 0x28b   : > { %v1938_v50 = vpop.f32.mrf.mxu3  ;;  %v1794_v15 = vpop.f32.mrf.mxu0  ;;  %5723 = vmatpush.bf16.msra.mxu2 %v10870_v1 }
 0x28c   : > { %19258 = vst [vmem:[#allocation48_spill] sm:$0xff] %v14876_v55  ;;  %v1795_v58 = vadd.f32 %v1794_v15, %v14655_v24  ;;  %v1939_v44 = vadd.f32 %v1938_v50, %v1890_v43  ;;  %v11123_v43 = vld [vmem:[%s19107_s3 + $0x7e0] sm:$0xf0] }
 0x28d   : > { %v1843_v48 = vpop.f32.mrf.mxu1 }
 0x28e   : > { %v1844_v27 = vadd.f32 %v1843_v48, %v1795_v58  ;;  %5271 = vmatmul.bf16.gmra.mxu0 %v14025_v9  ;;  %v2046_v33 = vmax.f32 %v1939_v44, 0.0  ;;  %5369 = vmatmul.bf16.gmra.mxu2 %v14319_v8  ;;  %v10358_v48 = vor.u32 %v12634_v56, %v10355_v5  ;;  %v11126_v44 = vor.u32 %v12826_v39, %v11123_v43  ;;  %v19262_v9 = vld [vmem:[#allocation6_spill] sm:$0xff] }
 0x290   : > { %5320 = vmatmul.bf16.gmra.mxu1 %v14033_v25  ;;  %5418 = vmatmul.bf16.gmra.mxu3 %v19259_v18  ;;  %v14884_v63 = vpack.c.bf16 %v2046_v33, %v2038_v2  ;;  %v10611_v18 = vld [vmem:[%s19107_s3 + $0x3e0] sm:$0xf0]  ;;  %v2053_v25 = vmax.f32 %v1844_v27, 0.0 }
 0x291   : > { %v1892_v21 = vpop.f32.mrf.mxu2  ;;  %5625 = vmatpush.bf16.msra.mxu0 %v10358_v48  ;;  %5772 = vmatpush.bf16.msra.mxu3 %v11126_v44  ;;  %v10614_v8 = vor.u32 %v12698_v34, %v10611_v18  ;;  %v19263_v18 = vld [vmem:[#allocation7_spill] sm:$0xff]  ;;  %v10835_v27 = vld [vmem:[%s19107_s3 + $0x5a0] sm:$0xf0] }
 0x292   : > { %19260 = vst [vmem:[#allocation49_spill] sm:$0xff] %v14884_v63  ;;  %v1893_v50 = vadd.f32 %v1892_v21, %v14665_v57 }
 0x293   : > { %v1941_v15 = vpop.f32.mrf.mxu3  ;;  %v1796_v58 = vpop.f32.mrf.mxu0  ;;  %5674 = vmatpush.bf16.msra.mxu1 %v10614_v8  ;;  %v12754_v8 = vld [vmem:[%s19107_s3 + $0x584] sm:$0xf] }
 0x294   : > { %v1797_v2 = vadd.f32 %v1796_v58, %v14655_v24  ;;  %v1942_v22 = vadd.f32 %v1941_v15, %v1893_v50  ;;  %v10838_v34 = vor.u32 %v12754_v8, %v10835_v27  ;;  %v2655_v27 = vld [vmem:[%s19108_s4] sm:$0xff] }
 0x295   : > { %v1845_v33 = vpop.f32.mrf.mxu1 }
 0x296   : > { %v1846_v21 = vadd.f32 %v1845_v33, %v1797_v2  ;;  %v2054_v29 = vmax.f32 %v1942_v22, 0.0  ;;  %v12626_v22 = vld [vmem:[%s19107_s3 + $0x184] sm:$0xf]  ;;  %5724 = vmatpush.bf16.msra.mxu2 %v10838_v34 }
 0x298   : > { %v2061_v56 = vmax.f32 %v1846_v21, 0.0  ;;  %v10323_v21 = vld [vmem:[%s19107_s3 + $0x1a0] sm:$0xf0] }
 0x299   : > { %v1894_v39 = vpop.f32.mrf.mxu2 }
 0x29a   : > { %v14912_v5 = vpack.c.bf16 %v2061_v56, %v2053_v25  ;;  %v1895_v1 = vadd.f32 %v1894_v39, %v14665_v57  ;;  %v19264_v25 = vld [vmem:[#allocation22_spill] sm:$0xff] }
 0x29b   : > { %v1943_v43 = vpop.f32.mrf.mxu3  ;;  %v1799_v50 = vpop.f32.mrf.mxu0  ;;  %v12818_v56 = vld [vmem:[%s19107_s3 + $0x784] sm:$0xf] }
 0x29c   : > { %19261 = vst [vmem:[#allocation50_spill] sm:$0xff] %v14912_v5  ;;  %v1800_v15 = vadd.f32 %v1799_v50, %v14655_v24  ;;  %v1944_v48 = vadd.f32 %v1943_v43, %v1895_v1  ;;  %v10326_v1 = vor.u32 %v12626_v22, %v10323_v21  ;;  %v12690_v22 = vld [vmem:[%s19107_s3 + $0x384] sm:$0xf] }
 0x29d   : > { %v1848_v58 = vpop.f32.mrf.mxu1  ;;  %v10579_v21 = vld [vmem:[%s19107_s3 + $0x3a0] sm:$0xf0] }
 0x29e   : > { %v1849_v44 = vadd.f32 %v1848_v58, %v1800_v15  ;;  %5276 = vmatmul.bf16.gmra.mxu0 %v19262_v9  ;;  %v2062_v2 = vmax.f32 %v1944_v48, 0.0  ;;  %5374 = vmatmul.bf16.gmra.mxu2 %v14363_v0 }
 0x29f   : > { %5626 = vmatpush.bf16.msra.mxu0 %v10326_v1 }
 0x2a0   : > { %5325 = vmatmul.bf16.gmra.mxu1 %v19263_v18  ;;  %5423 = vmatmul.bf16.gmra.mxu3 %v19264_v25  ;;  %v14926_v33 = vpack.c.bf16 %v2062_v2, %v2054_v29  ;;  %v11091_v29 = vld [vmem:[%s19107_s3 + $0x7a0] sm:$0xf0] }
 0x2a1   : > { %v1897_v39 = vpop.f32.mrf.mxu2  ;;  %v11094_v58 = vor.u32 %v12818_v56, %v11091_v29  ;;  %v10582_v56 = vor.u32 %v12690_v22, %v10579_v21  ;;  %v14951_v29 = vperm.slane %v2655_v27, 0  ;;  %v12810_v27 = vld [vmem:[%s19107_s3 + $0x744] sm:$0xf] }
 0x2a2   : > { %19265 = vst [vmem:[#allocation51_spill] sm:$0xff] %v14926_v33  ;;  %v1898_v43 = vadd.f32 %v1897_v39, %v14665_v57  ;;  %v2069_v39 = vmax.f32 %v1849_v44, 0.0  ;;  %v11059_v22 = vld [vmem:[%s19107_s3 + $0x760] sm:$0xf0] }
 0x2a3   : > { %v1946_v50 = vpop.f32.mrf.mxu3  ;;  %v1801_v15 = vpop.f32.mrf.mxu0  ;;  %5773 = vmatpush.bf16.msra.mxu3 %v11094_v58  ;;  %5675 = vmatpush.bf16.msra.mxu1 %v10582_v56  ;;  %v11062_v56 = vor.u32 %v12810_v27, %v11059_v22 }
 0x2a4   : > { %v1802_v48 = vadd.f32 %v1801_v15, %v14655_v24  ;;  %v1947_v8 = vadd.f32 %v1946_v50, %v1898_v43 }
 0x2a5   : > { %v1850_v2 = vpop.f32.mrf.mxu1 }
 0x2a6   : > { %v1851_v34 = vadd.f32 %v1850_v2, %v1802_v48  ;;  %v2070_v48 = vmax.f32 %v1947_v8, 0.0  ;;  %v10803_v2 = vld [vmem:[%s19107_s3 + $0x560] sm:$0xf0] }
 0x2a7   : > { %v10291_v8 = vld [vmem:[%s19107_s3 + $0x160] sm:$0xf0]  ;;  %5774 = vmatpush.bf16.msra.mxu3 %v11062_v56 }
 0x2a8   : > { %v2077_v24 = vmax.f32 %v1851_v34, 0.0  ;;  %v12738_v56 = vld [vmem:[%s19107_s3 + $0x504] sm:$0xf] }
 0x2a9   : > { %v1899_v43 = vpop.f32.mrf.mxu2 }
 0x2aa   : > { %v14953_v1 = vpack.c.bf16 %v2077_v24, %v2069_v39  ;;  %v1900_v50 = vadd.f32 %v1899_v43, %v14665_v57  ;;  %v12746_v57 = vld [vmem:[%s19107_s3 + $0x544] sm:$0xf] }
 0x2ab   : > { %v1948_v15 = vpop.f32.mrf.mxu3  ;;  %v5242_v58 = vpop.f32.mrf.mxu0 }
 0x2ac   : > { %19266 = vst [vmem:[#allocation52_spill] sm:$0xff] %v14953_v1  ;;  %v5243_v25 = vadd.f32 %v5242_v58, %v14951_v29  ;;  %v1949_v18 = vadd.f32 %v1948_v15, %v1900_v50 }
 0x2ad   : > { %v5291_v0 = vpop.f32.mrf.mxu1 }
 0x2ae   : > { %v5292_v9 = vadd.f32 %v5291_v0, %v5243_v25  ;;  %5437 = vmatmul.bf16.vlgmr.msrb.gmra.mxu0 %v14402_v49  ;;  %v2078_v44 = vmax.f32 %v1949_v18, 0.0  ;;  %5535 = vmatmul.bf16.vlgmr.msrb.gmra.mxu2 %v14696_v11  ;;  %v12618_v0 = vld [vmem:[%s19107_s3 + $0x144] sm:$0xf]  ;;  %v10806_v18 = vor.u32 %v12746_v57, %v10803_v2 }
 0x2af   : > { %v10294_v34 = vor.u32 %v12618_v0, %v10291_v8 }
 0x2b0   : > { %5486 = vmatmul.bf16.vlgmr.msrb.gmra.mxu1 %v14410_v31  ;;  %5584 = vmatmul.bf16.vlgmr.msrb.gmra.mxu3 %v14704_v37  ;;  %v14970_v25 = vpack.c.bf16 %v2078_v44, %v2070_v48  ;;  %v12682_v48 = vld [vmem:[%s19107_s3 + $0x344] sm:$0xf] }
 0x2b1   : > { %v5340_v21 = vpop.f32.mrf.mxu2  ;;  %5725 = vmatpush.bf16.msra.mxu2 %v10806_v18  ;;  %5627 = vmatpush.bf16.msra.mxu0 %v10294_v34  ;;  %v10547_v44 = vld [vmem:[%s19107_s3 + $0x360] sm:$0xf0] }
 0x2b2   : > { %19267 = vst [vmem:[#allocation53_spill] sm:$0xff] %v14970_v25  ;;  %v5341_v39 = vadd.f32 %v5340_v21, %v5292_v9  ;;  %v10550_v9 = vor.u32 %v12682_v48, %v10547_v44  ;;  %v11027_v48 = vld [vmem:[%s19107_s3 + $0x720] sm:$0xf0] }
 0x2b3   : > { %v5389_v24 = vpop.f32.mrf.mxu3  ;;  %v5244_v43 = vpop.f32.mrf.mxu0 }
 0x2b4   : > { %v5245_v50 = vadd.f32 %v5244_v43, %v14951_v29  ;;  %v14982_v58 = vadd.f32 %v5389_v24, %v5341_v39  ;;  %5676 = vmatpush.bf16.msra.mxu1 %v10550_v9  ;;  %v10771_v39 = vld [vmem:[%s19107_s3 + $0x520] sm:$0xf0] }
 0x2b5   : > { %v5293_v15 = vpop.f32.mrf.mxu1  ;;  %v12610_v24 = vld [vmem:[%s19107_s3 + $0x104] sm:$0xf]  ;;  %v10774_v43 = vor.u32 %v12738_v56, %v10771_v39 }
 0x2b6   : > { %v5294_v57 = vadd.f32 %v5293_v15, %v5245_v50  ;;  %v10259_v50 = vld [vmem:[%s19107_s3 + $0x120] sm:$0xf0] }
 0x2b7   : > { %v12802_v15 = vld [vmem:[%s19107_s3 + $0x704] sm:$0xf]  ;;  %5726 = vmatpush.bf16.msra.mxu2 %v10774_v43 }
 0x2b8   : > { %v11030_v9 = vor.u32 %v12802_v15, %v11027_v48  ;;  %v12674_v56 = vld [vmem:[%s19107_s3 + $0x304] sm:$0xf] }
 0x2b9   : > { %v5342_v2 = vpop.f32.mrf.mxu2  ;;  %v10515_v39 = vld [vmem:[%s19107_s3 + $0x320] sm:$0xf0] }
 0x2ba   : > { %v5343_v0 = vadd.f32 %v5342_v2, %v5294_v57  ;;  %v10262_v57 = vor.u32 %v12610_v24, %v10259_v50  ;;  %5775 = vmatpush.bf16.msra.mxu3 %v11030_v9 }
 0x2bb   : > { %v5391_v18 = vpop.f32.mrf.mxu3  ;;  %v5247_v8 = vpop.f32.mrf.mxu0 }
 0x2bc   : > { %v5248_v27 = vadd.f32 %v5247_v8, %v14951_v29  ;;  %v14991_v21 = vadd.f32 %v5391_v18, %v5343_v0  ;;  %5628 = vmatpush.bf16.msra.mxu0 %v10262_v57 }
 0x2bd   : > { %v5296_v22 = vpop.f32.mrf.mxu1 }
 0x2be   : > { %v5297_v34 = vadd.f32 %v5296_v22, %v5248_v27  ;;  %5442 = vmatmul.bf16.gmra.mxu0 %v14438_v14  ;;  %5540 = vmatmul.bf16.gmra.mxu2 %v14732_v53 }
 0x2c0   : > { %5491 = vmatmul.bf16.gmra.mxu1 %v14446_v41  ;;  %5589 = vmatmul.bf16.gmra.mxu3 %v14740_v28 }
 0x2c1   : > { %v5345_v44 = vpop.f32.mrf.mxu2 }
 0x2c2   : > { %v5346_v2 = vadd.f32 %v5345_v44, %v5297_v34  ;;  %v10518_v34 = vor.u32 %v12674_v56, %v10515_v39  ;;  %v10227_v56 = vld [vmem:[%s19107_s3 + $0xe0] sm:$0xf0] }
 0x2c3   : > { %v5394_v0 = vpop.f32.mrf.mxu3  ;;  %v5249_v18 = vpop.f32.mrf.mxu0  ;;  %v12794_v39 = vld [vmem:[%s19107_s3 + $0x6c4] sm:$0xf] }
 0x2c4   : > { %v5250_v8 = vadd.f32 %v5249_v18, %v14951_v29  ;;  %v15016_v22 = vadd.f32 %v5394_v0, %v5346_v2  ;;  %5677 = vmatpush.bf16.msra.mxu1 %v10518_v34  ;;  %v12730_v0 = vld [vmem:[%s19107_s3 + $0x4c4] sm:$0xf] }
 0x2c5   : > { %v5298_v27 = vpop.f32.mrf.mxu1  ;;  %v10739_v18 = vld [vmem:[%s19107_s3 + $0x4e0] sm:$0xf0] }
 0x2c6   : > { %v5299_v24 = vadd.f32 %v5298_v27, %v5250_v8  ;;  %v12602_v8 = vld [vmem:[%s19107_s3 + $0xc4] sm:$0xf]  ;;  %v10742_v27 = vor.u32 %v12730_v0, %v10739_v18 }
 0x2c8   : > { %5727 = vmatpush.bf16.msra.mxu2 %v10742_v27 }
 0x2c9   : > { %v5347_v50 = vpop.f32.mrf.mxu2 }
 0x2ca   : > { %v5348_v43 = vadd.f32 %v5347_v50, %v5299_v24  ;;  %v10995_v24 = vld [vmem:[%s19107_s3 + $0x6e0] sm:$0xf0]  ;;  %v10230_v50 = vor.u32 %v12602_v8, %v10227_v56 }
 0x2cb   : > { %v5396_v15 = vpop.f32.mrf.mxu3  ;;  %v5252_v48 = vpop.f32.mrf.mxu0  ;;  %v10483_v8 = vld [vmem:[%s19107_s3 + $0x2e0] sm:$0xf0] }
 0x2cc   : > { %v5253_v44 = vadd.f32 %v5252_v48, %v14951_v29  ;;  %v15025_v9 = vadd.f32 %v5396_v15, %v5348_v43  ;;  %v10998_v43 = vor.u32 %v12794_v39, %v10995_v24  ;;  %5629 = vmatpush.bf16.msra.mxu0 %v10230_v50 }
 0x2cd   : > { %v5301_v57 = vpop.f32.mrf.mxu1 }
 0x2ce   : > { %v5302_v2 = vadd.f32 %v5301_v57, %v5253_v44  ;;  %5447 = vmatmul.bf16.gmra.mxu0 %v14474_v32  ;;  %5545 = vmatmul.bf16.gmra.mxu2 %v14768_v7 }
 0x2cf   : > { %5776 = vmatpush.bf16.msra.mxu3 %v10998_v43 }
 0x2d0   : > { %5496 = vmatmul.bf16.gmra.mxu1 %v14482_v59  ;;  %5594 = vmatmul.bf16.gmra.mxu3 %v14776_v54  ;;  %v12666_v54 = vld [vmem:[%s19107_s3 + $0x2c4] sm:$0xf] }
 0x2d1   : > { %v5350_v34 = vpop.f32.mrf.mxu2 }
 0x2d2   : > { %v5351_v15 = vadd.f32 %v5350_v34, %v5302_v2  ;;  %v10486_v2 = vor.u32 %v12666_v54, %v10483_v8  ;;  %v12722_v54 = vld [vmem:[%s19107_s3 + $0x484] sm:$0xf] }
 0x2d3   : > { %v5399_v48 = vpop.f32.mrf.mxu3  ;;  %v5254_v44 = vpop.f32.mrf.mxu0  ;;  %v10195_v8 = vld [vmem:[%s19107_s3 + $0xa0] sm:$0xf0] }
 0x2d4   : > { %v5255_v57 = vadd.f32 %v5254_v44, %v14951_v29  ;;  %v15050_v18 = vadd.f32 %v5399_v48, %v5351_v15  ;;  %5678 = vmatpush.bf16.msra.mxu1 %v10486_v2  ;;  %v10707_v44 = vld [vmem:[%s19107_s3 + $0x4a0] sm:$0xf0] }
 0x2d5   : > { %v5303_v0 = vpop.f32.mrf.mxu1  ;;  %v10963_v2 = vld [vmem:[%s19107_s3 + $0x6a0] sm:$0xf0] }
 0x2d6   : > { %v5304_v56 = vadd.f32 %v5303_v0, %v5255_v57  ;;  %v12594_v57 = vld [vmem:[%s19107_s3 + $0x84] sm:$0xf]  ;;  %v10710_v0 = vor.u32 %v12722_v54, %v10707_v44 }
 0x2d8   : > { %5728 = vmatpush.bf16.msra.mxu2 %v10710_v0 }
 0x2d9   : > { %v5352_v39 = vpop.f32.mrf.mxu2 }
 0x2da   : > { %v5353_v27 = vadd.f32 %v5352_v39, %v5304_v56  ;;  %v12786_v56 = vld [vmem:[%s19107_s3 + $0x684] sm:$0xf] }
 0x2db   : > { %v5401_v24 = vpop.f32.mrf.mxu3  ;;  %v5257_v34 = vpop.f32.mrf.mxu0 }
 0x2dc   : > { %v5258_v50 = vadd.f32 %v5257_v34, %v14951_v29  ;;  %v15059_v15 = vadd.f32 %v5401_v24, %v5353_v27  ;;  %v10198_v27 = vor.u32 %v12594_v57, %v10195_v8  ;;  %v10966_v24 = vor.u32 %v12786_v56, %v10963_v2  ;;  %v10451_v57 = vld [vmem:[%s19107_s3 + $0x2a0] sm:$0xf0] }
 0x2dd   : > { %v5306_v43 = vpop.f32.mrf.mxu1 }
 0x2de   : > { %v5307_v48 = vadd.f32 %v5306_v43, %v5258_v50  ;;  %5452 = vmatmul.bf16.gmra.mxu0 %v14510_v52  ;;  %5550 = vmatmul.bf16.gmra.mxu2 %v14804_v30  ;;  %v12658_v30 = vld [vmem:[%s19107_s3 + $0x284] sm:$0xf] }
 0x2df   : > { %5630 = vmatpush.bf16.msra.mxu0 %v10198_v27  ;;  %5777 = vmatpush.bf16.msra.mxu3 %v10966_v24 }
 0x2e0   : > { %5501 = vmatmul.bf16.gmra.mxu1 %v14518_v19  ;;  %5599 = vmatmul.bf16.gmra.mxu3 %v14812_v3 }
 0x2e1   : > { %v5355_v39 = vpop.f32.mrf.mxu2 }
 0x2e2   : > { %v5356_v34 = vadd.f32 %v5355_v39, %v5307_v48  ;;  %v10454_v48 = vor.u32 %v12658_v30, %v10451_v57  ;;  %v12714_v30 = vld [vmem:[%s19107_s3 + $0x444] sm:$0xf] }
 0x2e3   : > { %v5404_v50 = vpop.f32.mrf.mxu3  ;;  %v5259_v43 = vpop.f32.mrf.mxu0  ;;  %v10163_v57 = vld [vmem:[%s19107_s3 + $0x60] sm:$0xf0] }
 0x2e4   : > { %v5260_v54 = vadd.f32 %v5259_v43, %v14951_v29  ;;  %v15084_v3 = vadd.f32 %v5404_v50, %v5356_v34  ;;  %5679 = vmatpush.bf16.msra.mxu1 %v10454_v48  ;;  %v10675_v43 = vld [vmem:[%s19107_s3 + $0x460] sm:$0xf0] }
 0x2e5   : > { %v5308_v44 = vpop.f32.mrf.mxu1  ;;  %v10931_v48 = vld [vmem:[%s19107_s3 + $0x660] sm:$0xf0] }
 0x2e6   : > { %v5309_v8 = vadd.f32 %v5308_v44, %v5260_v54  ;;  %v12586_v54 = vld [vmem:[%s19107_s3 + $0x44] sm:$0xf]  ;;  %v10678_v44 = vor.u32 %v12714_v30, %v10675_v43 }
 0x2e8   : > { %5729 = vmatpush.bf16.msra.mxu2 %v10678_v44 }
 0x2e9   : > { %v5357_v56 = vpop.f32.mrf.mxu2 }
 0x2ea   : > { %v5358_v0 = vadd.f32 %v5357_v56, %v5309_v8  ;;  %v12778_v8 = vld [vmem:[%s19107_s3 + $0x644] sm:$0xf] }
 0x2eb   : > { %v5406_v2 = vpop.f32.mrf.mxu3  ;;  %v5262_v39 = vpop.f32.mrf.mxu0 }
 0x2ec   : > { %v5263_v27 = vadd.f32 %v5262_v39, %v14951_v29  ;;  %v15093_v34 = vadd.f32 %v5406_v2, %v5358_v0  ;;  %v10166_v0 = vor.u32 %v12586_v54, %v10163_v57  ;;  %v10934_v2 = vor.u32 %v12778_v8, %v10931_v48  ;;  %v10419_v54 = vld [vmem:[%s19107_s3 + $0x260] sm:$0xf0] }
 0x2ed   : > { %v5311_v24 = vpop.f32.mrf.mxu1 }
 0x2ee   : > { %v5312_v50 = vadd.f32 %v5311_v24, %v5263_v27  ;;  %5457 = vmatmul.bf16.gmra.mxu0 %v14546_v6  ;;  %5555 = vmatmul.bf16.gmra.mxu2 %v14840_v42  ;;  %v12650_v42 = vld [vmem:[%s19107_s3 + $0x244] sm:$0xf] }
 0x2ef   : > { %5631 = vmatpush.bf16.msra.mxu0 %v10166_v0  ;;  %5778 = vmatpush.bf16.msra.mxu3 %v10934_v2 }
 0x2f0   : > { %5506 = vmatmul.bf16.gmra.mxu1 %v14554_v38  ;;  %5604 = vmatmul.bf16.gmra.mxu3 %v14848_v46 }
 0x2f1   : > { %v5360_v56 = vpop.f32.mrf.mxu2 }
 0x2f2   : > { %v5361_v39 = vadd.f32 %v5360_v56, %v5312_v50  ;;  %v10422_v50 = vor.u32 %v12650_v42, %v10419_v54  ;;  %v12706_v42 = vld [vmem:[%s19107_s3 + $0x404] sm:$0xf] }
 0x2f3   : > { %v5409_v27 = vpop.f32.mrf.mxu3  ;;  %v5264_v24 = vpop.f32.mrf.mxu0  ;;  %v10131_v54 = vld [vmem:[%s19107_s3 + $0x20] sm:$0xf0] }
 0x2f4   : > { %v5265_v30 = vadd.f32 %v5264_v24, %v14951_v29  ;;  %v15118_v46 = vadd.f32 %v5409_v27, %v5361_v39  ;;  %5680 = vmatpush.bf16.msra.mxu1 %v10422_v50  ;;  %v10643_v24 = vld [vmem:[%s19107_s3 + $0x420] sm:$0xf0] }
 0x2f5   : > { %v5313_v43 = vpop.f32.mrf.mxu1  ;;  %v10899_v50 = vld [vmem:[%s19107_s3 + $0x620] sm:$0xf0] }
 0x2f6   : > { %v5314_v57 = vadd.f32 %v5313_v43, %v5265_v30  ;;  %v12578_v30 = vld [vmem:[%s19107_s3 + $0x4] sm:$0xf]  ;;  %v10646_v43 = vor.u32 %v12706_v42, %v10643_v24 }
 0x2f8   : > { %5730 = vmatpush.bf16.msra.mxu2 %v10646_v43 }
 0x2f9   : > { %v5362_v8 = vpop.f32.mrf.mxu2 }
 0x2fa   : > { %v5363_v44 = vadd.f32 %v5362_v8, %v5314_v57  ;;  %v12770_v57 = vld [vmem:[%s19107_s3 + $0x604] sm:$0xf] }
 0x2fb   : > { %v5411_v48 = vpop.f32.mrf.mxu3  ;;  %v5267_v56 = vpop.f32.mrf.mxu0 }
 0x2fc   : > { %v5268_v0 = vadd.f32 %v5267_v56, %v14951_v29  ;;  %v15127_v39 = vadd.f32 %v5411_v48, %v5363_v44  ;;  %v10134_v44 = vor.u32 %v12578_v30, %v10131_v54  ;;  %v10902_v48 = vor.u32 %v12770_v57, %v10899_v50  ;;  %v10387_v30 = vld [vmem:[%s19107_s3 + $0x220] sm:$0xf0] }
 0x2fd   : > { %v5316_v2 = vpop.f32.mrf.mxu1 }
 0x2fe   : > { %v5317_v27 = vadd.f32 %v5316_v2, %v5268_v0  ;;  %5462 = vmatmul.bf16.gmra.mxu0 %v14582_v26  ;;  %5560 = vmatmul.bf16.gmra.mxu2 %v14876_v55  ;;  %v12642_v55 = vld [vmem:[%s19107_s3 + $0x204] sm:$0xf] }
 0x2ff   : > { %5632 = vmatpush.bf16.msra.mxu0 %v10134_v44  ;;  %5779 = vmatpush.bf16.msra.mxu3 %v10902_v48 }
 0x300   : > { %5511 = vmatmul.bf16.gmra.mxu1 %v14590_v17  ;;  %5609 = vmatmul.bf16.gmra.mxu3 %v14884_v63 }
 0x301   : > { %v5365_v8 = vpop.f32.mrf.mxu2 }
 0x302   : > { %v5366_v56 = vadd.f32 %v5365_v8, %v5317_v27  ;;  %v10390_v27 = vor.u32 %v12642_v55, %v10387_v30  ;;  %v13018_v55 = vld [vmem:[%s19107_s3 + $0xdc4] sm:$0xf] }
 0x303   : > { %v5414_v0 = vpop.f32.mrf.mxu3  ;;  %v5269_v2 = vpop.f32.mrf.mxu0  ;;  %v11379_v30 = vld [vmem:[%s19107_s3 + $0x9e0] sm:$0xf0] }
 0x304   : > { %v5270_v42 = vadd.f32 %v5269_v2, %v14951_v29  ;;  %v15152_v63 = vadd.f32 %v5414_v0, %v5366_v56  ;;  %5681 = vmatpush.bf16.msra.mxu1 %v10390_v27  ;;  %v11891_v2 = vld [vmem:[%s19107_s3 + $0xde0] sm:$0xf0] }
 0x305   : > { %v5318_v24 = vpop.f32.mrf.mxu1  ;;  %v12147_v27 = vld [vmem:[%s19107_s3 + $0xfe0] sm:$0xf0] }
 0x306   : > { %v5319_v54 = vadd.f32 %v5318_v24, %v5270_v42  ;;  %v12890_v42 = vld [vmem:[%s19107_s3 + $0x9c4] sm:$0xf]  ;;  %v11894_v24 = vor.u32 %v13018_v55, %v11891_v2 }
 0x308   : > { %5919 = vmatpush.bf16.msrb.mxu2 %v11894_v24 }
 0x309   : > { %v5367_v57 = vpop.f32.mrf.mxu2 }
 0x30a   : > { %v5368_v43 = vadd.f32 %v5367_v57, %v5319_v54  ;;  %v13082_v54 = vld [vmem:[%s19107_s3 + $0xfc4] sm:$0xf] }
 0x30b   : > { %v5416_v50 = vpop.f32.mrf.mxu3  ;;  %v5272_v8 = vpop.f32.mrf.mxu0 }
 0x30c   : > { %v5273_v44 = vadd.f32 %v5272_v8, %v14951_v29  ;;  %v15161_v56 = vadd.f32 %v5416_v50, %v5368_v43  ;;  %v11382_v43 = vor.u32 %v12890_v42, %v11379_v30  ;;  %v12150_v50 = vor.u32 %v13082_v54, %v12147_v27  ;;  %v11635_v42 = vld [vmem:[%s19107_s3 + $0xbe0] sm:$0xf0] }
 0x30d   : > { %v5321_v48 = vpop.f32.mrf.mxu1 }
 0x30e   : > { %v5322_v0 = vadd.f32 %v5321_v48, %v5273_v44  ;;  %5467 = vmatmul.bf16.gmra.mxu0 %v14618_v47  ;;  %5565 = vmatmul.bf16.gmra.mxu2 %v14912_v5 }
 0x30f   : > { %5821 = vmatpush.bf16.msrb.mxu0 %v11382_v43  ;;  %5968 = vmatpush.bf16.msrb.mxu3 %v12150_v50 }
 0x310   : > { %5516 = vmatmul.bf16.gmra.mxu1 %v14626_v60  ;;  %5614 = vmatmul.bf16.gmra.mxu3 %v14926_v33  ;;  %v12954_v60 = vld [vmem:[%s19107_s3 + $0xbc4] sm:$0xf] }
 0x311   : > { %v5370_v57 = vpop.f32.mrf.mxu2 }
 0x312   : > { %v5371_v8 = vadd.f32 %v5370_v57, %v5322_v0  ;;  %v11638_v0 = vor.u32 %v12954_v60, %v11635_v42  ;;  %v13010_v60 = vld [vmem:[%s19107_s3 + $0xd84] sm:$0xf] }
 0x313   : > { %v5419_v44 = vpop.f32.mrf.mxu3  ;;  %v5274_v48 = vpop.f32.mrf.mxu0  ;;  %v13074_v42 = vld [vmem:[%s19107_s3 + $0xf84] sm:$0xf] }
 0x314   : > { %v5275_v55 = vadd.f32 %v5274_v48, %v14951_v29  ;;  %v15186_v33 = vadd.f32 %v5419_v44, %v5371_v8  ;;  %5870 = vmatpush.bf16.msrb.mxu1 %v11638_v0  ;;  %v12882_v44 = vld [vmem:[%s19107_s3 + $0x984] sm:$0xf] }
 0x315   : > { %v5323_v2 = vpop.f32.mrf.mxu1  ;;  %v12115_v0 = vld [vmem:[%s19107_s3 + $0xfa0] sm:$0xf0] }
 0x316   : > { %v5324_v5 = vadd.f32 %v5323_v2, %v5275_v55  ;;  %v11347_v2 = vld [vmem:[%s19107_s3 + $0x9a0] sm:$0xf0] }
 0x319   : > { %v5372_v30 = vpop.f32.mrf.mxu2 }
 0x31a   : > { %v5373_v24 = vadd.f32 %v5372_v30, %v5324_v5  ;;  %v11859_v5 = vld [vmem:[%s19107_s3 + $0xda0] sm:$0xf0] }
 0x31b   : > { %v5421_v54 = vpop.f32.mrf.mxu3  ;;  %v5277_v27 = vpop.f32.mrf.mxu0  ;;  %v11862_v55 = vor.u32 %v13010_v60, %v11859_v5 }
 0x31c   : > { %v5278_v57 = vadd.f32 %v5277_v27, %v14951_v29  ;;  %v15195_v50 = vadd.f32 %v5421_v54, %v5373_v24  ;;  %v11350_v27 = vor.u32 %v12882_v44, %v11347_v2 }
 0x31d   : > { %v5326_v43 = vpop.f32.mrf.mxu1  ;;  %5920 = vmatpush.bf16.msrb.mxu2 %v11862_v55 }
 0x31e   : > { %v5327_v8 = vadd.f32 %v5326_v43, %v5278_v57  ;;  %5472 = vmatmul.bf16.gmra.mxu0 %v14657_v4  ;;  %5570 = vmatmul.bf16.gmra.mxu2 %v14953_v1  ;;  %v12118_v57 = vor.u32 %v13074_v42, %v12115_v0  ;;  %v12946_v1 = vld [vmem:[%s19107_s3 + $0xb84] sm:$0xf] }
 0x31f   : > { %5822 = vmatpush.bf16.msrb.mxu0 %v11350_v27 }
 0x320   : > { %5521 = vmatmul.bf16.gmra.mxu1 %v14668_v13  ;;  %5619 = vmatmul.bf16.gmra.mxu3 %v14970_v25 }
 0x321   : > { %v5375_v48 = vpop.f32.mrf.mxu2  ;;  %5969 = vmatpush.bf16.msrb.mxu3 %v12118_v57  ;;  %v11315_v57 = vld [vmem:[%s19107_s3 + $0x960] sm:$0xf0] }
 0x322   : > { %v5376_v30 = vadd.f32 %v5375_v48, %v5327_v8  ;;  %v11603_v8 = vld [vmem:[%s19107_s3 + $0xba0] sm:$0xf0] }
 0x323   : > { %v5424_v24 = vpop.f32.mrf.mxu3  ;;  %v5279_v54 = vpop.f32.mrf.mxu0  ;;  %v11606_v48 = vor.u32 %v12946_v1, %v11603_v8  ;;  %v13002_v1 = vld [vmem:[%s19107_s3 + $0xd44] sm:$0xf] }
 0x324   : > { %v5280_v43 = vadd.f32 %v5279_v54, %v14951_v29  ;;  %v15220_v5 = vadd.f32 %v5424_v24, %v5376_v30  ;;  %v19268_v54 = vld [vmem:[#allocation8_spill] sm:$0xff] }
 0x325   : > { %v5328_v60 = vpop.f32.mrf.mxu1  ;;  %5871 = vmatpush.bf16.msrb.mxu1 %v11606_v48 }
 0x326   : > { %v5329_v25 = vadd.f32 %v5328_v60, %v5280_v43  ;;  %v13066_v43 = vld [vmem:[%s19107_s3 + $0xf44] sm:$0xf] }
 0x327   : > { %v12083_v60 = vld [vmem:[%s19107_s3 + $0xf60] sm:$0xf0] }
 0x329   : > { %v5377_v44 = vpop.f32.mrf.mxu2 }
 0x32a   : > { %v5378_v2 = vadd.f32 %v5377_v44, %v5329_v25  ;;  %v11827_v25 = vld [vmem:[%s19107_s3 + $0xd60] sm:$0xf0]  ;;  %v12086_v44 = vor.u32 %v13066_v43, %v12083_v60 }
 0x32b   : > { %v5426_v29 = vpop.f32.mrf.mxu3  ;;  %v5438_v42 = vpop.f32.mrf.mxu0  ;;  %v11830_v27 = vor.u32 %v13002_v1, %v11827_v25 }
 0x32c   : > { %v5439_v55 = vadd.f32 %v5438_v42, %v14982_v58  ;;  %v15229_v30 = vadd.f32 %v5426_v29, %v5378_v2  ;;  %v12874_v58 = vld [vmem:[%s19107_s3 + $0x944] sm:$0xf]  ;;  %5970 = vmatpush.bf16.msrb.mxu3 %v12086_v44 }
 0x32d   : > { %v5487_v0 = vpop.f32.mrf.mxu1  ;;  %v11318_v48 = vor.u32 %v12874_v58, %v11315_v57  ;;  %5921 = vmatpush.bf16.msrb.mxu2 %v11830_v27  ;;  %v11571_v58 = vld [vmem:[%s19107_s3 + $0xb60] sm:$0xf0] }
 0x32e   : > { %v5488_v24 = vadd.f32 %v5487_v0, %v5439_v55  ;;  %5633 = vmatmul.bf16.vlgmr.msra.gmra.mxu0 %v13809_v61  ;;  %5731 = vmatmul.bf16.vlgmr.msra.gmra.mxu2 %v14103_v20 }
 0x32f   : > { %5823 = vmatpush.bf16.msrb.mxu0 %v11318_v48 }
 0x330   : > { %5682 = vmatmul.bf16.vlgmr.msra.gmra.mxu1 %v13817_v12  ;;  %5780 = vmatmul.bf16.vlgmr.msra.gmra.mxu3 %v19268_v54  ;;  %v12938_v54 = vld [vmem:[%s19107_s3 + $0xb44] sm:$0xf] }
 0x331   : > { %v5536_v8 = vpop.f32.mrf.mxu2  ;;  %v11574_v57 = vor.u32 %v12938_v54, %v11571_v58  ;;  %v12994_v54 = vld [vmem:[%s19107_s3 + $0xd04] sm:$0xf] }
 0x332   : > { %v5537_v2 = vadd.f32 %v5536_v8, %v5488_v24  ;;  %v11283_v58 = vld [vmem:[%s19107_s3 + $0x920] sm:$0xf0] }
 0x333   : > { %v5585_v29 = vpop.f32.mrf.mxu3  ;;  %v5440_v42 = vpop.f32.mrf.mxu0  ;;  %5872 = vmatpush.bf16.msrb.mxu1 %v11574_v57  ;;  %v13058_v57 = vld [vmem:[%s19107_s3 + $0xf04] sm:$0xf] }
 0x334   : > { %v5441_v55 = vadd.f32 %v5440_v42, %v14991_v21  ;;  %v5586_v1 = vadd.f32 %v5585_v29, %v5537_v2  ;;  %v19269_v42 = vld [vmem:[#allocation9_spill] sm:$0xff] }
 0x335   : > { %v5489_v0 = vpop.f32.mrf.mxu1 }
 0x336   : > { %v5490_v25 = vadd.f32 %v5489_v0, %v5441_v55  ;;  %v8369_v2 = vmax.f32 %v5586_v1, 0.0  ;;  %v19270_v55 = vld [vmem:[#allocation10_spill] sm:$0xff] }
 0x337   : > { %v12866_v0 = vld [vmem:[%s19107_s3 + $0x904] sm:$0xf] }
 0x339   : > { %v5538_v24 = vpop.f32.mrf.mxu2 }
 0x33a   : > { %v5539_v43 = vadd.f32 %v5538_v24, %v5490_v25  ;;  %v12051_v24 = vld [vmem:[%s19107_s3 + $0xf20] sm:$0xf0] }
 0x33b   : > { %v5587_v27 = vpop.f32.mrf.mxu3  ;;  %v5443_v60 = vpop.f32.mrf.mxu0 }
 0x33c   : > { %v5444_v21 = vadd.f32 %v5443_v60, %v15016_v22  ;;  %v5588_v48 = vadd.f32 %v5587_v27, %v5539_v43  ;;  %v11795_v22 = vld [vmem:[%s19107_s3 + $0xd20] sm:$0xf0]  ;;  %v11286_v27 = vor.u32 %v12866_v0, %v11283_v58  ;;  %v12054_v60 = vor.u32 %v13058_v57, %v12051_v24 }
 0x33d   : > { %v5492_v8 = vpop.f32.mrf.mxu1  ;;  %v11798_v25 = vor.u32 %v12994_v54, %v11795_v22  ;;  %v11539_v0 = vld [vmem:[%s19107_s3 + $0xb20] sm:$0xf0] }
 0x33e   : > { %v5493_v44 = vadd.f32 %v5492_v8, %v5444_v21  ;;  %5638 = vmatmul.bf16.gmra.mxu0 %v13845_v45  ;;  %v8377_v29 = vmax.f32 %v5588_v48, 0.0  ;;  %5736 = vmatmul.bf16.gmra.mxu2 %v19269_v42 }
 0x33f   : > { %5922 = vmatpush.bf16.msrb.mxu2 %v11798_v25  ;;  %5824 = vmatpush.bf16.msrb.mxu0 %v11286_v27 }
 0x340   : > { %5687 = vmatmul.bf16.gmra.mxu1 %v13853_v62  ;;  %5785 = vmatmul.bf16.gmra.mxu3 %v19270_v55  ;;  %v15274_v1 = vpack.c.bf16 %v8377_v29, %v8369_v2 }
 0x341   : > { %v5541_v43 = vpop.f32.mrf.mxu2  ;;  %5971 = vmatpush.bf16.msrb.mxu3 %v12054_v60 }
 0x342   : > { %19271 = vst [vmem:[#allocation9_spill] sm:$0xff] %v15274_v1  ;;  %v5542_v21 = vadd.f32 %v5541_v43, %v5493_v44  ;;  %v12930_v1 = vld [vmem:[%s19107_s3 + $0xb04] sm:$0xf] }
 0x343   : > { %v5590_v8 = vpop.f32.mrf.mxu3  ;;  %v5445_v48 = vpop.f32.mrf.mxu0  ;;  %v11542_v58 = vor.u32 %v12930_v1, %v11539_v0  ;;  %v12986_v1 = vld [vmem:[%s19107_s3 + $0xcc4] sm:$0xf] }
 0x344   : > { %v5446_v2 = vadd.f32 %v5445_v48, %v15025_v9  ;;  %v5591_v54 = vadd.f32 %v5590_v8, %v5542_v21  ;;  %v19272_v48 = vld [vmem:[#allocation11_spill] sm:$0xff]  ;;  %v13050_v0 = vld [vmem:[%s19107_s3 + $0xec4] sm:$0xf] }
 0x345   : > { %v5494_v29 = vpop.f32.mrf.mxu1  ;;  %5873 = vmatpush.bf16.msrb.mxu1 %v11542_v58  ;;  %v12019_v58 = vld [vmem:[%s19107_s3 + $0xee0] sm:$0xf0] }
 0x346   : > { %v5495_v22 = vadd.f32 %v5494_v29, %v5446_v2  ;;  %v8385_v21 = vmax.f32 %v5591_v54, 0.0  ;;  %v19273_v2 = vld [vmem:[#allocation12_spill] sm:$0xff]  ;;  %v12858_v29 = vld [vmem:[%s19107_s3 + $0x8c4] sm:$0xf] }
 0x349   : > { %v5543_v44 = vpop.f32.mrf.mxu2 }
 0x34a   : > { %v5544_v57 = vadd.f32 %v5543_v44, %v5495_v22  ;;  %v11251_v22 = vld [vmem:[%s19107_s3 + $0x8e0] sm:$0xf0] }
 0x34b   : > { %v5592_v25 = vpop.f32.mrf.mxu3  ;;  %v5448_v24 = vpop.f32.mrf.mxu0 }
 0x34c   : > { %v5449_v9 = vadd.f32 %v5448_v24, %v15050_v18  ;;  %v5593_v27 = vadd.f32 %v5592_v25, %v5544_v57  ;;  %v11763_v18 = vld [vmem:[%s19107_s3 + $0xce0] sm:$0xf0]  ;;  %v11254_v25 = vor.u32 %v12858_v29, %v11251_v22  ;;  %v12022_v24 = vor.u32 %v13050_v0, %v12019_v58 }
 0x34d   : > { %v5497_v43 = vpop.f32.mrf.mxu1  ;;  %v11766_v54 = vor.u32 %v12986_v1, %v11763_v18 }
 0x34e   : > { %v5498_v60 = vadd.f32 %v5497_v43, %v5449_v9  ;;  %5643 = vmatmul.bf16.gmra.mxu0 %v13881_v35  ;;  %v8393_v8 = vmax.f32 %v5593_v27, 0.0  ;;  %5741 = vmatmul.bf16.gmra.mxu2 %v19272_v48 }
 0x34f   : > { %5923 = vmatpush.bf16.msrb.mxu2 %v11766_v54  ;;  %5825 = vmatpush.bf16.msrb.mxu0 %v11254_v25 }
 0x350   : > { %5692 = vmatmul.bf16.gmra.mxu1 %v13889_v51  ;;  %5790 = vmatmul.bf16.gmra.mxu3 %v19273_v2  ;;  %v15315_v44 = vpack.c.bf16 %v8393_v8, %v8385_v21  ;;  %v12922_v51 = vld [vmem:[%s19107_s3 + $0xac4] sm:$0xf] }
 0x351   : > { %v5546_v57 = vpop.f32.mrf.mxu2  ;;  %5972 = vmatpush.bf16.msrb.mxu3 %v12022_v24  ;;  %v11507_v21 = vld [vmem:[%s19107_s3 + $0xae0] sm:$0xf0] }
 0x352   : > { %19274 = vst [vmem:[#allocation10_spill] sm:$0xff] %v15315_v44  ;;  %v5547_v9 = vadd.f32 %v5546_v57, %v5498_v60  ;;  %v11510_v8 = vor.u32 %v12922_v51, %v11507_v21  ;;  %v12978_v51 = vld [vmem:[%s19107_s3 + $0xc84] sm:$0xf] }
 0x353   : > { %v5595_v43 = vpop.f32.mrf.mxu3  ;;  %v5450_v27 = vpop.f32.mrf.mxu0  ;;  %v12914_v44 = vld [vmem:[%s19107_s3 + $0xa84] sm:$0xf] }
 0x354   : > { %v5451_v1 = vadd.f32 %v5450_v27, %v15059_v15  ;;  %v5596_v2 = vadd.f32 %v5595_v43, %v5547_v9  ;;  %5874 = vmatpush.bf16.msrb.mxu1 %v11510_v8  ;;  %v19275_v9 = vld [vmem:[#allocation13_spill] sm:$0xff]  ;;  %v19276_v43 = vld [vmem:[#allocation14_spill] sm:$0xff] }
 0x355   : > { %v5499_v18 = vpop.f32.mrf.mxu1  ;;  %v11219_v27 = vld [vmem:[%s19107_s3 + $0x8a0] sm:$0xf0] }
 0x356   : > { %v5500_v48 = vadd.f32 %v5499_v18, %v5451_v1  ;;  %v8401_v25 = vmax.f32 %v5596_v2, 0.0  ;;  %v13042_v1 = vld [vmem:[%s19107_s3 + $0xe84] sm:$0xf] }
 0x357   : > { %v11987_v18 = vld [vmem:[%s19107_s3 + $0xea0] sm:$0xf0] }
 0x359   : > { %v5548_v60 = vpop.f32.mrf.mxu2 }
 0x35a   : > { %v5549_v29 = vadd.f32 %v5548_v60, %v5500_v48  ;;  %v12850_v48 = vld [vmem:[%s19107_s3 + $0x884] sm:$0xf] }
 0x35b   : > { %v5597_v54 = vpop.f32.mrf.mxu3  ;;  %v5453_v22 = vpop.f32.mrf.mxu0  ;;  %v11222_v60 = vor.u32 %v12850_v48, %v11219_v27 }
 0x35c   : > { %v5454_v15 = vadd.f32 %v5453_v22, %v15084_v3  ;;  %v5598_v58 = vadd.f32 %v5597_v54, %v5549_v29  ;;  %v11731_v3 = vld [vmem:[%s19107_s3 + $0xca0] sm:$0xf0]  ;;  %v11990_v29 = vor.u32 %v13042_v1, %v11987_v18 }
 0x35d   : > { %v5502_v0 = vpop.f32.mrf.mxu1  ;;  %v11734_v2 = vor.u32 %v12978_v51, %v11731_v3  ;;  %5826 = vmatpush.bf16.msrb.mxu0 %v11222_v60 }
 0x35e   : > { %v5503_v57 = vadd.f32 %v5502_v0, %v5454_v15  ;;  %5648 = vmatmul.bf16.gmra.mxu0 %v13917_v23  ;;  %v8409_v24 = vmax.f32 %v5598_v58, 0.0  ;;  %5746 = vmatmul.bf16.gmra.mxu2 %v19275_v9 }
 0x35f   : > { %5924 = vmatpush.bf16.msrb.mxu2 %v11734_v2  ;;  %5973 = vmatpush.bf16.msrb.mxu3 %v11990_v29 }
 0x360   : > { %5697 = vmatmul.bf16.gmra.mxu1 %v13925_v40  ;;  %5795 = vmatmul.bf16.gmra.mxu3 %v19276_v43  ;;  %v15347_v21 = vpack.c.bf16 %v8409_v24, %v8401_v25  ;;  %v11475_v25 = vld [vmem:[%s19107_s3 + $0xaa0] sm:$0xf0] }
 0x361   : > { %v5551_v8 = vpop.f32.mrf.mxu2  ;;  %v11478_v24 = vor.u32 %v12914_v44, %v11475_v25  ;;  %v12970_v44 = vld [vmem:[%s19107_s3 + $0xc44] sm:$0xf] }
 0x362   : > { %19277 = vst [vmem:[#allocation13_spill] sm:$0xff] %v15347_v21  ;;  %v5552_v54 = vadd.f32 %v5551_v8, %v5503_v57  ;;  %v12906_v21 = vld [vmem:[%s19107_s3 + $0xa44] sm:$0xf] }
 0x363   : > { %v5600_v22 = vpop.f32.mrf.mxu3  ;;  %v5455_v15 = vpop.f32.mrf.mxu0  ;;  %5875 = vmatpush.bf16.msrb.mxu1 %v11478_v24 }
 0x364   : > { %v5456_v0 = vadd.f32 %v5455_v15, %v15093_v34  ;;  %v5601_v51 = vadd.f32 %v5600_v22, %v5552_v54  ;;  %v19278_v54 = vld [vmem:[#allocation15_spill] sm:$0xff]  ;;  %v19279_v22 = vld [vmem:[#allocation16_spill] sm:$0xff]  ;;  %v12842_v15 = vld [vmem:[%s19107_s3 + $0x844] sm:$0xf] }
 0x365   : > { %v5504_v58 = vpop.f32.mrf.mxu1 }
 0x366   : > { %v5505_v3 = vadd.f32 %v5504_v58, %v5456_v0  ;;  %v8417_v60 = vmax.f32 %v5601_v51, 0.0  ;;  %v11187_v58 = vld [vmem:[%s19107_s3 + $0x860] sm:$0xf0] }
 0x367   : > { %v13034_v51 = vld [vmem:[%s19107_s3 + $0xe44] sm:$0xf] }
 0x369   : > { %v5553_v57 = vpop.f32.mrf.mxu2 }
 0x36a   : > { %v5554_v48 = vadd.f32 %v5553_v57, %v5505_v3  ;;  %v11955_v3 = vld [vmem:[%s19107_s3 + $0xe60] sm:$0xf0]  ;;  %v11190_v57 = vor.u32 %v12842_v15, %v11187_v58 }
 0x36b   : > { %v5602_v2 = vpop.f32.mrf.mxu3  ;;  %v5458_v27 = vpop.f32.mrf.mxu0 }
 0x36c   : > { %v5459_v34 = vadd.f32 %v5458_v27, %v15118_v46  ;;  %v5603_v18 = vadd.f32 %v5602_v2, %v5554_v48  ;;  %v11699_v46 = vld [vmem:[%s19107_s3 + $0xc60] sm:$0xf0]  ;;  %v11958_v48 = vor.u32 %v13034_v51, %v11955_v3  ;;  %5827 = vmatpush.bf16.msrb.mxu0 %v11190_v57 }
 0x36d   : > { %v5507_v1 = vpop.f32.mrf.mxu1  ;;  %v11702_v0 = vor.u32 %v12970_v44, %v11699_v46 }
 0x36e   : > { %v5508_v8 = vadd.f32 %v5507_v1, %v5459_v34  ;;  %5653 = vmatmul.bf16.gmra.mxu0 %v13953_v16  ;;  %v8425_v29 = vmax.f32 %v5603_v18, 0.0  ;;  %5751 = vmatmul.bf16.gmra.mxu2 %v19278_v54 }
 0x36f   : > { %5925 = vmatpush.bf16.msrb.mxu2 %v11702_v0  ;;  %5974 = vmatpush.bf16.msrb.mxu3 %v11958_v48 }
 0x370   : > { %5702 = vmatmul.bf16.gmra.mxu1 %v13961_v36  ;;  %5800 = vmatmul.bf16.gmra.mxu3 %v19279_v22  ;;  %v15379_v25 = vpack.c.bf16 %v8425_v29, %v8417_v60  ;;  %v11443_v60 = vld [vmem:[%s19107_s3 + $0xa60] sm:$0xf0] }
 0x371   : > { %v5556_v24 = vpop.f32.mrf.mxu2  ;;  %v11446_v29 = vor.u32 %v12906_v21, %v11443_v60  ;;  %v12962_v21 = vld [vmem:[%s19107_s3 + $0xc04] sm:$0xf] }
 0x372   : > { %19280 = vst [vmem:[#allocation14_spill] sm:$0xff] %v15379_v25  ;;  %v5557_v2 = vadd.f32 %v5556_v24, %v5508_v8  ;;  %v11923_v60 = vld [vmem:[%s19107_s3 + $0xe20] sm:$0xf0] }
 0x373   : > { %v5605_v27 = vpop.f32.mrf.mxu3  ;;  %v5460_v34 = vpop.f32.mrf.mxu0  ;;  %5876 = vmatpush.bf16.msrb.mxu1 %v11446_v29 }
 0x374   : > { %v5461_v1 = vadd.f32 %v5460_v34, %v15127_v39  ;;  %v5606_v44 = vadd.f32 %v5605_v27, %v5557_v2  ;;  %v19281_v2 = vld [vmem:[#allocation3_spill] sm:$0xff]  ;;  %v19282_v27 = vld [vmem:[#allocation17_spill] sm:$0xff]  ;;  %v19283_v34 = vld [vmem:[#allocation18_spill] sm:$0xff] }
 0x375   : > { %v5509_v18 = vpop.f32.mrf.mxu1 }
 0x376   : > { %v5510_v46 = vadd.f32 %v5509_v18, %v5461_v1  ;;  %v8433_v57 = vmax.f32 %v5606_v44, 0.0  ;;  %v12834_v1 = vld [vmem:[%s19107_s3 + $0x804] sm:$0xf] }
 0x377   : > { %v11155_v44 = vld [vmem:[%s19107_s3 + $0x820] sm:$0xf0] }
 0x379   : > { %v5558_v8 = vpop.f32.mrf.mxu2 }
 0x37a   : > { %v5559_v15 = vadd.f32 %v5558_v8, %v5510_v46  ;;  %v13026_v46 = vld [vmem:[%s19107_s3 + $0xe04] sm:$0xf] }
 0x37b   : > { %v5607_v0 = vpop.f32.mrf.mxu3  ;;  %v5463_v58 = vpop.f32.mrf.mxu0 }
 0x37c   : > { %v5464_v39 = vadd.f32 %v5463_v58, %v15152_v63  ;;  %v5608_v3 = vadd.f32 %v5607_v0, %v5559_v15  ;;  %v11667_v63 = vld [vmem:[%s19107_s3 + $0xc20] sm:$0xf0]  ;;  %v11158_v15 = vor.u32 %v12834_v1, %v11155_v44  ;;  %v11926_v0 = vor.u32 %v13026_v46, %v11923_v60 }
 0x37d   : > { %v5512_v51 = vpop.f32.mrf.mxu1  ;;  %v11670_v18 = vor.u32 %v12962_v21, %v11667_v63 }
 0x37e   : > { %v5513_v24 = vadd.f32 %v5512_v51, %v5464_v39  ;;  %5658 = vmatmul.bf16.gmra.mxu0 %v13989_v10  ;;  %v8441_v48 = vmax.f32 %v5608_v3, 0.0  ;;  %5756 = vmatmul.bf16.gmra.mxu2 %v19282_v27 }
 0x37f   : > { %5926 = vmatpush.bf16.msrb.mxu2 %v11670_v18  ;;  %5828 = vmatpush.bf16.msrb.mxu0 %v11158_v15  ;;  %v19285_v15 = vld [vmem:[#allocation4_spill] sm:$0xff] }
 0x380   : > { %5707 = vmatmul.bf16.gmra.mxu1 %v19281_v2  ;;  %5805 = vmatmul.bf16.gmra.mxu3 %v19283_v34  ;;  %v15411_v29 = vpack.c.bf16 %v8441_v48, %v8433_v57  ;;  %v12898_v34 = vld [vmem:[%s19107_s3 + $0xa04] sm:$0xf] }
 0x381   : > { %v5561_v8 = vpop.f32.mrf.mxu2  ;;  %5975 = vmatpush.bf16.msrb.mxu3 %v11926_v0  ;;  %v11411_v57 = vld [vmem:[%s19107_s3 + $0xa20] sm:$0xf0] }
 0x382   : > { %19284 = vst [vmem:[#allocation15_spill] sm:$0xff] %v15411_v29  ;;  %v5562_v58 = vadd.f32 %v5561_v8, %v5513_v24  ;;  %v11414_v48 = vor.u32 %v12898_v34, %v11411_v57  ;;  %v10361_v34 = vld [vmem:[%s19107_s3 + $0x1c8] sm:$0xf] }
 0x383   : > { %v5610_v39 = vpop.f32.mrf.mxu3  ;;  %v5465_v51 = vpop.f32.mrf.mxu0  ;;  %v11129_v57 = vld [vmem:[%s19107_s3 + $0x7c8] sm:$0xf] }
 0x384   : > { %v5466_v3 = vadd.f32 %v5465_v51, %v15161_v56  ;;  %v5611_v63 = vadd.f32 %v5610_v39, %v5562_v58  ;;  %5877 = vmatpush.bf16.msrb.mxu1 %v11414_v48  ;;  %v19286_v39 = vld [vmem:[#allocation5_spill] sm:$0xff]  ;;  %v19287_v51 = vld [vmem:[#allocation19_spill] sm:$0xff] }
 0x385   : > { %v5514_v21 = vpop.f32.mrf.mxu1  ;;  %v12831_v48 = vld [vmem:[%s19107_s3 + $0x7e4] sm:$0xf0] }
 0x386   : > { %v5515_v25 = vadd.f32 %v5514_v21, %v5466_v3  ;;  %v8449_v0 = vmax.f32 %v5611_v63, 0.0  ;;  %v19288_v3 = vld [vmem:[#allocation20_spill] sm:$0xff]  ;;  %v12639_v63 = vld [vmem:[%s19107_s3 + $0x1e4] sm:$0xf0] }
 0x389   : > { %v5563_v24 = vpop.f32.mrf.mxu2 }
 0x38a   : > { %v5564_v1 = vadd.f32 %v5563_v24, %v5515_v25  ;;  %v10873_v25 = vld [vmem:[%s19107_s3 + $0x5c8] sm:$0xf] }
 0x38b   : > { %v5612_v18 = vpop.f32.mrf.mxu3  ;;  %v5468_v44 = vpop.f32.mrf.mxu0 }
 0x38c   : > { %v5469_v56 = vadd.f32 %v5468_v44, %v15186_v33  ;;  %v5613_v60 = vadd.f32 %v5612_v18, %v5564_v1  ;;  %v12767_v33 = vld [vmem:[%s19107_s3 + $0x5e4] sm:$0xf0]  ;;  %v10362_v18 = vor.u32 %v12639_v63, %v10361_v34  ;;  %v11130_v44 = vor.u32 %v12831_v48, %v11129_v57 }
 0x38d   : > { %v5517_v46 = vpop.f32.mrf.mxu1  ;;  %v10874_v21 = vor.u32 %v12767_v33, %v10873_v25 }
 0x38e   : > { %v5518_v8 = vadd.f32 %v5517_v46, %v5469_v56  ;;  %5663 = vmatmul.bf16.gmra.mxu0 %v19285_v15  ;;  %v8457_v58 = vmax.f32 %v5613_v60, 0.0  ;;  %5761 = vmatmul.bf16.gmra.mxu2 %v19287_v51 }
 0x38f   : > { %6115 = vmatpush.bf16.msra.mxu2 %v10874_v21  ;;  %6017 = vmatpush.bf16.msra.mxu0 %v10362_v18 }
 0x390   : > { %5712 = vmatmul.bf16.gmra.mxu1 %v19286_v39  ;;  %5810 = vmatmul.bf16.gmra.mxu3 %v19288_v3  ;;  %v15443_v24 = vpack.c.bf16 %v8457_v58, %v8449_v0  ;;  %v10617_v3 = vld [vmem:[%s19107_s3 + $0x3c8] sm:$0xf] }
 0x391   : > { %v5566_v1 = vpop.f32.mrf.mxu2  ;;  %6164 = vmatpush.bf16.msra.mxu3 %v11130_v44  ;;  %v12703_v0 = vld [vmem:[%s19107_s3 + $0x3e4] sm:$0xf0]  ;;  %v19290_v44 = vld [vmem:[#allocation6_spill] sm:$0xff] }
 0x392   : > { %19289 = vst [vmem:[#allocation16_spill] sm:$0xff] %v15443_v24  ;;  %v5567_v56 = vadd.f32 %v5566_v1, %v5518_v8  ;;  %v10618_v34 = vor.u32 %v12703_v0, %v10617_v3  ;;  %v19292_v24 = vld [vmem:[#allocation21_spill] sm:$0xff]  ;;  %v10841_v3 = vld [vmem:[%s19107_s3 + $0x588] sm:$0xf] }
 0x393   : > { %v5615_v46 = vpop.f32.mrf.mxu3  ;;  %v5470_v60 = vpop.f32.mrf.mxu0  ;;  %v12631_v0 = vld [vmem:[%s19107_s3 + $0x1a4] sm:$0xf0] }
 0x394   : > { %v5471_v25 = vadd.f32 %v5470_v60, %v15195_v50  ;;  %v5616_v29 = vadd.f32 %v5615_v46, %v5567_v56  ;;  %6066 = vmatpush.bf16.msra.mxu1 %v10618_v34  ;;  %v19291_v60 = vld [vmem:[#allocation7_spill] sm:$0xff] }
 0x395   : > { %v5519_v33 = vpop.f32.mrf.mxu1  ;;  %v12823_v34 = vld [vmem:[%s19107_s3 + $0x7a4] sm:$0xf0] }
 0x396   : > { %v5520_v58 = vadd.f32 %v5519_v33, %v5471_v25  ;;  %v8465_v56 = vmax.f32 %v5616_v29, 0.0  ;;  %v19293_v25 = vld [vmem:[#allocation22_spill] sm:$0xff]  ;;  %v10329_v33 = vld [vmem:[%s19107_s3 + $0x188] sm:$0xf] }
 0x399   : > { %v5568_v8 = vpop.f32.mrf.mxu2 }
 0x39a   : > { %v5569_v63 = vadd.f32 %v5568_v8, %v5520_v58  ;;  %v11097_v58 = vld [vmem:[%s19107_s3 + $0x788] sm:$0xf] }
 0x39b   : > { %v5617_v21 = vpop.f32.mrf.mxu3  ;;  %v5473_v57 = vpop.f32.mrf.mxu0 }
 0x39c   : > { %v5474_v50 = vadd.f32 %v5473_v57, %v15220_v5  ;;  %v5618_v1 = vadd.f32 %v5617_v21, %v5569_v63  ;;  %v12759_v5 = vld [vmem:[%s19107_s3 + $0x5a4] sm:$0xf0]  ;;  %v10330_v21 = vor.u32 %v12631_v0, %v10329_v33  ;;  %v11098_v57 = vor.u32 %v12823_v34, %v11097_v58 }
 0x39d   : > { %v5522_v48 = vpop.f32.mrf.mxu1  ;;  %v10842_v29 = vor.u32 %v12759_v5, %v10841_v3 }
 0x39e   : > { %v5523_v18 = vadd.f32 %v5522_v48, %v5474_v50  ;;  %5668 = vmatmul.bf16.gmra.mxu0 %v19290_v44  ;;  %v8473_v46 = vmax.f32 %v5618_v1, 0.0  ;;  %5766 = vmatmul.bf16.gmra.mxu2 %v19292_v24  ;;  %v10585_v24 = vld [vmem:[%s19107_s3 + $0x388] sm:$0xf] }
 0x39f   : > { %6116 = vmatpush.bf16.msra.mxu2 %v10842_v29  ;;  %6018 = vmatpush.bf16.msra.mxu0 %v10330_v21 }
 0x3a0   : > { %5717 = vmatmul.bf16.gmra.mxu1 %v19291_v60  ;;  %5815 = vmatmul.bf16.gmra.mxu3 %v19293_v25  ;;  %v15475_v8 = vpack.c.bf16 %v8473_v46, %v8465_v56  ;;  %v12695_v56 = vld [vmem:[%s19107_s3 + $0x3a4] sm:$0xf0] }
 0x3a1   : > { %v5571_v63 = vpop.f32.mrf.mxu2  ;;  %6165 = vmatpush.bf16.msra.mxu3 %v11098_v57  ;;  %v10586_v33 = vor.u32 %v12695_v56, %v10585_v24  ;;  %v12623_v56 = vld [vmem:[%s19107_s3 + $0x164] sm:$0xf0] }
 0x3a2   : > { %19294 = vst [vmem:[#allocation3_spill] sm:$0xff] %v15475_v8  ;;  %v5572_v50 = vadd.f32 %v5571_v63, %v5523_v18  ;;  %v13164_v18 = vld [vmem:[%s19108_s4] sm:$0xff]  ;;  %v10553_v8 = vld [vmem:[%s19107_s3 + $0x348] sm:$0xf] }
 0x3a3   : > { %v5620_v48 = vpop.f32.mrf.mxu3  ;;  %v5475_v1 = vpop.f32.mrf.mxu0  ;;  %v15487_v29 = vperm.slane %v13164_v18, 1  ;;  %6067 = vmatpush.bf16.msra.mxu1 %v10586_v33  ;;  %v12815_v33 = vld [vmem:[%s19107_s3 + $0x764] sm:$0xf0] }
 0x3a4   : > { %v5476_v3 = vadd.f32 %v5475_v1, %v15229_v30  ;;  %v5621_v25 = vadd.f32 %v5620_v48, %v5572_v50  ;;  %v10809_v1 = vld [vmem:[%s19107_s3 + $0x548] sm:$0xf] }
 0x3a5   : > { %v5524_v5 = vpop.f32.mrf.mxu1 }
 0x3a6   : > { %v5525_v46 = vadd.f32 %v5524_v5, %v5476_v3  ;;  %v8481_v48 = vmax.f32 %v5621_v25, 0.0  ;;  %v12751_v3 = vld [vmem:[%s19107_s3 + $0x564] sm:$0xf0] }
 0x3a7   : > { %v10297_v5 = vld [vmem:[%s19107_s3 + $0x148] sm:$0xf]  ;;  %v10810_v25 = vor.u32 %v12751_v3, %v10809_v1 }
 0x3a9   : > { %v5573_v30 = vpop.f32.mrf.mxu2  ;;  %6117 = vmatpush.bf16.msra.mxu2 %v10810_v25 }
 0x3aa   : > { %v5574_v0 = vadd.f32 %v5573_v30, %v5525_v46  ;;  %v11065_v46 = vld [vmem:[%s19107_s3 + $0x748] sm:$0xf] }
 0x3ab   : > { %v5622_v58 = vpop.f32.mrf.mxu3  ;;  %v5634_v34 = vpop.f32.mrf.mxu0 }
 0x3ac   : > { %v5635_v63 = vadd.f32 %v5634_v34, %v15487_v29  ;;  %v5623_v57 = vadd.f32 %v5622_v58, %v5574_v0  ;;  %v10298_v0 = vor.u32 %v12623_v56, %v10297_v5  ;;  %v11066_v58 = vor.u32 %v12815_v33, %v11065_v46 }
 0x3ad   : > { %v5683_v21 = vpop.f32.mrf.mxu1 }
 0x3ae   : > { %v5684_v50 = vadd.f32 %v5683_v21, %v5635_v63  ;;  %5829 = vmatmul.bf16.vlgmr.msrb.gmra.mxu0 %v14402_v49  ;;  %v8489_v24 = vmax.f32 %v5623_v57, 0.0  ;;  %5927 = vmatmul.bf16.vlgmr.msrb.gmra.mxu2 %v14696_v11 }
 0x3af   : > { %6019 = vmatpush.bf16.msra.mxu0 %v10298_v0  ;;  %6166 = vmatpush.bf16.msra.mxu3 %v11066_v58 }
 0x3b0   : > { %5878 = vmatmul.bf16.vlgmr.msrb.gmra.mxu1 %v14410_v31  ;;  %5976 = vmatmul.bf16.vlgmr.msrb.gmra.mxu3 %v14704_v37  ;;  %v15512_v18 = vpack.c.bf16 %v8489_v24, %v8481_v48  ;;  %v12687_v48 = vld [vmem:[%s19107_s3 + $0x364] sm:$0xf0] }
 0x3b1   : > { %v5732_v30 = vpop.f32.mrf.mxu2 }
 0x3b2   : > { %19295 = vst [vmem:[#allocation17_spill] sm:$0xff] %v15512_v18  ;;  %v5733_v34 = vadd.f32 %v5732_v30, %v5684_v50  ;;  %v10554_v50 = vor.u32 %v12687_v48, %v10553_v8  ;;  %v10777_v8 = vld [vmem:[%s19107_s3 + $0x508] sm:$0xf] }
 0x3b3   : > { %v5781_v63 = vpop.f32.mrf.mxu3  ;;  %v5636_v21 = vpop.f32.mrf.mxu0  ;;  %v12807_v48 = vld [vmem:[%s19107_s3 + $0x724] sm:$0xf0] }
 0x3b4   : > { %v5637_v57 = vadd.f32 %v5636_v21, %v15487_v29  ;;  %v15515_v3 = vadd.f32 %v5781_v63, %v5733_v34  ;;  %6068 = vmatpush.bf16.msra.mxu1 %v10554_v50  ;;  %v12743_v34 = vld [vmem:[%s19107_s3 + $0x524] sm:$0xf0] }
 0x3b5   : > { %v5685_v1 = vpop.f32.mrf.mxu1  ;;  %v10265_v63 = vld [vmem:[%s19107_s3 + $0x108] sm:$0xf]  ;;  %v10778_v21 = vor.u32 %v12743_v34, %v10777_v8 }
 0x3b6   : > { %v5686_v24 = vadd.f32 %v5685_v1, %v5637_v57  ;;  %v12615_v57 = vld [vmem:[%s19107_s3 + $0x124] sm:$0xf0] }
 0x3b7   : > { %v11033_v1 = vld [vmem:[%s19107_s3 + $0x708] sm:$0xf]  ;;  %v10266_v50 = vor.u32 %v12615_v57, %v10265_v63  ;;  %6118 = vmatpush.bf16.msra.mxu2 %v10778_v21 }
 0x3b8   : > { %v10521_v34 = vld [vmem:[%s19107_s3 + $0x308] sm:$0xf] }
 0x3b9   : > { %v5734_v5 = vpop.f32.mrf.mxu2  ;;  %6020 = vmatpush.bf16.msra.mxu0 %v10266_v50  ;;  %v12679_v63 = vld [vmem:[%s19107_s3 + $0x324] sm:$0xf0] }
 0x3ba   : > { %v5735_v25 = vadd.f32 %v5734_v5, %v5686_v24  ;;  %v11034_v5 = vor.u32 %v12807_v48, %v11033_v1 }
 0x3bb   : > { %v5783_v56 = vpop.f32.mrf.mxu3  ;;  %v5639_v46 = vpop.f32.mrf.mxu0 }
 0x3bc   : > { %v5640_v33 = vadd.f32 %v5639_v46, %v15487_v29  ;;  %v15524_v0 = vadd.f32 %v5783_v56, %v5735_v25  ;;  %6167 = vmatpush.bf16.msra.mxu3 %v11034_v5 }
 0x3bd   : > { %v5688_v30 = vpop.f32.mrf.mxu1 }
 0x3be   : > { %v5689_v58 = vadd.f32 %v5688_v30, %v5640_v33  ;;  %5834 = vmatmul.bf16.gmra.mxu0 %v14438_v14  ;;  %5932 = vmatmul.bf16.gmra.mxu2 %v14732_v53 }
 0x3c0   : > { %5883 = vmatmul.bf16.gmra.mxu1 %v14446_v41  ;;  %5981 = vmatmul.bf16.gmra.mxu3 %v14740_v28 }
 0x3c1   : > { %v5737_v24 = vpop.f32.mrf.mxu2 }
 0x3c2   : > { %v5738_v25 = vadd.f32 %v5737_v24, %v5689_v58  ;;  %v10522_v58 = vor.u32 %v12679_v63, %v10521_v34  ;;  %v10233_v34 = vld [vmem:[%s19107_s3 + $0xc8] sm:$0xf] }
 0x3c3   : > { %v5786_v56 = vpop.f32.mrf.mxu3  ;;  %v5641_v46 = vpop.f32.mrf.mxu0 }
 0x3c4   : > { %v5642_v33 = vadd.f32 %v5641_v46, %v15487_v29  ;;  %v15549_v8 = vadd.f32 %v5786_v56, %v5738_v25  ;;  %6069 = vmatpush.bf16.msra.mxu1 %v10522_v58  ;;  %v19296_v46 = vld [vmem:[#allocation43_spill] sm:$0xff] }
 0x3c5   : > { %v5690_v30 = vpop.f32.mrf.mxu1  ;;  %v11001_v58 = vld [vmem:[%s19107_s3 + $0x6c8] sm:$0xf] }
 0x3c6   : > { %v5691_v57 = vadd.f32 %v5690_v30, %v5642_v33  ;;  %v10745_v33 = vld [vmem:[%s19107_s3 + $0x4c8] sm:$0xf] }
 0x3c7   : > { %v12735_v30 = vld [vmem:[%s19107_s3 + $0x4e4] sm:$0xf0] }
 0x3c8   : > { %v10746_v63 = vor.u32 %v12735_v30, %v10745_v33 }
 0x3c9   : > { %v5739_v1 = vpop.f32.mrf.mxu2 }
 0x3ca   : > { %v5740_v21 = vadd.f32 %v5739_v1, %v5691_v57  ;;  %v12607_v57 = vld [vmem:[%s19107_s3 + $0xe4] sm:$0xf0]  ;;  %6119 = vmatpush.bf16.msra.mxu2 %v10746_v63 }
 0x3cb   : > { %v5788_v48 = vpop.f32.mrf.mxu3  ;;  %v5644_v24 = vpop.f32.mrf.mxu0  ;;  %v12799_v1 = vld [vmem:[%s19107_s3 + $0x6e4] sm:$0xf0] }
 0x3cc   : > { %v5645_v50 = vadd.f32 %v5644_v24, %v15487_v29  ;;  %v15558_v25 = vadd.f32 %v5788_v48, %v5740_v21  ;;  %v10234_v48 = vor.u32 %v12607_v57, %v10233_v34  ;;  %v11002_v24 = vor.u32 %v12799_v1, %v11001_v58  ;;  %v12671_v34 = vld [vmem:[%s19107_s3 + $0x2e4] sm:$0xf0] }
 0x3cd   : > { %v5693_v5 = vpop.f32.mrf.mxu1 }
 0x3ce   : > { %v5694_v56 = vadd.f32 %v5693_v5, %v5645_v50  ;;  %5839 = vmatmul.bf16.gmra.mxu0 %v14474_v32  ;;  %5937 = vmatmul.bf16.gmra.mxu2 %v14768_v7  ;;  %v10489_v7 = vld [vmem:[%s19107_s3 + $0x2c8] sm:$0xf] }
 0x3cf   : > { %6021 = vmatpush.bf16.msra.mxu0 %v10234_v48  ;;  %6168 = vmatpush.bf16.msra.mxu3 %v11002_v24  ;;  %v19305_v32 = vld [vmem:[#allocation51_spill] sm:$0xff] }
 0x3d0   : > { %5888 = vmatmul.bf16.gmra.mxu1 %v14482_v59  ;;  %5986 = vmatmul.bf16.gmra.mxu3 %v19296_v46  ;;  %v19298_v59 = vld [vmem:[#allocation45_spill] sm:$0xff] }
 0x3d1   : > { %v5742_v21 = vpop.f32.mrf.mxu2 }
 0x3d2   : > { %v5743_v50 = vadd.f32 %v5742_v21, %v5694_v56  ;;  %v10490_v56 = vor.u32 %v12671_v34, %v10489_v7  ;;  %v10713_v7 = vld [vmem:[%s19107_s3 + $0x488] sm:$0xf] }
 0x3d3   : > { %v5791_v5 = vpop.f32.mrf.mxu3  ;;  %v5646_v18 = vpop.f32.mrf.mxu0 }
 0x3d4   : > { %v5647_v33 = vadd.f32 %v5646_v18, %v15487_v29  ;;  %v15583_v46 = vadd.f32 %v5791_v5, %v5743_v50  ;;  %6070 = vmatpush.bf16.msra.mxu1 %v10490_v56  ;;  %v19297_v5 = vld [vmem:[#allocation44_spill] sm:$0xff]  ;;  %v10969_v56 = vld [vmem:[%s19107_s3 + $0x688] sm:$0xf] }
 0x3d5   : > { %v5695_v30 = vpop.f32.mrf.mxu1 }
 0x3d6   : > { %v5696_v57 = vadd.f32 %v5695_v30, %v5647_v33  ;;  %v12727_v33 = vld [vmem:[%s19107_s3 + $0x4a4] sm:$0xf0] }
 0x3d7   : > { %v10201_v30 = vld [vmem:[%s19107_s3 + $0x88] sm:$0xf]  ;;  %v10714_v34 = vor.u32 %v12727_v33, %v10713_v7 }
 0x3d9   : > { %v5744_v58 = vpop.f32.mrf.mxu2  ;;  %6120 = vmatpush.bf16.msra.mxu2 %v10714_v34 }
 0x3da   : > { %v5745_v63 = vadd.f32 %v5744_v58, %v5696_v57  ;;  %v12599_v57 = vld [vmem:[%s19107_s3 + $0xa4] sm:$0xf0] }
 0x3db   : > { %v5793_v1 = vpop.f32.mrf.mxu3  ;;  %v5649_v18 = vpop.f32.mrf.mxu0  ;;  %v12791_v58 = vld [vmem:[%s19107_s3 + $0x6a4] sm:$0xf0] }
 0x3dc   : > { %v5650_v21 = vadd.f32 %v5649_v18, %v15487_v29  ;;  %v15592_v24 = vadd.f32 %v5793_v1, %v5745_v63  ;;  %v10202_v1 = vor.u32 %v12599_v57, %v10201_v30  ;;  %v10970_v18 = vor.u32 %v12791_v58, %v10969_v56  ;;  %v12663_v30 = vld [vmem:[%s19107_s3 + $0x2a4] sm:$0xf0] }
 0x3dd   : > { %v5698_v48 = vpop.f32.mrf.mxu1 }
 0x3de   : > { %v5699_v50 = vadd.f32 %v5698_v48, %v5650_v21  ;;  %5844 = vmatmul.bf16.gmra.mxu0 %v14510_v52  ;;  %5942 = vmatmul.bf16.gmra.mxu2 %v19297_v5  ;;  %v19300_v52 = vld [vmem:[#allocation47_spill] sm:$0xff] }
 0x3df   : > { %6022 = vmatpush.bf16.msra.mxu0 %v10202_v1  ;;  %6169 = vmatpush.bf16.msra.mxu3 %v10970_v18 }
 0x3e0   : > { %5893 = vmatmul.bf16.gmra.mxu1 %v14518_v19  ;;  %5991 = vmatmul.bf16.gmra.mxu3 %v19298_v59  ;;  %v10457_v19 = vld [vmem:[%s19107_s3 + $0x288] sm:$0xf] }
 0x3e1   : > { %v5747_v63 = vpop.f32.mrf.mxu2 }
 0x3e2   : > { %v5748_v21 = vadd.f32 %v5747_v63, %v5699_v50  ;;  %v10458_v50 = vor.u32 %v12663_v30, %v10457_v19  ;;  %v10681_v19 = vld [vmem:[%s19107_s3 + $0x448] sm:$0xf] }
 0x3e3   : > { %v5796_v48 = vpop.f32.mrf.mxu3  ;;  %v5651_v59 = vpop.f32.mrf.mxu0 }
 0x3e4   : > { %v5652_v7 = vadd.f32 %v5651_v59, %v15487_v29  ;;  %v15617_v5 = vadd.f32 %v5796_v48, %v5748_v21  ;;  %6071 = vmatpush.bf16.msra.mxu1 %v10458_v50  ;;  %v19299_v48 = vld [vmem:[#allocation46_spill] sm:$0xff]  ;;  %v10937_v50 = vld [vmem:[%s19107_s3 + $0x648] sm:$0xf] }
 0x3e5   : > { %v5700_v33 = vpop.f32.mrf.mxu1 }
 0x3e6   : > { %v5701_v57 = vadd.f32 %v5700_v33, %v5652_v7  ;;  %v12719_v7 = vld [vmem:[%s19107_s3 + $0x464] sm:$0xf0] }
 0x3e7   : > { %v10169_v33 = vld [vmem:[%s19107_s3 + $0x48] sm:$0xf]  ;;  %v10682_v30 = vor.u32 %v12719_v7, %v10681_v19 }
 0x3e9   : > { %v5749_v56 = vpop.f32.mrf.mxu2  ;;  %6121 = vmatpush.bf16.msra.mxu2 %v10682_v30 }
 0x3ea   : > { %v5750_v34 = vadd.f32 %v5749_v56, %v5701_v57  ;;  %v12591_v57 = vld [vmem:[%s19107_s3 + $0x64] sm:$0xf0] }
 0x3eb   : > { %v5798_v58 = vpop.f32.mrf.mxu3  ;;  %v5654_v59 = vpop.f32.mrf.mxu0  ;;  %v12783_v56 = vld [vmem:[%s19107_s3 + $0x664] sm:$0xf0] }
 0x3ec   : > { %v5655_v63 = vadd.f32 %v5654_v59, %v15487_v29  ;;  %v15626_v18 = vadd.f32 %v5798_v58, %v5750_v34  ;;  %v10170_v58 = vor.u32 %v12591_v57, %v10169_v33  ;;  %v10938_v59 = vor.u32 %v12783_v56, %v10937_v50  ;;  %v12655_v33 = vld [vmem:[%s19107_s3 + $0x264] sm:$0xf0] }
 0x3ed   : > { %v5703_v1 = vpop.f32.mrf.mxu1 }
 0x3ee   : > { %v5704_v21 = vadd.f32 %v5703_v1, %v5655_v63  ;;  %5849 = vmatmul.bf16.gmra.mxu0 %v14546_v6  ;;  %5947 = vmatmul.bf16.gmra.mxu2 %v19299_v48  ;;  %v19302_v6 = vld [vmem:[#allocation49_spill] sm:$0xff] }
 0x3ef   : > { %6023 = vmatpush.bf16.msra.mxu0 %v10170_v58  ;;  %6170 = vmatpush.bf16.msra.mxu3 %v10938_v59 }
 0x3f0   : > { %5898 = vmatmul.bf16.gmra.mxu1 %v14554_v38  ;;  %5996 = vmatmul.bf16.gmra.mxu3 %v19300_v52  ;;  %v10425_v38 = vld [vmem:[%s19107_s3 + $0x248] sm:$0xf] }
 0x3f1   : > { %v5752_v34 = vpop.f32.mrf.mxu2 }
 0x3f2   : > { %v5753_v63 = vadd.f32 %v5752_v34, %v5704_v21  ;;  %v10426_v21 = vor.u32 %v12655_v33, %v10425_v38  ;;  %v10649_v38 = vld [vmem:[%s19107_s3 + $0x408] sm:$0xf] }
 0x3f3   : > { %v5801_v1 = vpop.f32.mrf.mxu3  ;;  %v5656_v52 = vpop.f32.mrf.mxu0 }
 0x3f4   : > { %v5657_v19 = vadd.f32 %v5656_v52, %v15487_v29  ;;  %v15651_v48 = vadd.f32 %v5801_v1, %v5753_v63  ;;  %6072 = vmatpush.bf16.msra.mxu1 %v10426_v21  ;;  %v19301_v1 = vld [vmem:[#allocation48_spill] sm:$0xff]  ;;  %v10905_v21 = vld [vmem:[%s19107_s3 + $0x608] sm:$0xf] }
 0x3f5   : > { %v5705_v7 = vpop.f32.mrf.mxu1 }
 0x3f6   : > { %v5706_v57 = vadd.f32 %v5705_v7, %v5657_v19  ;;  %v12711_v19 = vld [vmem:[%s19107_s3 + $0x424] sm:$0xf0] }
 0x3f7   : > { %v10137_v7 = vld [vmem:[%s19107_s3 + $0x8] sm:$0xf]  ;;  %v10650_v33 = vor.u32 %v12711_v19, %v10649_v38 }
 0x3f9   : > { %v5754_v50 = vpop.f32.mrf.mxu2  ;;  %6122 = vmatpush.bf16.msra.mxu2 %v10650_v33 }
 0x3fa   : > { %v5755_v30 = vadd.f32 %v5754_v50, %v5706_v57  ;;  %v12583_v57 = vld [vmem:[%s19107_s3 + $0x24] sm:$0xf0] }
 0x3fb   : > { %v5803_v56 = vpop.f32.mrf.mxu3  ;;  %v5659_v52 = vpop.f32.mrf.mxu0  ;;  %v12775_v50 = vld [vmem:[%s19107_s3 + $0x624] sm:$0xf0] }
 0x3fc   : > { %v5660_v34 = vadd.f32 %v5659_v52, %v15487_v29  ;;  %v15660_v59 = vadd.f32 %v5803_v56, %v5755_v30  ;;  %v10138_v56 = vor.u32 %v12583_v57, %v10137_v7  ;;  %v10906_v52 = vor.u32 %v12775_v50, %v10905_v21  ;;  %v12647_v7 = vld [vmem:[%s19107_s3 + $0x224] sm:$0xf0] }
 0x3fd   : > { %v5708_v58 = vpop.f32.mrf.mxu1 }
 0x3fe   : > { %v5709_v63 = vadd.f32 %v5708_v58, %v5660_v34  ;;  %5854 = vmatmul.bf16.gmra.mxu0 %v14582_v26  ;;  %5952 = vmatmul.bf16.gmra.mxu2 %v19301_v1  ;;  %v19304_v26 = vld [vmem:[#allocation50_spill] sm:$0xff] }
 0x3ff   : > { %6024 = vmatpush.bf16.msra.mxu0 %v10138_v56  ;;  %6171 = vmatpush.bf16.msra.mxu3 %v10906_v52 }
 0x400   : > { %5903 = vmatmul.bf16.gmra.mxu1 %v14590_v17  ;;  %6001 = vmatmul.bf16.gmra.mxu3 %v19302_v6  ;;  %v10393_v17 = vld [vmem:[%s19107_s3 + $0x208] sm:$0xf] }
 0x401   : > { %v5757_v30 = vpop.f32.mrf.mxu2 }
 0x402   : > { %v5758_v34 = vadd.f32 %v5757_v30, %v5709_v63  ;;  %v10394_v63 = vor.u32 %v12647_v7, %v10393_v17  ;;  %v11897_v17 = vld [vmem:[%s19107_s3 + $0xdc8] sm:$0xf] }
 0x403   : > { %v5806_v58 = vpop.f32.mrf.mxu3  ;;  %v5661_v6 = vpop.f32.mrf.mxu0 }
 0x404   : > { %v5662_v38 = vadd.f32 %v5661_v6, %v15487_v29  ;;  %v15685_v1 = vadd.f32 %v5806_v58, %v5758_v34  ;;  %6073 = vmatpush.bf16.msra.mxu1 %v10394_v63  ;;  %v19303_v58 = vld [vmem:[#allocation35_spill] sm:$0xff] }
 0x405   : > { %v5710_v19 = vpop.f32.mrf.mxu1  ;;  %v12153_v63 = vld [vmem:[%s19107_s3 + $0xfc8] sm:$0xf] }
 0x406   : > { %v5711_v57 = vadd.f32 %v5710_v19, %v5662_v38  ;;  %v13023_v38 = vld [vmem:[%s19107_s3 + $0xde4] sm:$0xf0] }
 0x407   : > { %v11385_v19 = vld [vmem:[%s19107_s3 + $0x9c8] sm:$0xf]  ;;  %v11898_v7 = vor.u32 %v13023_v38, %v11897_v17 }
 0x409   : > { %v5759_v21 = vpop.f32.mrf.mxu2  ;;  %6311 = vmatpush.bf16.msrb.mxu2 %v11898_v7 }
 0x40a   : > { %v5760_v33 = vadd.f32 %v5759_v21, %v5711_v57  ;;  %v12895_v57 = vld [vmem:[%s19107_s3 + $0x9e4] sm:$0xf0] }
 0x40b   : > { %v5808_v50 = vpop.f32.mrf.mxu3  ;;  %v5664_v6 = vpop.f32.mrf.mxu0  ;;  %v13087_v21 = vld [vmem:[%s19107_s3 + $0xfe4] sm:$0xf0] }
 0x40c   : > { %v5665_v30 = vadd.f32 %v5664_v6, %v15487_v29  ;;  %v15694_v52 = vadd.f32 %v5808_v50, %v5760_v33  ;;  %v11386_v50 = vor.u32 %v12895_v57, %v11385_v19  ;;  %v12154_v6 = vor.u32 %v13087_v21, %v12153_v63  ;;  %v12959_v19 = vld [vmem:[%s19107_s3 + $0xbe4] sm:$0xf0] }
 0x40d   : > { %v5713_v56 = vpop.f32.mrf.mxu1 }
 0x40e   : > { %v5714_v34 = vadd.f32 %v5713_v56, %v5665_v30  ;;  %5859 = vmatmul.bf16.gmra.mxu0 %v14618_v47  ;;  %5957 = vmatmul.bf16.gmra.mxu2 %v19304_v26  ;;  %v11641_v47 = vld [vmem:[%s19107_s3 + $0xbc8] sm:$0xf] }
 0x40f   : > { %6213 = vmatpush.bf16.msrb.mxu0 %v11386_v50  ;;  %6360 = vmatpush.bf16.msrb.mxu3 %v12154_v6 }
 0x410   : > { %5908 = vmatmul.bf16.gmra.mxu1 %v19303_v58  ;;  %6006 = vmatmul.bf16.gmra.mxu3 %v19305_v32 }
 0x411   : > { %v5762_v33 = vpop.f32.mrf.mxu2 }
 0x412   : > { %v5763_v30 = vadd.f32 %v5762_v33, %v5714_v34  ;;  %v11642_v34 = vor.u32 %v12959_v19, %v11641_v47  ;;  %v11865_v47 = vld [vmem:[%s19107_s3 + $0xd88] sm:$0xf] }
 0x413   : > { %v5811_v56 = vpop.f32.mrf.mxu3  ;;  %v5666_v32 = vpop.f32.mrf.mxu0 }
 0x414   : > { %v5667_v17 = vadd.f32 %v5666_v32, %v15487_v29  ;;  %v15719_v26 = vadd.f32 %v5811_v56, %v5763_v30  ;;  %6262 = vmatpush.bf16.msrb.mxu1 %v11642_v34  ;;  %v19306_v30 = vld [vmem:[#allocation52_spill] sm:$0xff]  ;;  %v19307_v56 = vld [vmem:[#allocation53_spill] sm:$0xff]  ;;  %v12887_v34 = vld [vmem:[%s19107_s3 + $0x9a4] sm:$0xf0] }
 0x415   : > { %v5715_v38 = vpop.f32.mrf.mxu1 }
 0x416   : > { %v5716_v58 = vadd.f32 %v5715_v38, %v5667_v17  ;;  %v11353_v17 = vld [vmem:[%s19107_s3 + $0x988] sm:$0xf] }
 0x419   : > { %v5764_v57 = vpop.f32.mrf.mxu2 }
 0x41a   : > { %v5765_v7 = vadd.f32 %v5764_v57, %v5716_v58  ;;  %v13015_v58 = vld [vmem:[%s19107_s3 + $0xda4] sm:$0xf0] }
 0x41b   : > { %v5813_v63 = vpop.f32.mrf.mxu3  ;;  %v5669_v32 = vpop.f32.mrf.mxu0  ;;  %v11866_v19 = vor.u32 %v13015_v58, %v11865_v47  ;;  %v12121_v57 = vld [vmem:[%s19107_s3 + $0xf88] sm:$0xf] }
 0x41c   : > { %v5670_v21 = vadd.f32 %v5669_v32, %v15487_v29  ;;  %v15728_v50 = vadd.f32 %v5813_v63, %v5765_v7  ;;  %v13079_v7 = vld [vmem:[%s19107_s3 + $0xfa4] sm:$0xf0] }
 0x41d   : > { %v5718_v33 = vpop.f32.mrf.mxu1  ;;  %6312 = vmatpush.bf16.msrb.mxu2 %v11866_v19 }
 0x41e   : > { %v5719_v6 = vadd.f32 %v5718_v33, %v5670_v21  ;;  %5864 = vmatmul.bf16.gmra.mxu0 %v14657_v4  ;;  %5962 = vmatmul.bf16.gmra.mxu2 %v19306_v30  ;;  %v11354_v33 = vor.u32 %v12887_v34, %v11353_v17  ;;  %v11609_v4 = vld [vmem:[%s19107_s3 + $0xb88] sm:$0xf] }
 0x420   : > { %5913 = vmatmul.bf16.gmra.mxu1 %v14668_v13  ;;  %6011 = vmatmul.bf16.gmra.mxu3 %v19307_v56  ;;  %v12122_v56 = vor.u32 %v13079_v7, %v12121_v57 }
 0x421   : > { %v5767_v38 = vpop.f32.mrf.mxu2  ;;  %6214 = vmatpush.bf16.msrb.mxu0 %v11354_v33  ;;  %v12089_v33 = vld [vmem:[%s19107_s3 + $0xf48] sm:$0xf] }
 0x422   : > { %v5768_v63 = vadd.f32 %v5767_v38, %v5719_v6  ;;  %6361 = vmatpush.bf16.msrb.mxu3 %v12122_v56  ;;  %v12951_v6 = vld [vmem:[%s19107_s3 + $0xba4] sm:$0xf0]  ;;  %v19308_v56 = vld [vmem:[#allocation8_spill] sm:$0xff] }
 0x423   : > { %v5816_v32 = vpop.f32.mrf.mxu3  ;;  %v5671_v21 = vpop.f32.mrf.mxu0  ;;  %v11610_v38 = vor.u32 %v12951_v6, %v11609_v4  ;;  %v11833_v4 = vld [vmem:[%s19107_s3 + $0xd48] sm:$0xf] }
 0x424   : > { %v5672_v30 = vadd.f32 %v5671_v21, %v15487_v29  ;;  %v15753_v58 = vadd.f32 %v5816_v32, %v5768_v63  ;;  %v12879_v21 = vld [vmem:[%s19107_s3 + $0x964] sm:$0xf0] }
 0x425   : > { %v5720_v47 = vpop.f32.mrf.mxu1  ;;  %6263 = vmatpush.bf16.msrb.mxu1 %v11610_v38 }
 0x426   : > { %v5721_v13 = vadd.f32 %v5720_v47, %v5672_v30  ;;  %v13071_v47 = vld [vmem:[%s19107_s3 + $0xf64] sm:$0xf0] }
 0x429   : > { %v5769_v17 = vpop.f32.mrf.mxu2 }
 0x42a   : > { %v5770_v34 = vadd.f32 %v5769_v17, %v5721_v13  ;;  %v13007_v13 = vld [vmem:[%s19107_s3 + $0xd64] sm:$0xf0]  ;;  %v12090_v17 = vor.u32 %v13071_v47, %v12089_v33 }
 0x42b   : > { %v5818_v29 = vpop.f32.mrf.mxu3  ;;  %v5830_v57 = vpop.f32.mrf.mxu0  ;;  %v11834_v32 = vor.u32 %v13007_v13, %v11833_v4 }
 0x42c   : > { %v5831_v19 = vadd.f32 %v5830_v57, %v15515_v3  ;;  %v15762_v63 = vadd.f32 %v5818_v29, %v5770_v34  ;;  %v11321_v3 = vld [vmem:[%s19107_s3 + $0x948] sm:$0xf]  ;;  %6362 = vmatpush.bf16.msrb.mxu3 %v12090_v17 }
 0x42d   : > { %v5879_v7 = vpop.f32.mrf.mxu1  ;;  %v11322_v38 = vor.u32 %v12879_v21, %v11321_v3  ;;  %6313 = vmatpush.bf16.msrb.mxu2 %v11834_v32  ;;  %v12943_v3 = vld [vmem:[%s19107_s3 + $0xb64] sm:$0xf0] }
 0x42e   : > { %v5880_v30 = vadd.f32 %v5879_v7, %v5831_v19  ;;  %6025 = vmatmul.bf16.vlgmr.msra.gmra.mxu0 %v13809_v61  ;;  %6123 = vmatmul.bf16.vlgmr.msra.gmra.mxu2 %v14103_v20 }
 0x42f   : > { %6215 = vmatpush.bf16.msrb.mxu0 %v11322_v38 }
 0x430   : > { %6074 = vmatmul.bf16.vlgmr.msra.gmra.mxu1 %v13817_v12  ;;  %6172 = vmatmul.bf16.vlgmr.msra.gmra.mxu3 %v19308_v56  ;;  %v11577_v56 = vld [vmem:[%s19107_s3 + $0xb48] sm:$0xf] }
 0x431   : > { %v5928_v6 = vpop.f32.mrf.mxu2  ;;  %v11578_v21 = vor.u32 %v12943_v3, %v11577_v56  ;;  %v11801_v56 = vld [vmem:[%s19107_s3 + $0xd08] sm:$0xf] }
 0x432   : > { %v5929_v34 = vadd.f32 %v5928_v6, %v5880_v30  ;;  %v13063_v3 = vld [vmem:[%s19107_s3 + $0xf24] sm:$0xf0] }
 0x433   : > { %v5977_v29 = vpop.f32.mrf.mxu3  ;;  %v5832_v57 = vpop.f32.mrf.mxu0  ;;  %6264 = vmatpush.bf16.msrb.mxu1 %v11578_v21 }
 0x434   : > { %v5833_v19 = vadd.f32 %v5832_v57, %v15524_v0  ;;  %v5978_v4 = vadd.f32 %v5977_v29, %v5929_v34  ;;  %v11289_v57 = vld [vmem:[%s19107_s3 + $0x908] sm:$0xf] }
 0x435   : > { %v5881_v7 = vpop.f32.mrf.mxu1 }
 0x436   : > { %v5882_v13 = vadd.f32 %v5881_v7, %v5833_v19  ;;  %v8370_v34 = vmax.f32 %v5978_v4, 0.0  ;;  %v12871_v4 = vld [vmem:[%s19107_s3 + $0x924] sm:$0xf0] }
 0x439   : > { %v5930_v30 = vpop.f32.mrf.mxu2 }
 0x43a   : > { %v5931_v33 = vadd.f32 %v5930_v30, %v5882_v13  ;;  %v12057_v13 = vld [vmem:[%s19107_s3 + $0xf08] sm:$0xf]  ;;  %v11290_v30 = vor.u32 %v12871_v4, %v11289_v57 }
 0x43b   : > { %v5979_v32 = vpop.f32.mrf.mxu3  ;;  %v5835_v47 = vpop.f32.mrf.mxu0 }
 0x43c   : > { %v5836_v0 = vadd.f32 %v5835_v47, %v15549_v8  ;;  %v5980_v38 = vadd.f32 %v5979_v32, %v5931_v33  ;;  %v12999_v8 = vld [vmem:[%s19107_s3 + $0xd24] sm:$0xf0]  ;;  %v12058_v33 = vor.u32 %v13063_v3, %v12057_v13  ;;  %6216 = vmatpush.bf16.msrb.mxu0 %v11290_v30 }
 0x43d   : > { %v5884_v6 = vpop.f32.mrf.mxu1  ;;  %v11802_v7 = vor.u32 %v12999_v8, %v11801_v56  ;;  %v11545_v56 = vld [vmem:[%s19107_s3 + $0xb08] sm:$0xf] }
 0x43e   : > { %v5885_v17 = vadd.f32 %v5884_v6, %v5836_v0  ;;  %6030 = vmatmul.bf16.gmra.mxu0 %v13845_v45  ;;  %v8378_v29 = vmax.f32 %v5980_v38, 0.0  ;;  %6128 = vmatmul.bf16.gmra.mxu2 %v19269_v42  ;;  %v12935_v8 = vld [vmem:[%s19107_s3 + $0xb24] sm:$0xf0] }
 0x43f   : > { %6314 = vmatpush.bf16.msrb.mxu2 %v11802_v7  ;;  %6363 = vmatpush.bf16.msrb.mxu3 %v12058_v33  ;;  %v11546_v57 = vor.u32 %v12935_v8, %v11545_v56  ;;  %v12863_v56 = vld [vmem:[%s19107_s3 + $0x8e4] sm:$0xf0] }
 0x440   : > { %6079 = vmatmul.bf16.gmra.mxu1 %v13853_v62  ;;  %6177 = vmatmul.bf16.gmra.mxu3 %v19270_v55  ;;  %v15807_v19 = vpack.c.bf16 %v8378_v29, %v8370_v34  ;;  %v12025_v8 = vld [vmem:[%s19107_s3 + $0xec8] sm:$0xf] }
 0x441   : > { %v5933_v21 = vpop.f32.mrf.mxu2  ;;  %6265 = vmatpush.bf16.msrb.mxu1 %v11546_v57  ;;  %v13055_v57 = vld [vmem:[%s19107_s3 + $0xee4] sm:$0xf0] }
 0x442   : > { %19309 = vst [vmem:[#allocation4_spill] sm:$0xff] %v15807_v19  ;;  %v5934_v32 = vadd.f32 %v5933_v21, %v5885_v17 }
 0x443   : > { %v5982_v47 = vpop.f32.mrf.mxu3  ;;  %v5837_v0 = vpop.f32.mrf.mxu0 }
 0x444   : > { %v5838_v6 = vadd.f32 %v5837_v0, %v15558_v25  ;;  %v5983_v34 = vadd.f32 %v5982_v47, %v5934_v32  ;;  %v19310_v47 = vld [vmem:[#allocation2_spill] sm:$0xff]  ;;  %v19311_v0 = vld [vmem:[#allocation11_spill] sm:$0xff] }
 0x445   : > { %v5886_v38 = vpop.f32.mrf.mxu1 }
 0x446   : > { %v5887_v29 = vadd.f32 %v5886_v38, %v5838_v6  ;;  %v8386_v33 = vmax.f32 %v5983_v34, 0.0  ;;  %v19312_v6 = vld [vmem:[#allocation12_spill] sm:$0xff]  ;;  %v11769_v38 = vld [vmem:[%s19107_s3 + $0xcc8] sm:$0xf] }
 0x449   : > { %v5935_v17 = vpop.f32.mrf.mxu2 }
 0x44a   : > { %v5936_v4 = vadd.f32 %v5935_v17, %v5887_v29  ;;  %v11257_v29 = vld [vmem:[%s19107_s3 + $0x8c8] sm:$0xf] }
 0x44b   : > { %v5984_v7 = vpop.f32.mrf.mxu3  ;;  %v5840_v13 = vpop.f32.mrf.mxu0 }
 0x44c   : > { %v5841_v25 = vadd.f32 %v5840_v13, %v15583_v46  ;;  %v5985_v21 = vadd.f32 %v5984_v7, %v5936_v4  ;;  %v12991_v46 = vld [vmem:[%s19107_s3 + $0xce4] sm:$0xf0]  ;;  %v11258_v7 = vor.u32 %v12863_v56, %v11257_v29  ;;  %v12026_v13 = vor.u32 %v13055_v57, %v12025_v8 }
 0x44d   : > { %v5889_v3 = vpop.f32.mrf.mxu1  ;;  %v11770_v34 = vor.u32 %v12991_v46, %v11769_v38 }
 0x44e   : > { %v5890_v30 = vadd.f32 %v5889_v3, %v5841_v25  ;;  %6035 = vmatmul.bf16.gmra.mxu0 %v13881_v35  ;;  %v8394_v32 = vmax.f32 %v5985_v21, 0.0  ;;  %6133 = vmatmul.bf16.gmra.mxu2 %v19311_v0  ;;  %v11513_v0 = vld [vmem:[%s19107_s3 + $0xac8] sm:$0xf] }
 0x44f   : > { %6315 = vmatpush.bf16.msrb.mxu2 %v11770_v34  ;;  %6217 = vmatpush.bf16.msrb.mxu0 %v11258_v7 }
 0x450   : > { %6084 = vmatmul.bf16.gmra.mxu1 %v19310_v47  ;;  %6182 = vmatmul.bf16.gmra.mxu3 %v19312_v6  ;;  %v15848_v17 = vpack.c.bf16 %v8394_v32, %v8386_v33  ;;  %v12927_v33 = vld [vmem:[%s19107_s3 + $0xae4] sm:$0xf0] }
 0x451   : > { %v5938_v4 = vpop.f32.mrf.mxu2  ;;  %6364 = vmatpush.bf16.msrb.mxu3 %v12026_v13  ;;  %v11514_v32 = vor.u32 %v12927_v33, %v11513_v0  ;;  %v11737_v0 = vld [vmem:[%s19107_s3 + $0xc88] sm:$0xf] }
 0x452   : > { %19313 = vst [vmem:[#allocation5_spill] sm:$0xff] %v15848_v17  ;;  %v5939_v25 = vadd.f32 %v5938_v4, %v5890_v30  ;;  %v19330_v17 = vld [vmem:[#allocation44_spill] sm:$0xff] }
 0x453   : > { %v5987_v3 = vpop.f32.mrf.mxu3  ;;  %v5842_v21 = vpop.f32.mrf.mxu0  ;;  %6266 = vmatpush.bf16.msrb.mxu1 %v11514_v32 }
 0x454   : > { %v5843_v38 = vadd.f32 %v5842_v21, %v15592_v24  ;;  %v5988_v19 = vadd.f32 %v5987_v3, %v5939_v25  ;;  %v12855_v25 = vld [vmem:[%s19107_s3 + $0x8a4] sm:$0xf0] }
 0x455   : > { %v5891_v46 = vpop.f32.mrf.mxu1  ;;  %v11993_v3 = vld [vmem:[%s19107_s3 + $0xe88] sm:$0xf] }
 0x456   : > { %v5892_v6 = vadd.f32 %v5891_v46, %v5843_v38  ;;  %v8402_v7 = vmax.f32 %v5988_v19, 0.0  ;;  %v13047_v21 = vld [vmem:[%s19107_s3 + $0xea4] sm:$0xf0] }
 0x457   : > { %v11994_v32 = vor.u32 %v13047_v21, %v11993_v3 }
 0x459   : > { %v5940_v30 = vpop.f32.mrf.mxu2  ;;  %6365 = vmatpush.bf16.msrb.mxu3 %v11994_v32  ;;  %v11705_v32 = vld [vmem:[%s19107_s3 + $0xc48] sm:$0xf] }
 0x45a   : > { %v5941_v29 = vadd.f32 %v5940_v30, %v5892_v6  ;;  %v11225_v6 = vld [vmem:[%s19107_s3 + $0x888] sm:$0xf] }
 0x45b   : > { %v5989_v34 = vpop.f32.mrf.mxu3  ;;  %v5845_v56 = vpop.f32.mrf.mxu0  ;;  %v11226_v33 = vor.u32 %v12855_v25, %v11225_v6 }
 0x45c   : > { %v5846_v24 = vadd.f32 %v5845_v56, %v15617_v5  ;;  %v5990_v57 = vadd.f32 %v5989_v34, %v5941_v29  ;;  %v12983_v5 = vld [vmem:[%s19107_s3 + $0xca4] sm:$0xf0] }
 0x45d   : > { %v5894_v8 = vpop.f32.mrf.mxu1  ;;  %v11738_v19 = vor.u32 %v12983_v5, %v11737_v0  ;;  %6218 = vmatpush.bf16.msrb.mxu0 %v11226_v33  ;;  %v11481_v0 = vld [vmem:[%s19107_s3 + $0xa88] sm:$0xf] }
 0x45e   : > { %v5895_v4 = vadd.f32 %v5894_v8, %v5846_v24  ;;  %6040 = vmatmul.bf16.gmra.mxu0 %v13917_v23  ;;  %v8410_v13 = vmax.f32 %v5990_v57, 0.0  ;;  %6138 = vmatmul.bf16.gmra.mxu2 %v19275_v9 }
 0x45f   : > { %6316 = vmatpush.bf16.msrb.mxu2 %v11738_v19 }
 0x460   : > { %6089 = vmatmul.bf16.gmra.mxu1 %v13925_v40  ;;  %6187 = vmatmul.bf16.gmra.mxu3 %v19276_v43  ;;  %v15880_v38 = vpack.c.bf16 %v8410_v13, %v8402_v7  ;;  %v12919_v7 = vld [vmem:[%s19107_s3 + $0xaa4] sm:$0xf0] }
 0x461   : > { %v5943_v46 = vpop.f32.mrf.mxu2  ;;  %v11482_v13 = vor.u32 %v12919_v7, %v11481_v0 }
 0x462   : > { %19314 = vst [vmem:[#allocation19_spill] sm:$0xff] %v15880_v38  ;;  %v5944_v30 = vadd.f32 %v5943_v46, %v5895_v4  ;;  %v19329_v38 = vld [vmem:[#allocation29_spill] sm:$0xff] }
 0x463   : > { %v5992_v29 = vpop.f32.mrf.mxu3  ;;  %v5847_v34 = vpop.f32.mrf.mxu0  ;;  %6267 = vmatpush.bf16.msrb.mxu1 %v11482_v13 }
 0x464   : > { %v5848_v56 = vadd.f32 %v5847_v34, %v15626_v18  ;;  %v5993_v8 = vadd.f32 %v5992_v29, %v5944_v30  ;;  %v11193_v30 = vld [vmem:[%s19107_s3 + $0x848] sm:$0xf] }
 0x465   : > { %v5896_v24 = vpop.f32.mrf.mxu1  ;;  %v12847_v34 = vld [vmem:[%s19107_s3 + $0x864] sm:$0xf0] }
 0x466   : > { %v5897_v57 = vadd.f32 %v5896_v24, %v5848_v56  ;;  %v8418_v46 = vmax.f32 %v5993_v8, 0.0  ;;  %v11961_v56 = vld [vmem:[%s19107_s3 + $0xe48] sm:$0xf]  ;;  %v11194_v0 = vor.u32 %v12847_v34, %v11193_v30 }
 0x467   : > { %v13039_v24 = vld [vmem:[%s19107_s3 + $0xe64] sm:$0xf0] }
 0x468   : > { %v11962_v7 = vor.u32 %v13039_v24, %v11961_v56  ;;  %6219 = vmatpush.bf16.msrb.mxu0 %v11194_v0  ;;  %v19316_v0 = vld [vmem:[#allocation18_spill] sm:$0xff] }
 0x469   : > { %v5945_v4 = vpop.f32.mrf.mxu2 }
 0x46a   : > { %v5946_v5 = vadd.f32 %v5945_v4, %v5897_v57  ;;  %6366 = vmatpush.bf16.msrb.mxu3 %v11962_v7  ;;  %v11673_v7 = vld [vmem:[%s19107_s3 + $0xc08] sm:$0xf] }
 0x46b   : > { %v5994_v6 = vpop.f32.mrf.mxu3  ;;  %v5850_v19 = vpop.f32.mrf.mxu0 }
 0x46c   : > { %v5851_v18 = vadd.f32 %v5850_v19, %v15651_v48  ;;  %v5995_v3 = vadd.f32 %v5994_v6, %v5946_v5  ;;  %v12975_v48 = vld [vmem:[%s19107_s3 + $0xc64] sm:$0xf0] }
 0x46d   : > { %v5899_v25 = vpop.f32.mrf.mxu1  ;;  %v11706_v29 = vor.u32 %v12975_v48, %v11705_v32 }
 0x46e   : > { %v5900_v21 = vadd.f32 %v5899_v25, %v5851_v18  ;;  %6045 = vmatmul.bf16.gmra.mxu0 %v13953_v16  ;;  %v8426_v33 = vmax.f32 %v5995_v3, 0.0  ;;  %6143 = vmatmul.bf16.gmra.mxu2 %v19278_v54  ;;  %v11449_v3 = vld [vmem:[%s19107_s3 + $0xa48] sm:$0xf] }
 0x46f   : > { %6317 = vmatpush.bf16.msrb.mxu2 %v11706_v29 }
 0x470   : > { %6094 = vmatmul.bf16.gmra.mxu1 %v13961_v36  ;;  %6192 = vmatmul.bf16.gmra.mxu3 %v19279_v22  ;;  %v15912_v8 = vpack.c.bf16 %v8426_v33, %v8418_v46  ;;  %v12911_v46 = vld [vmem:[%s19107_s3 + $0xa64] sm:$0xf0] }
 0x471   : > { %v5948_v57 = vpop.f32.mrf.mxu2  ;;  %v11450_v33 = vor.u32 %v12911_v46, %v11449_v3 }
 0x472   : > { %19315 = vst [vmem:[#allocation6_spill] sm:$0xff] %v15912_v8  ;;  %v5949_v13 = vadd.f32 %v5948_v57, %v5900_v21  ;;  %v12667_v8 = vld [vmem:[%s19107_s3 + $0x2cc] sm:$0xf] }
 0x473   : > { %v5997_v4 = vpop.f32.mrf.mxu3  ;;  %v5852_v5 = vpop.f32.mrf.mxu0  ;;  %6268 = vmatpush.bf16.msrb.mxu1 %v11450_v33 }
 0x474   : > { %v5853_v6 = vadd.f32 %v5852_v5, %v15660_v59  ;;  %v5998_v18 = vadd.f32 %v5997_v4, %v5949_v13  ;;  %v11161_v13 = vld [vmem:[%s19107_s3 + $0x808] sm:$0xf] }
 0x475   : > { %v5901_v19 = vpop.f32.mrf.mxu1  ;;  %v12839_v5 = vld [vmem:[%s19107_s3 + $0x824] sm:$0xf0] }
 0x476   : > { %v5902_v25 = vadd.f32 %v5901_v19, %v5853_v6  ;;  %v8434_v24 = vmax.f32 %v5998_v18, 0.0  ;;  %v11929_v6 = vld [vmem:[%s19107_s3 + $0xe08] sm:$0xf]  ;;  %v11162_v3 = vor.u32 %v12839_v5, %v11161_v13 }
 0x477   : > { %v13031_v19 = vld [vmem:[%s19107_s3 + $0xe24] sm:$0xf0] }
 0x478   : > { %v11930_v46 = vor.u32 %v13031_v19, %v11929_v6  ;;  %6220 = vmatpush.bf16.msrb.mxu0 %v11162_v3  ;;  %v19318_v3 = vld [vmem:[#allocation20_spill] sm:$0xff] }
 0x479   : > { %v5950_v21 = vpop.f32.mrf.mxu2 }
 0x47a   : > { %v5951_v32 = vadd.f32 %v5950_v21, %v5902_v25  ;;  %6367 = vmatpush.bf16.msrb.mxu3 %v11930_v46  ;;  %v12763_v46 = vld [vmem:[%s19107_s3 + $0x5cc] sm:$0xf] }
 0x47b   : > { %v5999_v48 = vpop.f32.mrf.mxu3  ;;  %v5855_v30 = vpop.f32.mrf.mxu0 }
 0x47c   : > { %v5856_v59 = vadd.f32 %v5855_v30, %v15685_v1  ;;  %v6000_v34 = vadd.f32 %v5999_v48, %v5951_v32  ;;  %v12967_v1 = vld [vmem:[%s19107_s3 + $0xc24] sm:$0xf0] }
 0x47d   : > { %v5904_v29 = vpop.f32.mrf.mxu1  ;;  %v11674_v4 = vor.u32 %v12967_v1, %v11673_v7 }
 0x47e   : > { %v5905_v56 = vadd.f32 %v5904_v29, %v5856_v59  ;;  %6050 = vmatmul.bf16.gmra.mxu0 %v13989_v10  ;;  %v8442_v57 = vmax.f32 %v6000_v34, 0.0  ;;  %6148 = vmatmul.bf16.gmra.mxu2 %v19282_v27  ;;  %v11417_v34 = vld [vmem:[%s19107_s3 + $0xa08] sm:$0xf] }
 0x47f   : > { %6318 = vmatpush.bf16.msrb.mxu2 %v11674_v4 }
 0x480   : > { %6099 = vmatmul.bf16.gmra.mxu1 %v19281_v2  ;;  %6197 = vmatmul.bf16.gmra.mxu3 %v19316_v0  ;;  %v15944_v18 = vpack.c.bf16 %v8442_v57, %v8434_v24  ;;  %v12903_v24 = vld [vmem:[%s19107_s3 + $0xa24] sm:$0xf0] }
 0x481   : > { %v5953_v25 = vpop.f32.mrf.mxu2  ;;  %v11418_v57 = vor.u32 %v12903_v24, %v11417_v34 }
 0x482   : > { %19317 = vst [vmem:[#allocation7_spill] sm:$0xff] %v15944_v18  ;;  %v5954_v33 = vadd.f32 %v5953_v25, %v5905_v56 }
 0x483   : > { %v6002_v21 = vpop.f32.mrf.mxu3  ;;  %v5857_v32 = vpop.f32.mrf.mxu0  ;;  %6269 = vmatpush.bf16.msrb.mxu1 %v11418_v57 }
 0x484   : > { %v5858_v48 = vadd.f32 %v5857_v32, %v15694_v52  ;;  %v6003_v59 = vadd.f32 %v6002_v21, %v5954_v33  ;;  %v12635_v33 = vld [vmem:[%s19107_s3 + $0x1cc] sm:$0xf] }
 0x485   : > { %v5906_v30 = vpop.f32.mrf.mxu1  ;;  %v10363_v32 = vld [vmem:[%s19107_s3 + $0x1e8] sm:$0xf0] }
 0x486   : > { %v5907_v29 = vadd.f32 %v5906_v30, %v5858_v48  ;;  %v8450_v19 = vmax.f32 %v6003_v59, 0.0  ;;  %v12827_v48 = vld [vmem:[%s19107_s3 + $0x7cc] sm:$0xf]  ;;  %v10366_v34 = vor.u32 %v12635_v33, %v10363_v32 }
 0x487   : > { %v11131_v30 = vld [vmem:[%s19107_s3 + $0x7e8] sm:$0xf0] }
 0x488   : > { %v11134_v24 = vor.u32 %v12827_v48, %v11131_v30  ;;  %6409 = vmatpush.bf16.msra.mxu0 %v10366_v34  ;;  %v19320_v34 = vld [vmem:[#allocation21_spill] sm:$0xff] }
 0x489   : > { %v5955_v56 = vpop.f32.mrf.mxu2 }
 0x48a   : > { %v5956_v7 = vadd.f32 %v5955_v56, %v5907_v29  ;;  %6556 = vmatpush.bf16.msra.mxu3 %v11134_v24  ;;  %v19321_v24 = vld [vmem:[#allocation22_spill] sm:$0xff] }
 0x48b   : > { %v6004_v1 = vpop.f32.mrf.mxu3  ;;  %v5860_v13 = vpop.f32.mrf.mxu0 }
 0x48c   : > { %v5861_v52 = vadd.f32 %v5860_v13, %v15719_v26  ;;  %v6005_v5 = vadd.f32 %v6004_v1, %v5956_v7  ;;  %v10875_v26 = vld [vmem:[%s19107_s3 + $0x5e8] sm:$0xf0] }
 0x48d   : > { %v5909_v4 = vpop.f32.mrf.mxu1  ;;  %v10878_v21 = vor.u32 %v12763_v46, %v10875_v26 }
 0x48e   : > { %v5910_v6 = vadd.f32 %v5909_v4, %v5861_v52  ;;  %6055 = vmatmul.bf16.gmra.mxu0 %v19285_v15  ;;  %v8458_v25 = vmax.f32 %v6005_v5, 0.0  ;;  %6153 = vmatmul.bf16.gmra.mxu2 %v19287_v51  ;;  %v12699_v4 = vld [vmem:[%s19107_s3 + $0x3cc] sm:$0xf] }
 0x48f   : > { %6507 = vmatpush.bf16.msra.mxu2 %v10878_v21  ;;  %v10619_v5 = vld [vmem:[%s19107_s3 + $0x3e8] sm:$0xf0] }
 0x490   : > { %6104 = vmatmul.bf16.gmra.mxu1 %v19286_v39  ;;  %6202 = vmatmul.bf16.gmra.mxu3 %v19318_v3  ;;  %v15976_v59 = vpack.c.bf16 %v8458_v25, %v8450_v19  ;;  %v10622_v25 = vor.u32 %v12699_v4, %v10619_v5 }
 0x491   : > { %v5958_v29 = vpop.f32.mrf.mxu2 }
 0x492   : > { %19319 = vst [vmem:[#allocation2_spill] sm:$0xff] %v15976_v59  ;;  %v5959_v57 = vadd.f32 %v5958_v29, %v5910_v6  ;;  %6458 = vmatpush.bf16.msra.mxu1 %v10622_v25 }
 0x493   : > { %v6007_v56 = vpop.f32.mrf.mxu3  ;;  %v5862_v7 = vpop.f32.mrf.mxu0 }
 0x494   : > { %v5863_v1 = vadd.f32 %v5862_v7, %v15728_v50  ;;  %v6008_v52 = vadd.f32 %v6007_v56, %v5959_v57  ;;  %v12755_v57 = vld [vmem:[%s19107_s3 + $0x58c] sm:$0xf] }
 0x495   : > { %v5911_v13 = vpop.f32.mrf.mxu1  ;;  %v12627_v56 = vld [vmem:[%s19107_s3 + $0x18c] sm:$0xf] }
 0x496   : > { %v5912_v19 = vadd.f32 %v5911_v13, %v5863_v1  ;;  %v8466_v30 = vmax.f32 %v6008_v52, 0.0  ;;  %v10331_v1 = vld [vmem:[%s19107_s3 + $0x1a8] sm:$0xf0] }
 0x497   : > { %v12819_v13 = vld [vmem:[%s19107_s3 + $0x78c] sm:$0xf] }
 0x498   : > { %v11099_v52 = vld [vmem:[%s19107_s3 + $0x7a8] sm:$0xf0] }
 0x499   : > { %v5960_v6 = vpop.f32.mrf.mxu2  ;;  %v11102_v25 = vor.u32 %v12819_v13, %v11099_v52 }
 0x49a   : > { %v5961_v46 = vadd.f32 %v5960_v6, %v5912_v19  ;;  %v10334_v19 = vor.u32 %v12627_v56, %v10331_v1 }
 0x49b   : > { %v6009_v26 = vpop.f32.mrf.mxu3  ;;  %v5865_v33 = vpop.f32.mrf.mxu0  ;;  %6557 = vmatpush.bf16.msra.mxu3 %v11102_v25 }
 0x49c   : > { %v5866_v50 = vadd.f32 %v5865_v33, %v15753_v58  ;;  %v6010_v32 = vadd.f32 %v6009_v26, %v5961_v46  ;;  %v10843_v58 = vld [vmem:[%s19107_s3 + $0x5a8] sm:$0xf0]  ;;  %6410 = vmatpush.bf16.msra.mxu0 %v10334_v19 }
 0x49d   : > { %v5914_v21 = vpop.f32.mrf.mxu1  ;;  %v10846_v7 = vor.u32 %v12755_v57, %v10843_v58 }
 0x49e   : > { %v5915_v48 = vadd.f32 %v5914_v21, %v5866_v50  ;;  %6060 = vmatmul.bf16.gmra.mxu0 %v19290_v44  ;;  %v8474_v29 = vmax.f32 %v6010_v32, 0.0  ;;  %6158 = vmatmul.bf16.gmra.mxu2 %v19320_v34  ;;  %v12691_v32 = vld [vmem:[%s19107_s3 + $0x38c] sm:$0xf] }
 0x49f   : > { %6508 = vmatpush.bf16.msra.mxu2 %v10846_v7 }
 0x4a0   : > { %6109 = vmatmul.bf16.gmra.mxu1 %v19291_v60  ;;  %6207 = vmatmul.bf16.gmra.mxu3 %v19321_v24  ;;  %v16008_v4 = vpack.c.bf16 %v8474_v29, %v8466_v30  ;;  %v10587_v30 = vld [vmem:[%s19107_s3 + $0x3a8] sm:$0xf0] }
 0x4a1   : > { %v5963_v5 = vpop.f32.mrf.mxu2  ;;  %v10590_v57 = vor.u32 %v12691_v32, %v10587_v30  ;;  %v12811_v32 = vld [vmem:[%s19107_s3 + $0x74c] sm:$0xf] }
 0x4a2   : > { %19322 = vst [vmem:[#allocation18_spill] sm:$0xff] %v16008_v4  ;;  %v5964_v6 = vadd.f32 %v5963_v5, %v5915_v48  ;;  %v13165_v48 = vld [vmem:[%s19108_s4] sm:$0xff]  ;;  %v11067_v30 = vld [vmem:[%s19107_s3 + $0x768] sm:$0xf0] }
 0x4a3   : > { %v6012_v46 = vpop.f32.mrf.mxu3  ;;  %v5867_v26 = vpop.f32.mrf.mxu0  ;;  %v16020_v58 = vperm.slane %v13165_v48, 2  ;;  %6459 = vmatpush.bf16.msra.mxu1 %v10590_v57  ;;  %v19327_v4 = vld [vmem:[#allocation43_spill] sm:$0xff] }
 0x4a4   : > { %v5868_v33 = vadd.f32 %v5867_v26, %v15762_v63  ;;  %v6013_v21 = vadd.f32 %v6012_v46, %v5964_v6  ;;  %v12747_v46 = vld [vmem:[%s19107_s3 + $0x54c] sm:$0xf] }
 0x4a5   : > { %v5916_v50 = vpop.f32.mrf.mxu1  ;;  %v10811_v26 = vld [vmem:[%s19107_s3 + $0x568] sm:$0xf0] }
 0x4a6   : > { %v5917_v29 = vadd.f32 %v5916_v50, %v5868_v33  ;;  %v8482_v25 = vmax.f32 %v6013_v21, 0.0  ;;  %v12619_v33 = vld [vmem:[%s19107_s3 + $0x14c] sm:$0xf]  ;;  %v10814_v50 = vor.u32 %v12747_v46, %v10811_v26 }
 0x4a7   : > { %v10299_v21 = vld [vmem:[%s19107_s3 + $0x168] sm:$0xf0] }
 0x4a8   : > { %v10302_v48 = vor.u32 %v12619_v33, %v10299_v21  ;;  %6509 = vmatpush.bf16.msra.mxu2 %v10814_v50  ;;  %v12683_v46 = vld [vmem:[%s19107_s3 + $0x34c] sm:$0xf] }
 0x4a9   : > { %v5965_v63 = vpop.f32.mrf.mxu2 }
 0x4aa   : > { %v5966_v56 = vadd.f32 %v5965_v63, %v5917_v29  ;;  %v11070_v63 = vor.u32 %v12811_v32, %v11067_v30  ;;  %6411 = vmatpush.bf16.msra.mxu0 %v10302_v48 }
 0x4ab   : > { %v6014_v7 = vpop.f32.mrf.mxu3  ;;  %v6026_v1 = vpop.f32.mrf.mxu0 }
 0x4ac   : > { %v6027_v13 = vadd.f32 %v6026_v1, %v16020_v58  ;;  %v6015_v5 = vadd.f32 %v6014_v7, %v5966_v56  ;;  %6558 = vmatpush.bf16.msra.mxu3 %v11070_v63  ;;  %v12739_v63 = vld [vmem:[%s19107_s3 + $0x50c] sm:$0xf] }
 0x4ad   : > { %v6075_v52 = vpop.f32.mrf.mxu1 }
 0x4ae   : > { %v6076_v19 = vadd.f32 %v6075_v52, %v6027_v13  ;;  %6221 = vmatmul.bf16.vlgmr.msrb.gmra.mxu0 %v14402_v49  ;;  %v8490_v6 = vmax.f32 %v6015_v5, 0.0  ;;  %6319 = vmatmul.bf16.vlgmr.msrb.gmra.mxu2 %v14696_v11 }
 0x4b0   : > { %6270 = vmatmul.bf16.vlgmr.msrb.gmra.mxu1 %v14410_v31  ;;  %6368 = vmatmul.bf16.vlgmr.msrb.gmra.mxu3 %v14704_v37  ;;  %v16045_v29 = vpack.c.bf16 %v8490_v6, %v8482_v25  ;;  %v10555_v25 = vld [vmem:[%s19107_s3 + $0x368] sm:$0xf0] }
 0x4b1   : > { %v6124_v57 = vpop.f32.mrf.mxu2  ;;  %v12947_v37 = vld [vmem:[%s19107_s3 + $0xb8c] sm:$0xf] }
 0x4b2   : > { %19323 = vst [vmem:[#allocation20_spill] sm:$0xff] %v16045_v29  ;;  %v6125_v56 = vadd.f32 %v6124_v57, %v6076_v19  ;;  %v10558_v19 = vor.u32 %v12683_v46, %v10555_v25  ;;  %v11035_v46 = vld [vmem:[%s19107_s3 + $0x728] sm:$0xf0]  ;;  %v19326_v29 = vld [vmem:[#allocation42_spill] sm:$0xff] }
 0x4b3   : > { %v6173_v7 = vpop.f32.mrf.mxu3  ;;  %v6028_v1 = vpop.f32.mrf.mxu0 }
 0x4b4   : > { %v6029_v13 = vadd.f32 %v6028_v1, %v16020_v58  ;;  %v16048_v5 = vadd.f32 %v6173_v7, %v6125_v56  ;;  %6460 = vmatpush.bf16.msra.mxu1 %v10558_v19  ;;  %v10779_v56 = vld [vmem:[%s19107_s3 + $0x528] sm:$0xf0] }
 0x4b5   : > { %v6077_v52 = vpop.f32.mrf.mxu1  ;;  %v12611_v7 = vld [vmem:[%s19107_s3 + $0x10c] sm:$0xf]  ;;  %v10782_v1 = vor.u32 %v12739_v63, %v10779_v56 }
 0x4b6   : > { %v6078_v6 = vadd.f32 %v6077_v52, %v6029_v13  ;;  %v10267_v13 = vld [vmem:[%s19107_s3 + $0x128] sm:$0xf0] }
 0x4b7   : > { %v12803_v52 = vld [vmem:[%s19107_s3 + $0x70c] sm:$0xf]  ;;  %6510 = vmatpush.bf16.msra.mxu2 %v10782_v1 }
 0x4b8   : > { %v11038_v19 = vor.u32 %v12803_v52, %v11035_v46  ;;  %v12675_v63 = vld [vmem:[%s19107_s3 + $0x30c] sm:$0xf] }
 0x4b9   : > { %v6126_v26 = vpop.f32.mrf.mxu2  ;;  %v10523_v56 = vld [vmem:[%s19107_s3 + $0x328] sm:$0xf0] }
 0x4ba   : > { %v6127_v33 = vadd.f32 %v6126_v26, %v6078_v6  ;;  %v10270_v6 = vor.u32 %v12611_v7, %v10267_v13  ;;  %6559 = vmatpush.bf16.msra.mxu3 %v11038_v19 }
 0x4bb   : > { %v6175_v50 = vpop.f32.mrf.mxu3  ;;  %v6031_v21 = vpop.f32.mrf.mxu0 }
 0x4bc   : > { %v6032_v32 = vadd.f32 %v6031_v21, %v16020_v58  ;;  %v16057_v57 = vadd.f32 %v6175_v50, %v6127_v33  ;;  %6412 = vmatpush.bf16.msra.mxu0 %v10270_v6 }
 0x4bd   : > { %v6080_v30 = vpop.f32.mrf.mxu1 }
 0x4be   : > { %v6081_v48 = vadd.f32 %v6080_v30, %v6032_v32  ;;  %6226 = vmatmul.bf16.gmra.mxu0 %v14438_v14  ;;  %6324 = vmatmul.bf16.gmra.mxu2 %v14732_v53  ;;  %v19342_v53 = vld [vmem:[#allocation50_spill] sm:$0xff] }
 0x4c0   : > { %6275 = vmatmul.bf16.gmra.mxu1 %v14446_v41  ;;  %6373 = vmatmul.bf16.gmra.mxu3 %v14740_v28  ;;  %v19339_v28 = vld [vmem:[#allocation49_spill] sm:$0xff]  ;;  %v19343_v41 = vld [vmem:[#allocation51_spill] sm:$0xff] }
 0x4c1   : > { %v6129_v25 = vpop.f32.mrf.mxu2 }
 0x4c2   : > { %v6130_v26 = vadd.f32 %v6129_v25, %v6081_v48  ;;  %v10526_v48 = vor.u32 %v12675_v63, %v10523_v56  ;;  %v12603_v63 = vld [vmem:[%s19107_s3 + $0xcc] sm:$0xf] }
 0x4c3   : > { %v6178_v33 = vpop.f32.mrf.mxu3  ;;  %v6033_v50 = vpop.f32.mrf.mxu0 }
 0x4c4   : > { %v6034_v21 = vadd.f32 %v6033_v50, %v16020_v58  ;;  %v16082_v30 = vadd.f32 %v6178_v33, %v6130_v26  ;;  %6461 = vmatpush.bf16.msra.mxu1 %v10526_v48  ;;  %v19324_v33 = vld [vmem:[#allocation26_spill] sm:$0xff]  ;;  %v19325_v50 = vld [vmem:[#allocation27_spill] sm:$0xff] }
 0x4c5   : > { %v6082_v32 = vpop.f32.mrf.mxu1  ;;  %v12795_v48 = vld [vmem:[%s19107_s3 + $0x6cc] sm:$0xf] }
 0x4c6   : > { %v6083_v7 = vadd.f32 %v6082_v32, %v6034_v21  ;;  %v12731_v21 = vld [vmem:[%s19107_s3 + $0x4cc] sm:$0xf] }
 0x4c7   : > { %v10747_v32 = vld [vmem:[%s19107_s3 + $0x4e8] sm:$0xf0] }
 0x4c8   : > { %v10750_v56 = vor.u32 %v12731_v21, %v10747_v32 }
 0x4c9   : > { %v6131_v13 = vpop.f32.mrf.mxu2 }
 0x4ca   : > { %v6132_v1 = vadd.f32 %v6131_v13, %v6083_v7  ;;  %v10235_v7 = vld [vmem:[%s19107_s3 + $0xe8] sm:$0xf0]  ;;  %6511 = vmatpush.bf16.msra.mxu2 %v10750_v56 }
 0x4cb   : > { %v6180_v52 = vpop.f32.mrf.mxu3  ;;  %v6036_v46 = vpop.f32.mrf.mxu0  ;;  %v11003_v13 = vld [vmem:[%s19107_s3 + $0x6e8] sm:$0xf0] }
 0x4cc   : > { %v6037_v25 = vadd.f32 %v6036_v46, %v16020_v58  ;;  %v16091_v19 = vadd.f32 %v6180_v52, %v6132_v1  ;;  %v10238_v52 = vor.u32 %v12603_v63, %v10235_v7  ;;  %v11006_v46 = vor.u32 %v12795_v48, %v11003_v13  ;;  %v10491_v63 = vld [vmem:[%s19107_s3 + $0x2e8] sm:$0xf0] }
 0x4cd   : > { %v6085_v6 = vpop.f32.mrf.mxu1 }
 0x4ce   : > { %v6086_v26 = vadd.f32 %v6085_v6, %v6037_v25  ;;  %6231 = vmatmul.bf16.gmra.mxu0 %v19324_v33  ;;  %6329 = vmatmul.bf16.gmra.mxu2 %v19326_v29  ;;  %v19334_v29 = vld [vmem:[#allocation46_spill] sm:$0xff]  ;;  %v19338_v33 = vld [vmem:[#allocation48_spill] sm:$0xff] }
 0x4cf   : > { %6413 = vmatpush.bf16.msra.mxu0 %v10238_v52  ;;  %6560 = vmatpush.bf16.msra.mxu3 %v11006_v46 }
 0x4d0   : > { %6280 = vmatmul.bf16.gmra.mxu1 %v19325_v50  ;;  %6378 = vmatmul.bf16.gmra.mxu3 %v19327_v4  ;;  %v19331_v4 = vld [vmem:[#allocation45_spill] sm:$0xff]  ;;  %v19335_v50 = vld [vmem:[#allocation47_spill] sm:$0xff] }
 0x4d1   : > { %v6134_v1 = vpop.f32.mrf.mxu2 }
 0x4d2   : > { %v6135_v25 = vadd.f32 %v6134_v1, %v6086_v26  ;;  %v10494_v26 = vor.u32 %v12667_v8, %v10491_v63  ;;  %v12723_v8 = vld [vmem:[%s19107_s3 + $0x48c] sm:$0xf] }
 0x4d3   : > { %v6183_v6 = vpop.f32.mrf.mxu3  ;;  %v6038_v59 = vpop.f32.mrf.mxu0 }
 0x4d4   : > { %v6039_v21 = vadd.f32 %v6038_v59, %v16020_v58  ;;  %v16116_v18 = vadd.f32 %v6183_v6, %v6135_v25  ;;  %6462 = vmatpush.bf16.msra.mxu1 %v10494_v26  ;;  %v19328_v6 = vld [vmem:[#allocation28_spill] sm:$0xff]  ;;  %v12787_v26 = vld [vmem:[%s19107_s3 + $0x68c] sm:$0xf] }
 0x4d5   : > { %v6087_v32 = vpop.f32.mrf.mxu1 }
 0x4d6   : > { %v6088_v7 = vadd.f32 %v6087_v32, %v6039_v21  ;;  %v10715_v21 = vld [vmem:[%s19107_s3 + $0x4a8] sm:$0xf0] }
 0x4d7   : > { %v12595_v32 = vld [vmem:[%s19107_s3 + $0x8c] sm:$0xf]  ;;  %v10718_v63 = vor.u32 %v12723_v8, %v10715_v21 }
 0x4d9   : > { %v6136_v48 = vpop.f32.mrf.mxu2  ;;  %6512 = vmatpush.bf16.msra.mxu2 %v10718_v63 }
 0x4da   : > { %v6137_v56 = vadd.f32 %v6136_v48, %v6088_v7  ;;  %v10203_v7 = vld [vmem:[%s19107_s3 + $0xa8] sm:$0xf0] }
 0x4db   : > { %v6185_v13 = vpop.f32.mrf.mxu3  ;;  %v6041_v59 = vpop.f32.mrf.mxu0  ;;  %v10971_v48 = vld [vmem:[%s19107_s3 + $0x6a8] sm:$0xf0] }
 0x4dc   : > { %v6042_v1 = vadd.f32 %v6041_v59, %v16020_v58  ;;  %v16125_v46 = vadd.f32 %v6185_v13, %v6137_v56  ;;  %v10206_v13 = vor.u32 %v12595_v32, %v10203_v7  ;;  %v10974_v59 = vor.u32 %v12787_v26, %v10971_v48  ;;  %v10459_v32 = vld [vmem:[%s19107_s3 + $0x2a8] sm:$0xf0] }
 0x4dd   : > { %v6090_v52 = vpop.f32.mrf.mxu1 }
 0x4de   : > { %v6091_v25 = vadd.f32 %v6090_v52, %v6042_v1  ;;  %6236 = vmatmul.bf16.gmra.mxu0 %v19328_v6  ;;  %6334 = vmatmul.bf16.gmra.mxu2 %v19330_v17  ;;  %v19333_v6 = vld [vmem:[#allocation31_spill] sm:$0xff] }
 0x4df   : > { %6414 = vmatpush.bf16.msra.mxu0 %v10206_v13  ;;  %6561 = vmatpush.bf16.msra.mxu3 %v10974_v59 }
 0x4e0   : > { %6285 = vmatmul.bf16.gmra.mxu1 %v19329_v38  ;;  %6383 = vmatmul.bf16.gmra.mxu3 %v19331_v4  ;;  %v12659_v38 = vld [vmem:[%s19107_s3 + $0x28c] sm:$0xf] }
 0x4e1   : > { %v6139_v56 = vpop.f32.mrf.mxu2 }
 0x4e2   : > { %v6140_v1 = vadd.f32 %v6139_v56, %v6091_v25  ;;  %v10462_v25 = vor.u32 %v12659_v38, %v10459_v32  ;;  %v12715_v38 = vld [vmem:[%s19107_s3 + $0x44c] sm:$0xf] }
 0x4e3   : > { %v6188_v52 = vpop.f32.mrf.mxu3  ;;  %v6043_v4 = vpop.f32.mrf.mxu0 }
 0x4e4   : > { %v6044_v8 = vadd.f32 %v6043_v4, %v16020_v58  ;;  %v16150_v17 = vadd.f32 %v6188_v52, %v6140_v1  ;;  %6463 = vmatpush.bf16.msra.mxu1 %v10462_v25  ;;  %v19332_v52 = vld [vmem:[#allocation30_spill] sm:$0xff]  ;;  %v12779_v25 = vld [vmem:[%s19107_s3 + $0x64c] sm:$0xf] }
 0x4e5   : > { %v6092_v21 = vpop.f32.mrf.mxu1 }
 0x4e6   : > { %v6093_v7 = vadd.f32 %v6092_v21, %v6044_v8  ;;  %v10683_v8 = vld [vmem:[%s19107_s3 + $0x468] sm:$0xf0] }
 0x4e7   : > { %v12587_v21 = vld [vmem:[%s19107_s3 + $0x4c] sm:$0xf]  ;;  %v10686_v32 = vor.u32 %v12715_v38, %v10683_v8 }
 0x4e9   : > { %v6141_v26 = vpop.f32.mrf.mxu2  ;;  %6513 = vmatpush.bf16.msra.mxu2 %v10686_v32 }
 0x4ea   : > { %v6142_v63 = vadd.f32 %v6141_v26, %v6093_v7  ;;  %v10171_v7 = vld [vmem:[%s19107_s3 + $0x68] sm:$0xf0] }
 0x4eb   : > { %v6190_v48 = vpop.f32.mrf.mxu3  ;;  %v6046_v4 = vpop.f32.mrf.mxu0  ;;  %v10939_v26 = vld [vmem:[%s19107_s3 + $0x668] sm:$0xf0] }
 0x4ec   : > { %v6047_v56 = vadd.f32 %v6046_v4, %v16020_v58  ;;  %v16159_v59 = vadd.f32 %v6190_v48, %v6142_v63  ;;  %v10174_v48 = vor.u32 %v12587_v21, %v10171_v7  ;;  %v10942_v4 = vor.u32 %v12779_v25, %v10939_v26  ;;  %v10427_v21 = vld [vmem:[%s19107_s3 + $0x268] sm:$0xf0] }
 0x4ed   : > { %v6095_v13 = vpop.f32.mrf.mxu1 }
 0x4ee   : > { %v6096_v1 = vadd.f32 %v6095_v13, %v6047_v56  ;;  %6241 = vmatmul.bf16.gmra.mxu0 %v19332_v52  ;;  %6339 = vmatmul.bf16.gmra.mxu2 %v19334_v29  ;;  %v19337_v52 = vld [vmem:[#allocation33_spill] sm:$0xff] }
 0x4ef   : > { %6415 = vmatpush.bf16.msra.mxu0 %v10174_v48  ;;  %6562 = vmatpush.bf16.msra.mxu3 %v10942_v4 }
 0x4f0   : > { %6290 = vmatmul.bf16.gmra.mxu1 %v19333_v6  ;;  %6388 = vmatmul.bf16.gmra.mxu3 %v19335_v50  ;;  %v12651_v6 = vld [vmem:[%s19107_s3 + $0x24c] sm:$0xf] }
 0x4f1   : > { %v6144_v63 = vpop.f32.mrf.mxu2 }
 0x4f2   : > { %v6145_v56 = vadd.f32 %v6144_v63, %v6096_v1  ;;  %v10430_v1 = vor.u32 %v12651_v6, %v10427_v21  ;;  %v12707_v6 = vld [vmem:[%s19107_s3 + $0x40c] sm:$0xf] }
 0x4f3   : > { %v6193_v13 = vpop.f32.mrf.mxu3  ;;  %v6048_v50 = vpop.f32.mrf.mxu0 }
 0x4f4   : > { %v6049_v38 = vadd.f32 %v6048_v50, %v16020_v58  ;;  %v16184_v29 = vadd.f32 %v6193_v13, %v6145_v56  ;;  %6464 = vmatpush.bf16.msra.mxu1 %v10430_v1  ;;  %v19336_v13 = vld [vmem:[#allocation32_spill] sm:$0xff]  ;;  %v12771_v1 = vld [vmem:[%s19107_s3 + $0x60c] sm:$0xf] }
 0x4f5   : > { %v6097_v8 = vpop.f32.mrf.mxu1 }
 0x4f6   : > { %v6098_v7 = vadd.f32 %v6097_v8, %v6049_v38  ;;  %v10651_v38 = vld [vmem:[%s19107_s3 + $0x428] sm:$0xf0] }
 0x4f7   : > { %v12579_v8 = vld [vmem:[%s19107_s3 + $0xc] sm:$0xf]  ;;  %v10654_v21 = vor.u32 %v12707_v6, %v10651_v38 }
 0x4f9   : > { %v6146_v25 = vpop.f32.mrf.mxu2  ;;  %6514 = vmatpush.bf16.msra.mxu2 %v10654_v21 }
 0x4fa   : > { %v6147_v32 = vadd.f32 %v6146_v25, %v6098_v7  ;;  %v10139_v7 = vld [vmem:[%s19107_s3 + $0x28] sm:$0xf0] }
 0x4fb   : > { %v6195_v26 = vpop.f32.mrf.mxu3  ;;  %v6051_v50 = vpop.f32.mrf.mxu0  ;;  %v10907_v25 = vld [vmem:[%s19107_s3 + $0x628] sm:$0xf0] }
 0x4fc   : > { %v6052_v63 = vadd.f32 %v6051_v50, %v16020_v58  ;;  %v16193_v4 = vadd.f32 %v6195_v26, %v6147_v32  ;;  %v10142_v26 = vor.u32 %v12579_v8, %v10139_v7  ;;  %v10910_v50 = vor.u32 %v12771_v1, %v10907_v25  ;;  %v10395_v8 = vld [vmem:[%s19107_s3 + $0x228] sm:$0xf0] }
 0x4fd   : > { %v6100_v48 = vpop.f32.mrf.mxu1 }
 0x4fe   : > { %v6101_v56 = vadd.f32 %v6100_v48, %v6052_v63  ;;  %6246 = vmatmul.bf16.gmra.mxu0 %v19336_v13  ;;  %6344 = vmatmul.bf16.gmra.mxu2 %v19338_v33  ;;  %v19341_v13 = vld [vmem:[#allocation35_spill] sm:$0xff] }
 0x4ff   : > { %6416 = vmatpush.bf16.msra.mxu0 %v10142_v26  ;;  %6563 = vmatpush.bf16.msra.mxu3 %v10910_v50 }
 0x500   : > { %6295 = vmatmul.bf16.gmra.mxu1 %v19337_v52  ;;  %6393 = vmatmul.bf16.gmra.mxu3 %v19339_v28  ;;  %v12643_v52 = vld [vmem:[%s19107_s3 + $0x20c] sm:$0xf] }
 0x501   : > { %v6149_v32 = vpop.f32.mrf.mxu2 }
 0x502   : > { %v6150_v63 = vadd.f32 %v6149_v32, %v6101_v56  ;;  %v10398_v56 = vor.u32 %v12643_v52, %v10395_v8  ;;  %v13019_v52 = vld [vmem:[%s19107_s3 + $0xdcc] sm:$0xf] }
 0x503   : > { %v6198_v48 = vpop.f32.mrf.mxu3  ;;  %v6053_v28 = vpop.f32.mrf.mxu0 }
 0x504   : > { %v6054_v6 = vadd.f32 %v6053_v28, %v16020_v58  ;;  %v16218_v33 = vadd.f32 %v6198_v48, %v6150_v63  ;;  %6465 = vmatpush.bf16.msra.mxu1 %v10398_v56  ;;  %v19340_v48 = vld [vmem:[#allocation34_spill] sm:$0xff]  ;;  %v13083_v56 = vld [vmem:[%s19107_s3 + $0xfcc] sm:$0xf] }
 0x505   : > { %v6102_v38 = vpop.f32.mrf.mxu1 }
 0x506   : > { %v6103_v7 = vadd.f32 %v6102_v38, %v6054_v6  ;;  %v11899_v6 = vld [vmem:[%s19107_s3 + $0xde8] sm:$0xf0] }
 0x507   : > { %v12891_v38 = vld [vmem:[%s19107_s3 + $0x9cc] sm:$0xf]  ;;  %v11902_v8 = vor.u32 %v13019_v52, %v11899_v6 }
 0x509   : > { %v6151_v1 = vpop.f32.mrf.mxu2  ;;  %6703 = vmatpush.bf16.msrb.mxu2 %v11902_v8 }
 0x50a   : > { %v6152_v21 = vadd.f32 %v6151_v1, %v6103_v7  ;;  %v11387_v7 = vld [vmem:[%s19107_s3 + $0x9e8] sm:$0xf0] }
 0x50b   : > { %v6200_v25 = vpop.f32.mrf.mxu3  ;;  %v6056_v28 = vpop.f32.mrf.mxu0  ;;  %v12155_v1 = vld [vmem:[%s19107_s3 + $0xfe8] sm:$0xf0] }
 0x50c   : > { %v6057_v32 = vadd.f32 %v6056_v28, %v16020_v58  ;;  %v16227_v50 = vadd.f32 %v6200_v25, %v6152_v21  ;;  %v11390_v25 = vor.u32 %v12891_v38, %v11387_v7  ;;  %v12158_v28 = vor.u32 %v13083_v56, %v12155_v1  ;;  %v11643_v38 = vld [vmem:[%s19107_s3 + $0xbe8] sm:$0xf0] }
 0x50d   : > { %v6105_v26 = vpop.f32.mrf.mxu1 }
 0x50e   : > { %v6106_v63 = vadd.f32 %v6105_v26, %v6057_v32  ;;  %6251 = vmatmul.bf16.gmra.mxu0 %v19340_v48  ;;  %6349 = vmatmul.bf16.gmra.mxu2 %v19342_v53  ;;  %v12955_v48 = vld [vmem:[%s19107_s3 + $0xbcc] sm:$0xf] }
 0x50f   : > { %6605 = vmatpush.bf16.msrb.mxu0 %v11390_v25  ;;  %6752 = vmatpush.bf16.msrb.mxu3 %v12158_v28 }
 0x510   : > { %6300 = vmatmul.bf16.gmra.mxu1 %v19341_v13  ;;  %6398 = vmatmul.bf16.gmra.mxu3 %v19343_v41 }
 0x511   : > { %v6154_v21 = vpop.f32.mrf.mxu2 }
 0x512   : > { %v6155_v32 = vadd.f32 %v6154_v21, %v6106_v63  ;;  %v11646_v63 = vor.u32 %v12955_v48, %v11643_v38  ;;  %v11867_v48 = vld [vmem:[%s19107_s3 + $0xda8] sm:$0xf0] }
 0x513   : > { %v6203_v26 = vpop.f32.mrf.mxu3  ;;  %v6058_v41 = vpop.f32.mrf.mxu0  ;;  %v12883_v38 = vld [vmem:[%s19107_s3 + $0x98c] sm:$0xf] }
 0x514   : > { %v6059_v52 = vadd.f32 %v6058_v41, %v16020_v58  ;;  %v16252_v53 = vadd.f32 %v6203_v26, %v6155_v32  ;;  %6654 = vmatpush.bf16.msrb.mxu1 %v11646_v63  ;;  %v19344_v32 = vld [vmem:[#allocation36_spill] sm:$0xff]  ;;  %v19345_v26 = vld [vmem:[#allocation37_spill] sm:$0xff] }
 0x515   : > { %v6107_v6 = vpop.f32.mrf.mxu1 }
 0x516   : > { %v6108_v13 = vadd.f32 %v6107_v6, %v6059_v52  ;;  %v19346_v52 = vld [vmem:[#allocation52_spill] sm:$0xff]  ;;  %v19347_v6 = vld [vmem:[#allocation53_spill] sm:$0xff] }
 0x519   : > { %v6156_v7 = vpop.f32.mrf.mxu2 }
 0x51a   : > { %v6157_v8 = vadd.f32 %v6156_v7, %v6108_v13  ;;  %v13011_v13 = vld [vmem:[%s19107_s3 + $0xd8c] sm:$0xf] }
 0x51b   : > { %v6205_v56 = vpop.f32.mrf.mxu3  ;;  %v6061_v41 = vpop.f32.mrf.mxu0  ;;  %v11870_v7 = vor.u32 %v13011_v13, %v11867_v48 }
 0x51c   : > { %v6062_v1 = vadd.f32 %v6061_v41, %v16020_v58  ;;  %v16261_v25 = vadd.f32 %v6205_v56, %v6157_v8  ;;  %v11355_v8 = vld [vmem:[%s19107_s3 + $0x9a8] sm:$0xf0] }
 0x51d   : > { %v6110_v21 = vpop.f32.mrf.mxu1  ;;  %v13075_v56 = vld [vmem:[%s19107_s3 + $0xf8c] sm:$0xf]  ;;  %6704 = vmatpush.bf16.msrb.mxu2 %v11870_v7 }
 0x51e   : > { %v6111_v28 = vadd.f32 %v6110_v21, %v6062_v1  ;;  %6256 = vmatmul.bf16.gmra.mxu0 %v19344_v32  ;;  %6354 = vmatmul.bf16.gmra.mxu2 %v19346_v52  ;;  %v12123_v41 = vld [vmem:[%s19107_s3 + $0xfa8] sm:$0xf0]  ;;  %v11358_v52 = vor.u32 %v12883_v38, %v11355_v8 }
 0x520   : > { %6305 = vmatmul.bf16.gmra.mxu1 %v19345_v26  ;;  %6403 = vmatmul.bf16.gmra.mxu3 %v19347_v6  ;;  %v12126_v26 = vor.u32 %v13075_v56, %v12123_v41 }
 0x521   : > { %v6159_v63 = vpop.f32.mrf.mxu2  ;;  %6606 = vmatpush.bf16.msrb.mxu0 %v11358_v52 }
 0x522   : > { %v6160_v1 = vadd.f32 %v6159_v63, %v6111_v28  ;;  %6753 = vmatpush.bf16.msrb.mxu3 %v12126_v26  ;;  %v11611_v28 = vld [vmem:[%s19107_s3 + $0xba8] sm:$0xf0]  ;;  %v19348_v26 = vld [vmem:[#allocation8_spill] sm:$0xff] }
 0x523   : > { %v6208_v21 = vpop.f32.mrf.mxu3  ;;  %v6063_v6 = vpop.f32.mrf.mxu0  ;;  %v11614_v63 = vor.u32 %v12947_v37, %v11611_v28  ;;  %v11835_v37 = vld [vmem:[%s19107_s3 + $0xd68] sm:$0xf0] }
 0x524   : > { %v6064_v32 = vadd.f32 %v6063_v6, %v16020_v58  ;;  %v16286_v48 = vadd.f32 %v6208_v21, %v6160_v1  ;;  %v11323_v1 = vld [vmem:[%s19107_s3 + $0x968] sm:$0xf0] }
 0x525   : > { %v6112_v13 = vpop.f32.mrf.mxu1  ;;  %6655 = vmatpush.bf16.msrb.mxu1 %v11614_v63  ;;  %v13067_v21 = vld [vmem:[%s19107_s3 + $0xf4c] sm:$0xf] }
 0x526   : > { %v6113_v14 = vadd.f32 %v6112_v13, %v6064_v32  ;;  %v12091_v13 = vld [vmem:[%s19107_s3 + $0xf68] sm:$0xf0] }
 0x529   : > { %v6161_v38 = vpop.f32.mrf.mxu2 }
 0x52a   : > { %v6162_v8 = vadd.f32 %v6161_v38, %v6113_v14  ;;  %v13003_v14 = vld [vmem:[%s19107_s3 + $0xd4c] sm:$0xf]  ;;  %v12094_v38 = vor.u32 %v13067_v21, %v12091_v13 }
 0x52b   : > { %v6210_v58 = vpop.f32.mrf.mxu3  ;;  %v6222_v6 = vpop.f32.mrf.mxu0  ;;  %v11838_v41 = vor.u32 %v13003_v14, %v11835_v37 }
 0x52c   : > { %v6223_v7 = vadd.f32 %v6222_v6, %v16048_v5  ;;  %v16295_v52 = vadd.f32 %v6210_v58, %v6162_v8  ;;  %v12875_v5 = vld [vmem:[%s19107_s3 + $0x94c] sm:$0xf]  ;;  %6754 = vmatpush.bf16.msrb.mxu3 %v12094_v38 }
 0x52d   : > { %v6271_v56 = vpop.f32.mrf.mxu1  ;;  %v11326_v63 = vor.u32 %v12875_v5, %v11323_v1  ;;  %6705 = vmatpush.bf16.msrb.mxu2 %v11838_v41  ;;  %v11579_v5 = vld [vmem:[%s19107_s3 + $0xb68] sm:$0xf0] }
 0x52e   : > { %v6272_v32 = vadd.f32 %v6271_v56, %v6223_v7  ;;  %6417 = vmatmul.bf16.vlgmr.msra.gmra.mxu0 %v13809_v61  ;;  %6515 = vmatmul.bf16.vlgmr.msra.gmra.mxu2 %v14103_v20 }
 0x52f   : > { %6607 = vmatpush.bf16.msrb.mxu0 %v11326_v63 }
 0x530   : > { %6466 = vmatmul.bf16.vlgmr.msra.gmra.mxu1 %v13817_v12  ;;  %6564 = vmatmul.bf16.vlgmr.msra.gmra.mxu3 %v19348_v26  ;;  %v12939_v26 = vld [vmem:[%s19107_s3 + $0xb4c] sm:$0xf] }
 0x531   : > { %v6320_v28 = vpop.f32.mrf.mxu2  ;;  %v11582_v1 = vor.u32 %v12939_v26, %v11579_v5  ;;  %v12995_v26 = vld [vmem:[%s19107_s3 + $0xd0c] sm:$0xf] }
 0x532   : > { %v6321_v8 = vadd.f32 %v6320_v28, %v6272_v32  ;;  %v12059_v5 = vld [vmem:[%s19107_s3 + $0xf28] sm:$0xf0] }
 0x533   : > { %v6369_v58 = vpop.f32.mrf.mxu3  ;;  %v6224_v6 = vpop.f32.mrf.mxu0  ;;  %6656 = vmatpush.bf16.msrb.mxu1 %v11582_v1 }
 0x534   : > { %v6225_v7 = vadd.f32 %v6224_v6, %v16057_v57  ;;  %v6370_v14 = vadd.f32 %v6369_v58, %v6321_v8  ;;  %v12867_v6 = vld [vmem:[%s19107_s3 + $0x90c] sm:$0xf] }
 0x535   : > { %v6273_v56 = vpop.f32.mrf.mxu1 }
 0x536   : > { %v6274_v37 = vadd.f32 %v6273_v56, %v6225_v7  ;;  %v8371_v8 = vmax.f32 %v6370_v14, 0.0  ;;  %v11291_v14 = vld [vmem:[%s19107_s3 + $0x928] sm:$0xf0] }
 0x539   : > { %v6322_v32 = vpop.f32.mrf.mxu2 }
 0x53a   : > { %v6323_v21 = vadd.f32 %v6322_v32, %v6274_v37  ;;  %v13059_v37 = vld [vmem:[%s19107_s3 + $0xf0c] sm:$0xf]  ;;  %v11294_v32 = vor.u32 %v12867_v6, %v11291_v14 }
 0x53b   : > { %v6371_v41 = vpop.f32.mrf.mxu3  ;;  %v6227_v13 = vpop.f32.mrf.mxu0 }
 0x53c   : > { %v6228_v57 = vadd.f32 %v6227_v13, %v16082_v30  ;;  %v6372_v63 = vadd.f32 %v6371_v41, %v6323_v21  ;;  %v11803_v30 = vld [vmem:[%s19107_s3 + $0xd28] sm:$0xf0]  ;;  %v12062_v21 = vor.u32 %v13059_v37, %v12059_v5  ;;  %6608 = vmatpush.bf16.msrb.mxu0 %v11294_v32 }
 0x53d   : > { %v6276_v28 = vpop.f32.mrf.mxu1  ;;  %v11806_v56 = vor.u32 %v12995_v26, %v11803_v30  ;;  %v12931_v26 = vld [vmem:[%s19107_s3 + $0xb0c] sm:$0xf] }
 0x53e   : > { %v6277_v38 = vadd.f32 %v6276_v28, %v6228_v57  ;;  %6422 = vmatmul.bf16.gmra.mxu0 %v13845_v45  ;;  %v8379_v58 = vmax.f32 %v6372_v63, 0.0  ;;  %6520 = vmatmul.bf16.gmra.mxu2 %v19269_v42  ;;  %v11547_v30 = vld [vmem:[%s19107_s3 + $0xb28] sm:$0xf0] }
 0x53f   : > { %6706 = vmatpush.bf16.msrb.mxu2 %v11806_v56  ;;  %6755 = vmatpush.bf16.msrb.mxu3 %v12062_v21  ;;  %v11550_v6 = vor.u32 %v12931_v26, %v11547_v30  ;;  %v13051_v26 = vld [vmem:[%s19107_s3 + $0xecc] sm:$0xf] }
 0x540   : > { %6471 = vmatmul.bf16.gmra.mxu1 %v13853_v62  ;;  %6569 = vmatmul.bf16.gmra.mxu3 %v19270_v55  ;;  %v16340_v7 = vpack.c.bf16 %v8379_v58, %v8371_v8  ;;  %v12027_v30 = vld [vmem:[%s19107_s3 + $0xee8] sm:$0xf0] }
 0x541   : > { %v6325_v1 = vpop.f32.mrf.mxu2  ;;  %6657 = vmatpush.bf16.msrb.mxu1 %v11550_v6 }
 0x542   : > { %19349 = vst [vmem:[#allocation21_spill] sm:$0xff] %v16340_v7  ;;  %v6326_v41 = vadd.f32 %v6325_v1, %v6277_v38 }
 0x543   : > { %v6374_v13 = vpop.f32.mrf.mxu3  ;;  %v6229_v57 = vpop.f32.mrf.mxu0 }
 0x544   : > { %v6230_v28 = vadd.f32 %v6229_v57, %v16091_v19  ;;  %v6375_v8 = vadd.f32 %v6374_v13, %v6326_v41  ;;  %v19350_v13 = vld [vmem:[#allocation11_spill] sm:$0xff]  ;;  %v19351_v57 = vld [vmem:[#allocation12_spill] sm:$0xff] }
 0x545   : > { %v6278_v63 = vpop.f32.mrf.mxu1 }
 0x546   : > { %v6279_v58 = vadd.f32 %v6278_v63, %v6230_v28  ;;  %v8387_v21 = vmax.f32 %v6375_v8, 0.0  ;;  %v12987_v28 = vld [vmem:[%s19107_s3 + $0xccc] sm:$0xf] }
 0x547   : > { %v12859_v63 = vld [vmem:[%s19107_s3 + $0x8cc] sm:$0xf] }
 0x549   : > { %v6327_v38 = vpop.f32.mrf.mxu2 }
 0x54a   : > { %v6328_v14 = vadd.f32 %v6327_v38, %v6279_v58  ;;  %v11259_v58 = vld [vmem:[%s19107_s3 + $0x8e8] sm:$0xf0] }
 0x54b   : > { %v6376_v56 = vpop.f32.mrf.mxu3  ;;  %v6232_v37 = vpop.f32.mrf.mxu0 }
 0x54c   : > { %v6233_v19 = vadd.f32 %v6232_v37, %v16116_v18  ;;  %v6377_v1 = vadd.f32 %v6376_v56, %v6328_v14  ;;  %v11771_v18 = vld [vmem:[%s19107_s3 + $0xce8] sm:$0xf0]  ;;  %v11262_v14 = vor.u32 %v12859_v63, %v11259_v58  ;;  %v12030_v56 = vor.u32 %v13051_v26, %v12027_v30 }
 0x54d   : > { %v6281_v5 = vpop.f32.mrf.mxu1  ;;  %v11774_v8 = vor.u32 %v12987_v28, %v11771_v18 }
 0x54e   : > { %v6282_v32 = vadd.f32 %v6281_v5, %v6233_v19  ;;  %6427 = vmatmul.bf16.gmra.mxu0 %v13881_v35  ;;  %v8395_v41 = vmax.f32 %v6377_v1, 0.0  ;;  %6525 = vmatmul.bf16.gmra.mxu2 %v19350_v13 }
 0x54f   : > { %6707 = vmatpush.bf16.msrb.mxu2 %v11774_v8  ;;  %6609 = vmatpush.bf16.msrb.mxu0 %v11262_v14 }
 0x550   : > { %6476 = vmatmul.bf16.gmra.mxu1 %v19310_v47  ;;  %6574 = vmatmul.bf16.gmra.mxu3 %v19351_v57  ;;  %v16381_v6 = vpack.c.bf16 %v8395_v41, %v8387_v21  ;;  %v12923_v57 = vld [vmem:[%s19107_s3 + $0xacc] sm:$0xf] }
 0x551   : > { %v6330_v38 = vpop.f32.mrf.mxu2  ;;  %6756 = vmatpush.bf16.msrb.mxu3 %v12030_v56  ;;  %v11515_v21 = vld [vmem:[%s19107_s3 + $0xae8] sm:$0xf0] }
 0x552   : > { %19352 = vst [vmem:[#allocation22_spill] sm:$0xff] %v16381_v6  ;;  %v6331_v37 = vadd.f32 %v6330_v38, %v6282_v32  ;;  %v11518_v41 = vor.u32 %v12923_v57, %v11515_v21  ;;  %v12851_v57 = vld [vmem:[%s19107_s3 + $0x88c] sm:$0xf]  ;;  %v19369_v6 = vld [vmem:[#allocation29_spill] sm:$0xff] }
 0x553   : > { %v6379_v19 = vpop.f32.mrf.mxu3  ;;  %v6234_v5 = vpop.f32.mrf.mxu0 }
 0x554   : > { %v6235_v1 = vadd.f32 %v6234_v5, %v16125_v46  ;;  %v6380_v18 = vadd.f32 %v6379_v19, %v6331_v37  ;;  %6658 = vmatpush.bf16.msrb.mxu1 %v11518_v41  ;;  %v11227_v19 = vld [vmem:[%s19107_s3 + $0x8a8] sm:$0xf0] }
 0x555   : > { %v6283_v28 = vpop.f32.mrf.mxu1  ;;  %v13043_v5 = vld [vmem:[%s19107_s3 + $0xe8c] sm:$0xf]  ;;  %v11230_v21 = vor.u32 %v12851_v57, %v11227_v19 }
 0x556   : > { %v6284_v7 = vadd.f32 %v6283_v28, %v6235_v1  ;;  %v8403_v14 = vmax.f32 %v6380_v18, 0.0  ;;  %v11995_v1 = vld [vmem:[%s19107_s3 + $0xea8] sm:$0xf0] }
 0x557   : > { %v11998_v41 = vor.u32 %v13043_v5, %v11995_v1  ;;  %6610 = vmatpush.bf16.msrb.mxu0 %v11230_v21 }
 0x559   : > { %v6332_v32 = vpop.f32.mrf.mxu2  ;;  %6757 = vmatpush.bf16.msrb.mxu3 %v11998_v41  ;;  %v12971_v41 = vld [vmem:[%s19107_s3 + $0xc4c] sm:$0xf] }
 0x55a   : > { %v6333_v63 = vadd.f32 %v6332_v32, %v6284_v7  ;;  %v12979_v7 = vld [vmem:[%s19107_s3 + $0xc8c] sm:$0xf] }
 0x55b   : > { %v6381_v8 = vpop.f32.mrf.mxu3  ;;  %v6237_v58 = vpop.f32.mrf.mxu0 }
 0x55c   : > { %v6238_v46 = vadd.f32 %v6237_v58, %v16150_v17  ;;  %v6382_v30 = vadd.f32 %v6381_v8, %v6333_v63  ;;  %v11739_v17 = vld [vmem:[%s19107_s3 + $0xca8] sm:$0xf0] }
 0x55d   : > { %v6286_v26 = vpop.f32.mrf.mxu1  ;;  %v11742_v37 = vor.u32 %v12979_v7, %v11739_v17  ;;  %v12915_v7 = vld [vmem:[%s19107_s3 + $0xa8c] sm:$0xf] }
 0x55e   : > { %v6287_v38 = vadd.f32 %v6286_v26, %v6238_v46  ;;  %6432 = vmatmul.bf16.gmra.mxu0 %v13917_v23  ;;  %v8411_v56 = vmax.f32 %v6382_v30, 0.0  ;;  %6530 = vmatmul.bf16.gmra.mxu2 %v19275_v9 }
 0x55f   : > { %6708 = vmatpush.bf16.msrb.mxu2 %v11742_v37 }
 0x560   : > { %6481 = vmatmul.bf16.gmra.mxu1 %v13925_v40  ;;  %6579 = vmatmul.bf16.gmra.mxu3 %v19276_v43  ;;  %v16413_v28 = vpack.c.bf16 %v8411_v56, %v8403_v14  ;;  %v11483_v14 = vld [vmem:[%s19107_s3 + $0xaa8] sm:$0xf0] }
 0x561   : > { %v6335_v18 = vpop.f32.mrf.mxu2  ;;  %v11486_v56 = vor.u32 %v12915_v7, %v11483_v14 }
 0x562   : > { %19353 = vst [vmem:[#allocation11_spill] sm:$0xff] %v16413_v28  ;;  %v6336_v32 = vadd.f32 %v6335_v18, %v6287_v38  ;;  %v10497_v28 = vld [vmem:[%s19107_s3 + $0x2d0] sm:$0xf] }
 0x563   : > { %v6384_v63 = vpop.f32.mrf.mxu3  ;;  %v6239_v8 = vpop.f32.mrf.mxu0  ;;  %6659 = vmatpush.bf16.msrb.mxu1 %v11486_v56 }
 0x564   : > { %v6240_v58 = vadd.f32 %v6239_v8, %v16159_v59  ;;  %v6385_v26 = vadd.f32 %v6384_v63, %v6336_v32  ;;  %v12843_v32 = vld [vmem:[%s19107_s3 + $0x84c] sm:$0xf] }
 0x565   : > { %v6288_v46 = vpop.f32.mrf.mxu1  ;;  %v11195_v8 = vld [vmem:[%s19107_s3 + $0x868] sm:$0xf0] }
 0x566   : > { %v6289_v30 = vadd.f32 %v6288_v46, %v6240_v58  ;;  %v8419_v18 = vmax.f32 %v6385_v26, 0.0  ;;  %v13035_v58 = vld [vmem:[%s19107_s3 + $0xe4c] sm:$0xf]  ;;  %v11198_v7 = vor.u32 %v12843_v32, %v11195_v8 }
 0x567   : > { %v11963_v46 = vld [vmem:[%s19107_s3 + $0xe68] sm:$0xf0] }
 0x568   : > { %v11966_v14 = vor.u32 %v13035_v58, %v11963_v46  ;;  %6611 = vmatpush.bf16.msrb.mxu0 %v11198_v7  ;;  %v12963_v7 = vld [vmem:[%s19107_s3 + $0xc0c] sm:$0xf] }
 0x569   : > { %v6337_v38 = vpop.f32.mrf.mxu2 }
 0x56a   : > { %v6338_v17 = vadd.f32 %v6337_v38, %v6289_v30  ;;  %6758 = vmatpush.bf16.msrb.mxu3 %v11966_v14  ;;  %v12835_v14 = vld [vmem:[%s19107_s3 + $0x80c] sm:$0xf] }
 0x56b   : > { %v6386_v57 = vpop.f32.mrf.mxu3  ;;  %v6242_v37 = vpop.f32.mrf.mxu0 }
 0x56c   : > { %v6243_v59 = vadd.f32 %v6242_v37, %v16184_v29  ;;  %v6387_v5 = vadd.f32 %v6386_v57, %v6338_v17  ;;  %v11707_v29 = vld [vmem:[%s19107_s3 + $0xc68] sm:$0xf0] }
 0x56d   : > { %v6291_v19 = vpop.f32.mrf.mxu1  ;;  %v11710_v63 = vor.u32 %v12971_v41, %v11707_v29 }
 0x56e   : > { %v6292_v1 = vadd.f32 %v6291_v19, %v6243_v59  ;;  %6437 = vmatmul.bf16.gmra.mxu0 %v13953_v16  ;;  %v8427_v21 = vmax.f32 %v6387_v5, 0.0  ;;  %6535 = vmatmul.bf16.gmra.mxu2 %v19278_v54  ;;  %v12907_v5 = vld [vmem:[%s19107_s3 + $0xa4c] sm:$0xf] }
 0x56f   : > { %6709 = vmatpush.bf16.msrb.mxu2 %v11710_v63 }
 0x570   : > { %6486 = vmatmul.bf16.gmra.mxu1 %v13961_v36  ;;  %6584 = vmatmul.bf16.gmra.mxu3 %v19279_v22  ;;  %v16445_v26 = vpack.c.bf16 %v8427_v21, %v8419_v18  ;;  %v11451_v18 = vld [vmem:[%s19107_s3 + $0xa68] sm:$0xf0] }
 0x571   : > { %v6340_v30 = vpop.f32.mrf.mxu2  ;;  %v11454_v21 = vor.u32 %v12907_v5, %v11451_v18 }
 0x572   : > { %19354 = vst [vmem:[#allocation54_spill] sm:$0xff] %v16445_v26  ;;  %v6341_v56 = vadd.f32 %v6340_v30, %v6292_v1 }
 0x573   : > { %v6389_v38 = vpop.f32.mrf.mxu3  ;;  %v6244_v17 = vpop.f32.mrf.mxu0  ;;  %6660 = vmatpush.bf16.msrb.mxu1 %v11454_v21 }
 0x574   : > { %v6245_v57 = vadd.f32 %v6244_v17, %v16193_v4  ;;  %v6390_v59 = vadd.f32 %v6389_v38, %v6341_v56  ;;  %v11163_v38 = vld [vmem:[%s19107_s3 + $0x828] sm:$0xf0] }
 0x575   : > { %v6293_v37 = vpop.f32.mrf.mxu1  ;;  %v13027_v17 = vld [vmem:[%s19107_s3 + $0xe0c] sm:$0xf] }
 0x576   : > { %v6294_v19 = vadd.f32 %v6293_v37, %v6245_v57  ;;  %v8435_v46 = vmax.f32 %v6390_v59, 0.0  ;;  %v11931_v57 = vld [vmem:[%s19107_s3 + $0xe28] sm:$0xf0] }
 0x577   : > { %v11934_v5 = vor.u32 %v13027_v17, %v11931_v57 }
 0x579   : > { %v6342_v1 = vpop.f32.mrf.mxu2  ;;  %6759 = vmatpush.bf16.msrb.mxu3 %v11934_v5 }
 0x57a   : > { %v6343_v41 = vadd.f32 %v6342_v1, %v6294_v19  ;;  %v11166_v19 = vor.u32 %v12835_v14, %v11163_v38 }
 0x57b   : > { %v6391_v29 = vpop.f32.mrf.mxu3  ;;  %v6247_v32 = vpop.f32.mrf.mxu0 }
 0x57c   : > { %v6248_v4 = vadd.f32 %v6247_v32, %v16218_v33  ;;  %v6392_v8 = vadd.f32 %v6391_v29, %v6343_v41  ;;  %v11675_v33 = vld [vmem:[%s19107_s3 + $0xc28] sm:$0xf0]  ;;  %6612 = vmatpush.bf16.msrb.mxu0 %v11166_v19  ;;  %v10369_v19 = vld [vmem:[%s19107_s3 + $0x1d0] sm:$0xf] }
 0x57d   : > { %v6296_v63 = vpop.f32.mrf.mxu1  ;;  %v11678_v56 = vor.u32 %v12963_v7, %v11675_v33 }
 0x57e   : > { %v6297_v58 = vadd.f32 %v6296_v63, %v6248_v4  ;;  %6442 = vmatmul.bf16.gmra.mxu0 %v13989_v10  ;;  %v8443_v30 = vmax.f32 %v6392_v8, 0.0  ;;  %6540 = vmatmul.bf16.gmra.mxu2 %v19282_v27  ;;  %v12899_v63 = vld [vmem:[%s19107_s3 + $0xa0c] sm:$0xf] }
 0x57f   : > { %6710 = vmatpush.bf16.msrb.mxu2 %v11678_v56  ;;  %v11419_v8 = vld [vmem:[%s19107_s3 + $0xa28] sm:$0xf0] }
 0x580   : > { %6491 = vmatmul.bf16.gmra.mxu1 %v19281_v2  ;;  %6589 = vmatmul.bf16.gmra.mxu3 %v19316_v0  ;;  %v16477_v37 = vpack.c.bf16 %v8443_v30, %v8435_v46  ;;  %v11422_v46 = vor.u32 %v12899_v63, %v11419_v8 }
 0x581   : > { %v6345_v59 = vpop.f32.mrf.mxu2 }
 0x582   : > { %19355 = vst [vmem:[#allocation55_spill] sm:$0xff] %v16477_v37  ;;  %v6346_v18 = vadd.f32 %v6345_v59, %v6297_v58  ;;  %6661 = vmatpush.bf16.msrb.mxu1 %v11422_v46  ;;  %v10881_v59 = vld [vmem:[%s19107_s3 + $0x5d0] sm:$0xf] }
 0x583   : > { %v6394_v21 = vpop.f32.mrf.mxu3  ;;  %v6249_v1 = vpop.f32.mrf.mxu0 }
 0x584   : > { %v6250_v41 = vadd.f32 %v6249_v1, %v16227_v50  ;;  %v6395_v32 = vadd.f32 %v6394_v21, %v6346_v18  ;;  %v12640_v18 = vld [vmem:[%s19107_s3 + $0x1ec] sm:$0xf0] }
 0x585   : > { %v6298_v29 = vpop.f32.mrf.mxu1  ;;  %v11137_v21 = vld [vmem:[%s19107_s3 + $0x7d0] sm:$0xf] }
 0x586   : > { %v6299_v4 = vadd.f32 %v6298_v29, %v6250_v41  ;;  %v8451_v17 = vmax.f32 %v6395_v32, 0.0  ;;  %v12832_v1 = vld [vmem:[%s19107_s3 + $0x7ec] sm:$0xf0]  ;;  %v10370_v32 = vor.u32 %v12640_v18, %v10369_v19 }
 0x588   : > { %6801 = vmatpush.bf16.msra.mxu0 %v10370_v32 }
 0x589   : > { %v6347_v58 = vpop.f32.mrf.mxu2 }
 0x58a   : > { %v6348_v30 = vadd.f32 %v6347_v58, %v6299_v4  ;;  %v11138_v4 = vor.u32 %v12832_v1, %v11137_v21  ;;  %v10849_v1 = vld [vmem:[%s19107_s3 + $0x590] sm:$0xf] }
 0x58b   : > { %v6396_v7 = vpop.f32.mrf.mxu3  ;;  %v6252_v33 = vpop.f32.mrf.mxu0 }
 0x58c   : > { %v6253_v50 = vadd.f32 %v6252_v33, %v16252_v53  ;;  %v6397_v56 = vadd.f32 %v6396_v7, %v6348_v30  ;;  %v12768_v53 = vld [vmem:[%s19107_s3 + $0x5ec] sm:$0xf0]  ;;  %6948 = vmatpush.bf16.msra.mxu3 %v11138_v4 }
 0x58d   : > { %v6301_v14 = vpop.f32.mrf.mxu1  ;;  %v10882_v5 = vor.u32 %v12768_v53, %v10881_v59  ;;  %v10625_v33 = vld [vmem:[%s19107_s3 + $0x3d0] sm:$0xf] }
 0x58e   : > { %v6302_v38 = vadd.f32 %v6301_v14, %v6253_v50  ;;  %6447 = vmatmul.bf16.gmra.mxu0 %v19285_v15  ;;  %v8459_v57 = vmax.f32 %v6397_v56, 0.0  ;;  %6545 = vmatmul.bf16.gmra.mxu2 %v19287_v51  ;;  %v12704_v50 = vld [vmem:[%s19107_s3 + $0x3ec] sm:$0xf0] }
 0x58f   : > { %6899 = vmatpush.bf16.msra.mxu2 %v10882_v5  ;;  %v10626_v56 = vor.u32 %v12704_v50, %v10625_v33  ;;  %v12632_v4 = vld [vmem:[%s19107_s3 + $0x1ac] sm:$0xf0] }
 0x590   : > { %6496 = vmatmul.bf16.gmra.mxu1 %v19286_v39  ;;  %6594 = vmatmul.bf16.gmra.mxu3 %v19318_v3  ;;  %v16509_v41 = vpack.c.bf16 %v8459_v57, %v8451_v17 }
 0x591   : > { %v6350_v29 = vpop.f32.mrf.mxu2  ;;  %6850 = vmatpush.bf16.msra.mxu1 %v10626_v56 }
 0x592   : > { %19356 = vst [vmem:[#allocation56_spill] sm:$0xff] %v16509_v41  ;;  %v6351_v63 = vadd.f32 %v6350_v29, %v6302_v38  ;;  %v10337_v29 = vld [vmem:[%s19107_s3 + $0x190] sm:$0xf]  ;;  %v19367_v41 = vld [vmem:[#allocation43_spill] sm:$0xff] }
 0x593   : > { %v6399_v8 = vpop.f32.mrf.mxu3  ;;  %v6254_v46 = vpop.f32.mrf.mxu0 }
 0x594   : > { %v6255_v58 = vadd.f32 %v6254_v46, %v16261_v25  ;;  %v6400_v7 = vadd.f32 %v6399_v8, %v6351_v63  ;;  %v11105_v63 = vld [vmem:[%s19107_s3 + $0x790] sm:$0xf] }
 0x595   : > { %v6303_v30 = vpop.f32.mrf.mxu1  ;;  %v12824_v8 = vld [vmem:[%s19107_s3 + $0x7ac] sm:$0xf0] }
 0x596   : > { %v6304_v14 = vadd.f32 %v6303_v30, %v6255_v58  ;;  %v8467_v18 = vmax.f32 %v6400_v7, 0.0  ;;  %v10338_v30 = vor.u32 %v12632_v4, %v10337_v29  ;;  %v11106_v7 = vor.u32 %v12824_v8, %v11105_v63 }
 0x598   : > { %6802 = vmatpush.bf16.msra.mxu0 %v10338_v30  ;;  %6949 = vmatpush.bf16.msra.mxu3 %v11106_v7  ;;  %v10817_v30 = vld [vmem:[%s19107_s3 + $0x550] sm:$0xf] }
 0x599   : > { %v6352_v38 = vpop.f32.mrf.mxu2  ;;  %v12752_v7 = vld [vmem:[%s19107_s3 + $0x56c] sm:$0xf0] }
 0x59a   : > { %v6353_v17 = vadd.f32 %v6352_v38, %v6304_v14 }
 0x59b   : > { %v6401_v57 = vpop.f32.mrf.mxu3  ;;  %v6257_v59 = vpop.f32.mrf.mxu0 }
 0x59c   : > { %v6258_v25 = vadd.f32 %v6257_v59, %v16286_v48  ;;  %v6402_v19 = vadd.f32 %v6401_v57, %v6353_v17  ;;  %v12760_v48 = vld [vmem:[%s19107_s3 + $0x5ac] sm:$0xf0] }
 0x59d   : > { %v6306_v53 = vpop.f32.mrf.mxu1  ;;  %v10850_v32 = vor.u32 %v12760_v48, %v10849_v1  ;;  %v10593_v57 = vld [vmem:[%s19107_s3 + $0x390] sm:$0xf] }
 0x59e   : > { %v6307_v5 = vadd.f32 %v6306_v53, %v6258_v25  ;;  %6452 = vmatmul.bf16.gmra.mxu0 %v19290_v44  ;;  %v8475_v21 = vmax.f32 %v6402_v19, 0.0  ;;  %6550 = vmatmul.bf16.gmra.mxu2 %v19320_v34  ;;  %v12696_v59 = vld [vmem:[%s19107_s3 + $0x3ac] sm:$0xf0]  ;;  %v13166_v19 = vld [vmem:[%s19108_s4] sm:$0xff] }
 0x59f   : > { %6900 = vmatpush.bf16.msra.mxu2 %v10850_v32  ;;  %v10594_v53 = vor.u32 %v12696_v59, %v10593_v57 }
 0x5a0   : > { %6501 = vmatmul.bf16.gmra.mxu1 %v19291_v60  ;;  %6599 = vmatmul.bf16.gmra.mxu3 %v19321_v24  ;;  %v16541_v46 = vpack.c.bf16 %v8475_v21, %v8467_v18 }
 0x5a1   : > { %v6355_v58 = vpop.f32.mrf.mxu2  ;;  %6851 = vmatpush.bf16.msra.mxu1 %v10594_v53 }
 0x5a2   : > { %19357 = vst [vmem:[#allocation57_spill] sm:$0xff] %v16541_v46  ;;  %v6356_v33 = vadd.f32 %v6355_v58, %v6307_v5  ;;  %v16553_v5 = vperm.slane %v13166_v19, 3  ;;  %v19358_v58 = vld [vmem:[#allocation39_spill] sm:$0xff]  ;;  %v19366_v46 = vld [vmem:[#allocation42_spill] sm:$0xff] }
 0x5a3   : > { %v6404_v50 = vpop.f32.mrf.mxu3  ;;  %v6259_v14 = vpop.f32.mrf.mxu0 }
 0x5a4   : > { %v6260_v56 = vadd.f32 %v6259_v14, %v16295_v52  ;;  %v6405_v17 = vadd.f32 %v6404_v50, %v6356_v33  ;;  %v10305_v33 = vld [vmem:[%s19107_s3 + $0x150] sm:$0xf]  ;;  %v10818_v50 = vor.u32 %v12752_v7, %v10817_v30 }
 0x5a5   : > { %v6308_v38 = vpop.f32.mrf.mxu1  ;;  %v12624_v14 = vld [vmem:[%s19107_s3 + $0x16c] sm:$0xf0] }
 0x5a6   : > { %v6309_v25 = vadd.f32 %v6308_v38, %v6260_v56  ;;  %v8483_v63 = vmax.f32 %v6405_v17, 0.0  ;;  %v11073_v56 = vld [vmem:[%s19107_s3 + $0x750] sm:$0xf]  ;;  %v10306_v59 = vor.u32 %v12624_v14, %v10305_v33  ;;  %6901 = vmatpush.bf16.msra.mxu2 %v10818_v50 }
 0x5a7   : > { %v12816_v38 = vld [vmem:[%s19107_s3 + $0x76c] sm:$0xf0] }
 0x5a8   : > { %6803 = vmatpush.bf16.msra.mxu0 %v10306_v59  ;;  %v19362_v59 = vld [vmem:[#allocation40_spill] sm:$0xff] }
 0x5a9   : > { %v6357_v52 = vpop.f32.mrf.mxu2 }
 0x5aa   : > { %v6358_v18 = vadd.f32 %v6357_v52, %v6309_v25  ;;  %v11074_v25 = vor.u32 %v12816_v38, %v11073_v56  ;;  %v19360_v38 = vld [vmem:[#allocation24_spill] sm:$0xff] }
 0x5ab   : > { %v6406_v21 = vpop.f32.mrf.mxu3  ;;  %v6418_v1 = vpop.f32.mrf.mxu0 }
 0x5ac   : > { %v6419_v48 = vadd.f32 %v6418_v1, %v16553_v5  ;;  %v6407_v32 = vadd.f32 %v6406_v21, %v6358_v18  ;;  %6950 = vmatpush.bf16.msra.mxu3 %v11074_v25  ;;  %v19363_v25 = vld [vmem:[#allocation41_spill] sm:$0xff] }
 0x5ad   : > { %v6467_v29 = vpop.f32.mrf.mxu1 }
 0x5ae   : > { %v6468_v4 = vadd.f32 %v6467_v29, %v6419_v48  ;;  %6613 = vmatmul.bf16.vlgmr.msrb.gmra.mxu0 %v14402_v49  ;;  %v8491_v8 = vmax.f32 %v6407_v32, 0.0  ;;  %6711 = vmatmul.bf16.vlgmr.msrb.gmra.mxu2 %v14696_v11  ;;  %v10561_v48 = vld [vmem:[%s19107_s3 + $0x350] sm:$0xf] }
 0x5af   : > { %v12688_v29 = vld [vmem:[%s19107_s3 + $0x36c] sm:$0xf0] }
 0x5b0   : > { %6662 = vmatmul.bf16.vlgmr.msrb.gmra.mxu1 %v14410_v31  ;;  %6760 = vmatmul.bf16.vlgmr.msrb.gmra.mxu3 %v19358_v58  ;;  %v16578_v17 = vpack.c.bf16 %v8491_v8, %v8483_v63  ;;  %v11617_v11 = vld [vmem:[%s19107_s3 + $0xb90] sm:$0xf] }
 0x5b1   : > { %v6516_v57 = vpop.f32.mrf.mxu2 }
 0x5b2   : > { %19359 = vst [vmem:[#allocation58_spill] sm:$0xff] %v16578_v17  ;;  %v6517_v53 = vadd.f32 %v6516_v57, %v6468_v4  ;;  %v10562_v4 = vor.u32 %v12688_v29, %v10561_v48  ;;  %v19361_v57 = vld [vmem:[#allocation25_spill] sm:$0xff]  ;;  %v11041_v48 = vld [vmem:[%s19107_s3 + $0x710] sm:$0xf]  ;;  %v19365_v17 = vld [vmem:[#allocation27_spill] sm:$0xff] }
 0x5b3   : > { %v6565_v19 = vpop.f32.mrf.mxu3  ;;  %v6420_v52 = vpop.f32.mrf.mxu0  ;;  %v12808_v29 = vld [vmem:[%s19107_s3 + $0x72c] sm:$0xf0] }
 0x5b4   : > { %v6421_v18 = vadd.f32 %v6420_v52, %v16553_v5  ;;  %v16581_v1 = vadd.f32 %v6565_v19, %v6517_v53  ;;  %6852 = vmatpush.bf16.msra.mxu1 %v10562_v4  ;;  %v10785_v53 = vld [vmem:[%s19107_s3 + $0x510] sm:$0xf] }
 0x5b5   : > { %v6469_v21 = vpop.f32.mrf.mxu1  ;;  %v12744_v19 = vld [vmem:[%s19107_s3 + $0x52c] sm:$0xf0] }
 0x5b6   : > { %v6470_v32 = vadd.f32 %v6469_v21, %v6421_v18  ;;  %v10273_v52 = vld [vmem:[%s19107_s3 + $0x110] sm:$0xf]  ;;  %v10786_v18 = vor.u32 %v12744_v19, %v10785_v53 }
 0x5b7   : > { %v12616_v21 = vld [vmem:[%s19107_s3 + $0x12c] sm:$0xf0] }
 0x5b8   : > { %v10274_v4 = vor.u32 %v12616_v21, %v10273_v52  ;;  %6902 = vmatpush.bf16.msra.mxu2 %v10786_v18  ;;  %v10529_v19 = vld [vmem:[%s19107_s3 + $0x310] sm:$0xf] }
 0x5b9   : > { %v6518_v63 = vpop.f32.mrf.mxu2  ;;  %v12680_v52 = vld [vmem:[%s19107_s3 + $0x32c] sm:$0xf0] }
 0x5ba   : > { %v6519_v8 = vadd.f32 %v6518_v63, %v6470_v32  ;;  %v11042_v63 = vor.u32 %v12808_v29, %v11041_v48  ;;  %6804 = vmatpush.bf16.msra.mxu0 %v10274_v4 }
 0x5bb   : > { %v6567_v30 = vpop.f32.mrf.mxu3  ;;  %v6423_v7 = vpop.f32.mrf.mxu0 }
 0x5bc   : > { %v6424_v33 = vadd.f32 %v6423_v7, %v16553_v5  ;;  %v16590_v14 = vadd.f32 %v6567_v30, %v6519_v8  ;;  %6951 = vmatpush.bf16.msra.mxu3 %v11042_v63 }
 0x5bd   : > { %v6472_v50 = vpop.f32.mrf.mxu1 }
 0x5be   : > { %v6473_v56 = vadd.f32 %v6472_v50, %v6424_v33  ;;  %6618 = vmatmul.bf16.gmra.mxu0 %v19360_v38  ;;  %6716 = vmatmul.bf16.gmra.mxu2 %v19362_v59  ;;  %v19379_v59 = vld [vmem:[#allocation49_spill] sm:$0xff]  ;;  %v19383_v38 = vld [vmem:[#allocation51_spill] sm:$0xff] }
 0x5c0   : > { %6667 = vmatmul.bf16.gmra.mxu1 %v19361_v57  ;;  %6765 = vmatmul.bf16.gmra.mxu3 %v19363_v25  ;;  %v19378_v25 = vld [vmem:[#allocation48_spill] sm:$0xff]  ;;  %v19382_v57 = vld [vmem:[#allocation50_spill] sm:$0xff] }
 0x5c1   : > { %v6521_v32 = vpop.f32.mrf.mxu2 }
 0x5c2   : > { %v6522_v8 = vadd.f32 %v6521_v32, %v6473_v56  ;;  %v10530_v56 = vor.u32 %v12680_v52, %v10529_v19  ;;  %v10241_v19 = vld [vmem:[%s19107_s3 + $0xd0] sm:$0xf] }
 0x5c3   : > { %v6570_v30 = vpop.f32.mrf.mxu3  ;;  %v6425_v7 = vpop.f32.mrf.mxu0 }
 0x5c4   : > { %v6426_v33 = vadd.f32 %v6425_v7, %v16553_v5  ;;  %v16615_v53 = vadd.f32 %v6570_v30, %v6522_v8  ;;  %6853 = vmatpush.bf16.msra.mxu1 %v10530_v56  ;;  %v19364_v7 = vld [vmem:[#allocation26_spill] sm:$0xff]  ;;  %v11009_v56 = vld [vmem:[%s19107_s3 + $0x6d0] sm:$0xf] }
 0x5c5   : > { %v6474_v50 = vpop.f32.mrf.mxu1 }
 0x5c6   : > { %v6475_v21 = vadd.f32 %v6474_v50, %v6426_v33  ;;  %v10753_v33 = vld [vmem:[%s19107_s3 + $0x4d0] sm:$0xf] }
 0x5c7   : > { %v12736_v50 = vld [vmem:[%s19107_s3 + $0x4ec] sm:$0xf0] }
 0x5c8   : > { %v10754_v52 = vor.u32 %v12736_v50, %v10753_v33 }
 0x5c9   : > { %v6523_v48 = vpop.f32.mrf.mxu2 }
 0x5ca   : > { %v6524_v18 = vadd.f32 %v6523_v48, %v6475_v21  ;;  %v12608_v21 = vld [vmem:[%s19107_s3 + $0xec] sm:$0xf0]  ;;  %6903 = vmatpush.bf16.msra.mxu2 %v10754_v52 }
 0x5cb   : > { %v6572_v29 = vpop.f32.mrf.mxu3  ;;  %v6428_v32 = vpop.f32.mrf.mxu0  ;;  %v12800_v48 = vld [vmem:[%s19107_s3 + $0x6ec] sm:$0xf0] }
 0x5cc   : > { %v6429_v4 = vadd.f32 %v6428_v32, %v16553_v5  ;;  %v16624_v8 = vadd.f32 %v6572_v29, %v6524_v18  ;;  %v10242_v29 = vor.u32 %v12608_v21, %v10241_v19  ;;  %v11010_v32 = vor.u32 %v12800_v48, %v11009_v56  ;;  %v12672_v19 = vld [vmem:[%s19107_s3 + $0x2ec] sm:$0xf0] }
 0x5cd   : > { %v6477_v63 = vpop.f32.mrf.mxu1 }
 0x5ce   : > { %v6478_v30 = vadd.f32 %v6477_v63, %v6429_v4  ;;  %6623 = vmatmul.bf16.gmra.mxu0 %v19364_v7  ;;  %6721 = vmatmul.bf16.gmra.mxu2 %v19366_v46  ;;  %v19371_v46 = vld [vmem:[#allocation45_spill] sm:$0xff]  ;;  %v19375_v7 = vld [vmem:[#allocation47_spill] sm:$0xff] }
 0x5cf   : > { %6805 = vmatpush.bf16.msra.mxu0 %v10242_v29  ;;  %6952 = vmatpush.bf16.msra.mxu3 %v11010_v32 }
 0x5d0   : > { %6672 = vmatmul.bf16.gmra.mxu1 %v19365_v17  ;;  %6770 = vmatmul.bf16.gmra.mxu3 %v19367_v41  ;;  %v19370_v41 = vld [vmem:[#allocation44_spill] sm:$0xff]  ;;  %v19374_v17 = vld [vmem:[#allocation46_spill] sm:$0xff] }
 0x5d1   : > { %v6526_v18 = vpop.f32.mrf.mxu2 }
 0x5d2   : > { %v6527_v4 = vadd.f32 %v6526_v18, %v6478_v30  ;;  %v10498_v30 = vor.u32 %v12672_v19, %v10497_v28  ;;  %v10721_v28 = vld [vmem:[%s19107_s3 + $0x490] sm:$0xf] }
 0x5d3   : > { %v6575_v63 = vpop.f32.mrf.mxu3  ;;  %v6430_v37 = vpop.f32.mrf.mxu0 }
 0x5d4   : > { %v6431_v33 = vadd.f32 %v6430_v37, %v16553_v5  ;;  %v16649_v26 = vadd.f32 %v6575_v63, %v6527_v4  ;;  %6854 = vmatpush.bf16.msra.mxu1 %v10498_v30  ;;  %v19368_v63 = vld [vmem:[#allocation28_spill] sm:$0xff] }
 0x5d5   : > { %v6479_v50 = vpop.f32.mrf.mxu1  ;;  %v10977_v30 = vld [vmem:[%s19107_s3 + $0x690] sm:$0xf] }
 0x5d6   : > { %v6480_v21 = vadd.f32 %v6479_v50, %v6431_v33  ;;  %v12728_v33 = vld [vmem:[%s19107_s3 + $0x4ac] sm:$0xf0] }
 0x5d7   : > { %v10209_v50 = vld [vmem:[%s19107_s3 + $0x90] sm:$0xf]  ;;  %v10722_v19 = vor.u32 %v12728_v33, %v10721_v28 }
 0x5d9   : > { %v6528_v56 = vpop.f32.mrf.mxu2  ;;  %6904 = vmatpush.bf16.msra.mxu2 %v10722_v19 }
 0x5da   : > { %v6529_v52 = vadd.f32 %v6528_v56, %v6480_v21  ;;  %v12600_v21 = vld [vmem:[%s19107_s3 + $0xac] sm:$0xf0] }
 0x5db   : > { %v6577_v48 = vpop.f32.mrf.mxu3  ;;  %v6433_v37 = vpop.f32.mrf.mxu0  ;;  %v12792_v56 = vld [vmem:[%s19107_s3 + $0x6ac] sm:$0xf0] }
 0x5dc   : > { %v6434_v18 = vadd.f32 %v6433_v37, %v16553_v5  ;;  %v16658_v32 = vadd.f32 %v6577_v48, %v6529_v52  ;;  %v10210_v48 = vor.u32 %v12600_v21, %v10209_v50  ;;  %v10978_v37 = vor.u32 %v12792_v56, %v10977_v30  ;;  %v12664_v50 = vld [vmem:[%s19107_s3 + $0x2ac] sm:$0xf0] }
 0x5dd   : > { %v6482_v29 = vpop.f32.mrf.mxu1 }
 0x5de   : > { %v6483_v4 = vadd.f32 %v6482_v29, %v6434_v18  ;;  %6628 = vmatmul.bf16.gmra.mxu0 %v19368_v63  ;;  %6726 = vmatmul.bf16.gmra.mxu2 %v19370_v41  ;;  %v19373_v63 = vld [vmem:[#allocation31_spill] sm:$0xff] }
 0x5df   : > { %6806 = vmatpush.bf16.msra.mxu0 %v10210_v48  ;;  %6953 = vmatpush.bf16.msra.mxu3 %v10978_v37 }
 0x5e0   : > { %6677 = vmatmul.bf16.gmra.mxu1 %v19369_v6  ;;  %6775 = vmatmul.bf16.gmra.mxu3 %v19371_v46  ;;  %v10465_v6 = vld [vmem:[%s19107_s3 + $0x290] sm:$0xf] }
 0x5e1   : > { %v6531_v52 = vpop.f32.mrf.mxu2 }
 0x5e2   : > { %v6532_v18 = vadd.f32 %v6531_v52, %v6483_v4  ;;  %v10466_v4 = vor.u32 %v12664_v50, %v10465_v6  ;;  %v10689_v6 = vld [vmem:[%s19107_s3 + $0x450] sm:$0xf] }
 0x5e3   : > { %v6580_v29 = vpop.f32.mrf.mxu3  ;;  %v6435_v46 = vpop.f32.mrf.mxu0 }
 0x5e4   : > { %v6436_v28 = vadd.f32 %v6435_v46, %v16553_v5  ;;  %v16683_v41 = vadd.f32 %v6580_v29, %v6532_v18  ;;  %6855 = vmatpush.bf16.msra.mxu1 %v10466_v4  ;;  %v19372_v29 = vld [vmem:[#allocation30_spill] sm:$0xff]  ;;  %v10945_v4 = vld [vmem:[%s19107_s3 + $0x650] sm:$0xf] }
 0x5e5   : > { %v6484_v33 = vpop.f32.mrf.mxu1 }
 0x5e6   : > { %v6485_v21 = vadd.f32 %v6484_v33, %v6436_v28  ;;  %v12720_v28 = vld [vmem:[%s19107_s3 + $0x46c] sm:$0xf0] }
 0x5e7   : > { %v10177_v33 = vld [vmem:[%s19107_s3 + $0x50] sm:$0xf]  ;;  %v10690_v50 = vor.u32 %v12720_v28, %v10689_v6 }
 0x5e9   : > { %v6533_v30 = vpop.f32.mrf.mxu2  ;;  %6905 = vmatpush.bf16.msra.mxu2 %v10690_v50 }
 0x5ea   : > { %v6534_v19 = vadd.f32 %v6533_v30, %v6485_v21  ;;  %v12592_v21 = vld [vmem:[%s19107_s3 + $0x6c] sm:$0xf0] }
 0x5eb   : > { %v6582_v56 = vpop.f32.mrf.mxu3  ;;  %v6438_v46 = vpop.f32.mrf.mxu0  ;;  %v12784_v30 = vld [vmem:[%s19107_s3 + $0x66c] sm:$0xf0] }
 0x5ec   : > { %v6439_v52 = vadd.f32 %v6438_v46, %v16553_v5  ;;  %v16692_v37 = vadd.f32 %v6582_v56, %v6534_v19  ;;  %v10178_v56 = vor.u32 %v12592_v21, %v10177_v33  ;;  %v10946_v46 = vor.u32 %v12784_v30, %v10945_v4  ;;  %v12656_v33 = vld [vmem:[%s19107_s3 + $0x26c] sm:$0xf0] }
 0x5ed   : > { %v6487_v48 = vpop.f32.mrf.mxu1 }
 0x5ee   : > { %v6488_v18 = vadd.f32 %v6487_v48, %v6439_v52  ;;  %6633 = vmatmul.bf16.gmra.mxu0 %v19372_v29  ;;  %6731 = vmatmul.bf16.gmra.mxu2 %v19374_v17  ;;  %v19377_v29 = vld [vmem:[#allocation33_spill] sm:$0xff] }
 0x5ef   : > { %6807 = vmatpush.bf16.msra.mxu0 %v10178_v56  ;;  %6954 = vmatpush.bf16.msra.mxu3 %v10946_v46 }
 0x5f0   : > { %6682 = vmatmul.bf16.gmra.mxu1 %v19373_v63  ;;  %6780 = vmatmul.bf16.gmra.mxu3 %v19375_v7  ;;  %v10433_v63 = vld [vmem:[%s19107_s3 + $0x250] sm:$0xf] }
 0x5f1   : > { %v6536_v19 = vpop.f32.mrf.mxu2 }
 0x5f2   : > { %v6537_v52 = vadd.f32 %v6536_v19, %v6488_v18  ;;  %v10434_v18 = vor.u32 %v12656_v33, %v10433_v63  ;;  %v10657_v63 = vld [vmem:[%s19107_s3 + $0x410] sm:$0xf] }
 0x5f3   : > { %v6585_v48 = vpop.f32.mrf.mxu3  ;;  %v6440_v7 = vpop.f32.mrf.mxu0 }
 0x5f4   : > { %v6441_v6 = vadd.f32 %v6440_v7, %v16553_v5  ;;  %v16717_v17 = vadd.f32 %v6585_v48, %v6537_v52  ;;  %6856 = vmatpush.bf16.msra.mxu1 %v10434_v18  ;;  %v19376_v48 = vld [vmem:[#allocation32_spill] sm:$0xff] }
 0x5f5   : > { %v6489_v28 = vpop.f32.mrf.mxu1  ;;  %v10913_v18 = vld [vmem:[%s19107_s3 + $0x610] sm:$0xf] }
 0x5f6   : > { %v6490_v21 = vadd.f32 %v6489_v28, %v6441_v6  ;;  %v12712_v6 = vld [vmem:[%s19107_s3 + $0x42c] sm:$0xf0] }
 0x5f7   : > { %v10145_v28 = vld [vmem:[%s19107_s3 + $0x10] sm:$0xf]  ;;  %v10658_v33 = vor.u32 %v12712_v6, %v10657_v63 }
 0x5f9   : > { %v6538_v4 = vpop.f32.mrf.mxu2  ;;  %6906 = vmatpush.bf16.msra.mxu2 %v10658_v33 }
 0x5fa   : > { %v6539_v50 = vadd.f32 %v6538_v4, %v6490_v21  ;;  %v12584_v21 = vld [vmem:[%s19107_s3 + $0x2c] sm:$0xf0] }
 0x5fb   : > { %v6587_v30 = vpop.f32.mrf.mxu3  ;;  %v6443_v7 = vpop.f32.mrf.mxu0  ;;  %v12776_v4 = vld [vmem:[%s19107_s3 + $0x62c] sm:$0xf0] }
 0x5fc   : > { %v6444_v19 = vadd.f32 %v6443_v7, %v16553_v5  ;;  %v16726_v46 = vadd.f32 %v6587_v30, %v6539_v50  ;;  %v10146_v30 = vor.u32 %v12584_v21, %v10145_v28  ;;  %v10914_v7 = vor.u32 %v12776_v4, %v10913_v18  ;;  %v12648_v28 = vld [vmem:[%s19107_s3 + $0x22c] sm:$0xf0] }
 0x5fd   : > { %v6492_v56 = vpop.f32.mrf.mxu1 }
 0x5fe   : > { %v6493_v52 = vadd.f32 %v6492_v56, %v6444_v19  ;;  %6638 = vmatmul.bf16.gmra.mxu0 %v19376_v48  ;;  %6736 = vmatmul.bf16.gmra.mxu2 %v19378_v25  ;;  %v19381_v48 = vld [vmem:[#allocation35_spill] sm:$0xff] }
 0x5ff   : > { %6808 = vmatpush.bf16.msra.mxu0 %v10146_v30  ;;  %6955 = vmatpush.bf16.msra.mxu3 %v10914_v7 }
 0x600   : > { %6687 = vmatmul.bf16.gmra.mxu1 %v19377_v29  ;;  %6785 = vmatmul.bf16.gmra.mxu3 %v19379_v59  ;;  %v10401_v29 = vld [vmem:[%s19107_s3 + $0x210] sm:$0xf] }
 0x601   : > { %v6541_v50 = vpop.f32.mrf.mxu2 }
 0x602   : > { %v6542_v19 = vadd.f32 %v6541_v50, %v6493_v52  ;;  %v10402_v52 = vor.u32 %v12648_v28, %v10401_v29  ;;  %v11905_v29 = vld [vmem:[%s19107_s3 + $0xdd0] sm:$0xf] }
 0x603   : > { %v6590_v56 = vpop.f32.mrf.mxu3  ;;  %v6445_v59 = vpop.f32.mrf.mxu0 }
 0x604   : > { %v6446_v63 = vadd.f32 %v6445_v59, %v16553_v5  ;;  %v16751_v25 = vadd.f32 %v6590_v56, %v6542_v19  ;;  %6857 = vmatpush.bf16.msra.mxu1 %v10402_v52  ;;  %v19380_v56 = vld [vmem:[#allocation34_spill] sm:$0xff]  ;;  %v12161_v52 = vld [vmem:[%s19107_s3 + $0xfd0] sm:$0xf] }
 0x605   : > { %v6494_v6 = vpop.f32.mrf.mxu1 }
 0x606   : > { %v6495_v21 = vadd.f32 %v6494_v6, %v6446_v63  ;;  %v13024_v63 = vld [vmem:[%s19107_s3 + $0xdec] sm:$0xf0] }
 0x607   : > { %v11393_v6 = vld [vmem:[%s19107_s3 + $0x9d0] sm:$0xf]  ;;  %v11906_v28 = vor.u32 %v13024_v63, %v11905_v29 }
 0x609   : > { %v6543_v18 = vpop.f32.mrf.mxu2  ;;  %7095 = vmatpush.bf16.msrb.mxu2 %v11906_v28 }
 0x60a   : > { %v6544_v33 = vadd.f32 %v6543_v18, %v6495_v21  ;;  %v12896_v21 = vld [vmem:[%s19107_s3 + $0x9ec] sm:$0xf0] }
 0x60b   : > { %v6592_v4 = vpop.f32.mrf.mxu3  ;;  %v6448_v59 = vpop.f32.mrf.mxu0  ;;  %v13088_v18 = vld [vmem:[%s19107_s3 + $0xfec] sm:$0xf0] }
 0x60c   : > { %v6449_v50 = vadd.f32 %v6448_v59, %v16553_v5  ;;  %v16760_v7 = vadd.f32 %v6592_v4, %v6544_v33  ;;  %v11394_v4 = vor.u32 %v12896_v21, %v11393_v6  ;;  %v12162_v59 = vor.u32 %v13088_v18, %v12161_v52  ;;  %v12960_v6 = vld [vmem:[%s19107_s3 + $0xbec] sm:$0xf0] }
 0x60d   : > { %v6497_v30 = vpop.f32.mrf.mxu1 }
 0x60e   : > { %v6498_v19 = vadd.f32 %v6497_v30, %v6449_v50  ;;  %6643 = vmatmul.bf16.gmra.mxu0 %v19380_v56  ;;  %6741 = vmatmul.bf16.gmra.mxu2 %v19382_v57  ;;  %v11649_v56 = vld [vmem:[%s19107_s3 + $0xbd0] sm:$0xf] }
 0x60f   : > { %6997 = vmatpush.bf16.msrb.mxu0 %v11394_v4  ;;  %7144 = vmatpush.bf16.msrb.mxu3 %v12162_v59 }
 0x610   : > { %6692 = vmatmul.bf16.gmra.mxu1 %v19381_v48  ;;  %6790 = vmatmul.bf16.gmra.mxu3 %v19383_v38 }
 0x611   : > { %v6546_v33 = vpop.f32.mrf.mxu2 }
 0x612   : > { %v6547_v50 = vadd.f32 %v6546_v33, %v6498_v19  ;;  %v11650_v19 = vor.u32 %v12960_v6, %v11649_v56  ;;  %v13016_v56 = vld [vmem:[%s19107_s3 + $0xdac] sm:$0xf0] }
 0x613   : > { %v6595_v30 = vpop.f32.mrf.mxu3  ;;  %v6450_v38 = vpop.f32.mrf.mxu0  ;;  %v11361_v6 = vld [vmem:[%s19107_s3 + $0x990] sm:$0xf] }
 0x614   : > { %v6451_v29 = vadd.f32 %v6450_v38, %v16553_v5  ;;  %v16785_v57 = vadd.f32 %v6595_v30, %v6547_v50  ;;  %7046 = vmatpush.bf16.msrb.mxu1 %v11650_v19  ;;  %v19384_v50 = vld [vmem:[#allocation36_spill] sm:$0xff]  ;;  %v19385_v30 = vld [vmem:[#allocation37_spill] sm:$0xff] }
 0x615   : > { %v6499_v63 = vpop.f32.mrf.mxu1 }
 0x616   : > { %v6500_v48 = vadd.f32 %v6499_v63, %v6451_v29  ;;  %v19386_v29 = vld [vmem:[#allocation52_spill] sm:$0xff]  ;;  %v19387_v63 = vld [vmem:[#allocation53_spill] sm:$0xff] }
 0x619   : > { %v6548_v21 = vpop.f32.mrf.mxu2 }
 0x61a   : > { %v6549_v28 = vadd.f32 %v6548_v21, %v6500_v48  ;;  %v11873_v48 = vld [vmem:[%s19107_s3 + $0xd90] sm:$0xf] }
 0x61b   : > { %v6597_v52 = vpop.f32.mrf.mxu3  ;;  %v6453_v38 = vpop.f32.mrf.mxu0  ;;  %v11874_v21 = vor.u32 %v13016_v56, %v11873_v48 }
 0x61c   : > { %v6454_v18 = vadd.f32 %v6453_v38, %v16553_v5  ;;  %v16794_v4 = vadd.f32 %v6597_v52, %v6549_v28  ;;  %v12888_v28 = vld [vmem:[%s19107_s3 + $0x9ac] sm:$0xf0] }
 0x61d   : > { %v6502_v33 = vpop.f32.mrf.mxu1  ;;  %v12129_v52 = vld [vmem:[%s19107_s3 + $0xf90] sm:$0xf]  ;;  %7096 = vmatpush.bf16.msrb.mxu2 %v11874_v21 }
 0x61e   : > { %v6503_v59 = vadd.f32 %v6502_v33, %v6454_v18  ;;  %6648 = vmatmul.bf16.gmra.mxu0 %v19384_v50  ;;  %6746 = vmatmul.bf16.gmra.mxu2 %v19386_v29  ;;  %v13080_v38 = vld [vmem:[%s19107_s3 + $0xfac] sm:$0xf0]  ;;  %v11362_v29 = vor.u32 %v12888_v28, %v11361_v6 }
 0x620   : > { %6697 = vmatmul.bf16.gmra.mxu1 %v19385_v30  ;;  %6795 = vmatmul.bf16.gmra.mxu3 %v19387_v63  ;;  %v12130_v30 = vor.u32 %v13080_v38, %v12129_v52 }
 0x621   : > { %v6551_v19 = vpop.f32.mrf.mxu2  ;;  %6998 = vmatpush.bf16.msrb.mxu0 %v11362_v29 }
 0x622   : > { %v6552_v18 = vadd.f32 %v6551_v19, %v6503_v59  ;;  %7145 = vmatpush.bf16.msrb.mxu3 %v12130_v30  ;;  %v12952_v59 = vld [vmem:[%s19107_s3 + $0xbac] sm:$0xf0] }
 0x623   : > { %v6600_v33 = vpop.f32.mrf.mxu3  ;;  %v6455_v63 = vpop.f32.mrf.mxu0  ;;  %v11618_v19 = vor.u32 %v12952_v59, %v11617_v11  ;;  %v19388_v30 = vld [vmem:[#allocation8_spill] sm:$0xff] }
 0x624   : > { %v6456_v50 = vadd.f32 %v6455_v63, %v16553_v5  ;;  %v16819_v56 = vadd.f32 %v6600_v33, %v6552_v18  ;;  %v11841_v11 = vld [vmem:[%s19107_s3 + $0xd50] sm:$0xf] }
 0x625   : > { %v6504_v48 = vpop.f32.mrf.mxu1  ;;  %7047 = vmatpush.bf16.msrb.mxu1 %v11618_v19  ;;  %v12880_v18 = vld [vmem:[%s19107_s3 + $0x96c] sm:$0xf0] }
 0x626   : > { %v6505_v58 = vadd.f32 %v6504_v48, %v6456_v50  ;;  %v12097_v33 = vld [vmem:[%s19107_s3 + $0xf50] sm:$0xf] }
 0x627   : > { %v13072_v48 = vld [vmem:[%s19107_s3 + $0xf6c] sm:$0xf0] }
 0x629   : > { %v6553_v6 = vpop.f32.mrf.mxu2 }
 0x62a   : > { %v6554_v28 = vadd.f32 %v6553_v6, %v6505_v58  ;;  %v13008_v58 = vld [vmem:[%s19107_s3 + $0xd6c] sm:$0xf0]  ;;  %v12098_v6 = vor.u32 %v13072_v48, %v12097_v33 }
 0x62b   : > { %v6602_v5 = vpop.f32.mrf.mxu3  ;;  %v6614_v63 = vpop.f32.mrf.mxu0  ;;  %v11842_v38 = vor.u32 %v13008_v58, %v11841_v11 }
 0x62c   : > { %v6615_v21 = vadd.f32 %v6614_v63, %v16581_v1  ;;  %v16828_v29 = vadd.f32 %v6602_v5, %v6554_v28  ;;  %v11329_v1 = vld [vmem:[%s19107_s3 + $0x950] sm:$0xf]  ;;  %7146 = vmatpush.bf16.msrb.mxu3 %v12098_v6 }
 0x62d   : > { %v6663_v52 = vpop.f32.mrf.mxu1  ;;  %v11330_v19 = vor.u32 %v12880_v18, %v11329_v1  ;;  %7097 = vmatpush.bf16.msrb.mxu2 %v11842_v38  ;;  %v12944_v1 = vld [vmem:[%s19107_s3 + $0xb6c] sm:$0xf0] }
 0x62e   : > { %v6664_v50 = vadd.f32 %v6663_v52, %v6615_v21  ;;  %6809 = vmatmul.bf16.vlgmr.msra.gmra.mxu0 %v13809_v61  ;;  %6907 = vmatmul.bf16.vlgmr.msra.gmra.mxu2 %v14103_v20 }
 0x62f   : > { %6999 = vmatpush.bf16.msrb.mxu0 %v11330_v19 }
 0x630   : > { %6858 = vmatmul.bf16.vlgmr.msra.gmra.mxu1 %v13817_v12  ;;  %6956 = vmatmul.bf16.vlgmr.msra.gmra.mxu3 %v19388_v30  ;;  %v11585_v30 = vld [vmem:[%s19107_s3 + $0xb50] sm:$0xf] }
 0x631   : > { %v6712_v59 = vpop.f32.mrf.mxu2  ;;  %v11586_v18 = vor.u32 %v12944_v1, %v11585_v30  ;;  %v11809_v30 = vld [vmem:[%s19107_s3 + $0xd10] sm:$0xf] }
 0x632   : > { %v6713_v28 = vadd.f32 %v6712_v59, %v6664_v50  ;;  %v13064_v1 = vld [vmem:[%s19107_s3 + $0xf2c] sm:$0xf0] }
 0x633   : > { %v6761_v5 = vpop.f32.mrf.mxu3  ;;  %v6616_v63 = vpop.f32.mrf.mxu0  ;;  %7048 = vmatpush.bf16.msrb.mxu1 %v11586_v18 }
 0x634   : > { %v6617_v21 = vadd.f32 %v6616_v63, %v16590_v14  ;;  %v6762_v11 = vadd.f32 %v6761_v5, %v6713_v28  ;;  %v11297_v63 = vld [vmem:[%s19107_s3 + $0x910] sm:$0xf] }
 0x635   : > { %v6665_v52 = vpop.f32.mrf.mxu1 }
 0x636   : > { %v6666_v58 = vadd.f32 %v6665_v52, %v6617_v21  ;;  %v8372_v28 = vmax.f32 %v6762_v11, 0.0  ;;  %v12872_v11 = vld [vmem:[%s19107_s3 + $0x92c] sm:$0xf0] }
 0x639   : > { %v6714_v50 = vpop.f32.mrf.mxu2 }
 0x63a   : > { %v6715_v33 = vadd.f32 %v6714_v50, %v6666_v58  ;;  %v12065_v58 = vld [vmem:[%s19107_s3 + $0xf10] sm:$0xf]  ;;  %v11298_v50 = vor.u32 %v12872_v11, %v11297_v63 }
 0x63b   : > { %v6763_v38 = vpop.f32.mrf.mxu3  ;;  %v6619_v48 = vpop.f32.mrf.mxu0 }
 0x63c   : > { %v6620_v14 = vadd.f32 %v6619_v48, %v16615_v53  ;;  %v6764_v19 = vadd.f32 %v6763_v38, %v6715_v33  ;;  %v13000_v53 = vld [vmem:[%s19107_s3 + $0xd2c] sm:$0xf0]  ;;  %v12066_v33 = vor.u32 %v13064_v1, %v12065_v58  ;;  %7000 = vmatpush.bf16.msrb.mxu0 %v11298_v50 }
 0x63d   : > { %v6668_v59 = vpop.f32.mrf.mxu1  ;;  %v11810_v52 = vor.u32 %v13000_v53, %v11809_v30  ;;  %v11553_v30 = vld [vmem:[%s19107_s3 + $0xb10] sm:$0xf] }
 0x63e   : > { %v6669_v6 = vadd.f32 %v6668_v59, %v6620_v14  ;;  %6814 = vmatmul.bf16.gmra.mxu0 %v13845_v45  ;;  %v8380_v5 = vmax.f32 %v6764_v19, 0.0  ;;  %6912 = vmatmul.bf16.gmra.mxu2 %v19269_v42  ;;  %v12936_v53 = vld [vmem:[%s19107_s3 + $0xb2c] sm:$0xf0] }
 0x63f   : > { %7098 = vmatpush.bf16.msrb.mxu2 %v11810_v52  ;;  %7147 = vmatpush.bf16.msrb.mxu3 %v12066_v33  ;;  %v11554_v63 = vor.u32 %v12936_v53, %v11553_v30  ;;  %v13056_v30 = vld [vmem:[%s19107_s3 + $0xeec] sm:$0xf0] }
 0x640   : > { %6863 = vmatmul.bf16.gmra.mxu1 %v13853_v62  ;;  %6961 = vmatmul.bf16.gmra.mxu3 %v19270_v55  ;;  %v16873_v21 = vpack.c.bf16 %v8380_v5, %v8372_v28 }
 0x641   : > { %v6717_v18 = vpop.f32.mrf.mxu2  ;;  %7049 = vmatpush.bf16.msrb.mxu1 %v11554_v63 }
 0x642   : > { %19389 = vst [vmem:[#allocation59_spill] sm:$0xff] %v16873_v21  ;;  %v6718_v38 = vadd.f32 %v6717_v18, %v6669_v6  ;;  %v11521_v21 = vld [vmem:[%s19107_s3 + $0xad0] sm:$0xf] }
 0x643   : > { %v6766_v48 = vpop.f32.mrf.mxu3  ;;  %v6621_v14 = vpop.f32.mrf.mxu0 }
 0x644   : > { %v6622_v59 = vadd.f32 %v6621_v14, %v16624_v8  ;;  %v6767_v28 = vadd.f32 %v6766_v48, %v6718_v38  ;;  %v19390_v48 = vld [vmem:[#allocation12_spill] sm:$0xff] }
 0x645   : > { %v6670_v19 = vpop.f32.mrf.mxu1  ;;  %v11777_v14 = vld [vmem:[%s19107_s3 + $0xcd0] sm:$0xf] }
 0x646   : > { %v6671_v5 = vadd.f32 %v6670_v19, %v6622_v59  ;;  %v8388_v33 = vmax.f32 %v6767_v28, 0.0  ;;  %v11265_v59 = vld [vmem:[%s19107_s3 + $0x8d0] sm:$0xf] }
 0x647   : > { %v12864_v28 = vld [vmem:[%s19107_s3 + $0x8ec] sm:$0xf0] }
 0x649   : > { %v6719_v6 = vpop.f32.mrf.mxu2 }
 0x64a   : > { %v6720_v11 = vadd.f32 %v6719_v6, %v6671_v5  ;;  %v12033_v5 = vld [vmem:[%s19107_s3 + $0xed0] sm:$0xf]  ;;  %v11266_v6 = vor.u32 %v12864_v28, %v11265_v59 }
 0x64b   : > { %v6768_v52 = vpop.f32.mrf.mxu3  ;;  %v6624_v58 = vpop.f32.mrf.mxu0 }
 0x64c   : > { %v6625_v8 = vadd.f32 %v6624_v58, %v16649_v26  ;;  %v6769_v18 = vadd.f32 %v6768_v52, %v6720_v11  ;;  %v12992_v26 = vld [vmem:[%s19107_s3 + $0xcec] sm:$0xf0]  ;;  %v12034_v11 = vor.u32 %v13056_v30, %v12033_v5  ;;  %7001 = vmatpush.bf16.msrb.mxu0 %v11266_v6 }
 0x64d   : > { %v6673_v1 = vpop.f32.mrf.mxu1  ;;  %v11778_v19 = vor.u32 %v12992_v26, %v11777_v14 }
 0x64e   : > { %v6674_v50 = vadd.f32 %v6673_v1, %v6625_v8  ;;  %6819 = vmatmul.bf16.gmra.mxu0 %v13881_v35  ;;  %v8396_v38 = vmax.f32 %v6769_v18, 0.0  ;;  %6917 = vmatmul.bf16.gmra.mxu2 %v19350_v13 }
 0x64f   : > { %7099 = vmatpush.bf16.msrb.mxu2 %v11778_v19  ;;  %7148 = vmatpush.bf16.msrb.mxu3 %v12034_v11 }
 0x650   : > { %6868 = vmatmul.bf16.gmra.mxu1 %v19310_v47  ;;  %6966 = vmatmul.bf16.gmra.mxu3 %v19390_v48  ;;  %v16914_v53 = vpack.c.bf16 %v8396_v38, %v8388_v33  ;;  %v12928_v33 = vld [vmem:[%s19107_s3 + $0xaec] sm:$0xf0] }
 0x651   : > { %v6722_v63 = vpop.f32.mrf.mxu2  ;;  %v11522_v38 = vor.u32 %v12928_v33, %v11521_v21  ;;  %v11745_v21 = vld [vmem:[%s19107_s3 + $0xc90] sm:$0xf] }
 0x652   : > { %19391 = vst [vmem:[#allocation12_spill] sm:$0xff] %v16914_v53  ;;  %v6723_v52 = vadd.f32 %v6722_v63, %v6674_v50  ;;  %v12668_v53 = vld [vmem:[%s19107_s3 + $0x2d4] sm:$0xf] }
 0x653   : > { %v6771_v58 = vpop.f32.mrf.mxu3  ;;  %v6626_v8 = vpop.f32.mrf.mxu0  ;;  %7050 = vmatpush.bf16.msrb.mxu1 %v11522_v38 }
 0x654   : > { %v6627_v1 = vadd.f32 %v6626_v8, %v16658_v32  ;;  %v6772_v14 = vadd.f32 %v6771_v58, %v6723_v52  ;;  %v11233_v52 = vld [vmem:[%s19107_s3 + $0x890] sm:$0xf] }
 0x655   : > { %v6675_v18 = vpop.f32.mrf.mxu1  ;;  %v12856_v8 = vld [vmem:[%s19107_s3 + $0x8ac] sm:$0xf0] }
 0x656   : > { %v6676_v26 = vadd.f32 %v6675_v18, %v6627_v1  ;;  %v8404_v6 = vmax.f32 %v6772_v14, 0.0  ;;  %v12001_v1 = vld [vmem:[%s19107_s3 + $0xe90] sm:$0xf]  ;;  %v11234_v33 = vor.u32 %v12856_v8, %v11233_v52 }
 0x657   : > { %v13048_v18 = vld [vmem:[%s19107_s3 + $0xeac] sm:$0xf0] }
 0x658   : > { %v12002_v38 = vor.u32 %v13048_v18, %v12001_v1  ;;  %7002 = vmatpush.bf16.msrb.mxu0 %v11234_v33 }
 0x659   : > { %v6724_v50 = vpop.f32.mrf.mxu2 }
 0x65a   : > { %v6725_v59 = vadd.f32 %v6724_v50, %v6676_v26  ;;  %7149 = vmatpush.bf16.msrb.mxu3 %v12002_v38  ;;  %v11713_v38 = vld [vmem:[%s19107_s3 + $0xc50] sm:$0xf] }
 0x65b   : > { %v6773_v19 = vpop.f32.mrf.mxu3  ;;  %v6629_v28 = vpop.f32.mrf.mxu0 }
 0x65c   : > { %v6630_v32 = vadd.f32 %v6629_v28, %v16683_v41  ;;  %v6774_v30 = vadd.f32 %v6773_v19, %v6725_v59  ;;  %v12984_v41 = vld [vmem:[%s19107_s3 + $0xcac] sm:$0xf0] }
 0x65d   : > { %v6678_v5 = vpop.f32.mrf.mxu1  ;;  %v11746_v58 = vor.u32 %v12984_v41, %v11745_v21  ;;  %v11489_v21 = vld [vmem:[%s19107_s3 + $0xa90] sm:$0xf] }
 0x65e   : > { %v6679_v63 = vadd.f32 %v6678_v5, %v6630_v32  ;;  %6824 = vmatmul.bf16.gmra.mxu0 %v13917_v23  ;;  %v8412_v11 = vmax.f32 %v6774_v30, 0.0  ;;  %6922 = vmatmul.bf16.gmra.mxu2 %v19275_v9 }
 0x65f   : > { %7100 = vmatpush.bf16.msrb.mxu2 %v11746_v58 }
 0x660   : > { %6873 = vmatmul.bf16.gmra.mxu1 %v13925_v40  ;;  %6971 = vmatmul.bf16.gmra.mxu3 %v19276_v43  ;;  %v16946_v14 = vpack.c.bf16 %v8412_v11, %v8404_v6  ;;  %v12920_v6 = vld [vmem:[%s19107_s3 + $0xaac] sm:$0xf0] }
 0x661   : > { %v6727_v26 = vpop.f32.mrf.mxu2  ;;  %v11490_v11 = vor.u32 %v12920_v6, %v11489_v21 }
 0x662   : > { %19392 = vst [vmem:[#allocation60_spill] sm:$0xff] %v16946_v14  ;;  %v6728_v50 = vadd.f32 %v6727_v26, %v6679_v63 }
 0x663   : > { %v6776_v59 = vpop.f32.mrf.mxu3  ;;  %v6631_v19 = vpop.f32.mrf.mxu0  ;;  %7051 = vmatpush.bf16.msrb.mxu1 %v11490_v11 }
 0x664   : > { %v6632_v28 = vadd.f32 %v6631_v19, %v16692_v37  ;;  %v6777_v5 = vadd.f32 %v6776_v59, %v6728_v50  ;;  %v11201_v50 = vld [vmem:[%s19107_s3 + $0x850] sm:$0xf] }
 0x665   : > { %v6680_v32 = vpop.f32.mrf.mxu1  ;;  %v12848_v19 = vld [vmem:[%s19107_s3 + $0x86c] sm:$0xf0] }
 0x666   : > { %v6681_v30 = vadd.f32 %v6680_v32, %v6632_v28  ;;  %v8420_v26 = vmax.f32 %v6777_v5, 0.0  ;;  %v11969_v28 = vld [vmem:[%s19107_s3 + $0xe50] sm:$0xf]  ;;  %v11202_v21 = vor.u32 %v12848_v19, %v11201_v50 }
 0x667   : > { %v13040_v32 = vld [vmem:[%s19107_s3 + $0xe6c] sm:$0xf0] }
 0x668   : > { %v11970_v6 = vor.u32 %v13040_v32, %v11969_v28  ;;  %7003 = vmatpush.bf16.msrb.mxu0 %v11202_v21  ;;  %v11681_v21 = vld [vmem:[%s19107_s3 + $0xc10] sm:$0xf] }
 0x669   : > { %v6729_v63 = vpop.f32.mrf.mxu2 }
 0x66a   : > { %v6730_v41 = vadd.f32 %v6729_v63, %v6681_v30  ;;  %7150 = vmatpush.bf16.msrb.mxu3 %v11970_v6  ;;  %v11169_v6 = vld [vmem:[%s19107_s3 + $0x810] sm:$0xf] }
 0x66b   : > { %v6778_v52 = vpop.f32.mrf.mxu3  ;;  %v6634_v58 = vpop.f32.mrf.mxu0 }
 0x66c   : > { %v6635_v37 = vadd.f32 %v6634_v58, %v16717_v17  ;;  %v6779_v1 = vadd.f32 %v6778_v52, %v6730_v41  ;;  %v12976_v17 = vld [vmem:[%s19107_s3 + $0xc6c] sm:$0xf0] }
 0x66d   : > { %v6683_v8 = vpop.f32.mrf.mxu1  ;;  %v11714_v59 = vor.u32 %v12976_v17, %v11713_v38 }
 0x66e   : > { %v6684_v18 = vadd.f32 %v6683_v8, %v6635_v37  ;;  %6829 = vmatmul.bf16.gmra.mxu0 %v13953_v16  ;;  %v8428_v33 = vmax.f32 %v6779_v1, 0.0  ;;  %6927 = vmatmul.bf16.gmra.mxu2 %v19278_v54  ;;  %v11457_v1 = vld [vmem:[%s19107_s3 + $0xa50] sm:$0xf] }
 0x66f   : > { %7101 = vmatpush.bf16.msrb.mxu2 %v11714_v59 }
 0x670   : > { %6878 = vmatmul.bf16.gmra.mxu1 %v13961_v36  ;;  %6976 = vmatmul.bf16.gmra.mxu3 %v19279_v22  ;;  %v16978_v5 = vpack.c.bf16 %v8428_v33, %v8420_v26  ;;  %v12912_v26 = vld [vmem:[%s19107_s3 + $0xa6c] sm:$0xf0] }
 0x671   : > { %v6732_v30 = vpop.f32.mrf.mxu2  ;;  %v11458_v33 = vor.u32 %v12912_v26, %v11457_v1 }
 0x672   : > { %19393 = vst [vmem:[#allocation61_spill] sm:$0xff] %v16978_v5  ;;  %v6733_v11 = vadd.f32 %v6732_v30, %v6684_v18 }
 0x673   : > { %v6781_v63 = vpop.f32.mrf.mxu3  ;;  %v6636_v41 = vpop.f32.mrf.mxu0  ;;  %7052 = vmatpush.bf16.msrb.mxu1 %v11458_v33 }
 0x674   : > { %v6637_v52 = vadd.f32 %v6636_v41, %v16726_v46  ;;  %v6782_v37 = vadd.f32 %v6781_v63, %v6733_v11  ;;  %v12840_v63 = vld [vmem:[%s19107_s3 + $0x82c] sm:$0xf0] }
 0x675   : > { %v6685_v58 = vpop.f32.mrf.mxu1  ;;  %v11937_v41 = vld [vmem:[%s19107_s3 + $0xe10] sm:$0xf] }
 0x676   : > { %v6686_v8 = vadd.f32 %v6685_v58, %v6637_v52  ;;  %v8436_v32 = vmax.f32 %v6782_v37, 0.0  ;;  %v13032_v52 = vld [vmem:[%s19107_s3 + $0xe2c] sm:$0xf0] }
 0x677   : > { %v11938_v1 = vor.u32 %v13032_v52, %v11937_v41 }
 0x679   : > { %v6734_v18 = vpop.f32.mrf.mxu2  ;;  %7151 = vmatpush.bf16.msrb.mxu3 %v11938_v1 }
 0x67a   : > { %v6735_v38 = vadd.f32 %v6734_v18, %v6686_v8  ;;  %v11170_v8 = vor.u32 %v12840_v63, %v11169_v6 }
 0x67b   : > { %v6783_v17 = vpop.f32.mrf.mxu3  ;;  %v6639_v50 = vpop.f32.mrf.mxu0 }
 0x67c   : > { %v6640_v46 = vadd.f32 %v6639_v50, %v16751_v25  ;;  %v6784_v19 = vadd.f32 %v6783_v17, %v6735_v38  ;;  %v12968_v25 = vld [vmem:[%s19107_s3 + $0xc2c] sm:$0xf0]  ;;  %7004 = vmatpush.bf16.msrb.mxu0 %v11170_v8  ;;  %v12636_v8 = vld [vmem:[%s19107_s3 + $0x1d4] sm:$0xf] }
 0x67d   : > { %v6688_v59 = vpop.f32.mrf.mxu1  ;;  %v11682_v11 = vor.u32 %v12968_v25, %v11681_v21 }
 0x67e   : > { %v6689_v28 = vadd.f32 %v6688_v59, %v6640_v46  ;;  %6834 = vmatmul.bf16.gmra.mxu0 %v13989_v10  ;;  %v8444_v30 = vmax.f32 %v6784_v19, 0.0  ;;  %6932 = vmatmul.bf16.gmra.mxu2 %v19282_v27  ;;  %v11425_v59 = vld [vmem:[%s19107_s3 + $0xa10] sm:$0xf] }
 0x67f   : > { %7102 = vmatpush.bf16.msrb.mxu2 %v11682_v11  ;;  %v12904_v19 = vld [vmem:[%s19107_s3 + $0xa2c] sm:$0xf0] }
 0x680   : > { %6883 = vmatmul.bf16.gmra.mxu1 %v19281_v2  ;;  %6981 = vmatmul.bf16.gmra.mxu3 %v19316_v0  ;;  %v17010_v58 = vpack.c.bf16 %v8444_v30, %v8436_v32  ;;  %v11426_v32 = vor.u32 %v12904_v19, %v11425_v59 }
 0x681   : > { %v6737_v37 = vpop.f32.mrf.mxu2 }
 0x682   : > { %19394 = vst [vmem:[#allocation62_spill] sm:$0xff] %v17010_v58  ;;  %v6738_v26 = vadd.f32 %v6737_v37, %v6689_v28  ;;  %7053 = vmatpush.bf16.msrb.mxu1 %v11426_v32  ;;  %v12764_v37 = vld [vmem:[%s19107_s3 + $0x5d4] sm:$0xf]  ;;  %v19407_v58 = vld [vmem:[#allocation43_spill] sm:$0xff] }
 0x683   : > { %v6786_v33 = vpop.f32.mrf.mxu3  ;;  %v6641_v18 = vpop.f32.mrf.mxu0 }
 0x684   : > { %v6642_v38 = vadd.f32 %v6641_v18, %v16760_v7  ;;  %v6787_v50 = vadd.f32 %v6786_v33, %v6738_v26  ;;  %v10371_v26 = vld [vmem:[%s19107_s3 + $0x1f0] sm:$0xf0] }
 0x685   : > { %v6690_v17 = vpop.f32.mrf.mxu1  ;;  %v12828_v33 = vld [vmem:[%s19107_s3 + $0x7d4] sm:$0xf] }
 0x686   : > { %v6691_v46 = vadd.f32 %v6690_v17, %v6642_v38  ;;  %v8452_v41 = vmax.f32 %v6787_v50, 0.0  ;;  %v11139_v18 = vld [vmem:[%s19107_s3 + $0x7f0] sm:$0xf0]  ;;  %v10374_v50 = vor.u32 %v12636_v8, %v10371_v26 }
 0x688   : > { %7193 = vmatpush.bf16.msra.mxu0 %v10374_v50 }
 0x689   : > { %v6739_v28 = vpop.f32.mrf.mxu2 }
 0x68a   : > { %v6740_v30 = vadd.f32 %v6739_v28, %v6691_v46  ;;  %v11142_v46 = vor.u32 %v12828_v33, %v11139_v18  ;;  %v12756_v18 = vld [vmem:[%s19107_s3 + $0x594] sm:$0xf] }
 0x68b   : > { %v6788_v21 = vpop.f32.mrf.mxu3  ;;  %v6644_v25 = vpop.f32.mrf.mxu0 }
 0x68c   : > { %v6645_v7 = vadd.f32 %v6644_v25, %v16785_v57  ;;  %v6789_v11 = vadd.f32 %v6788_v21, %v6740_v30  ;;  %v10883_v57 = vld [vmem:[%s19107_s3 + $0x5f0] sm:$0xf0]  ;;  %7340 = vmatpush.bf16.msra.mxu3 %v11142_v46 }
 0x68d   : > { %v6693_v6 = vpop.f32.mrf.mxu1  ;;  %v10886_v1 = vor.u32 %v12764_v37, %v10883_v57  ;;  %v12700_v25 = vld [vmem:[%s19107_s3 + $0x3d4] sm:$0xf] }
 0x68e   : > { %v6694_v63 = vadd.f32 %v6693_v6, %v6645_v7  ;;  %6839 = vmatmul.bf16.gmra.mxu0 %v19285_v15  ;;  %v8460_v52 = vmax.f32 %v6789_v11, 0.0  ;;  %6937 = vmatmul.bf16.gmra.mxu2 %v19287_v51  ;;  %v10627_v7 = vld [vmem:[%s19107_s3 + $0x3f0] sm:$0xf0] }
 0x68f   : > { %7291 = vmatpush.bf16.msra.mxu2 %v10886_v1  ;;  %v10630_v11 = vor.u32 %v12700_v25, %v10627_v7  ;;  %v10339_v46 = vld [vmem:[%s19107_s3 + $0x1b0] sm:$0xf0] }
 0x690   : > { %6888 = vmatmul.bf16.gmra.mxu1 %v19286_v39  ;;  %6986 = vmatmul.bf16.gmra.mxu3 %v19318_v3  ;;  %v17042_v38 = vpack.c.bf16 %v8460_v52, %v8452_v41 }
 0x691   : > { %v6742_v17 = vpop.f32.mrf.mxu2  ;;  %7242 = vmatpush.bf16.msra.mxu1 %v10630_v11 }
 0x692   : > { %19395 = vst [vmem:[#allocation63_spill] sm:$0xff] %v17042_v38  ;;  %v6743_v59 = vadd.f32 %v6742_v17, %v6694_v63  ;;  %v12628_v17 = vld [vmem:[%s19107_s3 + $0x194] sm:$0xf]  ;;  %v19406_v38 = vld [vmem:[#allocation42_spill] sm:$0xff] }
 0x693   : > { %v6791_v19 = vpop.f32.mrf.mxu3  ;;  %v6646_v32 = vpop.f32.mrf.mxu0 }
 0x694   : > { %v6647_v28 = vadd.f32 %v6646_v32, %v16794_v4  ;;  %v6792_v21 = vadd.f32 %v6791_v19, %v6743_v59  ;;  %v12820_v59 = vld [vmem:[%s19107_s3 + $0x794] sm:$0xf] }
 0x695   : > { %v6695_v30 = vpop.f32.mrf.mxu1  ;;  %v11107_v19 = vld [vmem:[%s19107_s3 + $0x7b0] sm:$0xf0] }
 0x696   : > { %v6696_v6 = vadd.f32 %v6695_v30, %v6647_v28  ;;  %v8468_v26 = vmax.f32 %v6792_v21, 0.0  ;;  %v10342_v30 = vor.u32 %v12628_v17, %v10339_v46  ;;  %v11110_v21 = vor.u32 %v12820_v59, %v11107_v19 }
 0x698   : > { %7194 = vmatpush.bf16.msra.mxu0 %v10342_v30  ;;  %7341 = vmatpush.bf16.msra.mxu3 %v11110_v21  ;;  %v19398_v30 = vld [vmem:[#allocation39_spill] sm:$0xff]  ;;  %v12748_v21 = vld [vmem:[%s19107_s3 + $0x554] sm:$0xf] }
 0x699   : > { %v6744_v63 = vpop.f32.mrf.mxu2 }
 0x69a   : > { %v6745_v41 = vadd.f32 %v6744_v63, %v6696_v6 }
 0x69b   : > { %v6793_v52 = vpop.f32.mrf.mxu3  ;;  %v6649_v37 = vpop.f32.mrf.mxu0 }
 0x69c   : > { %v6650_v4 = vadd.f32 %v6649_v37, %v16819_v56  ;;  %v6794_v8 = vadd.f32 %v6793_v52, %v6745_v41  ;;  %v10851_v56 = vld [vmem:[%s19107_s3 + $0x5b0] sm:$0xf0] }
 0x69d   : > { %v6698_v57 = vpop.f32.mrf.mxu1  ;;  %v10854_v50 = vor.u32 %v12756_v18, %v10851_v56  ;;  %v12692_v52 = vld [vmem:[%s19107_s3 + $0x394] sm:$0xf] }
 0x69e   : > { %v6699_v1 = vadd.f32 %v6698_v57, %v6650_v4  ;;  %6844 = vmatmul.bf16.gmra.mxu0 %v19290_v44  ;;  %v8476_v33 = vmax.f32 %v6794_v8, 0.0  ;;  %6942 = vmatmul.bf16.gmra.mxu2 %v19320_v34  ;;  %v10595_v37 = vld [vmem:[%s19107_s3 + $0x3b0] sm:$0xf0]  ;;  %v13167_v8 = vld [vmem:[%s19108_s4] sm:$0xff] }
 0x69f   : > { %7292 = vmatpush.bf16.msra.mxu2 %v10854_v50  ;;  %v10598_v57 = vor.u32 %v12692_v52, %v10595_v37 }
 0x6a0   : > { %6893 = vmatmul.bf16.gmra.mxu1 %v19291_v60  ;;  %6991 = vmatmul.bf16.gmra.mxu3 %v19321_v24  ;;  %v17074_v32 = vpack.c.bf16 %v8476_v33, %v8468_v26 }
 0x6a1   : > { %v6747_v28 = vpop.f32.mrf.mxu2  ;;  %7243 = vmatpush.bf16.msra.mxu1 %v10598_v57 }
 0x6a2   : > { %19396 = vst [vmem:[#allocation64_spill] sm:$0xff] %v17074_v32  ;;  %v6748_v25 = vadd.f32 %v6747_v28, %v6699_v1  ;;  %v17086_v1 = vperm.slane %v13167_v8, 4  ;;  %v19397_v28 = vld [vmem:[#allocation38_spill] sm:$0xff]  ;;  %v19405_v32 = vld [vmem:[#allocation27_spill] sm:$0xff] }
 0x6a3   : > { %v6796_v7 = vpop.f32.mrf.mxu3  ;;  %v6651_v6 = vpop.f32.mrf.mxu0 }
 0x6a4   : > { %v6652_v11 = vadd.f32 %v6651_v6, %v16828_v29  ;;  %v6797_v41 = vadd.f32 %v6796_v7, %v6748_v25  ;;  %v10819_v25 = vld [vmem:[%s19107_s3 + $0x570] sm:$0xf0] }
 0x6a5   : > { %v6700_v63 = vpop.f32.mrf.mxu1  ;;  %v12620_v7 = vld [vmem:[%s19107_s3 + $0x154] sm:$0xf]  ;;  %v10822_v6 = vor.u32 %v12748_v21, %v10819_v25 }
 0x6a6   : > { %v6701_v4 = vadd.f32 %v6700_v63, %v6652_v11  ;;  %v8484_v59 = vmax.f32 %v6797_v41, 0.0  ;;  %v10307_v11 = vld [vmem:[%s19107_s3 + $0x170] sm:$0xf0] }
 0x6a7   : > { %v12812_v63 = vld [vmem:[%s19107_s3 + $0x754] sm:$0xf]  ;;  %7293 = vmatpush.bf16.msra.mxu2 %v10822_v6 }
 0x6a8   : > { %v11075_v41 = vld [vmem:[%s19107_s3 + $0x770] sm:$0xf0] }
 0x6a9   : > { %v6749_v29 = vpop.f32.mrf.mxu2  ;;  %v11078_v57 = vor.u32 %v12812_v63, %v11075_v41 }
 0x6aa   : > { %v6750_v26 = vadd.f32 %v6749_v29, %v6701_v4  ;;  %v10310_v4 = vor.u32 %v12620_v7, %v10307_v11 }
 0x6ab   : > { %v6798_v33 = vpop.f32.mrf.mxu3  ;;  %v6810_v18 = vpop.f32.mrf.mxu0  ;;  %7342 = vmatpush.bf16.msra.mxu3 %v11078_v57  ;;  %v19402_v57 = vld [vmem:[#allocation40_spill] sm:$0xff] }
 0x6ac   : > { %v6811_v56 = vadd.f32 %v6810_v18, %v17086_v1  ;;  %v6799_v50 = vadd.f32 %v6798_v33, %v6750_v26  ;;  %7195 = vmatpush.bf16.msra.mxu0 %v10310_v4  ;;  %v19401_v4 = vld [vmem:[#allocation25_spill] sm:$0xff] }
 0x6ad   : > { %v6859_v17 = vpop.f32.mrf.mxu1 }
 0x6ae   : > { %v6860_v46 = vadd.f32 %v6859_v17, %v6811_v56  ;;  %7005 = vmatmul.bf16.vlgmr.msrb.gmra.mxu0 %v14402_v49  ;;  %v8492_v19 = vmax.f32 %v6799_v50, 0.0  ;;  %7103 = vmatmul.bf16.vlgmr.msrb.gmra.mxu2 %v19397_v28  ;;  %v12684_v17 = vld [vmem:[%s19107_s3 + $0x354] sm:$0xf] }
 0x6af   : > { %v10563_v50 = vld [vmem:[%s19107_s3 + $0x370] sm:$0xf0] }
 0x6b0   : > { %7054 = vmatmul.bf16.vlgmr.msrb.gmra.mxu1 %v14410_v31  ;;  %7152 = vmatmul.bf16.vlgmr.msrb.gmra.mxu3 %v19398_v30  ;;  %v17111_v52 = vpack.c.bf16 %v8492_v19, %v8484_v59  ;;  %v19423_v30 = vld [vmem:[#allocation51_spill] sm:$0xff]  ;;  %v12948_v31 = vld [vmem:[%s19107_s3 + $0xb94] sm:$0xf] }
 0x6b1   : > { %v6908_v37 = vpop.f32.mrf.mxu2 }
 0x6b2   : > { %19399 = vst [vmem:[#allocation65_spill] sm:$0xff] %v17111_v52  ;;  %v6909_v8 = vadd.f32 %v6908_v37, %v6860_v46  ;;  %v10566_v46 = vor.u32 %v12684_v17, %v10563_v50  ;;  %v19400_v37 = vld [vmem:[#allocation24_spill] sm:$0xff] }
 0x6b3   : > { %v6957_v29 = vpop.f32.mrf.mxu3  ;;  %v6812_v26 = vpop.f32.mrf.mxu0  ;;  %v10275_v17 = vld [vmem:[%s19107_s3 + $0x130] sm:$0xf0] }
 0x6b4   : > { %v6813_v33 = vadd.f32 %v6812_v26, %v17086_v1  ;;  %v17114_v56 = vadd.f32 %v6957_v29, %v6909_v8  ;;  %7244 = vmatpush.bf16.msra.mxu1 %v10566_v46  ;;  %v19403_v8 = vld [vmem:[#allocation41_spill] sm:$0xff]  ;;  %v12740_v29 = vld [vmem:[%s19107_s3 + $0x514] sm:$0xf] }
 0x6b5   : > { %v6861_v18 = vpop.f32.mrf.mxu1  ;;  %v10787_v26 = vld [vmem:[%s19107_s3 + $0x530] sm:$0xf0] }
 0x6b6   : > { %v6862_v59 = vadd.f32 %v6861_v18, %v6813_v33  ;;  %v12612_v33 = vld [vmem:[%s19107_s3 + $0x114] sm:$0xf]  ;;  %v10790_v18 = vor.u32 %v12740_v29, %v10787_v26 }
 0x6b7   : > { %v12804_v50 = vld [vmem:[%s19107_s3 + $0x714] sm:$0xf] }
 0x6b8   : > { %7294 = vmatpush.bf16.msra.mxu2 %v10790_v18  ;;  %v12676_v52 = vld [vmem:[%s19107_s3 + $0x314] sm:$0xf] }
 0x6b9   : > { %v6910_v19 = vpop.f32.mrf.mxu2 }
 0x6ba   : > { %v6911_v21 = vadd.f32 %v6910_v19, %v6862_v59  ;;  %v11043_v59 = vld [vmem:[%s19107_s3 + $0x730] sm:$0xf0]  ;;  %v10278_v19 = vor.u32 %v12612_v33, %v10275_v17 }
 0x6bb   : > { %v6959_v25 = vpop.f32.mrf.mxu3  ;;  %v6815_v7 = vpop.f32.mrf.mxu0  ;;  %v10531_v33 = vld [vmem:[%s19107_s3 + $0x330] sm:$0xf0] }
 0x6bc   : > { %v6816_v6 = vadd.f32 %v6815_v7, %v17086_v1  ;;  %v17123_v63 = vadd.f32 %v6959_v25, %v6911_v21  ;;  %v11046_v21 = vor.u32 %v12804_v50, %v11043_v59  ;;  %7196 = vmatpush.bf16.msra.mxu0 %v10278_v19 }
 0x6bd   : > { %v6864_v11 = vpop.f32.mrf.mxu1 }
 0x6be   : > { %v6865_v41 = vadd.f32 %v6864_v11, %v6816_v6  ;;  %7010 = vmatmul.bf16.gmra.mxu0 %v19400_v37  ;;  %7108 = vmatmul.bf16.gmra.mxu2 %v19402_v57  ;;  %v19418_v57 = vld [vmem:[#allocation48_spill] sm:$0xff]  ;;  %v19422_v37 = vld [vmem:[#allocation50_spill] sm:$0xff] }
 0x6bf   : > { %7343 = vmatpush.bf16.msra.mxu3 %v11046_v21 }
 0x6c0   : > { %7059 = vmatmul.bf16.gmra.mxu1 %v19401_v4  ;;  %7157 = vmatmul.bf16.gmra.mxu3 %v19403_v8  ;;  %v19415_v8 = vld [vmem:[#allocation47_spill] sm:$0xff]  ;;  %v19419_v4 = vld [vmem:[#allocation49_spill] sm:$0xff] }
 0x6c1   : > { %v6913_v46 = vpop.f32.mrf.mxu2 }
 0x6c2   : > { %v6914_v25 = vadd.f32 %v6913_v46, %v6865_v41  ;;  %v10534_v41 = vor.u32 %v12676_v52, %v10531_v33  ;;  %v12732_v52 = vld [vmem:[%s19107_s3 + $0x4d4] sm:$0xf] }
 0x6c3   : > { %v6962_v7 = vpop.f32.mrf.mxu3  ;;  %v6817_v6 = vpop.f32.mrf.mxu0 }
 0x6c4   : > { %v6818_v11 = vadd.f32 %v6817_v6, %v17086_v1  ;;  %v17148_v26 = vadd.f32 %v6962_v7, %v6914_v25  ;;  %7245 = vmatpush.bf16.msra.mxu1 %v10534_v41  ;;  %v19404_v6 = vld [vmem:[#allocation26_spill] sm:$0xff]  ;;  %v12796_v41 = vld [vmem:[%s19107_s3 + $0x6d4] sm:$0xf] }
 0x6c5   : > { %v6866_v29 = vpop.f32.mrf.mxu1 }
 0x6c6   : > { %v6867_v17 = vadd.f32 %v6866_v29, %v6818_v11  ;;  %v10755_v11 = vld [vmem:[%s19107_s3 + $0x4f0] sm:$0xf0] }
 0x6c7   : > { %v12604_v29 = vld [vmem:[%s19107_s3 + $0xd4] sm:$0xf]  ;;  %v10758_v33 = vor.u32 %v12732_v52, %v10755_v11 }
 0x6c9   : > { %v6915_v50 = vpop.f32.mrf.mxu2  ;;  %7295 = vmatpush.bf16.msra.mxu2 %v10758_v33 }
 0x6ca   : > { %v6916_v18 = vadd.f32 %v6915_v50, %v6867_v17  ;;  %v10243_v17 = vld [vmem:[%s19107_s3 + $0xf0] sm:$0xf0] }
 0x6cb   : > { %v6964_v59 = vpop.f32.mrf.mxu3  ;;  %v6820_v46 = vpop.f32.mrf.mxu0  ;;  %v11011_v50 = vld [vmem:[%s19107_s3 + $0x6f0] sm:$0xf0] }
 0x6cc   : > { %v6821_v19 = vadd.f32 %v6820_v46, %v17086_v1  ;;  %v17157_v25 = vadd.f32 %v6964_v59, %v6916_v18  ;;  %v10246_v59 = vor.u32 %v12604_v29, %v10243_v17  ;;  %v11014_v46 = vor.u32 %v12796_v41, %v11011_v50  ;;  %v10499_v29 = vld [vmem:[%s19107_s3 + $0x2f0] sm:$0xf0] }
 0x6cd   : > { %v6869_v21 = vpop.f32.mrf.mxu1 }
 0x6ce   : > { %v6870_v7 = vadd.f32 %v6869_v21, %v6821_v19  ;;  %7015 = vmatmul.bf16.gmra.mxu0 %v19404_v6  ;;  %7113 = vmatmul.bf16.gmra.mxu2 %v19406_v38  ;;  %v19410_v38 = vld [vmem:[#allocation44_spill] sm:$0xff]  ;;  %v19414_v6 = vld [vmem:[#allocation46_spill] sm:$0xff] }
 0x6cf   : > { %7197 = vmatpush.bf16.msra.mxu0 %v10246_v59  ;;  %7344 = vmatpush.bf16.msra.mxu3 %v11014_v46 }
 0x6d0   : > { %7064 = vmatmul.bf16.gmra.mxu1 %v19405_v32  ;;  %7162 = vmatmul.bf16.gmra.mxu3 %v19407_v58  ;;  %v19409_v58 = vld [vmem:[#allocation29_spill] sm:$0xff] }
 0x6d1   : > { %v6918_v18 = vpop.f32.mrf.mxu2  ;;  %v19411_v32 = vld [vmem:[#allocation45_spill] sm:$0xff] }
 0x6d2   : > { %v6919_v19 = vadd.f32 %v6918_v18, %v6870_v7  ;;  %v10502_v7 = vor.u32 %v12668_v53, %v10499_v29  ;;  %v12724_v53 = vld [vmem:[%s19107_s3 + $0x494] sm:$0xf] }
 0x6d3   : > { %v6967_v21 = vpop.f32.mrf.mxu3  ;;  %v6822_v5 = vpop.f32.mrf.mxu0 }
 0x6d4   : > { %v6823_v52 = vadd.f32 %v6822_v5, %v17086_v1  ;;  %v17182_v14 = vadd.f32 %v6967_v21, %v6919_v19  ;;  %7246 = vmatpush.bf16.msra.mxu1 %v10502_v7  ;;  %v19408_v21 = vld [vmem:[#allocation28_spill] sm:$0xff] }
 0x6d5   : > { %v6871_v11 = vpop.f32.mrf.mxu1  ;;  %v12788_v7 = vld [vmem:[%s19107_s3 + $0x694] sm:$0xf] }
 0x6d6   : > { %v6872_v17 = vadd.f32 %v6871_v11, %v6823_v52  ;;  %v10723_v52 = vld [vmem:[%s19107_s3 + $0x4b0] sm:$0xf0] }
 0x6d7   : > { %v12596_v11 = vld [vmem:[%s19107_s3 + $0x94] sm:$0xf]  ;;  %v10726_v29 = vor.u32 %v12724_v53, %v10723_v52 }
 0x6d9   : > { %v6920_v41 = vpop.f32.mrf.mxu2  ;;  %7296 = vmatpush.bf16.msra.mxu2 %v10726_v29 }
 0x6da   : > { %v6921_v33 = vadd.f32 %v6920_v41, %v6872_v17  ;;  %v10211_v17 = vld [vmem:[%s19107_s3 + $0xb0] sm:$0xf0] }
 0x6db   : > { %v6969_v50 = vpop.f32.mrf.mxu3  ;;  %v6825_v5 = vpop.f32.mrf.mxu0  ;;  %v10979_v41 = vld [vmem:[%s19107_s3 + $0x6b0] sm:$0xf0] }
 0x6dc   : > { %v6826_v18 = vadd.f32 %v6825_v5, %v17086_v1  ;;  %v17191_v46 = vadd.f32 %v6969_v50, %v6921_v33  ;;  %v10214_v50 = vor.u32 %v12596_v11, %v10211_v17  ;;  %v10982_v5 = vor.u32 %v12788_v7, %v10979_v41  ;;  %v10467_v11 = vld [vmem:[%s19107_s3 + $0x2b0] sm:$0xf0] }
 0x6dd   : > { %v6874_v59 = vpop.f32.mrf.mxu1 }
 0x6de   : > { %v6875_v19 = vadd.f32 %v6874_v59, %v6826_v18  ;;  %7020 = vmatmul.bf16.gmra.mxu0 %v19408_v21  ;;  %7118 = vmatmul.bf16.gmra.mxu2 %v19410_v38  ;;  %v19413_v21 = vld [vmem:[#allocation31_spill] sm:$0xff] }
 0x6df   : > { %7198 = vmatpush.bf16.msra.mxu0 %v10214_v50  ;;  %7345 = vmatpush.bf16.msra.mxu3 %v10982_v5 }
 0x6e0   : > { %7069 = vmatmul.bf16.gmra.mxu1 %v19409_v58  ;;  %7167 = vmatmul.bf16.gmra.mxu3 %v19411_v32  ;;  %v12660_v58 = vld [vmem:[%s19107_s3 + $0x294] sm:$0xf] }
 0x6e1   : > { %v6923_v33 = vpop.f32.mrf.mxu2 }
 0x6e2   : > { %v6924_v18 = vadd.f32 %v6923_v33, %v6875_v19  ;;  %v10470_v19 = vor.u32 %v12660_v58, %v10467_v11  ;;  %v12716_v58 = vld [vmem:[%s19107_s3 + $0x454] sm:$0xf] }
 0x6e3   : > { %v6972_v59 = vpop.f32.mrf.mxu3  ;;  %v6827_v32 = vpop.f32.mrf.mxu0 }
 0x6e4   : > { %v6828_v53 = vadd.f32 %v6827_v32, %v17086_v1  ;;  %v17216_v38 = vadd.f32 %v6972_v59, %v6924_v18  ;;  %7247 = vmatpush.bf16.msra.mxu1 %v10470_v19  ;;  %v19412_v59 = vld [vmem:[#allocation30_spill] sm:$0xff]  ;;  %v12780_v19 = vld [vmem:[%s19107_s3 + $0x654] sm:$0xf] }
 0x6e5   : > { %v6876_v52 = vpop.f32.mrf.mxu1 }
 0x6e6   : > { %v6877_v17 = vadd.f32 %v6876_v52, %v6828_v53  ;;  %v10691_v53 = vld [vmem:[%s19107_s3 + $0x470] sm:$0xf0] }
 0x6e7   : > { %v12588_v52 = vld [vmem:[%s19107_s3 + $0x54] sm:$0xf]  ;;  %v10694_v11 = vor.u32 %v12716_v58, %v10691_v53 }
 0x6e9   : > { %v6925_v7 = vpop.f32.mrf.mxu2  ;;  %7297 = vmatpush.bf16.msra.mxu2 %v10694_v11 }
 0x6ea   : > { %v6926_v29 = vadd.f32 %v6925_v7, %v6877_v17  ;;  %v10179_v17 = vld [vmem:[%s19107_s3 + $0x70] sm:$0xf0] }
 0x6eb   : > { %v6974_v41 = vpop.f32.mrf.mxu3  ;;  %v6830_v32 = vpop.f32.mrf.mxu0  ;;  %v10947_v7 = vld [vmem:[%s19107_s3 + $0x670] sm:$0xf0] }
 0x6ec   : > { %v6831_v33 = vadd.f32 %v6830_v32, %v17086_v1  ;;  %v17225_v5 = vadd.f32 %v6974_v41, %v6926_v29  ;;  %v10182_v41 = vor.u32 %v12588_v52, %v10179_v17  ;;  %v10950_v32 = vor.u32 %v12780_v19, %v10947_v7  ;;  %v10435_v52 = vld [vmem:[%s19107_s3 + $0x270] sm:$0xf0] }
 0x6ed   : > { %v6879_v50 = vpop.f32.mrf.mxu1 }
 0x6ee   : > { %v6880_v18 = vadd.f32 %v6879_v50, %v6831_v33  ;;  %7025 = vmatmul.bf16.gmra.mxu0 %v19412_v59  ;;  %7123 = vmatmul.bf16.gmra.mxu2 %v19414_v6  ;;  %v19417_v59 = vld [vmem:[#allocation33_spill] sm:$0xff] }
 0x6ef   : > { %7199 = vmatpush.bf16.msra.mxu0 %v10182_v41  ;;  %7346 = vmatpush.bf16.msra.mxu3 %v10950_v32 }
 0x6f0   : > { %7074 = vmatmul.bf16.gmra.mxu1 %v19413_v21  ;;  %7172 = vmatmul.bf16.gmra.mxu3 %v19415_v8  ;;  %v12652_v21 = vld [vmem:[%s19107_s3 + $0x254] sm:$0xf] }
 0x6f1   : > { %v6928_v29 = vpop.f32.mrf.mxu2 }
 0x6f2   : > { %v6929_v33 = vadd.f32 %v6928_v29, %v6880_v18  ;;  %v10438_v18 = vor.u32 %v12652_v21, %v10435_v52  ;;  %v12708_v21 = vld [vmem:[%s19107_s3 + $0x414] sm:$0xf] }
 0x6f3   : > { %v6977_v50 = vpop.f32.mrf.mxu3  ;;  %v6832_v8 = vpop.f32.mrf.mxu0 }
 0x6f4   : > { %v6833_v58 = vadd.f32 %v6832_v8, %v17086_v1  ;;  %v17250_v6 = vadd.f32 %v6977_v50, %v6929_v33  ;;  %7248 = vmatpush.bf16.msra.mxu1 %v10438_v18  ;;  %v19416_v50 = vld [vmem:[#allocation32_spill] sm:$0xff] }
 0x6f5   : > { %v6881_v53 = vpop.f32.mrf.mxu1  ;;  %v12772_v18 = vld [vmem:[%s19107_s3 + $0x614] sm:$0xf] }
 0x6f6   : > { %v6882_v17 = vadd.f32 %v6881_v53, %v6833_v58  ;;  %v10659_v58 = vld [vmem:[%s19107_s3 + $0x430] sm:$0xf0] }
 0x6f7   : > { %v12580_v53 = vld [vmem:[%s19107_s3 + $0x14] sm:$0xf]  ;;  %v10662_v52 = vor.u32 %v12708_v21, %v10659_v58 }
 0x6f9   : > { %v6930_v19 = vpop.f32.mrf.mxu2  ;;  %7298 = vmatpush.bf16.msra.mxu2 %v10662_v52 }
 0x6fa   : > { %v6931_v11 = vadd.f32 %v6930_v19, %v6882_v17  ;;  %v10147_v17 = vld [vmem:[%s19107_s3 + $0x30] sm:$0xf0] }
 0x6fb   : > { %v6979_v7 = vpop.f32.mrf.mxu3  ;;  %v6835_v8 = vpop.f32.mrf.mxu0  ;;  %v10915_v19 = vld [vmem:[%s19107_s3 + $0x630] sm:$0xf0] }
 0x6fc   : > { %v6836_v29 = vadd.f32 %v6835_v8, %v17086_v1  ;;  %v17259_v32 = vadd.f32 %v6979_v7, %v6931_v11  ;;  %v10150_v7 = vor.u32 %v12580_v53, %v10147_v17  ;;  %v10918_v8 = vor.u32 %v12772_v18, %v10915_v19  ;;  %v10403_v53 = vld [vmem:[%s19107_s3 + $0x230] sm:$0xf0] }
 0x6fd   : > { %v6884_v41 = vpop.f32.mrf.mxu1 }
 0x6fe   : > { %v6885_v33 = vadd.f32 %v6884_v41, %v6836_v29  ;;  %7030 = vmatmul.bf16.gmra.mxu0 %v19416_v50  ;;  %7128 = vmatmul.bf16.gmra.mxu2 %v19418_v57  ;;  %v19421_v50 = vld [vmem:[#allocation35_spill] sm:$0xff] }
 0x6ff   : > { %7200 = vmatpush.bf16.msra.mxu0 %v10150_v7  ;;  %7347 = vmatpush.bf16.msra.mxu3 %v10918_v8 }
 0x700   : > { %7079 = vmatmul.bf16.gmra.mxu1 %v19417_v59  ;;  %7177 = vmatmul.bf16.gmra.mxu3 %v19419_v4  ;;  %v12644_v59 = vld [vmem:[%s19107_s3 + $0x214] sm:$0xf] }
 0x701   : > { %v6933_v11 = vpop.f32.mrf.mxu2 }
 0x702   : > { %v6934_v29 = vadd.f32 %v6933_v11, %v6885_v33  ;;  %v10406_v33 = vor.u32 %v12644_v59, %v10403_v53  ;;  %v13020_v59 = vld [vmem:[%s19107_s3 + $0xdd4] sm:$0xf] }
 0x703   : > { %v6982_v41 = vpop.f32.mrf.mxu3  ;;  %v6837_v4 = vpop.f32.mrf.mxu0 }
 0x704   : > { %v6838_v21 = vadd.f32 %v6837_v4, %v17086_v1  ;;  %v17284_v57 = vadd.f32 %v6982_v41, %v6934_v29  ;;  %7249 = vmatpush.bf16.msra.mxu1 %v10406_v33  ;;  %v19420_v41 = vld [vmem:[#allocation34_spill] sm:$0xff]  ;;  %v13084_v33 = vld [vmem:[%s19107_s3 + $0xfd4] sm:$0xf] }
 0x705   : > { %v6886_v58 = vpop.f32.mrf.mxu1 }
 0x706   : > { %v6887_v17 = vadd.f32 %v6886_v58, %v6838_v21  ;;  %v11907_v21 = vld [vmem:[%s19107_s3 + $0xdf0] sm:$0xf0] }
 0x707   : > { %v12892_v58 = vld [vmem:[%s19107_s3 + $0x9d4] sm:$0xf]  ;;  %v11910_v53 = vor.u32 %v13020_v59, %v11907_v21 }
 0x709   : > { %v6935_v18 = vpop.f32.mrf.mxu2  ;;  %7487 = vmatpush.bf16.msrb.mxu2 %v11910_v53 }
 0x70a   : > { %v6936_v52 = vadd.f32 %v6935_v18, %v6887_v17  ;;  %v11395_v17 = vld [vmem:[%s19107_s3 + $0x9f0] sm:$0xf0] }
 0x70b   : > { %v6984_v19 = vpop.f32.mrf.mxu3  ;;  %v6840_v4 = vpop.f32.mrf.mxu0  ;;  %v12163_v18 = vld [vmem:[%s19107_s3 + $0xff0] sm:$0xf0] }
 0x70c   : > { %v6841_v11 = vadd.f32 %v6840_v4, %v17086_v1  ;;  %v17293_v8 = vadd.f32 %v6984_v19, %v6936_v52  ;;  %v11398_v19 = vor.u32 %v12892_v58, %v11395_v17  ;;  %v12166_v4 = vor.u32 %v13084_v33, %v12163_v18  ;;  %v11651_v58 = vld [vmem:[%s19107_s3 + $0xbf0] sm:$0xf0] }
 0x70d   : > { %v6889_v7 = vpop.f32.mrf.mxu1 }
 0x70e   : > { %v6890_v29 = vadd.f32 %v6889_v7, %v6841_v11  ;;  %7035 = vmatmul.bf16.gmra.mxu0 %v19420_v41  ;;  %7133 = vmatmul.bf16.gmra.mxu2 %v19422_v37  ;;  %v12956_v41 = vld [vmem:[%s19107_s3 + $0xbd4] sm:$0xf] }
 0x70f   : > { %7389 = vmatpush.bf16.msrb.mxu0 %v11398_v19  ;;  %7536 = vmatpush.bf16.msrb.mxu3 %v12166_v4 }
 0x710   : > { %7084 = vmatmul.bf16.gmra.mxu1 %v19421_v50  ;;  %7182 = vmatmul.bf16.gmra.mxu3 %v19423_v30 }
 0x711   : > { %v6938_v52 = vpop.f32.mrf.mxu2 }
 0x712   : > { %v6939_v11 = vadd.f32 %v6938_v52, %v6890_v29  ;;  %v11654_v29 = vor.u32 %v12956_v41, %v11651_v58  ;;  %v11875_v41 = vld [vmem:[%s19107_s3 + $0xdb0] sm:$0xf0] }
 0x713   : > { %v6987_v7 = vpop.f32.mrf.mxu3  ;;  %v6842_v30 = vpop.f32.mrf.mxu0  ;;  %v12884_v58 = vld [vmem:[%s19107_s3 + $0x994] sm:$0xf] }
 0x714   : > { %v6843_v59 = vadd.f32 %v6842_v30, %v17086_v1  ;;  %v17318_v37 = vadd.f32 %v6987_v7, %v6939_v11  ;;  %7438 = vmatpush.bf16.msrb.mxu1 %v11654_v29  ;;  %v19424_v11 = vld [vmem:[#allocation36_spill] sm:$0xff]  ;;  %v19425_v7 = vld [vmem:[#allocation37_spill] sm:$0xff] }
 0x715   : > { %v6891_v21 = vpop.f32.mrf.mxu1 }
 0x716   : > { %v6892_v50 = vadd.f32 %v6891_v21, %v6843_v59  ;;  %v19426_v59 = vld [vmem:[#allocation52_spill] sm:$0xff]  ;;  %v19427_v21 = vld [vmem:[#allocation53_spill] sm:$0xff] }
 0x719   : > { %v6940_v17 = vpop.f32.mrf.mxu2 }
 0x71a   : > { %v6941_v53 = vadd.f32 %v6940_v17, %v6892_v50  ;;  %v13012_v50 = vld [vmem:[%s19107_s3 + $0xd94] sm:$0xf] }
 0x71b   : > { %v6989_v33 = vpop.f32.mrf.mxu3  ;;  %v6845_v30 = vpop.f32.mrf.mxu0  ;;  %v11878_v17 = vor.u32 %v13012_v50, %v11875_v41 }
 0x71c   : > { %v6846_v18 = vadd.f32 %v6845_v30, %v17086_v1  ;;  %v17327_v19 = vadd.f32 %v6989_v33, %v6941_v53  ;;  %v11363_v53 = vld [vmem:[%s19107_s3 + $0x9b0] sm:$0xf0] }
 0x71d   : > { %v6894_v52 = vpop.f32.mrf.mxu1  ;;  %v13076_v33 = vld [vmem:[%s19107_s3 + $0xf94] sm:$0xf]  ;;  %7488 = vmatpush.bf16.msrb.mxu2 %v11878_v17 }
 0x71e   : > { %v6895_v4 = vadd.f32 %v6894_v52, %v6846_v18  ;;  %7040 = vmatmul.bf16.gmra.mxu0 %v19424_v11  ;;  %7138 = vmatmul.bf16.gmra.mxu2 %v19426_v59  ;;  %v12131_v30 = vld [vmem:[%s19107_s3 + $0xfb0] sm:$0xf0]  ;;  %v11366_v59 = vor.u32 %v12884_v58, %v11363_v53 }
 0x720   : > { %7089 = vmatmul.bf16.gmra.mxu1 %v19425_v7  ;;  %7187 = vmatmul.bf16.gmra.mxu3 %v19427_v21  ;;  %v12134_v7 = vor.u32 %v13076_v33, %v12131_v30 }
 0x721   : > { %v6943_v29 = vpop.f32.mrf.mxu2  ;;  %7390 = vmatpush.bf16.msrb.mxu0 %v11366_v59 }
 0x722   : > { %v6944_v18 = vadd.f32 %v6943_v29, %v6895_v4  ;;  %7537 = vmatpush.bf16.msrb.mxu3 %v12134_v7  ;;  %v11619_v4 = vld [vmem:[%s19107_s3 + $0xbb0] sm:$0xf0] }
 0x723   : > { %v6992_v52 = vpop.f32.mrf.mxu3  ;;  %v6847_v21 = vpop.f32.mrf.mxu0  ;;  %v11622_v29 = vor.u32 %v12948_v31, %v11619_v4  ;;  %v19428_v7 = vld [vmem:[#allocation8_spill] sm:$0xff] }
 0x724   : > { %v6848_v11 = vadd.f32 %v6847_v21, %v17086_v1  ;;  %v17352_v41 = vadd.f32 %v6992_v52, %v6944_v18  ;;  %v13004_v31 = vld [vmem:[%s19107_s3 + $0xd54] sm:$0xf] }
 0x725   : > { %v6896_v50 = vpop.f32.mrf.mxu1  ;;  %7439 = vmatpush.bf16.msrb.mxu1 %v11622_v29  ;;  %v11331_v18 = vld [vmem:[%s19107_s3 + $0x970] sm:$0xf0] }
 0x726   : > { %v6897_v28 = vadd.f32 %v6896_v50, %v6848_v11  ;;  %v13068_v52 = vld [vmem:[%s19107_s3 + $0xf54] sm:$0xf] }
 0x727   : > { %v12099_v50 = vld [vmem:[%s19107_s3 + $0xf70] sm:$0xf0] }
 0x729   : > { %v6945_v58 = vpop.f32.mrf.mxu2 }
 0x72a   : > { %v6946_v53 = vadd.f32 %v6945_v58, %v6897_v28  ;;  %v11843_v28 = vld [vmem:[%s19107_s3 + $0xd70] sm:$0xf0]  ;;  %v12102_v58 = vor.u32 %v13068_v52, %v12099_v50 }
 0x72b   : > { %v6994_v1 = vpop.f32.mrf.mxu3  ;;  %v7006_v21 = vpop.f32.mrf.mxu0  ;;  %v11846_v30 = vor.u32 %v13004_v31, %v11843_v28 }
 0x72c   : > { %v7007_v17 = vadd.f32 %v7006_v21, %v17114_v56  ;;  %v17361_v59 = vadd.f32 %v6994_v1, %v6946_v53  ;;  %v12876_v56 = vld [vmem:[%s19107_s3 + $0x954] sm:$0xf]  ;;  %7538 = vmatpush.bf16.msrb.mxu3 %v12102_v58 }
 0x72d   : > { %v7055_v33 = vpop.f32.mrf.mxu1  ;;  %v11334_v29 = vor.u32 %v12876_v56, %v11331_v18  ;;  %7489 = vmatpush.bf16.msrb.mxu2 %v11846_v30  ;;  %v11587_v56 = vld [vmem:[%s19107_s3 + $0xb70] sm:$0xf0] }
 0x72e   : > { %v7056_v11 = vadd.f32 %v7055_v33, %v7007_v17  ;;  %7201 = vmatmul.bf16.vlgmr.msra.gmra.mxu0 %v13809_v61  ;;  %7299 = vmatmul.bf16.vlgmr.msra.gmra.mxu2 %v14103_v20 }
 0x72f   : > { %7391 = vmatpush.bf16.msrb.mxu0 %v11334_v29 }
 0x730   : > { %7250 = vmatmul.bf16.vlgmr.msra.gmra.mxu1 %v13817_v12  ;;  %7348 = vmatmul.bf16.vlgmr.msra.gmra.mxu3 %v19428_v7  ;;  %v12940_v7 = vld [vmem:[%s19107_s3 + $0xb54] sm:$0xf] }
 0x731   : > { %v7104_v4 = vpop.f32.mrf.mxu2  ;;  %v11590_v18 = vor.u32 %v12940_v7, %v11587_v56  ;;  %v12996_v7 = vld [vmem:[%s19107_s3 + $0xd14] sm:$0xf] }
 0x732   : > { %v7105_v53 = vadd.f32 %v7104_v4, %v7056_v11  ;;  %v12067_v56 = vld [vmem:[%s19107_s3 + $0xf30] sm:$0xf0] }
 0x733   : > { %v7153_v1 = vpop.f32.mrf.mxu3  ;;  %v7008_v21 = vpop.f32.mrf.mxu0  ;;  %7440 = vmatpush.bf16.msrb.mxu1 %v11590_v18 }
 0x734   : > { %v7009_v17 = vadd.f32 %v7008_v21, %v17123_v63  ;;  %v7154_v31 = vadd.f32 %v7153_v1, %v7105_v53  ;;  %v12868_v21 = vld [vmem:[%s19107_s3 + $0x914] sm:$0xf] }
 0x735   : > { %v7057_v33 = vpop.f32.mrf.mxu1 }
 0x736   : > { %v7058_v28 = vadd.f32 %v7057_v33, %v7009_v17  ;;  %v8373_v53 = vmax.f32 %v7154_v31, 0.0  ;;  %v11299_v31 = vld [vmem:[%s19107_s3 + $0x930] sm:$0xf0] }
 0x739   : > { %v7106_v11 = vpop.f32.mrf.mxu2 }
 0x73a   : > { %v7107_v52 = vadd.f32 %v7106_v11, %v7058_v28  ;;  %v13060_v28 = vld [vmem:[%s19107_s3 + $0xf14] sm:$0xf]  ;;  %v11302_v11 = vor.u32 %v12868_v21, %v11299_v31 }
 0x73b   : > { %v7155_v30 = vpop.f32.mrf.mxu3  ;;  %v7011_v50 = vpop.f32.mrf.mxu0 }
 0x73c   : > { %v7012_v63 = vadd.f32 %v7011_v50, %v17148_v26  ;;  %v7156_v29 = vadd.f32 %v7155_v30, %v7107_v52  ;;  %v11811_v26 = vld [vmem:[%s19107_s3 + $0xd30] sm:$0xf0]  ;;  %v12070_v52 = vor.u32 %v13060_v28, %v12067_v56  ;;  %7392 = vmatpush.bf16.msrb.mxu0 %v11302_v11 }
 0x73d   : > { %v7060_v4 = vpop.f32.mrf.mxu1  ;;  %v11814_v33 = vor.u32 %v12996_v7, %v11811_v26  ;;  %v12932_v7 = vld [vmem:[%s19107_s3 + $0xb14] sm:$0xf] }
 0x73e   : > { %v7061_v58 = vadd.f32 %v7060_v4, %v7012_v63  ;;  %7206 = vmatmul.bf16.gmra.mxu0 %v13845_v45  ;;  %v8381_v1 = vmax.f32 %v7156_v29, 0.0  ;;  %7304 = vmatmul.bf16.gmra.mxu2 %v19269_v42  ;;  %v11555_v26 = vld [vmem:[%s19107_s3 + $0xb30] sm:$0xf0] }
 0x73f   : > { %7490 = vmatpush.bf16.msrb.mxu2 %v11814_v33  ;;  %7539 = vmatpush.bf16.msrb.mxu3 %v12070_v52  ;;  %v11558_v21 = vor.u32 %v12932_v7, %v11555_v26 }
 0x740   : > { %7255 = vmatmul.bf16.gmra.mxu1 %v13853_v62  ;;  %7353 = vmatmul.bf16.gmra.mxu3 %v19270_v55  ;;  %v17406_v17 = vpack.c.bf16 %v8381_v1, %v8373_v53 }
 0x741   : > { %v7109_v18 = vpop.f32.mrf.mxu2  ;;  %7441 = vmatpush.bf16.msrb.mxu1 %v11558_v21 }
 0x742   : > { %19429 = vst [vmem:[#allocation66_spill] sm:$0xff] %v17406_v17  ;;  %v7110_v30 = vadd.f32 %v7109_v18, %v7061_v58  ;;  %v10505_v17 = vld [vmem:[%s19107_s3 + $0x2d8] sm:$0xf] }
 0x743   : > { %v7158_v50 = vpop.f32.mrf.mxu3  ;;  %v7013_v63 = vpop.f32.mrf.mxu0 }
 0x744   : > { %v7014_v4 = vadd.f32 %v7013_v63, %v17157_v25  ;;  %v7159_v53 = vadd.f32 %v7158_v50, %v7110_v30  ;;  %v12988_v50 = vld [vmem:[%s19107_s3 + $0xcd4] sm:$0xf] }
 0x745   : > { %v7062_v29 = vpop.f32.mrf.mxu1  ;;  %v12860_v63 = vld [vmem:[%s19107_s3 + $0x8d4] sm:$0xf] }
 0x746   : > { %v7063_v1 = vadd.f32 %v7062_v29, %v7014_v4  ;;  %v8389_v52 = vmax.f32 %v7159_v53, 0.0  ;;  %v11267_v29 = vld [vmem:[%s19107_s3 + $0x8f0] sm:$0xf0] }
 0x747   : > { %v13052_v53 = vld [vmem:[%s19107_s3 + $0xed4] sm:$0xf]  ;;  %v11270_v21 = vor.u32 %v12860_v63, %v11267_v29 }
 0x749   : > { %v7111_v58 = vpop.f32.mrf.mxu2  ;;  %7393 = vmatpush.bf16.msrb.mxu0 %v11270_v21 }
 0x74a   : > { %v7112_v31 = vadd.f32 %v7111_v58, %v7063_v1  ;;  %v12035_v1 = vld [vmem:[%s19107_s3 + $0xef0] sm:$0xf0] }
 0x74b   : > { %v7160_v33 = vpop.f32.mrf.mxu3  ;;  %v7016_v28 = vpop.f32.mrf.mxu0  ;;  %v12038_v58 = vor.u32 %v13052_v53, %v12035_v1 }
 0x74c   : > { %v7017_v25 = vadd.f32 %v7016_v28, %v17182_v14  ;;  %v7161_v18 = vadd.f32 %v7160_v33, %v7112_v31  ;;  %v11779_v14 = vld [vmem:[%s19107_s3 + $0xcf0] sm:$0xf0] }
 0x74d   : > { %v7065_v56 = vpop.f32.mrf.mxu1  ;;  %v11782_v4 = vor.u32 %v12988_v50, %v11779_v14  ;;  %7540 = vmatpush.bf16.msrb.mxu3 %v12038_v58  ;;  %v12924_v14 = vld [vmem:[%s19107_s3 + $0xad4] sm:$0xf] }
 0x74e   : > { %v7066_v11 = vadd.f32 %v7065_v56, %v7017_v25  ;;  %7211 = vmatmul.bf16.gmra.mxu0 %v13881_v35  ;;  %v8397_v30 = vmax.f32 %v7161_v18, 0.0  ;;  %7309 = vmatmul.bf16.gmra.mxu2 %v19350_v13 }
 0x74f   : > { %7491 = vmatpush.bf16.msrb.mxu2 %v11782_v4 }
 0x750   : > { %7260 = vmatmul.bf16.gmra.mxu1 %v19310_v47  ;;  %7358 = vmatmul.bf16.gmra.mxu3 %v19390_v48  ;;  %v17447_v7 = vpack.c.bf16 %v8397_v30, %v8389_v52  ;;  %v11523_v52 = vld [vmem:[%s19107_s3 + $0xaf0] sm:$0xf0] }
 0x751   : > { %v7114_v26 = vpop.f32.mrf.mxu2  ;;  %v11526_v30 = vor.u32 %v12924_v14, %v11523_v52 }
 0x752   : > { %19430 = vst [vmem:[#allocation67_spill] sm:$0xff] %v17447_v7  ;;  %v7115_v31 = vadd.f32 %v7114_v26, %v7066_v11 }
 0x753   : > { %v7163_v33 = vpop.f32.mrf.mxu3  ;;  %v7018_v28 = vpop.f32.mrf.mxu0  ;;  %7442 = vmatpush.bf16.msrb.mxu1 %v11526_v30 }
 0x754   : > { %v7019_v25 = vadd.f32 %v7018_v28, %v17191_v46  ;;  %v7164_v18 = vadd.f32 %v7163_v33, %v7115_v31  ;;  %v12980_v31 = vld [vmem:[%s19107_s3 + $0xc94] sm:$0xf] }
 0x755   : > { %v7067_v56 = vpop.f32.mrf.mxu1  ;;  %v12852_v33 = vld [vmem:[%s19107_s3 + $0x894] sm:$0xf] }
 0x756   : > { %v7068_v50 = vadd.f32 %v7067_v56, %v7019_v25  ;;  %v8405_v21 = vmax.f32 %v7164_v18, 0.0  ;;  %v11235_v25 = vld [vmem:[%s19107_s3 + $0x8b0] sm:$0xf0] }
 0x757   : > { %v13044_v56 = vld [vmem:[%s19107_s3 + $0xe94] sm:$0xf]  ;;  %v11238_v52 = vor.u32 %v12852_v33, %v11235_v25 }
 0x758   : > { %v12003_v18 = vld [vmem:[%s19107_s3 + $0xeb0] sm:$0xf0] }
 0x759   : > { %v7116_v11 = vpop.f32.mrf.mxu2  ;;  %v12006_v30 = vor.u32 %v13044_v56, %v12003_v18  ;;  %7394 = vmatpush.bf16.msrb.mxu0 %v11238_v52 }
 0x75a   : > { %v7117_v63 = vadd.f32 %v7116_v11, %v7068_v50 }
 0x75b   : > { %v7165_v4 = vpop.f32.mrf.mxu3  ;;  %v7021_v29 = vpop.f32.mrf.mxu0  ;;  %7541 = vmatpush.bf16.msrb.mxu3 %v12006_v30  ;;  %v12972_v30 = vld [vmem:[%s19107_s3 + $0xc54] sm:$0xf] }
 0x75c   : > { %v7022_v46 = vadd.f32 %v7021_v29, %v17216_v38  ;;  %v7166_v1 = vadd.f32 %v7165_v4, %v7117_v63  ;;  %v11747_v38 = vld [vmem:[%s19107_s3 + $0xcb0] sm:$0xf0] }
 0x75d   : > { %v7070_v53 = vpop.f32.mrf.mxu1  ;;  %v11750_v28 = vor.u32 %v12980_v31, %v11747_v38  ;;  %v12916_v31 = vld [vmem:[%s19107_s3 + $0xa94] sm:$0xf] }
 0x75e   : > { %v7071_v26 = vadd.f32 %v7070_v53, %v7022_v46  ;;  %7216 = vmatmul.bf16.gmra.mxu0 %v13917_v23  ;;  %v8413_v58 = vmax.f32 %v7166_v1, 0.0  ;;  %7314 = vmatmul.bf16.gmra.mxu2 %v19275_v9 }
 0x75f   : > { %7492 = vmatpush.bf16.msrb.mxu2 %v11750_v28 }
 0x760   : > { %7265 = vmatmul.bf16.gmra.mxu1 %v13925_v40  ;;  %7363 = vmatmul.bf16.gmra.mxu3 %v19276_v43  ;;  %v17479_v50 = vpack.c.bf16 %v8413_v58, %v8405_v21  ;;  %v11491_v21 = vld [vmem:[%s19107_s3 + $0xab0] sm:$0xf0] }
 0x761   : > { %v7119_v14 = vpop.f32.mrf.mxu2  ;;  %v11494_v58 = vor.u32 %v12916_v31, %v11491_v21 }
 0x762   : > { %19431 = vst [vmem:[#allocation68_spill] sm:$0xff] %v17479_v50  ;;  %v7120_v11 = vadd.f32 %v7119_v14, %v7071_v26 }
 0x763   : > { %v7168_v63 = vpop.f32.mrf.mxu3  ;;  %v7023_v4 = vpop.f32.mrf.mxu0  ;;  %7443 = vmatpush.bf16.msrb.mxu1 %v11494_v58 }
 0x764   : > { %v7024_v29 = vadd.f32 %v7023_v4, %v17225_v5  ;;  %v7169_v53 = vadd.f32 %v7168_v63, %v7120_v11  ;;  %v12844_v11 = vld [vmem:[%s19107_s3 + $0x854] sm:$0xf] }
 0x765   : > { %v7072_v46 = vpop.f32.mrf.mxu1  ;;  %v11203_v4 = vld [vmem:[%s19107_s3 + $0x870] sm:$0xf0] }
 0x766   : > { %v7073_v1 = vadd.f32 %v7072_v46, %v7024_v29  ;;  %v8421_v14 = vmax.f32 %v7169_v53, 0.0  ;;  %v13036_v29 = vld [vmem:[%s19107_s3 + $0xe54] sm:$0xf]  ;;  %v11206_v31 = vor.u32 %v12844_v11, %v11203_v4 }
 0x767   : > { %v11971_v46 = vld [vmem:[%s19107_s3 + $0xe70] sm:$0xf0] }
 0x768   : > { %v11974_v21 = vor.u32 %v13036_v29, %v11971_v46  ;;  %7395 = vmatpush.bf16.msrb.mxu0 %v11206_v31  ;;  %v12964_v31 = vld [vmem:[%s19107_s3 + $0xc14] sm:$0xf] }
 0x769   : > { %v7121_v26 = vpop.f32.mrf.mxu2 }
 0x76a   : > { %v7122_v38 = vadd.f32 %v7121_v26, %v7073_v1  ;;  %7542 = vmatpush.bf16.msrb.mxu3 %v11974_v21  ;;  %v12836_v21 = vld [vmem:[%s19107_s3 + $0x814] sm:$0xf] }
 0x76b   : > { %v7170_v33 = vpop.f32.mrf.mxu3  ;;  %v7026_v28 = vpop.f32.mrf.mxu0 }
 0x76c   : > { %v7027_v5 = vadd.f32 %v7026_v28, %v17250_v6  ;;  %v7171_v56 = vadd.f32 %v7170_v33, %v7122_v38  ;;  %v11715_v6 = vld [vmem:[%s19107_s3 + $0xc70] sm:$0xf0] }
 0x76d   : > { %v7075_v25 = vpop.f32.mrf.mxu1  ;;  %v11718_v63 = vor.u32 %v12972_v30, %v11715_v6 }
 0x76e   : > { %v7076_v18 = vadd.f32 %v7075_v25, %v7027_v5  ;;  %7221 = vmatmul.bf16.gmra.mxu0 %v13953_v16  ;;  %v8429_v52 = vmax.f32 %v7171_v56, 0.0  ;;  %7319 = vmatmul.bf16.gmra.mxu2 %v19278_v54  ;;  %v12908_v56 = vld [vmem:[%s19107_s3 + $0xa54] sm:$0xf] }
 0x76f   : > { %7493 = vmatpush.bf16.msrb.mxu2 %v11718_v63 }
 0x770   : > { %7270 = vmatmul.bf16.gmra.mxu1 %v13961_v36  ;;  %7368 = vmatmul.bf16.gmra.mxu3 %v19279_v22  ;;  %v17511_v53 = vpack.c.bf16 %v8429_v52, %v8421_v14  ;;  %v11459_v14 = vld [vmem:[%s19107_s3 + $0xa70] sm:$0xf0] }
 0x771   : > { %v7124_v1 = vpop.f32.mrf.mxu2  ;;  %v11462_v52 = vor.u32 %v12908_v56, %v11459_v14 }
 0x772   : > { %19432 = vst [vmem:[#allocation69_spill] sm:$0xff] %v17511_v53  ;;  %v7125_v58 = vadd.f32 %v7124_v1, %v7076_v18  ;;  %v19447_v53 = vld [vmem:[#allocation43_spill] sm:$0xff] }
 0x773   : > { %v7173_v26 = vpop.f32.mrf.mxu3  ;;  %v7028_v38 = vpop.f32.mrf.mxu0  ;;  %7444 = vmatpush.bf16.msrb.mxu1 %v11462_v52 }
 0x774   : > { %v7029_v33 = vadd.f32 %v7028_v38, %v17259_v32  ;;  %v7174_v5 = vadd.f32 %v7173_v26, %v7125_v58  ;;  %v11171_v26 = vld [vmem:[%s19107_s3 + $0x830] sm:$0xf0] }
 0x775   : > { %v7077_v28 = vpop.f32.mrf.mxu1  ;;  %v13028_v38 = vld [vmem:[%s19107_s3 + $0xe14] sm:$0xf] }
 0x776   : > { %v7078_v25 = vadd.f32 %v7077_v28, %v7029_v33  ;;  %v8437_v46 = vmax.f32 %v7174_v5, 0.0  ;;  %v11939_v33 = vld [vmem:[%s19107_s3 + $0xe30] sm:$0xf0] }
 0x777   : > { %v11942_v56 = vor.u32 %v13028_v38, %v11939_v33 }
 0x779   : > { %v7126_v18 = vpop.f32.mrf.mxu2  ;;  %7543 = vmatpush.bf16.msrb.mxu3 %v11942_v56 }
 0x77a   : > { %v7127_v30 = vadd.f32 %v7126_v18, %v7078_v25  ;;  %v11174_v25 = vor.u32 %v12836_v21, %v11171_v26 }
 0x77b   : > { %v7175_v6 = vpop.f32.mrf.mxu3  ;;  %v7031_v11 = vpop.f32.mrf.mxu0 }
 0x77c   : > { %v7032_v32 = vadd.f32 %v7031_v11, %v17284_v57  ;;  %v7176_v4 = vadd.f32 %v7175_v6, %v7127_v30  ;;  %v11683_v57 = vld [vmem:[%s19107_s3 + $0xc30] sm:$0xf0]  ;;  %7396 = vmatpush.bf16.msrb.mxu0 %v11174_v25  ;;  %v10377_v25 = vld [vmem:[%s19107_s3 + $0x1d8] sm:$0xf] }
 0x77d   : > { %v7080_v63 = vpop.f32.mrf.mxu1  ;;  %v11686_v58 = vor.u32 %v12964_v31, %v11683_v57 }
 0x77e   : > { %v7081_v29 = vadd.f32 %v7080_v63, %v7032_v32  ;;  %7226 = vmatmul.bf16.gmra.mxu0 %v13989_v10  ;;  %v8445_v1 = vmax.f32 %v7176_v4, 0.0  ;;  %7324 = vmatmul.bf16.gmra.mxu2 %v19282_v27  ;;  %v12900_v63 = vld [vmem:[%s19107_s3 + $0xa14] sm:$0xf] }
 0x77f   : > { %7494 = vmatpush.bf16.msrb.mxu2 %v11686_v58  ;;  %v11427_v4 = vld [vmem:[%s19107_s3 + $0xa30] sm:$0xf0] }
 0x780   : > { %7275 = vmatmul.bf16.gmra.mxu1 %v19281_v2  ;;  %7373 = vmatmul.bf16.gmra.mxu3 %v19316_v0  ;;  %v17543_v28 = vpack.c.bf16 %v8445_v1, %v8437_v46  ;;  %v11430_v46 = vor.u32 %v12900_v63, %v11427_v4 }
 0x781   : > { %v7129_v5 = vpop.f32.mrf.mxu2 }
 0x782   : > { %19433 = vst [vmem:[#allocation70_spill] sm:$0xff] %v17543_v28  ;;  %v7130_v14 = vadd.f32 %v7129_v5, %v7081_v29  ;;  %7445 = vmatpush.bf16.msrb.mxu1 %v11430_v46  ;;  %v10889_v5 = vld [vmem:[%s19107_s3 + $0x5d8] sm:$0xf]  ;;  %v19446_v28 = vld [vmem:[#allocation42_spill] sm:$0xff] }
 0x783   : > { %v7178_v52 = vpop.f32.mrf.mxu3  ;;  %v7033_v18 = vpop.f32.mrf.mxu0 }
 0x784   : > { %v7034_v30 = vadd.f32 %v7033_v18, %v17293_v8  ;;  %v7179_v11 = vadd.f32 %v7178_v52, %v7130_v14  ;;  %v12641_v14 = vld [vmem:[%s19107_s3 + $0x1f4] sm:$0xf0] }
 0x785   : > { %v7082_v6 = vpop.f32.mrf.mxu1  ;;  %v11145_v52 = vld [vmem:[%s19107_s3 + $0x7d8] sm:$0xf] }
 0x786   : > { %v7083_v32 = vadd.f32 %v7082_v6, %v7034_v30  ;;  %v8453_v38 = vmax.f32 %v7179_v11, 0.0  ;;  %v12833_v18 = vld [vmem:[%s19107_s3 + $0x7f4] sm:$0xf0]  ;;  %v10378_v11 = vor.u32 %v12641_v14, %v10377_v25 }
 0x788   : > { %7585 = vmatpush.bf16.msra.mxu0 %v10378_v11 }
 0x789   : > { %v7131_v29 = vpop.f32.mrf.mxu2 }
 0x78a   : > { %v7132_v1 = vadd.f32 %v7131_v29, %v7083_v32  ;;  %v11146_v32 = vor.u32 %v12833_v18, %v11145_v52  ;;  %v10857_v18 = vld [vmem:[%s19107_s3 + $0x598] sm:$0xf] }
 0x78b   : > { %v7180_v31 = vpop.f32.mrf.mxu3  ;;  %v7036_v57 = vpop.f32.mrf.mxu0 }
 0x78c   : > { %v7037_v8 = vadd.f32 %v7036_v57, %v17318_v37  ;;  %v7181_v58 = vadd.f32 %v7180_v31, %v7132_v1  ;;  %v12769_v37 = vld [vmem:[%s19107_s3 + $0x5f4] sm:$0xf0]  ;;  %7732 = vmatpush.bf16.msra.mxu3 %v11146_v32 }
 0x78d   : > { %v7085_v21 = vpop.f32.mrf.mxu1  ;;  %v10890_v56 = vor.u32 %v12769_v37, %v10889_v5  ;;  %v10633_v57 = vld [vmem:[%s19107_s3 + $0x3d8] sm:$0xf] }
 0x78e   : > { %v7086_v26 = vadd.f32 %v7085_v21, %v7037_v8  ;;  %7231 = vmatmul.bf16.gmra.mxu0 %v19285_v15  ;;  %v8461_v33 = vmax.f32 %v7181_v58, 0.0  ;;  %7329 = vmatmul.bf16.gmra.mxu2 %v19287_v51  ;;  %v12705_v8 = vld [vmem:[%s19107_s3 + $0x3f4] sm:$0xf0] }
 0x78f   : > { %7683 = vmatpush.bf16.msra.mxu2 %v10890_v56  ;;  %v10634_v58 = vor.u32 %v12705_v8, %v10633_v57  ;;  %v12633_v32 = vld [vmem:[%s19107_s3 + $0x1b4] sm:$0xf0] }
 0x790   : > { %7280 = vmatmul.bf16.gmra.mxu1 %v19286_v39  ;;  %7378 = vmatmul.bf16.gmra.mxu3 %v19318_v3  ;;  %v17575_v30 = vpack.c.bf16 %v8461_v33, %v8453_v38 }
 0x791   : > { %v7134_v6 = vpop.f32.mrf.mxu2  ;;  %7634 = vmatpush.bf16.msra.mxu1 %v10634_v58 }
 0x792   : > { %19434 = vst [vmem:[#allocation71_spill] sm:$0xff] %v17575_v30  ;;  %v7135_v63 = vadd.f32 %v7134_v6, %v7086_v26  ;;  %v10345_v6 = vld [vmem:[%s19107_s3 + $0x198] sm:$0xf]  ;;  %v19445_v30 = vld [vmem:[#allocation27_spill] sm:$0xff] }
 0x793   : > { %v7183_v4 = vpop.f32.mrf.mxu3  ;;  %v7038_v46 = vpop.f32.mrf.mxu0 }
 0x794   : > { %v7039_v29 = vadd.f32 %v7038_v46, %v17327_v19  ;;  %v7184_v31 = vadd.f32 %v7183_v4, %v7135_v63  ;;  %v11113_v63 = vld [vmem:[%s19107_s3 + $0x798] sm:$0xf] }
 0x795   : > { %v7087_v1 = vpop.f32.mrf.mxu1  ;;  %v12825_v4 = vld [vmem:[%s19107_s3 + $0x7b4] sm:$0xf0] }
 0x796   : > { %v7088_v21 = vadd.f32 %v7087_v1, %v7039_v29  ;;  %v8469_v14 = vmax.f32 %v7184_v31, 0.0  ;;  %v10346_v1 = vor.u32 %v12633_v32, %v10345_v6  ;;  %v11114_v31 = vor.u32 %v12825_v4, %v11113_v63 }
 0x798   : > { %7586 = vmatpush.bf16.msra.mxu0 %v10346_v1  ;;  %7733 = vmatpush.bf16.msra.mxu3 %v11114_v31  ;;  %v19437_v1 = vld [vmem:[#allocation38_spill] sm:$0xff]  ;;  %v19438_v31 = vld [vmem:[#allocation39_spill] sm:$0xff] }
 0x799   : > { %v7136_v26 = vpop.f32.mrf.mxu2 }
 0x79a   : > { %v7137_v38 = vadd.f32 %v7136_v26, %v7088_v21 }
 0x79b   : > { %v7185_v33 = vpop.f32.mrf.mxu3  ;;  %v7041_v5 = vpop.f32.mrf.mxu0 }
 0x79c   : > { %v7042_v19 = vadd.f32 %v7041_v5, %v17352_v41  ;;  %v7186_v25 = vadd.f32 %v7185_v33, %v7137_v38  ;;  %v12761_v41 = vld [vmem:[%s19107_s3 + $0x5b4] sm:$0xf0] }
 0x79d   : > { %v7090_v37 = vpop.f32.mrf.mxu1  ;;  %v10858_v11 = vor.u32 %v12761_v41, %v10857_v18  ;;  %v10601_v33 = vld [vmem:[%s19107_s3 + $0x398] sm:$0xf] }
 0x79e   : > { %v7091_v56 = vadd.f32 %v7090_v37, %v7042_v19  ;;  %7236 = vmatmul.bf16.gmra.mxu0 %v19290_v44  ;;  %v8477_v52 = vmax.f32 %v7186_v25, 0.0  ;;  %7334 = vmatmul.bf16.gmra.mxu2 %v19320_v34  ;;  %v12697_v5 = vld [vmem:[%s19107_s3 + $0x3b4] sm:$0xf0]  ;;  %v13168_v25 = vld [vmem:[%s19108_s4] sm:$0xff] }
 0x79f   : > { %7684 = vmatpush.bf16.msra.mxu2 %v10858_v11  ;;  %v10602_v37 = vor.u32 %v12697_v5, %v10601_v33  ;;  %v12817_v33 = vld [vmem:[%s19107_s3 + $0x774] sm:$0xf0] }
 0x7a0   : > { %7285 = vmatmul.bf16.gmra.mxu1 %v19291_v60  ;;  %7383 = vmatmul.bf16.gmra.mxu3 %v19321_v24  ;;  %v17607_v46 = vpack.c.bf16 %v8477_v52, %v8469_v14 }
 0x7a1   : > { %v7139_v29 = vpop.f32.mrf.mxu2  ;;  %7635 = vmatpush.bf16.msra.mxu1 %v10602_v37 }
 0x7a2   : > { %19435 = vst [vmem:[#allocation72_spill] sm:$0xff] %v17607_v46  ;;  %v7140_v57 = vadd.f32 %v7139_v29, %v7091_v56  ;;  %v17619_v56 = vperm.slane %v13168_v25, 5  ;;  %v19436_v29 = vld [vmem:[#allocation23_spill] sm:$0xff]  ;;  %v10537_v46 = vld [vmem:[%s19107_s3 + $0x318] sm:$0xf] }
 0x7a3   : > { %v7188_v8 = vpop.f32.mrf.mxu3  ;;  %v7043_v21 = vpop.f32.mrf.mxu0 }
 0x7a4   : > { %v7044_v58 = vadd.f32 %v7043_v21, %v17361_v59  ;;  %v7189_v38 = vadd.f32 %v7188_v8, %v7140_v57  ;;  %v10825_v57 = vld [vmem:[%s19107_s3 + $0x558] sm:$0xf] }
 0x7a5   : > { %v7092_v26 = vpop.f32.mrf.mxu1  ;;  %v12753_v8 = vld [vmem:[%s19107_s3 + $0x574] sm:$0xf0] }
 0x7a6   : > { %v7093_v19 = vadd.f32 %v7092_v26, %v7044_v58  ;;  %v8485_v63 = vmax.f32 %v7189_v38, 0.0  ;;  %v10313_v21 = vld [vmem:[%s19107_s3 + $0x158] sm:$0xf]  ;;  %v10826_v58 = vor.u32 %v12753_v8, %v10825_v57 }
 0x7a7   : > { %v12625_v26 = vld [vmem:[%s19107_s3 + $0x174] sm:$0xf0] }
 0x7a8   : > { %v11081_v38 = vld [vmem:[%s19107_s3 + $0x758] sm:$0xf]  ;;  %v10314_v37 = vor.u32 %v12625_v26, %v10313_v21  ;;  %7685 = vmatpush.bf16.msra.mxu2 %v10826_v58 }
 0x7a9   : > { %v7141_v59 = vpop.f32.mrf.mxu2  ;;  %v11082_v25 = vor.u32 %v12817_v33, %v11081_v38 }
 0x7aa   : > { %v7142_v14 = vadd.f32 %v7141_v59, %v7093_v19  ;;  %7587 = vmatpush.bf16.msra.mxu0 %v10314_v37  ;;  %v19440_v37 = vld [vmem:[#allocation24_spill] sm:$0xff] }
 0x7ab   : > { %v7190_v52 = vpop.f32.mrf.mxu3  ;;  %v7202_v18 = vpop.f32.mrf.mxu0  ;;  %7734 = vmatpush.bf16.msra.mxu3 %v11082_v25  ;;  %v19441_v25 = vld [vmem:[#allocation25_spill] sm:$0xff] }
 0x7ac   : > { %v7203_v41 = vadd.f32 %v7202_v18, %v17619_v56  ;;  %v7191_v11 = vadd.f32 %v7190_v52, %v7142_v14 }
 0x7ad   : > { %v7251_v6 = vpop.f32.mrf.mxu1 }
 0x7ae   : > { %v7252_v32 = vadd.f32 %v7251_v6, %v7203_v41  ;;  %7397 = vmatmul.bf16.vlgmr.msrb.gmra.mxu0 %v14402_v49  ;;  %v8493_v4 = vmax.f32 %v7191_v11, 0.0  ;;  %7495 = vmatmul.bf16.vlgmr.msrb.gmra.mxu2 %v19437_v1  ;;  %v10569_v11 = vld [vmem:[%s19107_s3 + $0x358] sm:$0xf] }
 0x7b0   : > { %7446 = vmatmul.bf16.vlgmr.msrb.gmra.mxu1 %v19436_v29  ;;  %7544 = vmatmul.bf16.vlgmr.msrb.gmra.mxu3 %v19438_v31  ;;  %v17644_v5 = vpack.c.bf16 %v8493_v4, %v8485_v63  ;;  %v12689_v63 = vld [vmem:[%s19107_s3 + $0x374] sm:$0xf0]  ;;  %v19463_v31 = vld [vmem:[#allocation51_spill] sm:$0xff] }
 0x7b1   : > { %v7300_v19 = vpop.f32.mrf.mxu2  ;;  %v11625_v29 = vld [vmem:[%s19107_s3 + $0xb98] sm:$0xf] }
 0x7b2   : > { %19439 = vst [vmem:[#allocation73_spill] sm:$0xff] %v17644_v5  ;;  %v7301_v59 = vadd.f32 %v7300_v19, %v7252_v32  ;;  %v10570_v32 = vor.u32 %v12689_v63, %v10569_v11  ;;  %v12617_v63 = vld [vmem:[%s19107_s3 + $0x134] sm:$0xf0] }
 0x7b3   : > { %v7349_v14 = vpop.f32.mrf.mxu3  ;;  %v7204_v52 = vpop.f32.mrf.mxu0 }
 0x7b4   : > { %v7205_v18 = vadd.f32 %v7204_v52, %v17619_v56  ;;  %v17647_v6 = vadd.f32 %v7349_v14, %v7301_v59  ;;  %7636 = vmatpush.bf16.msra.mxu1 %v10570_v32  ;;  %v19442_v59 = vld [vmem:[#allocation40_spill] sm:$0xff]  ;;  %v19443_v14 = vld [vmem:[#allocation41_spill] sm:$0xff] }
 0x7b5   : > { %v7253_v41 = vpop.f32.mrf.mxu1  ;;  %v10793_v52 = vld [vmem:[%s19107_s3 + $0x518] sm:$0xf] }
 0x7b6   : > { %v7254_v4 = vadd.f32 %v7253_v41, %v7205_v18  ;;  %v12745_v18 = vld [vmem:[%s19107_s3 + $0x534] sm:$0xf0] }
 0x7b7   : > { %v10281_v41 = vld [vmem:[%s19107_s3 + $0x118] sm:$0xf]  ;;  %v10794_v11 = vor.u32 %v12745_v18, %v10793_v52 }
 0x7b8   : > { %v12809_v32 = vld [vmem:[%s19107_s3 + $0x734] sm:$0xf0] }
 0x7b9   : > { %v7302_v57 = vpop.f32.mrf.mxu2  ;;  %7686 = vmatpush.bf16.msra.mxu2 %v10794_v11 }
 0x7ba   : > { %v7303_v8 = vadd.f32 %v7302_v57, %v7254_v4  ;;  %v11049_v4 = vld [vmem:[%s19107_s3 + $0x718] sm:$0xf] }
 0x7bb   : > { %v7351_v21 = vpop.f32.mrf.mxu3  ;;  %v7207_v58 = vpop.f32.mrf.mxu0 }
 0x7bc   : > { %v7208_v26 = vadd.f32 %v7207_v58, %v17619_v56  ;;  %v17656_v33 = vadd.f32 %v7351_v21, %v7303_v8  ;;  %v10282_v8 = vor.u32 %v12617_v63, %v10281_v41  ;;  %v11050_v21 = vor.u32 %v12809_v32, %v11049_v4  ;;  %v12681_v41 = vld [vmem:[%s19107_s3 + $0x334] sm:$0xf0] }
 0x7bd   : > { %v7256_v38 = vpop.f32.mrf.mxu1 }
 0x7be   : > { %v7257_v19 = vadd.f32 %v7256_v38, %v7208_v26  ;;  %7402 = vmatmul.bf16.gmra.mxu0 %v19440_v37  ;;  %7500 = vmatmul.bf16.gmra.mxu2 %v19442_v59  ;;  %v19458_v59 = vld [vmem:[#allocation48_spill] sm:$0xff]  ;;  %v19462_v37 = vld [vmem:[#allocation50_spill] sm:$0xff] }
 0x7bf   : > { %7588 = vmatpush.bf16.msra.mxu0 %v10282_v8  ;;  %7735 = vmatpush.bf16.msra.mxu3 %v11050_v21 }
 0x7c0   : > { %7451 = vmatmul.bf16.gmra.mxu1 %v19441_v25  ;;  %7549 = vmatmul.bf16.gmra.mxu3 %v19443_v14  ;;  %v19455_v14 = vld [vmem:[#allocation47_spill] sm:$0xff]  ;;  %v19459_v25 = vld [vmem:[#allocation49_spill] sm:$0xff] }
 0x7c1   : > { %v7305_v57 = vpop.f32.mrf.mxu2 }
 0x7c2   : > { %v7306_v58 = vadd.f32 %v7305_v57, %v7257_v19  ;;  %v10538_v19 = vor.u32 %v12681_v41, %v10537_v46  ;;  %v10761_v46 = vld [vmem:[%s19107_s3 + $0x4d8] sm:$0xf] }
 0x7c3   : > { %v7354_v26 = vpop.f32.mrf.mxu3  ;;  %v7209_v38 = vpop.f32.mrf.mxu0 }
 0x7c4   : > { %v7210_v52 = vadd.f32 %v7209_v38, %v17619_v56  ;;  %v17681_v5 = vadd.f32 %v7354_v26, %v7306_v58  ;;  %7637 = vmatpush.bf16.msra.mxu1 %v10538_v19  ;;  %v19444_v38 = vld [vmem:[#allocation26_spill] sm:$0xff]  ;;  %v11017_v19 = vld [vmem:[%s19107_s3 + $0x6d8] sm:$0xf] }
 0x7c5   : > { %v7258_v18 = vpop.f32.mrf.mxu1 }
 0x7c6   : > { %v7259_v63 = vadd.f32 %v7258_v18, %v7210_v52  ;;  %v12737_v52 = vld [vmem:[%s19107_s3 + $0x4f4] sm:$0xf0] }
 0x7c7   : > { %v10249_v18 = vld [vmem:[%s19107_s3 + $0xd8] sm:$0xf]  ;;  %v10762_v41 = vor.u32 %v12737_v52, %v10761_v46 }
 0x7c9   : > { %v7307_v4 = vpop.f32.mrf.mxu2  ;;  %7687 = vmatpush.bf16.msra.mxu2 %v10762_v41 }
 0x7ca   : > { %v7308_v11 = vadd.f32 %v7307_v4, %v7259_v63  ;;  %v12609_v63 = vld [vmem:[%s19107_s3 + $0xf4] sm:$0xf0] }
 0x7cb   : > { %v7356_v32 = vpop.f32.mrf.mxu3  ;;  %v7212_v57 = vpop.f32.mrf.mxu0  ;;  %v12801_v4 = vld [vmem:[%s19107_s3 + $0x6f4] sm:$0xf0] }
 0x7cc   : > { %v7213_v8 = vadd.f32 %v7212_v57, %v17619_v56  ;;  %v17690_v58 = vadd.f32 %v7356_v32, %v7308_v11  ;;  %v10250_v32 = vor.u32 %v12609_v63, %v10249_v18  ;;  %v11018_v57 = vor.u32 %v12801_v4, %v11017_v19  ;;  %v12673_v18 = vld [vmem:[%s19107_s3 + $0x2f4] sm:$0xf0] }
 0x7cd   : > { %v7261_v21 = vpop.f32.mrf.mxu1 }
 0x7ce   : > { %v7262_v26 = vadd.f32 %v7261_v21, %v7213_v8  ;;  %7407 = vmatmul.bf16.gmra.mxu0 %v19444_v38  ;;  %7505 = vmatmul.bf16.gmra.mxu2 %v19446_v28  ;;  %v19450_v28 = vld [vmem:[#allocation44_spill] sm:$0xff]  ;;  %v19454_v38 = vld [vmem:[#allocation46_spill] sm:$0xff] }
 0x7cf   : > { %7589 = vmatpush.bf16.msra.mxu0 %v10250_v32  ;;  %7736 = vmatpush.bf16.msra.mxu3 %v11018_v57 }
 0x7d0   : > { %7456 = vmatmul.bf16.gmra.mxu1 %v19445_v30  ;;  %7554 = vmatmul.bf16.gmra.mxu3 %v19447_v53  ;;  %v19449_v53 = vld [vmem:[#allocation29_spill] sm:$0xff] }
 0x7d1   : > { %v7310_v11 = vpop.f32.mrf.mxu2  ;;  %v19451_v30 = vld [vmem:[#allocation45_spill] sm:$0xff] }
 0x7d2   : > { %v7311_v8 = vadd.f32 %v7310_v11, %v7262_v26  ;;  %v10506_v26 = vor.u32 %v12673_v18, %v10505_v17  ;;  %v10729_v17 = vld [vmem:[%s19107_s3 + $0x498] sm:$0xf] }
 0x7d3   : > { %v7359_v21 = vpop.f32.mrf.mxu3  ;;  %v7214_v50 = vpop.f32.mrf.mxu0 }
 0x7d4   : > { %v7215_v46 = vadd.f32 %v7214_v50, %v17619_v56  ;;  %v17715_v7 = vadd.f32 %v7359_v21, %v7311_v8  ;;  %7638 = vmatpush.bf16.msra.mxu1 %v10506_v26  ;;  %v19448_v21 = vld [vmem:[#allocation28_spill] sm:$0xff]  ;;  %v10985_v26 = vld [vmem:[%s19107_s3 + $0x698] sm:$0xf] }
 0x7d5   : > { %v7263_v52 = vpop.f32.mrf.mxu1 }
 0x7d6   : > { %v7264_v63 = vadd.f32 %v7263_v52, %v7215_v46  ;;  %v12729_v46 = vld [vmem:[%s19107_s3 + $0x4b4] sm:$0xf0] }
 0x7d7   : > { %v10217_v52 = vld [vmem:[%s19107_s3 + $0x98] sm:$0xf]  ;;  %v10730_v18 = vor.u32 %v12729_v46, %v10729_v17 }
 0x7d9   : > { %v7312_v19 = vpop.f32.mrf.mxu2  ;;  %7688 = vmatpush.bf16.msra.mxu2 %v10730_v18 }
 0x7da   : > { %v7313_v41 = vadd.f32 %v7312_v19, %v7264_v63  ;;  %v12601_v63 = vld [vmem:[%s19107_s3 + $0xb4] sm:$0xf0] }
 0x7db   : > { %v7361_v4 = vpop.f32.mrf.mxu3  ;;  %v7217_v50 = vpop.f32.mrf.mxu0  ;;  %v12793_v19 = vld [vmem:[%s19107_s3 + $0x6b4] sm:$0xf0] }
 0x7dc   : > { %v7218_v11 = vadd.f32 %v7217_v50, %v17619_v56  ;;  %v17724_v57 = vadd.f32 %v7361_v4, %v7313_v41  ;;  %v10218_v4 = vor.u32 %v12601_v63, %v10217_v52  ;;  %v10986_v50 = vor.u32 %v12793_v19, %v10985_v26  ;;  %v12665_v52 = vld [vmem:[%s19107_s3 + $0x2b4] sm:$0xf0] }
 0x7dd   : > { %v7266_v32 = vpop.f32.mrf.mxu1 }
 0x7de   : > { %v7267_v8 = vadd.f32 %v7266_v32, %v7218_v11  ;;  %7412 = vmatmul.bf16.gmra.mxu0 %v19448_v21  ;;  %7510 = vmatmul.bf16.gmra.mxu2 %v19450_v28  ;;  %v19453_v21 = vld [vmem:[#allocation31_spill] sm:$0xff] }
 0x7df   : > { %7590 = vmatpush.bf16.msra.mxu0 %v10218_v4  ;;  %7737 = vmatpush.bf16.msra.mxu3 %v10986_v50 }
 0x7e0   : > { %7461 = vmatmul.bf16.gmra.mxu1 %v19449_v53  ;;  %7559 = vmatmul.bf16.gmra.mxu3 %v19451_v30  ;;  %v10473_v53 = vld [vmem:[%s19107_s3 + $0x298] sm:$0xf] }
 0x7e1   : > { %v7315_v41 = vpop.f32.mrf.mxu2 }
 0x7e2   : > { %v7316_v11 = vadd.f32 %v7315_v41, %v7267_v8  ;;  %v10474_v8 = vor.u32 %v12665_v52, %v10473_v53  ;;  %v10697_v53 = vld [vmem:[%s19107_s3 + $0x458] sm:$0xf] }
 0x7e3   : > { %v7364_v32 = vpop.f32.mrf.mxu3  ;;  %v7219_v30 = vpop.f32.mrf.mxu0 }
 0x7e4   : > { %v7220_v17 = vadd.f32 %v7219_v30, %v17619_v56  ;;  %v17749_v28 = vadd.f32 %v7364_v32, %v7316_v11  ;;  %7639 = vmatpush.bf16.msra.mxu1 %v10474_v8  ;;  %v19452_v32 = vld [vmem:[#allocation30_spill] sm:$0xff]  ;;  %v10953_v8 = vld [vmem:[%s19107_s3 + $0x658] sm:$0xf] }
 0x7e5   : > { %v7268_v46 = vpop.f32.mrf.mxu1 }
 0x7e6   : > { %v7269_v63 = vadd.f32 %v7268_v46, %v7220_v17  ;;  %v12721_v17 = vld [vmem:[%s19107_s3 + $0x474] sm:$0xf0] }
 0x7e7   : > { %v10185_v46 = vld [vmem:[%s19107_s3 + $0x58] sm:$0xf]  ;;  %v10698_v52 = vor.u32 %v12721_v17, %v10697_v53 }
 0x7e9   : > { %v7317_v26 = vpop.f32.mrf.mxu2  ;;  %7689 = vmatpush.bf16.msra.mxu2 %v10698_v52 }
 0x7ea   : > { %v7318_v18 = vadd.f32 %v7317_v26, %v7269_v63  ;;  %v12593_v63 = vld [vmem:[%s19107_s3 + $0x74] sm:$0xf0] }
 0x7eb   : > { %v7366_v19 = vpop.f32.mrf.mxu3  ;;  %v7222_v30 = vpop.f32.mrf.mxu0  ;;  %v12785_v26 = vld [vmem:[%s19107_s3 + $0x674] sm:$0xf0] }
 0x7ec   : > { %v7223_v41 = vadd.f32 %v7222_v30, %v17619_v56  ;;  %v17758_v50 = vadd.f32 %v7366_v19, %v7318_v18  ;;  %v10186_v19 = vor.u32 %v12593_v63, %v10185_v46  ;;  %v10954_v30 = vor.u32 %v12785_v26, %v10953_v8  ;;  %v12657_v46 = vld [vmem:[%s19107_s3 + $0x274] sm:$0xf0] }
 0x7ed   : > { %v7271_v4 = vpop.f32.mrf.mxu1 }
 0x7ee   : > { %v7272_v11 = vadd.f32 %v7271_v4, %v7223_v41  ;;  %7417 = vmatmul.bf16.gmra.mxu0 %v19452_v32  ;;  %7515 = vmatmul.bf16.gmra.mxu2 %v19454_v38  ;;  %v19457_v32 = vld [vmem:[#allocation33_spill] sm:$0xff] }
 0x7ef   : > { %7591 = vmatpush.bf16.msra.mxu0 %v10186_v19  ;;  %7738 = vmatpush.bf16.msra.mxu3 %v10954_v30 }
 0x7f0   : > { %7466 = vmatmul.bf16.gmra.mxu1 %v19453_v21  ;;  %7564 = vmatmul.bf16.gmra.mxu3 %v19455_v14  ;;  %v10441_v21 = vld [vmem:[%s19107_s3 + $0x258] sm:$0xf] }
 0x7f1   : > { %v7320_v18 = vpop.f32.mrf.mxu2 }
 0x7f2   : > { %v7321_v41 = vadd.f32 %v7320_v18, %v7272_v11  ;;  %v10442_v11 = vor.u32 %v12657_v46, %v10441_v21  ;;  %v10665_v21 = vld [vmem:[%s19107_s3 + $0x418] sm:$0xf] }
 0x7f3   : > { %v7369_v4 = vpop.f32.mrf.mxu3  ;;  %v7224_v14 = vpop.f32.mrf.mxu0 }
 0x7f4   : > { %v7225_v53 = vadd.f32 %v7224_v14, %v17619_v56  ;;  %v17783_v38 = vadd.f32 %v7369_v4, %v7321_v41  ;;  %7640 = vmatpush.bf16.msra.mxu1 %v10442_v11  ;;  %v19456_v4 = vld [vmem:[#allocation32_spill] sm:$0xff]  ;;  %v10921_v11 = vld [vmem:[%s19107_s3 + $0x618] sm:$0xf] }
 0x7f5   : > { %v7273_v17 = vpop.f32.mrf.mxu1 }
 0x7f6   : > { %v7274_v63 = vadd.f32 %v7273_v17, %v7225_v53  ;;  %v12713_v53 = vld [vmem:[%s19107_s3 + $0x434] sm:$0xf0] }
 0x7f7   : > { %v10153_v17 = vld [vmem:[%s19107_s3 + $0x18] sm:$0xf]  ;;  %v10666_v46 = vor.u32 %v12713_v53, %v10665_v21 }
 0x7f9   : > { %v7322_v8 = vpop.f32.mrf.mxu2  ;;  %7690 = vmatpush.bf16.msra.mxu2 %v10666_v46 }
 0x7fa   : > { %v7323_v52 = vadd.f32 %v7322_v8, %v7274_v63  ;;  %v12585_v63 = vld [vmem:[%s19107_s3 + $0x34] sm:$0xf0] }
 0x7fb   : > { %v7371_v26 = vpop.f32.mrf.mxu3  ;;  %v7227_v14 = vpop.f32.mrf.mxu0  ;;  %v12777_v8 = vld [vmem:[%s19107_s3 + $0x634] sm:$0xf0] }
 0x7fc   : > { %v7228_v18 = vadd.f32 %v7227_v14, %v17619_v56  ;;  %v17792_v30 = vadd.f32 %v7371_v26, %v7323_v52  ;;  %v10154_v26 = vor.u32 %v12585_v63, %v10153_v17  ;;  %v10922_v14 = vor.u32 %v12777_v8, %v10921_v11  ;;  %v12649_v17 = vld [vmem:[%s19107_s3 + $0x234] sm:$0xf0] }
 0x7fd   : > { %v7276_v19 = vpop.f32.mrf.mxu1 }
 0x7fe   : > { %v7277_v41 = vadd.f32 %v7276_v19, %v7228_v18  ;;  %7422 = vmatmul.bf16.gmra.mxu0 %v19456_v4  ;;  %7520 = vmatmul.bf16.gmra.mxu2 %v19458_v59  ;;  %v19461_v4 = vld [vmem:[#allocation35_spill] sm:$0xff] }
 0x7ff   : > { %7592 = vmatpush.bf16.msra.mxu0 %v10154_v26  ;;  %7739 = vmatpush.bf16.msra.mxu3 %v10922_v14 }
 0x800   : > { %7471 = vmatmul.bf16.gmra.mxu1 %v19457_v32  ;;  %7569 = vmatmul.bf16.gmra.mxu3 %v19459_v25  ;;  %v10409_v32 = vld [vmem:[%s19107_s3 + $0x218] sm:$0xf] }
 0x801   : > { %v7325_v52 = vpop.f32.mrf.mxu2 }
 0x802   : > { %v7326_v18 = vadd.f32 %v7325_v52, %v7277_v41  ;;  %v10410_v41 = vor.u32 %v12649_v17, %v10409_v32  ;;  %v11913_v32 = vld [vmem:[%s19107_s3 + $0xdd8] sm:$0xf] }
 0x803   : > { %v7374_v19 = vpop.f32.mrf.mxu3  ;;  %v7229_v25 = vpop.f32.mrf.mxu0 }
 0x804   : > { %v7230_v21 = vadd.f32 %v7229_v25, %v17619_v56  ;;  %v17817_v59 = vadd.f32 %v7374_v19, %v7326_v18  ;;  %7641 = vmatpush.bf16.msra.mxu1 %v10410_v41  ;;  %v19460_v19 = vld [vmem:[#allocation34_spill] sm:$0xff]  ;;  %v12169_v41 = vld [vmem:[%s19107_s3 + $0xfd8] sm:$0xf] }
 0x805   : > { %v7278_v53 = vpop.f32.mrf.mxu1 }
 0x806   : > { %v7279_v63 = vadd.f32 %v7278_v53, %v7230_v21  ;;  %v13025_v21 = vld [vmem:[%s19107_s3 + $0xdf4] sm:$0xf0] }
 0x807   : > { %v11401_v53 = vld [vmem:[%s19107_s3 + $0x9d8] sm:$0xf]  ;;  %v11914_v17 = vor.u32 %v13025_v21, %v11913_v32 }
 0x809   : > { %v7327_v11 = vpop.f32.mrf.mxu2  ;;  %7879 = vmatpush.bf16.msrb.mxu2 %v11914_v17 }
 0x80a   : > { %v7328_v46 = vadd.f32 %v7327_v11, %v7279_v63  ;;  %v12897_v63 = vld [vmem:[%s19107_s3 + $0x9f4] sm:$0xf0] }
 0x80b   : > { %v7376_v8 = vpop.f32.mrf.mxu3  ;;  %v7232_v25 = vpop.f32.mrf.mxu0  ;;  %v13089_v11 = vld [vmem:[%s19107_s3 + $0xff4] sm:$0xf0] }
 0x80c   : > { %v7233_v52 = vadd.f32 %v7232_v25, %v17619_v56  ;;  %v17826_v14 = vadd.f32 %v7376_v8, %v7328_v46  ;;  %v11402_v8 = vor.u32 %v12897_v63, %v11401_v53  ;;  %v12170_v25 = vor.u32 %v13089_v11, %v12169_v41  ;;  %v12961_v53 = vld [vmem:[%s19107_s3 + $0xbf4] sm:$0xf0] }
 0x80d   : > { %v7281_v26 = vpop.f32.mrf.mxu1 }
 0x80e   : > { %v7282_v18 = vadd.f32 %v7281_v26, %v7233_v52  ;;  %7427 = vmatmul.bf16.gmra.mxu0 %v19460_v19  ;;  %7525 = vmatmul.bf16.gmra.mxu2 %v19462_v37  ;;  %v11657_v19 = vld [vmem:[%s19107_s3 + $0xbd8] sm:$0xf] }
 0x80f   : > { %7781 = vmatpush.bf16.msrb.mxu0 %v11402_v8  ;;  %7928 = vmatpush.bf16.msrb.mxu3 %v12170_v25 }
 0x810   : > { %7476 = vmatmul.bf16.gmra.mxu1 %v19461_v4  ;;  %7574 = vmatmul.bf16.gmra.mxu3 %v19463_v31 }
 0x811   : > { %v7330_v46 = vpop.f32.mrf.mxu2 }
 0x812   : > { %v7331_v52 = vadd.f32 %v7330_v46, %v7282_v18  ;;  %v11658_v18 = vor.u32 %v12961_v53, %v11657_v19  ;;  %v13017_v19 = vld [vmem:[%s19107_s3 + $0xdb4] sm:$0xf0] }
 0x813   : > { %v7379_v26 = vpop.f32.mrf.mxu3  ;;  %v7234_v31 = vpop.f32.mrf.mxu0  ;;  %v11369_v53 = vld [vmem:[%s19107_s3 + $0x998] sm:$0xf] }
 0x814   : > { %v7235_v32 = vadd.f32 %v7234_v31, %v17619_v56  ;;  %v17851_v37 = vadd.f32 %v7379_v26, %v7331_v52  ;;  %7830 = vmatpush.bf16.msrb.mxu1 %v11658_v18  ;;  %v19464_v52 = vld [vmem:[#allocation36_spill] sm:$0xff]  ;;  %v19465_v26 = vld [vmem:[#allocation37_spill] sm:$0xff] }
 0x815   : > { %v7283_v21 = vpop.f32.mrf.mxu1 }
 0x816   : > { %v7284_v4 = vadd.f32 %v7283_v21, %v7235_v32  ;;  %v19466_v32 = vld [vmem:[#allocation52_spill] sm:$0xff]  ;;  %v19467_v21 = vld [vmem:[#allocation53_spill] sm:$0xff] }
 0x819   : > { %v7332_v63 = vpop.f32.mrf.mxu2 }
 0x81a   : > { %v7333_v17 = vadd.f32 %v7332_v63, %v7284_v4  ;;  %v11881_v4 = vld [vmem:[%s19107_s3 + $0xd98] sm:$0xf] }
 0x81b   : > { %v7381_v41 = vpop.f32.mrf.mxu3  ;;  %v7237_v31 = vpop.f32.mrf.mxu0  ;;  %v11882_v63 = vor.u32 %v13017_v19, %v11881_v4 }
 0x81c   : > { %v7238_v11 = vadd.f32 %v7237_v31, %v17619_v56  ;;  %v17860_v8 = vadd.f32 %v7381_v41, %v7333_v17  ;;  %v12889_v17 = vld [vmem:[%s19107_s3 + $0x9b4] sm:$0xf0] }
 0x81d   : > { %v7286_v46 = vpop.f32.mrf.mxu1  ;;  %v12137_v41 = vld [vmem:[%s19107_s3 + $0xf98] sm:$0xf]  ;;  %7880 = vmatpush.bf16.msrb.mxu2 %v11882_v63 }
 0x81e   : > { %v7287_v25 = vadd.f32 %v7286_v46, %v7238_v11  ;;  %7432 = vmatmul.bf16.gmra.mxu0 %v19464_v52  ;;  %7530 = vmatmul.bf16.gmra.mxu2 %v19466_v32  ;;  %v13081_v31 = vld [vmem:[%s19107_s3 + $0xfb4] sm:$0xf0]  ;;  %v11370_v32 = vor.u32 %v12889_v17, %v11369_v53 }
 0x820   : > { %7481 = vmatmul.bf16.gmra.mxu1 %v19465_v26  ;;  %7579 = vmatmul.bf16.gmra.mxu3 %v19467_v21  ;;  %v12138_v26 = vor.u32 %v13081_v31, %v12137_v41 }
 0x821   : > { %v7335_v18 = vpop.f32.mrf.mxu2  ;;  %7782 = vmatpush.bf16.msrb.mxu0 %v11370_v32 }
 0x822   : > { %v7336_v11 = vadd.f32 %v7335_v18, %v7287_v25  ;;  %7929 = vmatpush.bf16.msrb.mxu3 %v12138_v26  ;;  %v12953_v25 = vld [vmem:[%s19107_s3 + $0xbb4] sm:$0xf0]  ;;  %v19468_v26 = vld [vmem:[#allocation8_spill] sm:$0xff] }
 0x823   : > { %v7384_v46 = vpop.f32.mrf.mxu3  ;;  %v7239_v21 = vpop.f32.mrf.mxu0  ;;  %v11626_v18 = vor.u32 %v12953_v25, %v11625_v29  ;;  %v11849_v29 = vld [vmem:[%s19107_s3 + $0xd58] sm:$0xf] }
 0x824   : > { %v7240_v52 = vadd.f32 %v7239_v21, %v17619_v56  ;;  %v17885_v19 = vadd.f32 %v7384_v46, %v7336_v11  ;;  %v12881_v11 = vld [vmem:[%s19107_s3 + $0x974] sm:$0xf0] }
 0x825   : > { %v7288_v4 = vpop.f32.mrf.mxu1  ;;  %7831 = vmatpush.bf16.msrb.mxu1 %v11626_v18  ;;  %v12105_v46 = vld [vmem:[%s19107_s3 + $0xf58] sm:$0xf] }
 0x826   : > { %v7289_v1 = vadd.f32 %v7288_v4, %v7240_v52  ;;  %v13073_v4 = vld [vmem:[%s19107_s3 + $0xf74] sm:$0xf0] }
 0x829   : > { %v7337_v53 = vpop.f32.mrf.mxu2 }
 0x82a   : > { %v7338_v17 = vadd.f32 %v7337_v53, %v7289_v1  ;;  %v13009_v1 = vld [vmem:[%s19107_s3 + $0xd74] sm:$0xf0]  ;;  %v12106_v53 = vor.u32 %v13073_v4, %v12105_v46 }
 0x82b   : > { %v7386_v56 = vpop.f32.mrf.mxu3  ;;  %v7398_v21 = vpop.f32.mrf.mxu0  ;;  %v11850_v31 = vor.u32 %v13009_v1, %v11849_v29 }
 0x82c   : > { %v7399_v63 = vadd.f32 %v7398_v21, %v17647_v6  ;;  %v17894_v32 = vadd.f32 %v7386_v56, %v7338_v17  ;;  %v11337_v6 = vld [vmem:[%s19107_s3 + $0x958] sm:$0xf]  ;;  %7930 = vmatpush.bf16.msrb.mxu3 %v12106_v53 }
 0x82d   : > { %v7447_v41 = vpop.f32.mrf.mxu1  ;;  %v11338_v18 = vor.u32 %v12881_v11, %v11337_v6  ;;  %7881 = vmatpush.bf16.msrb.mxu2 %v11850_v31  ;;  %v12945_v6 = vld [vmem:[%s19107_s3 + $0xb74] sm:$0xf0] }
 0x82e   : > { %v7448_v52 = vadd.f32 %v7447_v41, %v7399_v63  ;;  %7593 = vmatmul.bf16.vlgmr.msra.gmra.mxu0 %v13809_v61  ;;  %7691 = vmatmul.bf16.vlgmr.msra.gmra.mxu2 %v14103_v20 }
 0x82f   : > { %7783 = vmatpush.bf16.msrb.mxu0 %v11338_v18 }
 0x830   : > { %7642 = vmatmul.bf16.vlgmr.msra.gmra.mxu1 %v13817_v12  ;;  %7740 = vmatmul.bf16.vlgmr.msra.gmra.mxu3 %v19468_v26  ;;  %v11593_v26 = vld [vmem:[%s19107_s3 + $0xb58] sm:$0xf] }
 0x831   : > { %v7496_v25 = vpop.f32.mrf.mxu2  ;;  %v11594_v11 = vor.u32 %v12945_v6, %v11593_v26  ;;  %v11817_v26 = vld [vmem:[%s19107_s3 + $0xd18] sm:$0xf] }
 0x832   : > { %v7497_v17 = vadd.f32 %v7496_v25, %v7448_v52  ;;  %v13065_v6 = vld [vmem:[%s19107_s3 + $0xf34] sm:$0xf0] }
 0x833   : > { %v7545_v56 = vpop.f32.mrf.mxu3  ;;  %v7400_v21 = vpop.f32.mrf.mxu0  ;;  %7832 = vmatpush.bf16.msrb.mxu1 %v11594_v11 }
 0x834   : > { %v7401_v63 = vadd.f32 %v7400_v21, %v17656_v33  ;;  %v7546_v29 = vadd.f32 %v7545_v56, %v7497_v17  ;;  %v11305_v21 = vld [vmem:[%s19107_s3 + $0x918] sm:$0xf] }
 0x835   : > { %v7449_v41 = vpop.f32.mrf.mxu1 }
 0x836   : > { %v7450_v1 = vadd.f32 %v7449_v41, %v7401_v63  ;;  %v8374_v17 = vmax.f32 %v7546_v29, 0.0  ;;  %v12873_v29 = vld [vmem:[%s19107_s3 + $0x934] sm:$0xf0] }
 0x839   : > { %v7498_v52 = vpop.f32.mrf.mxu2 }
 0x83a   : > { %v7499_v46 = vadd.f32 %v7498_v52, %v7450_v1  ;;  %v12073_v1 = vld [vmem:[%s19107_s3 + $0xf18] sm:$0xf]  ;;  %v11306_v52 = vor.u32 %v12873_v29, %v11305_v21 }
 0x83b   : > { %v7547_v31 = vpop.f32.mrf.mxu3  ;;  %v7403_v4 = vpop.f32.mrf.mxu0 }
 0x83c   : > { %v7404_v33 = vadd.f32 %v7403_v4, %v17681_v5  ;;  %v7548_v18 = vadd.f32 %v7547_v31, %v7499_v46  ;;  %v13001_v5 = vld [vmem:[%s19107_s3 + $0xd34] sm:$0xf0]  ;;  %v12074_v46 = vor.u32 %v13065_v6, %v12073_v1  ;;  %7784 = vmatpush.bf16.msrb.mxu0 %v11306_v52 }
 0x83d   : > { %v7452_v25 = vpop.f32.mrf.mxu1  ;;  %v11818_v41 = vor.u32 %v13001_v5, %v11817_v26  ;;  %v11561_v26 = vld [vmem:[%s19107_s3 + $0xb18] sm:$0xf] }
 0x83e   : > { %v7453_v53 = vadd.f32 %v7452_v25, %v7404_v33  ;;  %7598 = vmatmul.bf16.gmra.mxu0 %v13845_v45  ;;  %v8382_v56 = vmax.f32 %v7548_v18, 0.0  ;;  %7696 = vmatmul.bf16.gmra.mxu2 %v19269_v42  ;;  %v12937_v5 = vld [vmem:[%s19107_s3 + $0xb34] sm:$0xf0] }
 0x83f   : > { %7882 = vmatpush.bf16.msrb.mxu2 %v11818_v41  ;;  %7931 = vmatpush.bf16.msrb.mxu3 %v12074_v46  ;;  %v11562_v21 = vor.u32 %v12937_v5, %v11561_v26 }
 0x840   : > { %7647 = vmatmul.bf16.gmra.mxu1 %v13853_v62  ;;  %7745 = vmatmul.bf16.gmra.mxu3 %v19270_v55  ;;  %v17939_v63 = vpack.c.bf16 %v8382_v56, %v8374_v17 }
 0x841   : > { %v7501_v11 = vpop.f32.mrf.mxu2  ;;  %7833 = vmatpush.bf16.msrb.mxu1 %v11562_v21 }
 0x842   : > { %19469 = vst [vmem:[#allocation74_spill] sm:$0xff] %v17939_v63  ;;  %v7502_v31 = vadd.f32 %v7501_v11, %v7453_v53  ;;  %v12669_v63 = vld [vmem:[%s19107_s3 + $0x2dc] sm:$0xf] }
 0x843   : > { %v7550_v4 = vpop.f32.mrf.mxu3  ;;  %v7405_v33 = vpop.f32.mrf.mxu0 }
 0x844   : > { %v7406_v25 = vadd.f32 %v7405_v33, %v17690_v58  ;;  %v7551_v17 = vadd.f32 %v7550_v4, %v7502_v31  ;;  %v11785_v4 = vld [vmem:[%s19107_s3 + $0xcd8] sm:$0xf] }
 0x845   : > { %v7454_v18 = vpop.f32.mrf.mxu1  ;;  %v11273_v33 = vld [vmem:[%s19107_s3 + $0x8d8] sm:$0xf] }
 0x846   : > { %v7455_v56 = vadd.f32 %v7454_v18, %v7406_v25  ;;  %v8390_v46 = vmax.f32 %v7551_v17, 0.0  ;;  %v12865_v18 = vld [vmem:[%s19107_s3 + $0x8f4] sm:$0xf0] }
 0x847   : > { %v12041_v17 = vld [vmem:[%s19107_s3 + $0xed8] sm:$0xf]  ;;  %v11274_v21 = vor.u32 %v12865_v18, %v11273_v33 }
 0x849   : > { %v7503_v53 = vpop.f32.mrf.mxu2  ;;  %7785 = vmatpush.bf16.msrb.mxu0 %v11274_v21 }
 0x84a   : > { %v7504_v29 = vadd.f32 %v7503_v53, %v7455_v56  ;;  %v13057_v56 = vld [vmem:[%s19107_s3 + $0xef4] sm:$0xf0] }
 0x84b   : > { %v7552_v41 = vpop.f32.mrf.mxu3  ;;  %v7408_v1 = vpop.f32.mrf.mxu0  ;;  %v12042_v53 = vor.u32 %v13057_v56, %v12041_v17 }
 0x84c   : > { %v7409_v58 = vadd.f32 %v7408_v1, %v17715_v7  ;;  %v7553_v11 = vadd.f32 %v7552_v41, %v7504_v29  ;;  %v12993_v7 = vld [vmem:[%s19107_s3 + $0xcf4] sm:$0xf0] }
 0x84d   : > { %v7457_v6 = vpop.f32.mrf.mxu1  ;;  %v11786_v25 = vor.u32 %v12993_v7, %v11785_v4  ;;  %7932 = vmatpush.bf16.msrb.mxu3 %v12042_v53  ;;  %v11529_v7 = vld [vmem:[%s19107_s3 + $0xad8] sm:$0xf] }
 0x84e   : > { %v7458_v52 = vadd.f32 %v7457_v6, %v7409_v58  ;;  %7603 = vmatmul.bf16.gmra.mxu0 %v13881_v35  ;;  %v8398_v31 = vmax.f32 %v7553_v11, 0.0  ;;  %7701 = vmatmul.bf16.gmra.mxu2 %v19350_v13 }
 0x84f   : > { %7883 = vmatpush.bf16.msrb.mxu2 %v11786_v25 }
 0x850   : > { %7652 = vmatmul.bf16.gmra.mxu1 %v19310_v47  ;;  %7750 = vmatmul.bf16.gmra.mxu3 %v19390_v48  ;;  %v17980_v26 = vpack.c.bf16 %v8398_v31, %v8390_v46  ;;  %v12929_v46 = vld [vmem:[%s19107_s3 + $0xaf4] sm:$0xf0] }
 0x851   : > { %v7506_v5 = vpop.f32.mrf.mxu2  ;;  %v11530_v31 = vor.u32 %v12929_v46, %v11529_v7 }
 0x852   : > { %19470 = vst [vmem:[#allocation75_spill] sm:$0xff] %v17980_v26  ;;  %v7507_v29 = vadd.f32 %v7506_v5, %v7458_v52 }
 0x853   : > { %v7555_v41 = vpop.f32.mrf.mxu3  ;;  %v7410_v1 = vpop.f32.mrf.mxu0  ;;  %7834 = vmatpush.bf16.msrb.mxu1 %v11530_v31 }
 0x854   : > { %v7411_v58 = vadd.f32 %v7410_v1, %v17724_v57  ;;  %v7556_v11 = vadd.f32 %v7555_v41, %v7507_v29  ;;  %v11753_v29 = vld [vmem:[%s19107_s3 + $0xc98] sm:$0xf] }
 0x855   : > { %v7459_v6 = vpop.f32.mrf.mxu1  ;;  %v11241_v41 = vld [vmem:[%s19107_s3 + $0x898] sm:$0xf] }
 0x856   : > { %v7460_v4 = vadd.f32 %v7459_v6, %v7411_v58  ;;  %v8406_v21 = vmax.f32 %v7556_v11, 0.0  ;;  %v12857_v58 = vld [vmem:[%s19107_s3 + $0x8b4] sm:$0xf0] }
 0x857   : > { %v12009_v6 = vld [vmem:[%s19107_s3 + $0xe98] sm:$0xf]  ;;  %v11242_v46 = vor.u32 %v12857_v58, %v11241_v41 }
 0x858   : > { %v13049_v11 = vld [vmem:[%s19107_s3 + $0xeb4] sm:$0xf0] }
 0x859   : > { %v7508_v52 = vpop.f32.mrf.mxu2  ;;  %v12010_v31 = vor.u32 %v13049_v11, %v12009_v6  ;;  %7786 = vmatpush.bf16.msrb.mxu0 %v11242_v46 }
 0x85a   : > { %v7509_v33 = vadd.f32 %v7508_v52, %v7460_v4 }
 0x85b   : > { %v7557_v25 = vpop.f32.mrf.mxu3  ;;  %v7413_v18 = vpop.f32.mrf.mxu0  ;;  %7933 = vmatpush.bf16.msrb.mxu3 %v12010_v31  ;;  %v11721_v31 = vld [vmem:[%s19107_s3 + $0xc58] sm:$0xf] }
 0x85c   : > { %v7414_v57 = vadd.f32 %v7413_v18, %v17749_v28  ;;  %v7558_v56 = vadd.f32 %v7557_v25, %v7509_v33  ;;  %v12985_v28 = vld [vmem:[%s19107_s3 + $0xcb4] sm:$0xf0] }
 0x85d   : > { %v7462_v17 = vpop.f32.mrf.mxu1  ;;  %v11754_v1 = vor.u32 %v12985_v28, %v11753_v29  ;;  %v11497_v29 = vld [vmem:[%s19107_s3 + $0xa98] sm:$0xf] }
 0x85e   : > { %v7463_v5 = vadd.f32 %v7462_v17, %v7414_v57  ;;  %7608 = vmatmul.bf16.gmra.mxu0 %v13917_v23  ;;  %v8414_v53 = vmax.f32 %v7558_v56, 0.0  ;;  %7706 = vmatmul.bf16.gmra.mxu2 %v19275_v9 }
 0x85f   : > { %7884 = vmatpush.bf16.msrb.mxu2 %v11754_v1 }
 0x860   : > { %7657 = vmatmul.bf16.gmra.mxu1 %v13925_v40  ;;  %7755 = vmatmul.bf16.gmra.mxu3 %v19276_v43  ;;  %v18012_v4 = vpack.c.bf16 %v8414_v53, %v8406_v21  ;;  %v12921_v21 = vld [vmem:[%s19107_s3 + $0xab4] sm:$0xf0] }
 0x861   : > { %v7511_v7 = vpop.f32.mrf.mxu2  ;;  %v11498_v53 = vor.u32 %v12921_v21, %v11497_v29 }
 0x862   : > { %19471 = vst [vmem:[#allocation76_spill] sm:$0xff] %v18012_v4  ;;  %v7512_v52 = vadd.f32 %v7511_v7, %v7463_v5 }
 0x863   : > { %v7560_v33 = vpop.f32.mrf.mxu3  ;;  %v7415_v25 = vpop.f32.mrf.mxu0  ;;  %7835 = vmatpush.bf16.msrb.mxu1 %v11498_v53 }
 0x864   : > { %v7416_v18 = vadd.f32 %v7415_v25, %v17758_v50  ;;  %v7561_v17 = vadd.f32 %v7560_v33, %v7512_v52  ;;  %v11209_v52 = vld [vmem:[%s19107_s3 + $0x858] sm:$0xf] }
 0x865   : > { %v7464_v57 = vpop.f32.mrf.mxu1  ;;  %v12849_v25 = vld [vmem:[%s19107_s3 + $0x874] sm:$0xf0] }
 0x866   : > { %v7465_v56 = vadd.f32 %v7464_v57, %v7416_v18  ;;  %v8422_v7 = vmax.f32 %v7561_v17, 0.0  ;;  %v11977_v18 = vld [vmem:[%s19107_s3 + $0xe58] sm:$0xf]  ;;  %v11210_v29 = vor.u32 %v12849_v25, %v11209_v52 }
 0x867   : > { %v13041_v57 = vld [vmem:[%s19107_s3 + $0xe74] sm:$0xf0] }
 0x868   : > { %v11978_v21 = vor.u32 %v13041_v57, %v11977_v18  ;;  %7787 = vmatpush.bf16.msrb.mxu0 %v11210_v29  ;;  %v11689_v29 = vld [vmem:[%s19107_s3 + $0xc18] sm:$0xf] }
 0x869   : > { %v7513_v5 = vpop.f32.mrf.mxu2 }
 0x86a   : > { %v7514_v28 = vadd.f32 %v7513_v5, %v7465_v56  ;;  %7934 = vmatpush.bf16.msrb.mxu3 %v11978_v21  ;;  %v11177_v21 = vld [vmem:[%s19107_s3 + $0x818] sm:$0xf] }
 0x86b   : > { %v7562_v41 = vpop.f32.mrf.mxu3  ;;  %v7418_v1 = vpop.f32.mrf.mxu0 }
 0x86c   : > { %v7419_v50 = vadd.f32 %v7418_v1, %v17783_v38  ;;  %v7563_v6 = vadd.f32 %v7562_v41, %v7514_v28  ;;  %v12977_v38 = vld [vmem:[%s19107_s3 + $0xc74] sm:$0xf0] }
 0x86d   : > { %v7467_v58 = vpop.f32.mrf.mxu1  ;;  %v11722_v33 = vor.u32 %v12977_v38, %v11721_v31 }
 0x86e   : > { %v7468_v11 = vadd.f32 %v7467_v58, %v7419_v50  ;;  %7613 = vmatmul.bf16.gmra.mxu0 %v13953_v16  ;;  %v8430_v46 = vmax.f32 %v7563_v6, 0.0  ;;  %7711 = vmatmul.bf16.gmra.mxu2 %v19278_v54  ;;  %v11465_v6 = vld [vmem:[%s19107_s3 + $0xa58] sm:$0xf] }
 0x86f   : > { %7885 = vmatpush.bf16.msrb.mxu2 %v11722_v33 }
 0x870   : > { %7662 = vmatmul.bf16.gmra.mxu1 %v13961_v36  ;;  %7760 = vmatmul.bf16.gmra.mxu3 %v19279_v22  ;;  %v18044_v17 = vpack.c.bf16 %v8430_v46, %v8422_v7  ;;  %v12913_v7 = vld [vmem:[%s19107_s3 + $0xa74] sm:$0xf0] }
 0x871   : > { %v7516_v56 = vpop.f32.mrf.mxu2  ;;  %v11466_v46 = vor.u32 %v12913_v7, %v11465_v6 }
 0x872   : > { %19472 = vst [vmem:[#allocation77_spill] sm:$0xff] %v18044_v17  ;;  %v7517_v53 = vadd.f32 %v7516_v56, %v7468_v11  ;;  %v19487_v17 = vld [vmem:[#allocation43_spill] sm:$0xff] }
 0x873   : > { %v7565_v5 = vpop.f32.mrf.mxu3  ;;  %v7420_v28 = vpop.f32.mrf.mxu0  ;;  %7836 = vmatpush.bf16.msrb.mxu1 %v11466_v46 }
 0x874   : > { %v7421_v41 = vadd.f32 %v7420_v28, %v17792_v30  ;;  %v7566_v50 = vadd.f32 %v7565_v5, %v7517_v53  ;;  %v12841_v5 = vld [vmem:[%s19107_s3 + $0x834] sm:$0xf0] }
 0x875   : > { %v7469_v1 = vpop.f32.mrf.mxu1  ;;  %v11945_v28 = vld [vmem:[%s19107_s3 + $0xe18] sm:$0xf] }
 0x876   : > { %v7470_v58 = vadd.f32 %v7469_v1, %v7421_v41  ;;  %v8438_v57 = vmax.f32 %v7566_v50, 0.0  ;;  %v13033_v41 = vld [vmem:[%s19107_s3 + $0xe34] sm:$0xf0] }
 0x877   : > { %v11946_v6 = vor.u32 %v13033_v41, %v11945_v28 }
 0x879   : > { %v7518_v11 = vpop.f32.mrf.mxu2  ;;  %7935 = vmatpush.bf16.msrb.mxu3 %v11946_v6 }
 0x87a   : > { %v7519_v31 = vadd.f32 %v7518_v11, %v7470_v58  ;;  %v11178_v58 = vor.u32 %v12841_v5, %v11177_v21 }
 0x87b   : > { %v7567_v38 = vpop.f32.mrf.mxu3  ;;  %v7423_v52 = vpop.f32.mrf.mxu0 }
 0x87c   : > { %v7424_v30 = vadd.f32 %v7423_v52, %v17817_v59  ;;  %v7568_v25 = vadd.f32 %v7567_v38, %v7519_v31  ;;  %v12969_v59 = vld [vmem:[%s19107_s3 + $0xc34] sm:$0xf0]  ;;  %7788 = vmatpush.bf16.msrb.mxu0 %v11178_v58  ;;  %v12637_v58 = vld [vmem:[%s19107_s3 + $0x1dc] sm:$0xf] }
 0x87d   : > { %v7472_v33 = vpop.f32.mrf.mxu1  ;;  %v11690_v53 = vor.u32 %v12969_v59, %v11689_v29 }
 0x87e   : > { %v7473_v18 = vadd.f32 %v7472_v33, %v7424_v30  ;;  %7618 = vmatmul.bf16.gmra.mxu0 %v13989_v10  ;;  %v8446_v56 = vmax.f32 %v7568_v25, 0.0  ;;  %7716 = vmatmul.bf16.gmra.mxu2 %v19282_v27  ;;  %v11433_v33 = vld [vmem:[%s19107_s3 + $0xa18] sm:$0xf] }
 0x87f   : > { %7886 = vmatpush.bf16.msrb.mxu2 %v11690_v53  ;;  %v12905_v25 = vld [vmem:[%s19107_s3 + $0xa34] sm:$0xf0] }
 0x880   : > { %7667 = vmatmul.bf16.gmra.mxu1 %v19281_v2  ;;  %7765 = vmatmul.bf16.gmra.mxu3 %v19316_v0  ;;  %v18076_v1 = vpack.c.bf16 %v8446_v56, %v8438_v57  ;;  %v11434_v57 = vor.u32 %v12905_v25, %v11433_v33 }
 0x881   : > { %v7521_v50 = vpop.f32.mrf.mxu2 }
 0x882   : > { %19473 = vst [vmem:[#allocation78_spill] sm:$0xff] %v18076_v1  ;;  %v7522_v7 = vadd.f32 %v7521_v50, %v7473_v18  ;;  %7837 = vmatpush.bf16.msrb.mxu1 %v11434_v57  ;;  %v12765_v50 = vld [vmem:[%s19107_s3 + $0x5dc] sm:$0xf]  ;;  %v19486_v1 = vld [vmem:[#allocation42_spill] sm:$0xff] }
 0x883   : > { %v7570_v46 = vpop.f32.mrf.mxu3  ;;  %v7425_v11 = vpop.f32.mrf.mxu0 }
 0x884   : > { %v7426_v31 = vadd.f32 %v7425_v11, %v17826_v14  ;;  %v7571_v52 = vadd.f32 %v7570_v46, %v7522_v7  ;;  %v10379_v7 = vld [vmem:[%s19107_s3 + $0x1f8] sm:$0xf0] }
 0x885   : > { %v7474_v38 = vpop.f32.mrf.mxu1  ;;  %v12829_v46 = vld [vmem:[%s19107_s3 + $0x7dc] sm:$0xf] }
 0x886   : > { %v7475_v30 = vadd.f32 %v7474_v38, %v7426_v31  ;;  %v8454_v28 = vmax.f32 %v7571_v52, 0.0  ;;  %v11147_v11 = vld [vmem:[%s19107_s3 + $0x7f8] sm:$0xf0]  ;;  %v10382_v52 = vor.u32 %v12637_v58, %v10379_v7 }
 0x888   : > { %7977 = vmatpush.bf16.msra.mxu0 %v10382_v52 }
 0x889   : > { %v7523_v18 = vpop.f32.mrf.mxu2 }
 0x88a   : > { %v7524_v56 = vadd.f32 %v7523_v18, %v7475_v30  ;;  %v11150_v30 = vor.u32 %v12829_v46, %v11147_v11  ;;  %v12757_v11 = vld [vmem:[%s19107_s3 + $0x59c] sm:$0xf] }
 0x88b   : > { %v7572_v29 = vpop.f32.mrf.mxu3  ;;  %v7428_v59 = vpop.f32.mrf.mxu0 }
 0x88c   : > { %v7429_v14 = vadd.f32 %v7428_v59, %v17851_v37  ;;  %v7573_v53 = vadd.f32 %v7572_v29, %v7524_v56  ;;  %v10891_v37 = vld [vmem:[%s19107_s3 + $0x5f8] sm:$0xf0]  ;;  %8124 = vmatpush.bf16.msra.mxu3 %v11150_v30 }
 0x88d   : > { %v7477_v21 = vpop.f32.mrf.mxu1  ;;  %v10894_v6 = vor.u32 %v12765_v50, %v10891_v37  ;;  %v12701_v59 = vld [vmem:[%s19107_s3 + $0x3dc] sm:$0xf] }
 0x88e   : > { %v7478_v5 = vadd.f32 %v7477_v21, %v7429_v14  ;;  %7623 = vmatmul.bf16.gmra.mxu0 %v19285_v15  ;;  %v8462_v41 = vmax.f32 %v7573_v53, 0.0  ;;  %7721 = vmatmul.bf16.gmra.mxu2 %v19287_v51  ;;  %v10635_v14 = vld [vmem:[%s19107_s3 + $0x3f8] sm:$0xf0] }
 0x88f   : > { %8075 = vmatpush.bf16.msra.mxu2 %v10894_v6  ;;  %v10638_v53 = vor.u32 %v12701_v59, %v10635_v14  ;;  %v10347_v30 = vld [vmem:[%s19107_s3 + $0x1b8] sm:$0xf0] }
 0x890   : > { %7672 = vmatmul.bf16.gmra.mxu1 %v19286_v39  ;;  %7770 = vmatmul.bf16.gmra.mxu3 %v19318_v3  ;;  %v18108_v31 = vpack.c.bf16 %v8462_v41, %v8454_v28 }
 0x891   : > { %v7526_v38 = vpop.f32.mrf.mxu2  ;;  %8026 = vmatpush.bf16.msra.mxu1 %v10638_v53 }
 0x892   : > { %19474 = vst [vmem:[#allocation79_spill] sm:$0xff] %v18108_v31  ;;  %v7527_v33 = vadd.f32 %v7526_v38, %v7478_v5  ;;  %v12629_v38 = vld [vmem:[%s19107_s3 + $0x19c] sm:$0xf]  ;;  %v19485_v31 = vld [vmem:[#allocation27_spill] sm:$0xff] }
 0x893   : > { %v7575_v25 = vpop.f32.mrf.mxu3  ;;  %v7430_v57 = vpop.f32.mrf.mxu0 }
 0x894   : > { %v7431_v18 = vadd.f32 %v7430_v57, %v17860_v8  ;;  %v7576_v29 = vadd.f32 %v7575_v25, %v7527_v33  ;;  %v12821_v33 = vld [vmem:[%s19107_s3 + $0x79c] sm:$0xf] }
 0x895   : > { %v7479_v56 = vpop.f32.mrf.mxu1  ;;  %v11115_v25 = vld [vmem:[%s19107_s3 + $0x7b8] sm:$0xf0] }
 0x896   : > { %v7480_v21 = vadd.f32 %v7479_v56, %v7431_v18  ;;  %v8470_v7 = vmax.f32 %v7576_v29, 0.0  ;;  %v10350_v56 = vor.u32 %v12629_v38, %v10347_v30  ;;  %v11118_v29 = vor.u32 %v12821_v33, %v11115_v25 }
 0x898   : > { %7978 = vmatpush.bf16.msra.mxu0 %v10350_v56  ;;  %8125 = vmatpush.bf16.msra.mxu3 %v11118_v29  ;;  %v19477_v56 = vld [vmem:[#allocation38_spill] sm:$0xff]  ;;  %v19478_v29 = vld [vmem:[#allocation39_spill] sm:$0xff] }
 0x899   : > { %v7528_v5 = vpop.f32.mrf.mxu2 }
 0x89a   : > { %v7529_v28 = vadd.f32 %v7528_v5, %v7480_v21 }
 0x89b   : > { %v7577_v41 = vpop.f32.mrf.mxu3  ;;  %v7433_v50 = vpop.f32.mrf.mxu0 }
 0x89c   : > { %v7434_v8 = vadd.f32 %v7433_v50, %v17885_v19  ;;  %v7578_v58 = vadd.f32 %v7577_v41, %v7529_v28  ;;  %v10859_v19 = vld [vmem:[%s19107_s3 + $0x5b8] sm:$0xf0] }
 0x89d   : > { %v7482_v37 = vpop.f32.mrf.mxu1  ;;  %v10862_v52 = vor.u32 %v12757_v11, %v10859_v19  ;;  %v12693_v41 = vld [vmem:[%s19107_s3 + $0x39c] sm:$0xf] }
 0x89e   : > { %v7483_v6 = vadd.f32 %v7482_v37, %v7434_v8  ;;  %7628 = vmatmul.bf16.gmra.mxu0 %v19290_v44  ;;  %v8478_v46 = vmax.f32 %v7578_v58, 0.0  ;;  %7726 = vmatmul.bf16.gmra.mxu2 %v19320_v34  ;;  %v10603_v50 = vld [vmem:[%s19107_s3 + $0x3b8] sm:$0xf0]  ;;  %v13169_v58 = vld [vmem:[%s19108_s4] sm:$0xff] }
 0x89f   : > { %8076 = vmatpush.bf16.msra.mxu2 %v10862_v52  ;;  %v10606_v37 = vor.u32 %v12693_v41, %v10603_v50  ;;  %v11083_v41 = vld [vmem:[%s19107_s3 + $0x778] sm:$0xf0] }
 0x8a0   : > { %7677 = vmatmul.bf16.gmra.mxu1 %v19291_v60  ;;  %7775 = vmatmul.bf16.gmra.mxu3 %v19321_v24  ;;  %v18140_v57 = vpack.c.bf16 %v8478_v46, %v8470_v7 }
 0x8a1   : > { %v7531_v18 = vpop.f32.mrf.mxu2  ;;  %8027 = vmatpush.bf16.msra.mxu1 %v10606_v37 }
 0x8a2   : > { %19475 = vst [vmem:[#allocation80_spill] sm:$0xff] %v18140_v57  ;;  %v7532_v59 = vadd.f32 %v7531_v18, %v7483_v6  ;;  %v18152_v6 = vperm.slane %v13169_v58, 6  ;;  %v19476_v18 = vld [vmem:[#allocation23_spill] sm:$0xff]  ;;  %v12677_v57 = vld [vmem:[%s19107_s3 + $0x31c] sm:$0xf] }
 0x8a3   : > { %v7580_v14 = vpop.f32.mrf.mxu3  ;;  %v7435_v21 = vpop.f32.mrf.mxu0 }
 0x8a4   : > { %v7436_v53 = vadd.f32 %v7435_v21, %v17894_v32  ;;  %v7581_v28 = vadd.f32 %v7580_v14, %v7532_v59  ;;  %v12749_v59 = vld [vmem:[%s19107_s3 + $0x55c] sm:$0xf] }
 0x8a5   : > { %v7484_v5 = vpop.f32.mrf.mxu1  ;;  %v10827_v14 = vld [vmem:[%s19107_s3 + $0x578] sm:$0xf0] }
 0x8a6   : > { %v7485_v8 = vadd.f32 %v7484_v5, %v7436_v53  ;;  %v8486_v33 = vmax.f32 %v7581_v28, 0.0  ;;  %v12621_v21 = vld [vmem:[%s19107_s3 + $0x15c] sm:$0xf]  ;;  %v10830_v53 = vor.u32 %v12749_v59, %v10827_v14 }
 0x8a7   : > { %v10315_v5 = vld [vmem:[%s19107_s3 + $0x178] sm:$0xf0] }
 0x8a8   : > { %v12813_v28 = vld [vmem:[%s19107_s3 + $0x75c] sm:$0xf]  ;;  %v10318_v37 = vor.u32 %v12621_v21, %v10315_v5  ;;  %8077 = vmatpush.bf16.msra.mxu2 %v10830_v53 }
 0x8a9   : > { %v7533_v32 = vpop.f32.mrf.mxu2  ;;  %v11086_v58 = vor.u32 %v12813_v28, %v11083_v41 }
 0x8aa   : > { %v7534_v7 = vadd.f32 %v7533_v32, %v7485_v8  ;;  %7979 = vmatpush.bf16.msra.mxu0 %v10318_v37  ;;  %v19480_v37 = vld [vmem:[#allocation24_spill] sm:$0xff] }
 0x8ab   : > { %v7582_v46 = vpop.f32.mrf.mxu3  ;;  %v7594_v11 = vpop.f32.mrf.mxu0  ;;  %8126 = vmatpush.bf16.msra.mxu3 %v11086_v58  ;;  %v19481_v58 = vld [vmem:[#allocation25_spill] sm:$0xff] }
 0x8ac   : > { %v7595_v19 = vadd.f32 %v7594_v11, %v18152_v6  ;;  %v7583_v52 = vadd.f32 %v7582_v46, %v7534_v7 }
 0x8ad   : > { %v7643_v38 = vpop.f32.mrf.mxu1 }
 0x8ae   : > { %v7644_v30 = vadd.f32 %v7643_v38, %v7595_v19  ;;  %7789 = vmatmul.bf16.vlgmr.msrb.gmra.mxu0 %v14402_v49  ;;  %v8494_v25 = vmax.f32 %v7583_v52, 0.0  ;;  %7887 = vmatmul.bf16.vlgmr.msrb.gmra.mxu2 %v19477_v56  ;;  %v12685_v52 = vld [vmem:[%s19107_s3 + $0x35c] sm:$0xf] }
 0x8b0   : > { %7838 = vmatmul.bf16.vlgmr.msrb.gmra.mxu1 %v19476_v18  ;;  %7936 = vmatmul.bf16.vlgmr.msrb.gmra.mxu3 %v19478_v29  ;;  %v18177_v50 = vpack.c.bf16 %v8494_v25, %v8486_v33  ;;  %v10571_v33 = vld [vmem:[%s19107_s3 + $0x378] sm:$0xf0]  ;;  %v19503_v29 = vld [vmem:[#allocation51_spill] sm:$0xff] }
 0x8b1   : > { %v7692_v8 = vpop.f32.mrf.mxu2  ;;  %v12949_v18 = vld [vmem:[%s19107_s3 + $0xb9c] sm:$0xf] }
 0x8b2   : > { %19479 = vst [vmem:[#allocation81_spill] sm:$0xff] %v18177_v50  ;;  %v7693_v32 = vadd.f32 %v7692_v8, %v7644_v30  ;;  %v10574_v30 = vor.u32 %v12685_v52, %v10571_v33  ;;  %v10283_v33 = vld [vmem:[%s19107_s3 + $0x138] sm:$0xf0] }
 0x8b3   : > { %v7741_v7 = vpop.f32.mrf.mxu3  ;;  %v7596_v46 = vpop.f32.mrf.mxu0 }
 0x8b4   : > { %v7597_v11 = vadd.f32 %v7596_v46, %v18152_v6  ;;  %v18180_v38 = vadd.f32 %v7741_v7, %v7693_v32  ;;  %8028 = vmatpush.bf16.msra.mxu1 %v10574_v30  ;;  %v19482_v32 = vld [vmem:[#allocation40_spill] sm:$0xff]  ;;  %v19483_v7 = vld [vmem:[#allocation41_spill] sm:$0xff] }
 0x8b5   : > { %v7645_v19 = vpop.f32.mrf.mxu1  ;;  %v12741_v46 = vld [vmem:[%s19107_s3 + $0x51c] sm:$0xf] }
 0x8b6   : > { %v7646_v25 = vadd.f32 %v7645_v19, %v7597_v11  ;;  %v10795_v11 = vld [vmem:[%s19107_s3 + $0x538] sm:$0xf0] }
 0x8b7   : > { %v12613_v19 = vld [vmem:[%s19107_s3 + $0x11c] sm:$0xf]  ;;  %v10798_v52 = vor.u32 %v12741_v46, %v10795_v11 }
 0x8b8   : > { %v11051_v30 = vld [vmem:[%s19107_s3 + $0x738] sm:$0xf0] }
 0x8b9   : > { %v7694_v59 = vpop.f32.mrf.mxu2  ;;  %8078 = vmatpush.bf16.msra.mxu2 %v10798_v52 }
 0x8ba   : > { %v7695_v14 = vadd.f32 %v7694_v59, %v7646_v25  ;;  %v12805_v25 = vld [vmem:[%s19107_s3 + $0x71c] sm:$0xf] }
 0x8bb   : > { %v7743_v21 = vpop.f32.mrf.mxu3  ;;  %v7599_v53 = vpop.f32.mrf.mxu0 }
 0x8bc   : > { %v7600_v5 = vadd.f32 %v7599_v53, %v18152_v6  ;;  %v18189_v41 = vadd.f32 %v7743_v21, %v7695_v14  ;;  %v10286_v14 = vor.u32 %v12613_v19, %v10283_v33  ;;  %v11054_v21 = vor.u32 %v12805_v25, %v11051_v30  ;;  %v10539_v19 = vld [vmem:[%s19107_s3 + $0x338] sm:$0xf0] }
 0x8bd   : > { %v7648_v28 = vpop.f32.mrf.mxu1 }
 0x8be   : > { %v7649_v8 = vadd.f32 %v7648_v28, %v7600_v5  ;;  %7794 = vmatmul.bf16.gmra.mxu0 %v19480_v37  ;;  %7892 = vmatmul.bf16.gmra.mxu2 %v19482_v32  ;;  %v19498_v32 = vld [vmem:[#allocation48_spill] sm:$0xff]  ;;  %v19502_v37 = vld [vmem:[#allocation50_spill] sm:$0xff] }
 0x8bf   : > { %7980 = vmatpush.bf16.msra.mxu0 %v10286_v14  ;;  %8127 = vmatpush.bf16.msra.mxu3 %v11054_v21 }
 0x8c0   : > { %7843 = vmatmul.bf16.gmra.mxu1 %v19481_v58  ;;  %7941 = vmatmul.bf16.gmra.mxu3 %v19483_v7  ;;  %v19495_v7 = vld [vmem:[#allocation47_spill] sm:$0xff]  ;;  %v19499_v58 = vld [vmem:[#allocation49_spill] sm:$0xff] }
 0x8c1   : > { %v7697_v59 = vpop.f32.mrf.mxu2 }
 0x8c2   : > { %v7698_v53 = vadd.f32 %v7697_v59, %v7649_v8  ;;  %v10542_v8 = vor.u32 %v12677_v57, %v10539_v19  ;;  %v12733_v57 = vld [vmem:[%s19107_s3 + $0x4dc] sm:$0xf] }
 0x8c3   : > { %v7746_v5 = vpop.f32.mrf.mxu3  ;;  %v7601_v28 = vpop.f32.mrf.mxu0 }
 0x8c4   : > { %v7602_v46 = vadd.f32 %v7601_v28, %v18152_v6  ;;  %v18214_v50 = vadd.f32 %v7746_v5, %v7698_v53  ;;  %8029 = vmatpush.bf16.msra.mxu1 %v10542_v8  ;;  %v19484_v28 = vld [vmem:[#allocation26_spill] sm:$0xff]  ;;  %v12797_v8 = vld [vmem:[%s19107_s3 + $0x6dc] sm:$0xf] }
 0x8c5   : > { %v7650_v11 = vpop.f32.mrf.mxu1 }
 0x8c6   : > { %v7651_v33 = vadd.f32 %v7650_v11, %v7602_v46  ;;  %v10763_v46 = vld [vmem:[%s19107_s3 + $0x4f8] sm:$0xf0] }
 0x8c7   : > { %v12605_v11 = vld [vmem:[%s19107_s3 + $0xdc] sm:$0xf]  ;;  %v10766_v19 = vor.u32 %v12733_v57, %v10763_v46 }
 0x8c9   : > { %v7699_v25 = vpop.f32.mrf.mxu2  ;;  %8079 = vmatpush.bf16.msra.mxu2 %v10766_v19 }
 0x8ca   : > { %v7700_v52 = vadd.f32 %v7699_v25, %v7651_v33  ;;  %v10251_v33 = vld [vmem:[%s19107_s3 + $0xf8] sm:$0xf0] }
 0x8cb   : > { %v7748_v30 = vpop.f32.mrf.mxu3  ;;  %v7604_v59 = vpop.f32.mrf.mxu0  ;;  %v11019_v25 = vld [vmem:[%s19107_s3 + $0x6f8] sm:$0xf0] }
 0x8cc   : > { %v7605_v14 = vadd.f32 %v7604_v59, %v18152_v6  ;;  %v18223_v53 = vadd.f32 %v7748_v30, %v7700_v52  ;;  %v10254_v30 = vor.u32 %v12605_v11, %v10251_v33  ;;  %v11022_v59 = vor.u32 %v12797_v8, %v11019_v25  ;;  %v10507_v11 = vld [vmem:[%s19107_s3 + $0x2f8] sm:$0xf0] }
 0x8cd   : > { %v7653_v21 = vpop.f32.mrf.mxu1 }
 0x8ce   : > { %v7654_v5 = vadd.f32 %v7653_v21, %v7605_v14  ;;  %7799 = vmatmul.bf16.gmra.mxu0 %v19484_v28  ;;  %7897 = vmatmul.bf16.gmra.mxu2 %v19486_v1  ;;  %v19490_v1 = vld [vmem:[#allocation44_spill] sm:$0xff]  ;;  %v19494_v28 = vld [vmem:[#allocation46_spill] sm:$0xff] }
 0x8cf   : > { %7981 = vmatpush.bf16.msra.mxu0 %v10254_v30  ;;  %8128 = vmatpush.bf16.msra.mxu3 %v11022_v59 }
 0x8d0   : > { %7848 = vmatmul.bf16.gmra.mxu1 %v19485_v31  ;;  %7946 = vmatmul.bf16.gmra.mxu3 %v19487_v17  ;;  %v19489_v17 = vld [vmem:[#allocation29_spill] sm:$0xff] }
 0x8d1   : > { %v7702_v52 = vpop.f32.mrf.mxu2  ;;  %v19491_v31 = vld [vmem:[#allocation45_spill] sm:$0xff] }
 0x8d2   : > { %v7703_v14 = vadd.f32 %v7702_v52, %v7654_v5  ;;  %v10510_v5 = vor.u32 %v12669_v63, %v10507_v11  ;;  %v12725_v63 = vld [vmem:[%s19107_s3 + $0x49c] sm:$0xf] }
 0x8d3   : > { %v7751_v21 = vpop.f32.mrf.mxu3  ;;  %v7606_v4 = vpop.f32.mrf.mxu0 }
 0x8d4   : > { %v7607_v57 = vadd.f32 %v7606_v4, %v18152_v6  ;;  %v18248_v26 = vadd.f32 %v7751_v21, %v7703_v14  ;;  %8030 = vmatpush.bf16.msra.mxu1 %v10510_v5  ;;  %v19488_v21 = vld [vmem:[#allocation28_spill] sm:$0xff]  ;;  %v12789_v5 = vld [vmem:[%s19107_s3 + $0x69c] sm:$0xf] }
 0x8d5   : > { %v7655_v46 = vpop.f32.mrf.mxu1 }
 0x8d6   : > { %v7656_v33 = vadd.f32 %v7655_v46, %v7607_v57  ;;  %v10731_v57 = vld [vmem:[%s19107_s3 + $0x4b8] sm:$0xf0] }
 0x8d7   : > { %v12597_v46 = vld [vmem:[%s19107_s3 + $0x9c] sm:$0xf]  ;;  %v10734_v11 = vor.u32 %v12725_v63, %v10731_v57 }
 0x8d9   : > { %v7704_v8 = vpop.f32.mrf.mxu2  ;;  %8080 = vmatpush.bf16.msra.mxu2 %v10734_v11 }
 0x8da   : > { %v7705_v19 = vadd.f32 %v7704_v8, %v7656_v33  ;;  %v10219_v33 = vld [vmem:[%s19107_s3 + $0xb8] sm:$0xf0] }
 0x8db   : > { %v7753_v25 = vpop.f32.mrf.mxu3  ;;  %v7609_v4 = vpop.f32.mrf.mxu0  ;;  %v10987_v8 = vld [vmem:[%s19107_s3 + $0x6b8] sm:$0xf0] }
 0x8dc   : > { %v7610_v52 = vadd.f32 %v7609_v4, %v18152_v6  ;;  %v18257_v59 = vadd.f32 %v7753_v25, %v7705_v19  ;;  %v10222_v25 = vor.u32 %v12597_v46, %v10219_v33  ;;  %v10990_v4 = vor.u32 %v12789_v5, %v10987_v8  ;;  %v10475_v46 = vld [vmem:[%s19107_s3 + $0x2b8] sm:$0xf0] }
 0x8dd   : > { %v7658_v30 = vpop.f32.mrf.mxu1 }
 0x8de   : > { %v7659_v14 = vadd.f32 %v7658_v30, %v7610_v52  ;;  %7804 = vmatmul.bf16.gmra.mxu0 %v19488_v21  ;;  %7902 = vmatmul.bf16.gmra.mxu2 %v19490_v1  ;;  %v19493_v21 = vld [vmem:[#allocation31_spill] sm:$0xff] }
 0x8df   : > { %7982 = vmatpush.bf16.msra.mxu0 %v10222_v25  ;;  %8129 = vmatpush.bf16.msra.mxu3 %v10990_v4 }
 0x8e0   : > { %7853 = vmatmul.bf16.gmra.mxu1 %v19489_v17  ;;  %7951 = vmatmul.bf16.gmra.mxu3 %v19491_v31  ;;  %v12661_v17 = vld [vmem:[%s19107_s3 + $0x29c] sm:$0xf] }
 0x8e1   : > { %v7707_v19 = vpop.f32.mrf.mxu2 }
 0x8e2   : > { %v7708_v52 = vadd.f32 %v7707_v19, %v7659_v14  ;;  %v10478_v14 = vor.u32 %v12661_v17, %v10475_v46  ;;  %v12717_v17 = vld [vmem:[%s19107_s3 + $0x45c] sm:$0xf] }
 0x8e3   : > { %v7756_v30 = vpop.f32.mrf.mxu3  ;;  %v7611_v31 = vpop.f32.mrf.mxu0 }
 0x8e4   : > { %v7612_v63 = vadd.f32 %v7611_v31, %v18152_v6  ;;  %v18282_v1 = vadd.f32 %v7756_v30, %v7708_v52  ;;  %8031 = vmatpush.bf16.msra.mxu1 %v10478_v14  ;;  %v19492_v30 = vld [vmem:[#allocation30_spill] sm:$0xff]  ;;  %v12781_v14 = vld [vmem:[%s19107_s3 + $0x65c] sm:$0xf] }
 0x8e5   : > { %v7660_v57 = vpop.f32.mrf.mxu1 }
 0x8e6   : > { %v7661_v33 = vadd.f32 %v7660_v57, %v7612_v63  ;;  %v10699_v63 = vld [vmem:[%s19107_s3 + $0x478] sm:$0xf0] }
 0x8e7   : > { %v12589_v57 = vld [vmem:[%s19107_s3 + $0x5c] sm:$0xf]  ;;  %v10702_v46 = vor.u32 %v12717_v17, %v10699_v63 }
 0x8e9   : > { %v7709_v5 = vpop.f32.mrf.mxu2  ;;  %8081 = vmatpush.bf16.msra.mxu2 %v10702_v46 }
 0x8ea   : > { %v7710_v11 = vadd.f32 %v7709_v5, %v7661_v33  ;;  %v10187_v33 = vld [vmem:[%s19107_s3 + $0x78] sm:$0xf0] }
 0x8eb   : > { %v7758_v8 = vpop.f32.mrf.mxu3  ;;  %v7614_v31 = vpop.f32.mrf.mxu0  ;;  %v10955_v5 = vld [vmem:[%s19107_s3 + $0x678] sm:$0xf0] }
 0x8ec   : > { %v7615_v19 = vadd.f32 %v7614_v31, %v18152_v6  ;;  %v18291_v4 = vadd.f32 %v7758_v8, %v7710_v11  ;;  %v10190_v8 = vor.u32 %v12589_v57, %v10187_v33  ;;  %v10958_v31 = vor.u32 %v12781_v14, %v10955_v5  ;;  %v10443_v57 = vld [vmem:[%s19107_s3 + $0x278] sm:$0xf0] }
 0x8ed   : > { %v7663_v25 = vpop.f32.mrf.mxu1 }
 0x8ee   : > { %v7664_v52 = vadd.f32 %v7663_v25, %v7615_v19  ;;  %7809 = vmatmul.bf16.gmra.mxu0 %v19492_v30  ;;  %7907 = vmatmul.bf16.gmra.mxu2 %v19494_v28  ;;  %v19497_v30 = vld [vmem:[#allocation33_spill] sm:$0xff] }
 0x8ef   : > { %7983 = vmatpush.bf16.msra.mxu0 %v10190_v8  ;;  %8130 = vmatpush.bf16.msra.mxu3 %v10958_v31 }
 0x8f0   : > { %7858 = vmatmul.bf16.gmra.mxu1 %v19493_v21  ;;  %7956 = vmatmul.bf16.gmra.mxu3 %v19495_v7  ;;  %v12653_v21 = vld [vmem:[%s19107_s3 + $0x25c] sm:$0xf] }
 0x8f1   : > { %v7712_v11 = vpop.f32.mrf.mxu2 }
 0x8f2   : > { %v7713_v19 = vadd.f32 %v7712_v11, %v7664_v52  ;;  %v10446_v52 = vor.u32 %v12653_v21, %v10443_v57  ;;  %v12709_v21 = vld [vmem:[%s19107_s3 + $0x41c] sm:$0xf] }
 0x8f3   : > { %v7761_v25 = vpop.f32.mrf.mxu3  ;;  %v7616_v7 = vpop.f32.mrf.mxu0 }
 0x8f4   : > { %v7617_v17 = vadd.f32 %v7616_v7, %v18152_v6  ;;  %v18316_v28 = vadd.f32 %v7761_v25, %v7713_v19  ;;  %8032 = vmatpush.bf16.msra.mxu1 %v10446_v52  ;;  %v19496_v25 = vld [vmem:[#allocation32_spill] sm:$0xff]  ;;  %v12773_v52 = vld [vmem:[%s19107_s3 + $0x61c] sm:$0xf] }
 0x8f5   : > { %v7665_v63 = vpop.f32.mrf.mxu1 }
 0x8f6   : > { %v7666_v33 = vadd.f32 %v7665_v63, %v7617_v17  ;;  %v10667_v17 = vld [vmem:[%s19107_s3 + $0x438] sm:$0xf0] }
 0x8f7   : > { %v12581_v63 = vld [vmem:[%s19107_s3 + $0x1c] sm:$0xf]  ;;  %v10670_v57 = vor.u32 %v12709_v21, %v10667_v17 }
 0x8f9   : > { %v7714_v14 = vpop.f32.mrf.mxu2  ;;  %8082 = vmatpush.bf16.msra.mxu2 %v10670_v57 }
 0x8fa   : > { %v7715_v46 = vadd.f32 %v7714_v14, %v7666_v33  ;;  %v10155_v33 = vld [vmem:[%s19107_s3 + $0x38] sm:$0xf0] }
 0x8fb   : > { %v7763_v5 = vpop.f32.mrf.mxu3  ;;  %v7619_v7 = vpop.f32.mrf.mxu0  ;;  %v10923_v14 = vld [vmem:[%s19107_s3 + $0x638] sm:$0xf0] }
 0x8fc   : > { %v7620_v11 = vadd.f32 %v7619_v7, %v18152_v6  ;;  %v18325_v31 = vadd.f32 %v7763_v5, %v7715_v46  ;;  %v10158_v5 = vor.u32 %v12581_v63, %v10155_v33  ;;  %v10926_v7 = vor.u32 %v12773_v52, %v10923_v14  ;;  %v10411_v63 = vld [vmem:[%s19107_s3 + $0x238] sm:$0xf0] }
 0x8fd   : > { %v7668_v8 = vpop.f32.mrf.mxu1 }
 0x8fe   : > { %v7669_v19 = vadd.f32 %v7668_v8, %v7620_v11  ;;  %7814 = vmatmul.bf16.gmra.mxu0 %v19496_v25  ;;  %7912 = vmatmul.bf16.gmra.mxu2 %v19498_v32  ;;  %v19501_v25 = vld [vmem:[#allocation35_spill] sm:$0xff] }
 0x8ff   : > { %7984 = vmatpush.bf16.msra.mxu0 %v10158_v5  ;;  %8131 = vmatpush.bf16.msra.mxu3 %v10926_v7 }
 0x900   : > { %7863 = vmatmul.bf16.gmra.mxu1 %v19497_v30  ;;  %7961 = vmatmul.bf16.gmra.mxu3 %v19499_v58  ;;  %v12645_v30 = vld [vmem:[%s19107_s3 + $0x21c] sm:$0xf] }
 0x901   : > { %v7717_v46 = vpop.f32.mrf.mxu2 }
 0x902   : > { %v7718_v11 = vadd.f32 %v7717_v46, %v7669_v19  ;;  %v10414_v19 = vor.u32 %v12645_v30, %v10411_v63  ;;  %v13021_v30 = vld [vmem:[%s19107_s3 + $0xddc] sm:$0xf] }
 0x903   : > { %v7766_v8 = vpop.f32.mrf.mxu3  ;;  %v7621_v58 = vpop.f32.mrf.mxu0 }
 0x904   : > { %v7622_v21 = vadd.f32 %v7621_v58, %v18152_v6  ;;  %v18350_v32 = vadd.f32 %v7766_v8, %v7718_v11  ;;  %8033 = vmatpush.bf16.msra.mxu1 %v10414_v19  ;;  %v19500_v8 = vld [vmem:[#allocation34_spill] sm:$0xff]  ;;  %v13085_v19 = vld [vmem:[%s19107_s3 + $0xfdc] sm:$0xf] }
 0x905   : > { %v7670_v17 = vpop.f32.mrf.mxu1 }
 0x906   : > { %v7671_v33 = vadd.f32 %v7670_v17, %v7622_v21  ;;  %v11915_v21 = vld [vmem:[%s19107_s3 + $0xdf8] sm:$0xf0] }
 0x907   : > { %v12893_v17 = vld [vmem:[%s19107_s3 + $0x9dc] sm:$0xf]  ;;  %v11918_v63 = vor.u32 %v13021_v30, %v11915_v21 }
 0x909   : > { %v7719_v52 = vpop.f32.mrf.mxu2  ;;  %8271 = vmatpush.bf16.msrb.mxu2 %v11918_v63 }
 0x90a   : > { %v7720_v57 = vadd.f32 %v7719_v52, %v7671_v33  ;;  %v11403_v33 = vld [vmem:[%s19107_s3 + $0x9f8] sm:$0xf0] }
 0x90b   : > { %v7768_v14 = vpop.f32.mrf.mxu3  ;;  %v7624_v58 = vpop.f32.mrf.mxu0  ;;  %v12171_v52 = vld [vmem:[%s19107_s3 + $0xff8] sm:$0xf0] }
 0x90c   : > { %v7625_v46 = vadd.f32 %v7624_v58, %v18152_v6  ;;  %v18359_v7 = vadd.f32 %v7768_v14, %v7720_v57  ;;  %v11406_v14 = vor.u32 %v12893_v17, %v11403_v33  ;;  %v12174_v58 = vor.u32 %v13085_v19, %v12171_v52  ;;  %v11659_v17 = vld [vmem:[%s19107_s3 + $0xbf8] sm:$0xf0] }
 0x90d   : > { %v7673_v5 = vpop.f32.mrf.mxu1 }
 0x90e   : > { %v7674_v11 = vadd.f32 %v7673_v5, %v7625_v46  ;;  %7819 = vmatmul.bf16.gmra.mxu0 %v19500_v8  ;;  %7917 = vmatmul.bf16.gmra.mxu2 %v19502_v37  ;;  %v12957_v8 = vld [vmem:[%s19107_s3 + $0xbdc] sm:$0xf] }
 0x90f   : > { %8173 = vmatpush.bf16.msrb.mxu0 %v11406_v14  ;;  %8320 = vmatpush.bf16.msrb.mxu3 %v12174_v58 }
 0x910   : > { %7868 = vmatmul.bf16.gmra.mxu1 %v19501_v25  ;;  %7966 = vmatmul.bf16.gmra.mxu3 %v19503_v29 }
 0x911   : > { %v7722_v57 = vpop.f32.mrf.mxu2 }
 0x912   : > { %v7723_v46 = vadd.f32 %v7722_v57, %v7674_v11  ;;  %v11662_v11 = vor.u32 %v12957_v8, %v11659_v17  ;;  %v11883_v8 = vld [vmem:[%s19107_s3 + $0xdb8] sm:$0xf0] }
 0x913   : > { %v7771_v5 = vpop.f32.mrf.mxu3  ;;  %v7626_v29 = vpop.f32.mrf.mxu0  ;;  %v12885_v17 = vld [vmem:[%s19107_s3 + $0x99c] sm:$0xf] }
 0x914   : > { %v7627_v30 = vadd.f32 %v7626_v29, %v18152_v6  ;;  %v18384_v37 = vadd.f32 %v7771_v5, %v7723_v46  ;;  %8222 = vmatpush.bf16.msrb.mxu1 %v11662_v11  ;;  %v19504_v46 = vld [vmem:[#allocation36_spill] sm:$0xff]  ;;  %v19505_v5 = vld [vmem:[#allocation37_spill] sm:$0xff] }
 0x915   : > { %v7675_v21 = vpop.f32.mrf.mxu1 }
 0x916   : > { %v7676_v25 = vadd.f32 %v7675_v21, %v7627_v30  ;;  %v19506_v30 = vld [vmem:[#allocation52_spill] sm:$0xff]  ;;  %v19507_v21 = vld [vmem:[#allocation53_spill] sm:$0xff] }
 0x919   : > { %v7724_v33 = vpop.f32.mrf.mxu2 }
 0x91a   : > { %v7725_v63 = vadd.f32 %v7724_v33, %v7676_v25  ;;  %v13013_v25 = vld [vmem:[%s19107_s3 + $0xd9c] sm:$0xf] }
 0x91b   : > { %v7773_v19 = vpop.f32.mrf.mxu3  ;;  %v7629_v29 = vpop.f32.mrf.mxu0  ;;  %v11886_v33 = vor.u32 %v13013_v25, %v11883_v8 }
 0x91c   : > { %v7630_v52 = vadd.f32 %v7629_v29, %v18152_v6  ;;  %v18393_v14 = vadd.f32 %v7773_v19, %v7725_v63  ;;  %v11371_v63 = vld [vmem:[%s19107_s3 + $0x9b8] sm:$0xf0] }
 0x91d   : > { %v7678_v57 = vpop.f32.mrf.mxu1  ;;  %v13077_v19 = vld [vmem:[%s19107_s3 + $0xf9c] sm:$0xf]  ;;  %8272 = vmatpush.bf16.msrb.mxu2 %v11886_v33 }
 0x91e   : > { %v7679_v58 = vadd.f32 %v7678_v57, %v7630_v52  ;;  %7824 = vmatmul.bf16.gmra.mxu0 %v19504_v46  ;;  %7922 = vmatmul.bf16.gmra.mxu2 %v19506_v30  ;;  %v12139_v29 = vld [vmem:[%s19107_s3 + $0xfb8] sm:$0xf0]  ;;  %v11374_v30 = vor.u32 %v12885_v17, %v11371_v63 }
 0x920   : > { %7873 = vmatmul.bf16.gmra.mxu1 %v19505_v5  ;;  %7971 = vmatmul.bf16.gmra.mxu3 %v19507_v21  ;;  %v12142_v5 = vor.u32 %v13077_v19, %v12139_v29 }
 0x921   : > { %v7727_v11 = vpop.f32.mrf.mxu2  ;;  %8174 = vmatpush.bf16.msrb.mxu0 %v11374_v30 }
 0x922   : > { %v7728_v52 = vadd.f32 %v7727_v11, %v7679_v58  ;;  %8321 = vmatpush.bf16.msrb.mxu3 %v12142_v5  ;;  %v11627_v58 = vld [vmem:[%s19107_s3 + $0xbb8] sm:$0xf0]  ;;  %v19508_v5 = vld [vmem:[#allocation8_spill] sm:$0xff] }
 0x923   : > { %v7776_v57 = vpop.f32.mrf.mxu3  ;;  %v7631_v21 = vpop.f32.mrf.mxu0  ;;  %v11630_v11 = vor.u32 %v12949_v18, %v11627_v58  ;;  %v13005_v18 = vld [vmem:[%s19107_s3 + $0xd5c] sm:$0xf] }
 0x924   : > { %v7632_v46 = vadd.f32 %v7631_v21, %v18152_v6  ;;  %v18418_v8 = vadd.f32 %v7776_v57, %v7728_v52 }
 0x925   : > { %v7680_v25 = vpop.f32.mrf.mxu1  ;;  %8223 = vmatpush.bf16.msrb.mxu1 %v11630_v11 }
 0x926   : > { %v7681_v56 = vadd.f32 %v7680_v25, %v7632_v46 }
 0x929   : > { %v7729_v17 = vpop.f32.mrf.mxu2 }
 0x92a   : > { %v7730_v63 = vadd.f32 %v7729_v17, %v7681_v56  ;;  %v11851_v56 = vld [vmem:[%s19107_s3 + $0xd78] sm:$0xf0] }
 0x92b   : > { %v7778_v6 = vpop.f32.mrf.mxu3  ;;  %v7790_v21 = vpop.f32.mrf.mxu0  ;;  %v11854_v29 = vor.u32 %v13005_v18, %v11851_v56 }
 0x92c   : > { %v7791_v33 = vadd.f32 %v7790_v21, %v18180_v38  ;;  %v18427_v30 = vadd.f32 %v7778_v6, %v7730_v63  ;;  %v12877_v38 = vld [vmem:[%s19107_s3 + $0x95c] sm:$0xf] }
 0x92d   : > { %v7839_v19 = vpop.f32.mrf.mxu1  ;;  %8273 = vmatpush.bf16.msrb.mxu2 %v11854_v29 }
 0x92e   : > { %v7840_v46 = vadd.f32 %v7839_v19, %v7791_v33  ;;  %7985 = vmatmul.bf16.vlgmr.msra.gmra.mxu0 %v13809_v61  ;;  %8083 = vmatmul.bf16.vlgmr.msra.gmra.mxu2 %v14103_v20  ;;  %v11339_v61 = vld [vmem:[%s19107_s3 + $0x978] sm:$0xf0] }
 0x92f   : > { %v12107_v20 = vld [vmem:[%s19107_s3 + $0xf78] sm:$0xf0]  ;;  %v11342_v57 = vor.u32 %v12877_v38, %v11339_v61 }
 0x930   : > { %8034 = vmatmul.bf16.vlgmr.msra.gmra.mxu1 %v13817_v12  ;;  %8132 = vmatmul.bf16.vlgmr.msra.gmra.mxu3 %v19508_v5  ;;  %v13069_v12 = vld [vmem:[%s19107_s3 + $0xf5c] sm:$0xf] }
 0x931   : > { %v7888_v52 = vpop.f32.mrf.mxu2  ;;  %v12110_v25 = vor.u32 %v13069_v12, %v12107_v20  ;;  %8175 = vmatpush.bf16.msrb.mxu0 %v11342_v57  ;;  %v12941_v19 = vld [vmem:[%s19107_s3 + $0xb5c] sm:$0xf] }
 0x932   : > { %v7889_v58 = vadd.f32 %v7888_v52, %v7840_v46  ;;  %v11595_v5 = vld [vmem:[%s19107_s3 + $0xb78] sm:$0xf0] }
 0x933   : > { %v7937_v11 = vpop.f32.mrf.mxu3  ;;  %v7792_v17 = vpop.f32.mrf.mxu0  ;;  %8322 = vmatpush.bf16.msrb.mxu3 %v12110_v25  ;;  %v11598_v18 = vor.u32 %v12941_v19, %v11595_v5  ;;  %v12997_v25 = vld [vmem:[%s19107_s3 + $0xd1c] sm:$0xf] }
 0x934   : > { %v7793_v63 = vadd.f32 %v7792_v17, %v18189_v41  ;;  %v7938_v21 = vadd.f32 %v7937_v11, %v7889_v58 }
 0x935   : > { %v7841_v6 = vpop.f32.mrf.mxu1  ;;  %8224 = vmatpush.bf16.msrb.mxu1 %v11598_v18 }
 0x936   : > { %v7842_v33 = vadd.f32 %v7841_v6, %v7793_v63  ;;  %v8375_v52 = vmax.f32 %v7938_v21, 0.0 }
 0x939   : > { %v7890_v46 = vpop.f32.mrf.mxu2 }
 0x93a   : > { %v7891_v56 = vadd.f32 %v7890_v46, %v7842_v33 }
 0x93b   : > { %v7939_v38 = vpop.f32.mrf.mxu3  ;;  %v7795_v29 = vpop.f32.mrf.mxu0 }
 0x93c   : > { %v7796_v41 = vadd.f32 %v7795_v29, %v18214_v50  ;;  %v7940_v12 = vadd.f32 %v7939_v38, %v7891_v56  ;;  %v11819_v50 = vld [vmem:[%s19107_s3 + $0xd38] sm:$0xf0] }
 0x93d   : > { %v7844_v61 = vpop.f32.mrf.mxu1  ;;  %v11822_v11 = vor.u32 %v12997_v25, %v11819_v50  ;;  %v12933_v38 = vld [vmem:[%s19107_s3 + $0xb1c] sm:$0xf] }
 0x93e   : > { %v7845_v20 = vadd.f32 %v7844_v61, %v7796_v41  ;;  %7990 = vmatmul.bf16.gmra.mxu0 %v13845_v45  ;;  %v8383_v57 = vmax.f32 %v7940_v12, 0.0  ;;  %8088 = vmatmul.bf16.gmra.mxu2 %v19269_v42  ;;  %v12869_v45 = vld [vmem:[%s19107_s3 + $0x91c] sm:$0xf] }
 0x93f   : > { %v13061_v42 = vld [vmem:[%s19107_s3 + $0xf1c] sm:$0xf]  ;;  %8274 = vmatpush.bf16.msrb.mxu2 %v11822_v11 }
 0x940   : > { %8039 = vmatmul.bf16.gmra.mxu1 %v13853_v62  ;;  %8137 = vmatmul.bf16.gmra.mxu3 %v19270_v55  ;;  %v18472_v58 = vpack.c.bf16 %v8383_v57, %v8375_v52  ;;  %v11307_v62 = vld [vmem:[%s19107_s3 + $0x938] sm:$0xf0] }
 0x941   : > { %v12075_v55 = vld [vmem:[%s19107_s3 + $0xf38] sm:$0xf0]  ;;  %v7893_v17 = vpop.f32.mrf.mxu2  ;;  %v11310_v63 = vor.u32 %v12869_v45, %v11307_v62 }
 0x942   : > { %v12078_v6 = vor.u32 %v13061_v42, %v12075_v55  ;;  %v7894_v21 = vadd.f32 %v7893_v17, %v7845_v20  ;;  %v11563_v29 = vld [vmem:[%s19107_s3 + $0xb38] sm:$0xf0] }
 0x943   : > { %v7942_v33 = vpop.f32.mrf.mxu3  ;;  %v7797_v19 = vpop.f32.mrf.mxu0  ;;  %8176 = vmatpush.bf16.msrb.mxu0 %v11310_v63  ;;  %v11566_v41 = vor.u32 %v12933_v38, %v11563_v29  ;;  %v12989_v62 = vld [vmem:[%s19107_s3 + $0xcdc] sm:$0xf] }
 0x944   : > { %v7798_v5 = vadd.f32 %v7797_v19, %v18223_v53  ;;  %8323 = vmatpush.bf16.msrb.mxu3 %v12078_v6  ;;  %v7943_v46 = vadd.f32 %v7942_v33, %v7894_v21  ;;  %v12925_v38 = vld [vmem:[%s19107_s3 + $0xadc] sm:$0xf] }
 0x945   : > { %v7846_v18 = vpop.f32.mrf.mxu1  ;;  %8225 = vmatpush.bf16.msrb.mxu1 %v11566_v41  ;;  %v11531_v29 = vld [vmem:[%s19107_s3 + $0xaf8] sm:$0xf0] }
 0x946   : > { %v7847_v56 = vadd.f32 %v7846_v18, %v7798_v5  ;;  %v8391_v45 = vmax.f32 %v7943_v46, 0.0  ;;  %v11534_v41 = vor.u32 %v12925_v38, %v11531_v29 }
 0x949   : > { %v7895_v61 = vpop.f32.mrf.mxu2  ;;  %8226 = vmatpush.bf16.msrb.mxu1 %v11534_v41 }
 0x94a   : > { %v7896_v12 = vadd.f32 %v7895_v61, %v7847_v56 }
 0x94b   : > { %v7944_v20 = vpop.f32.mrf.mxu3  ;;  %v7800_v52 = vpop.f32.mrf.mxu0 }
 0x94c   : > { %v7801_v53 = vadd.f32 %v7800_v52, %v18248_v26  ;;  %v7945_v25 = vadd.f32 %v7944_v20, %v7896_v12  ;;  %v11787_v26 = vld [vmem:[%s19107_s3 + $0xcf8] sm:$0xf0] }
 0x94d   : > { %v7849_v57 = vpop.f32.mrf.mxu1  ;;  %v11790_v42 = vor.u32 %v12989_v62, %v11787_v26 }
 0x94e   : > { %v7850_v50 = vadd.f32 %v7849_v57, %v7801_v53  ;;  %7995 = vmatmul.bf16.gmra.mxu0 %v13881_v35  ;;  %v8399_v11 = vmax.f32 %v7945_v25, 0.0  ;;  %8093 = vmatmul.bf16.gmra.mxu2 %v19350_v13  ;;  %v12861_v35 = vld [vmem:[%s19107_s3 + $0x8dc] sm:$0xf] }
 0x94f   : > { %v13053_v13 = vld [vmem:[%s19107_s3 + $0xedc] sm:$0xf]  ;;  %8275 = vmatpush.bf16.msrb.mxu2 %v11790_v42 }
 0x950   : > { %8044 = vmatmul.bf16.gmra.mxu1 %v19310_v47  ;;  %8142 = vmatmul.bf16.gmra.mxu3 %v19390_v48  ;;  %v11275_v47 = vld [vmem:[%s19107_s3 + $0x8f8] sm:$0xf0]  ;;  %v18513_v55 = vpack.c.bf16 %v8399_v11, %v8391_v45 }
 0x951   : > { %v12043_v48 = vld [vmem:[%s19107_s3 + $0xef8] sm:$0xf0]  ;;  %v7898_v17 = vpop.f32.mrf.mxu2  ;;  %v11278_v63 = vor.u32 %v12861_v35, %v11275_v47 }
 0x952   : > { %v12046_v6 = vor.u32 %v13053_v13, %v12043_v48  ;;  %v7899_v21 = vadd.f32 %v7898_v17, %v7850_v50  ;;  %v12981_v11 = vld [vmem:[%s19107_s3 + $0xc9c] sm:$0xf] }
 0x953   : > { %v7947_v33 = vpop.f32.mrf.mxu3  ;;  %v7802_v19 = vpop.f32.mrf.mxu0  ;;  %8177 = vmatpush.bf16.msrb.mxu0 %v11278_v63 }
 0x954   : > { %v7803_v5 = vadd.f32 %v7802_v19, %v18257_v59  ;;  %8324 = vmatpush.bf16.msrb.mxu3 %v12046_v6  ;;  %v7948_v46 = vadd.f32 %v7947_v33, %v7899_v21  ;;  %v12917_v19 = vld [vmem:[%s19107_s3 + $0xa9c] sm:$0xf] }
 0x955   : > { %v7851_v18 = vpop.f32.mrf.mxu1 }
 0x956   : > { %v7852_v56 = vadd.f32 %v7851_v18, %v7803_v5  ;;  %v8407_v50 = vmax.f32 %v7948_v46, 0.0  ;;  %v11499_v5 = vld [vmem:[%s19107_s3 + $0xab8] sm:$0xf0] }
 0x957   : > { %v11502_v18 = vor.u32 %v12917_v19, %v11499_v5 }
 0x959   : > { %v7900_v61 = vpop.f32.mrf.mxu2  ;;  %8227 = vmatpush.bf16.msrb.mxu1 %v11502_v18  ;;  %v12965_v18 = vld [vmem:[%s19107_s3 + $0xc1c] sm:$0xf] }
 0x95a   : > { %v7901_v12 = vadd.f32 %v7900_v61, %v7852_v56 }
 0x95b   : > { %v7949_v20 = vpop.f32.mrf.mxu3  ;;  %v7805_v52 = vpop.f32.mrf.mxu0 }
 0x95c   : > { %v7806_v59 = vadd.f32 %v7805_v52, %v18282_v1  ;;  %v7950_v57 = vadd.f32 %v7949_v20, %v7901_v12  ;;  %v11755_v1 = vld [vmem:[%s19107_s3 + $0xcb8] sm:$0xf0] }
 0x95d   : > { %v7854_v53 = vpop.f32.mrf.mxu1  ;;  %v11758_v62 = vor.u32 %v12981_v11, %v11755_v1 }
 0x95e   : > { %v7855_v25 = vadd.f32 %v7854_v53, %v7806_v59  ;;  %8000 = vmatmul.bf16.gmra.mxu0 %v13917_v23  ;;  %v8415_v45 = vmax.f32 %v7950_v57, 0.0  ;;  %8098 = vmatmul.bf16.gmra.mxu2 %v19275_v9  ;;  %v12853_v23 = vld [vmem:[%s19107_s3 + $0x89c] sm:$0xf] }
 0x95f   : > { %v13045_v9 = vld [vmem:[%s19107_s3 + $0xe9c] sm:$0xf]  ;;  %8276 = vmatpush.bf16.msrb.mxu2 %v11758_v62 }
 0x960   : > { %8049 = vmatmul.bf16.gmra.mxu1 %v13925_v40  ;;  %8147 = vmatmul.bf16.gmra.mxu3 %v19276_v43  ;;  %v11243_v40 = vld [vmem:[%s19107_s3 + $0x8b8] sm:$0xf0]  ;;  %v18545_v26 = vpack.c.bf16 %v8415_v45, %v8407_v50 }
 0x961   : > { %v12011_v43 = vld [vmem:[%s19107_s3 + $0xeb8] sm:$0xf0]  ;;  %v7903_v35 = vpop.f32.mrf.mxu2  ;;  %v11246_v42 = vor.u32 %v12853_v23, %v11243_v40 }
 0x962   : > { %v12014_v47 = vor.u32 %v13045_v9, %v12011_v43  ;;  %v7904_v13 = vadd.f32 %v7903_v35, %v7855_v25  ;;  %v12973_v59 = vld [vmem:[%s19107_s3 + $0xc5c] sm:$0xf] }
 0x963   : > { %v7952_v48 = vpop.f32.mrf.mxu3  ;;  %v7807_v17 = vpop.f32.mrf.mxu0  ;;  %8178 = vmatpush.bf16.msrb.mxu0 %v11246_v42  ;;  %v12909_v35 = vld [vmem:[%s19107_s3 + $0xa5c] sm:$0xf] }
 0x964   : > { %v7808_v63 = vadd.f32 %v7807_v17, %v18291_v4  ;;  %8325 = vmatpush.bf16.msrb.mxu3 %v12014_v47  ;;  %v7953_v21 = vadd.f32 %v7952_v48, %v7904_v13  ;;  %v11467_v42 = vld [vmem:[%s19107_s3 + $0xa78] sm:$0xf0] }
 0x965   : > { %v7856_v6 = vpop.f32.mrf.mxu1  ;;  %v11470_v47 = vor.u32 %v12909_v35, %v11467_v42 }
 0x966   : > { %v7857_v33 = vadd.f32 %v7856_v6, %v7808_v63  ;;  %v8423_v20 = vmax.f32 %v7953_v21, 0.0 }
 0x967   : > { %8228 = vmatpush.bf16.msrb.mxu1 %v11470_v47 }
 0x969   : > { %v7905_v46 = vpop.f32.mrf.mxu2 }
 0x96a   : > { %v7906_v56 = vadd.f32 %v7905_v46, %v7857_v33 }
 0x96b   : > { %v7954_v38 = vpop.f32.mrf.mxu3  ;;  %v7810_v29 = vpop.f32.mrf.mxu0 }
 0x96c   : > { %v7811_v4 = vadd.f32 %v7810_v29, %v18316_v28  ;;  %v7955_v61 = vadd.f32 %v7954_v38, %v7906_v56  ;;  %v11723_v28 = vld [vmem:[%s19107_s3 + $0xc78] sm:$0xf0] }
 0x96d   : > { %v7859_v41 = vpop.f32.mrf.mxu1  ;;  %v11726_v53 = vor.u32 %v12973_v59, %v11723_v28 }
 0x96e   : > { %v7860_v12 = vadd.f32 %v7859_v41, %v7811_v4  ;;  %8005 = vmatmul.bf16.gmra.mxu0 %v13953_v16  ;;  %v8431_v52 = vmax.f32 %v7955_v61, 0.0  ;;  %8103 = vmatmul.bf16.gmra.mxu2 %v19278_v54  ;;  %v12845_v16 = vld [vmem:[%s19107_s3 + $0x85c] sm:$0xf] }
 0x96f   : > { %v13037_v54 = vld [vmem:[%s19107_s3 + $0xe5c] sm:$0xf]  ;;  %8277 = vmatpush.bf16.msrb.mxu2 %v11726_v53 }
 0x970   : > { %8054 = vmatmul.bf16.gmra.mxu1 %v13961_v36  ;;  %8152 = vmatmul.bf16.gmra.mxu3 %v19279_v22  ;;  %v11211_v36 = vld [vmem:[%s19107_s3 + $0x878] sm:$0xf0]  ;;  %v18577_v57 = vpack.c.bf16 %v8431_v52, %v8423_v20 }
 0x971   : > { %v11979_v22 = vld [vmem:[%s19107_s3 + $0xe78] sm:$0xf0]  ;;  %v7908_v25 = vpop.f32.mrf.mxu2  ;;  %v11214_v50 = vor.u32 %v12845_v16, %v11211_v36 }
 0x972   : > { %v11982_v45 = vor.u32 %v13037_v54, %v11979_v22  ;;  %v7909_v11 = vadd.f32 %v7908_v25, %v7860_v12  ;;  %v12901_v16 = vld [vmem:[%s19107_s3 + $0xa1c] sm:$0xf] }
 0x973   : > { %v7957_v1 = vpop.f32.mrf.mxu3  ;;  %v7812_v23 = vpop.f32.mrf.mxu0  ;;  %8179 = vmatpush.bf16.msrb.mxu0 %v11214_v50  ;;  %v11435_v53 = vld [vmem:[%s19107_s3 + $0xa38] sm:$0xf0] }
 0x974   : > { %v7813_v62 = vadd.f32 %v7812_v23, %v18325_v31  ;;  %8326 = vmatpush.bf16.msrb.mxu3 %v11982_v45  ;;  %v7958_v9 = vadd.f32 %v7957_v1, %v7909_v11  ;;  %v11438_v36 = vor.u32 %v12901_v16, %v11435_v53 }
 0x975   : > { %v7861_v40 = vpop.f32.mrf.mxu1 }
 0x976   : > { %v7862_v43 = vadd.f32 %v7861_v40, %v7813_v62  ;;  %v8439_v19 = vmax.f32 %v7958_v9, 0.0  ;;  %8229 = vmatpush.bf16.msrb.mxu1 %v11438_v36  ;;  %v13113_v40 = vld [vmem:[%s19109_s5 + $0xb8] sm:$0xff] }
 0x979   : > { %v7910_v13 = vpop.f32.mrf.mxu2 }
 0x97a   : > { %v7911_v48 = vadd.f32 %v7910_v13, %v7862_v43  ;;  %v13105_v13 = vld [vmem:[%s19109_s5 + $0x78] sm:$0xff] }
 0x97b   : > { %v7959_v17 = vpop.f32.mrf.mxu3  ;;  %v7815_v63 = vpop.f32.mrf.mxu0  ;;  %9126 = vmatpush.bf16.msra.mxu1 %v13105_v13 }
 0x97c   : > { %v7816_v31 = vadd.f32 %v7815_v63, %v18350_v32  ;;  %v7960_v21 = vadd.f32 %v7959_v17, %v7911_v48  ;;  %v11691_v32 = vld [vmem:[%s19107_s3 + $0xc38] sm:$0xf0] }
 0x97d   : > { %v7864_v6 = vpop.f32.mrf.mxu1  ;;  %v11694_v46 = vor.u32 %v12965_v18, %v11691_v32  ;;  %v13112_v32 = vld [vmem:[%s19109_s5 + $0xb0] sm:$0xff] }
 0x97e   : > { %v7865_v33 = vadd.f32 %v7864_v6, %v7816_v31  ;;  %8010 = vmatmul.bf16.gmra.mxu0 %v13989_v10  ;;  %v8447_v5 = vmax.f32 %v7960_v21, 0.0  ;;  %8108 = vmatmul.bf16.gmra.mxu2 %v19282_v27  ;;  %v12837_v10 = vld [vmem:[%s19107_s3 + $0x81c] sm:$0xf] }
 0x97f   : > { %v13029_v27 = vld [vmem:[%s19107_s3 + $0xe1c] sm:$0xf]  ;;  %8278 = vmatpush.bf16.msrb.mxu2 %v11694_v46 }
 0x980   : > { %8059 = vmatmul.bf16.gmra.mxu1 %v19281_v2  ;;  %8157 = vmatmul.bf16.gmra.mxu3 %v19316_v0  ;;  %v11179_v2 = vld [vmem:[%s19107_s3 + $0x838] sm:$0xf0]  ;;  %v18609_v56 = vpack.c.bf16 %v8447_v5, %v8439_v19 }
 0x981   : > { %v11947_v0 = vld [vmem:[%s19107_s3 + $0xe38] sm:$0xf0]  ;;  %v7913_v38 = vpop.f32.mrf.mxu2  ;;  %v11182_v29 = vor.u32 %v12837_v10, %v11179_v2 }
 0x982   : > { %v11950_v4 = vor.u32 %v13029_v27, %v11947_v0  ;;  %v7914_v41 = vadd.f32 %v7913_v38, %v7865_v33  ;;  %v13104_v38 = vld [vmem:[%s19109_s5 + $0x70] sm:$0xff] }
 0x983   : > { %v7962_v61 = vpop.f32.mrf.mxu3  ;;  %v7817_v12 = vpop.f32.mrf.mxu0  ;;  %8180 = vmatpush.bf16.msrb.mxu0 %v11182_v29  ;;  %9175 = vmatpush.bf16.msra.mxu2 %v13113_v40 }
 0x984   : > { %v7818_v20 = vadd.f32 %v7817_v12, %v18359_v7  ;;  %8327 = vmatpush.bf16.msrb.mxu3 %v11950_v4  ;;  %v7963_v59 = vadd.f32 %v7962_v61, %v7914_v41  ;;  %9127 = vmatpush.bf16.msra.mxu1 %v13104_v38  ;;  %v13170_v4 = vld [vmem:[%s19108_s4] sm:$0xff] }
 0x985   : > { %v7866_v52 = vpop.f32.mrf.mxu1  ;;  %v18661_v41 = vperm.slane %v13170_v4, 7 }
 0x986   : > { %v7867_v28 = vadd.f32 %v7866_v52, %v7818_v20  ;;  %v8455_v23 = vmax.f32 %v7963_v59, 0.0 }
 0x987   : > { %9176 = vmatpush.bf16.msra.mxu2 %v13112_v32 }
 0x989   : > { %v7915_v54 = vpop.f32.mrf.mxu2 }
 0x98a   : > { %v7916_v22 = vadd.f32 %v7915_v54, %v7867_v28  ;;  %v19509_v54 = vld [vmem:[#allocation23_spill] sm:$0xff] }
 0x98b   : > { %v7964_v25 = vpop.f32.mrf.mxu3  ;;  %v7820_v50 = vpop.f32.mrf.mxu0 }
 0x98c   : > { %v7821_v7 = vadd.f32 %v7820_v50, %v18384_v37  ;;  %v7965_v11 = vadd.f32 %v7964_v25, %v7916_v22  ;;  %v13097_v37 = vld [vmem:[%s19109_s5 + $0x38] sm:$0xff]  ;;  %v19510_v22 = vld [vmem:[#allocation38_spill] sm:$0xff]  ;;  %v19511_v25 = vld [vmem:[#allocation39_spill] sm:$0xff] }
 0x98d   : > { %v7869_v45 = vpop.f32.mrf.mxu1  ;;  %9077 = vmatpush.bf16.msra.mxu0 %v13097_v37  ;;  %v13111_v50 = vld [vmem:[%s19109_s5 + $0xa8] sm:$0xff] }
 0x98e   : > { %v7870_v1 = vadd.f32 %v7869_v45, %v7821_v7  ;;  %8015 = vmatmul.bf16.gmra.mxu0 %v19285_v15  ;;  %v8463_v62 = vmax.f32 %v7965_v11, 0.0  ;;  %8113 = vmatmul.bf16.gmra.mxu2 %v19287_v51  ;;  %v13121_v15 = vld [vmem:[%s19109_s5 + $0xf8] sm:$0xff]  ;;  %v13095_v7 = vld [vmem:[%s19109_s5 + $0x28] sm:$0xff] }
 0x98f   : > { %9224 = vmatpush.bf16.msra.mxu3 %v13121_v15  ;;  %9177 = vmatpush.bf16.msra.mxu2 %v13111_v50 }
 0x990   : > { %8064 = vmatmul.bf16.gmra.mxu1 %v19286_v39  ;;  %8162 = vmatmul.bf16.gmra.mxu3 %v19318_v3  ;;  %v18632_v9 = vpack.c.bf16 %v8463_v62, %v8455_v23 }
 0x991   : > { %v7918_v43 = vpop.f32.mrf.mxu2 }
 0x992   : > { %v7919_v39 = vadd.f32 %v7918_v43, %v7870_v1  ;;  %v13103_v43 = vld [vmem:[%s19109_s5 + $0x68] sm:$0xff] }
 0x993   : > { %v7967_v51 = vpop.f32.mrf.mxu3  ;;  %v7822_v3 = vpop.f32.mrf.mxu0  ;;  %9128 = vmatpush.bf16.msra.mxu1 %v13103_v43 }
 0x994   : > { %v7823_v35 = vadd.f32 %v7822_v3, %v18393_v14  ;;  %v7968_v47 = vadd.f32 %v7967_v51, %v7919_v39 }
 0x995   : > { %v7871_v42 = vpop.f32.mrf.mxu1 }
 0x996   : > { %v7872_v48 = vadd.f32 %v7871_v42, %v7823_v35  ;;  %v8471_v14 = vmax.f32 %v7968_v47, 0.0 }
 0x999   : > { %v7920_v17 = vpop.f32.mrf.mxu2 }
 0x99a   : > { %v7921_v63 = vadd.f32 %v7920_v17, %v7872_v48 }
 0x99b   : > { %v7969_v31 = vpop.f32.mrf.mxu3  ;;  %v7825_v6 = vpop.f32.mrf.mxu0 }
 0x99c   : > { %v7826_v21 = vadd.f32 %v7825_v6, %v18418_v8  ;;  %v7970_v19 = vadd.f32 %v7969_v31, %v7921_v63  ;;  %v13096_v8 = vld [vmem:[%s19109_s5 + $0x30] sm:$0xff]  ;;  %v19513_v31 = vld [vmem:[#allocation25_spill] sm:$0xff] }
 0x99d   : > { %v7874_v33 = vpop.f32.mrf.mxu1  ;;  %9078 = vmatpush.bf16.msra.mxu0 %v13096_v8  ;;  %v19512_v63 = vld [vmem:[#allocation24_spill] sm:$0xff] }
 0x99e   : > { %v7875_v5 = vadd.f32 %v7874_v33, %v7826_v21  ;;  %8020 = vmatmul.bf16.gmra.mxu0 %v19290_v44  ;;  %v8479_v18 = vmax.f32 %v7970_v19, 0.0  ;;  %8118 = vmatmul.bf16.gmra.mxu2 %v19320_v34  ;;  %v13120_v44 = vld [vmem:[%s19109_s5 + $0xf0] sm:$0xff]  ;;  %v19515_v21 = vld [vmem:[#allocation41_spill] sm:$0xff]  ;;  %v13110_v33 = vld [vmem:[%s19109_s5 + $0xa0] sm:$0xff] }
 0x99f   : > { %9225 = vmatpush.bf16.msra.mxu3 %v13120_v44  ;;  %v19514_v6 = vld [vmem:[#allocation40_spill] sm:$0xff]  ;;  %v13094_v19 = vld [vmem:[%s19109_s5 + $0x20] sm:$0xff]  ;;  %9178 = vmatpush.bf16.msra.mxu2 %v13110_v33 }
 0x9a0   : > { %8069 = vmatmul.bf16.gmra.mxu1 %v19291_v60  ;;  %8167 = vmatmul.bf16.gmra.mxu3 %v19321_v24  ;;  %v18652_v10 = vpack.c.bf16 %v8479_v18, %v8471_v14 }
 0x9a1   : > { %v7923_v46 = vpop.f32.mrf.mxu2  ;;  %9079 = vmatpush.bf16.msra.mxu0 %v13095_v7 }
 0x9a2   : > { %v7924_v60 = vadd.f32 %v7923_v46, %v7875_v5  ;;  %v13118_v5 = vld [vmem:[%s19109_s5 + $0xe0] sm:$0xff] }
 0x9a3   : > { %v7972_v34 = vpop.f32.mrf.mxu3  ;;  %v7827_v24 = vpop.f32.mrf.mxu0 }
 0x9a4   : > { %v7828_v2 = vadd.f32 %v7827_v24, %v18427_v30  ;;  %v7973_v0 = vadd.f32 %v7972_v34, %v7924_v60  ;;  %v13102_v34 = vld [vmem:[%s19109_s5 + $0x60] sm:$0xff] }
 0x9a5   : > { %v7876_v27 = vpop.f32.mrf.mxu1  ;;  %9080 = vmatpush.bf16.msra.mxu0 %v13094_v19  ;;  %9129 = vmatpush.bf16.msra.mxu1 %v13102_v34 }
 0x9a6   : > { %v7877_v29 = vadd.f32 %v7876_v27, %v7828_v2  ;;  %v8487_v53 = vmax.f32 %v7973_v0, 0.0 }
 0x9a9   : > { %v7925_v61 = vpop.f32.mrf.mxu2 }
 0x9aa   : > { %v7926_v12 = vadd.f32 %v7925_v61, %v7877_v29 }
 0x9ab   : > { %v7974_v20 = vpop.f32.mrf.mxu3  ;;  %v7986_v52 = vpop.f32.mrf.mxu0 }
 0x9ac   : > { %v7987_v30 = vadd.f32 %v7986_v52, %v18661_v41  ;;  %v7975_v28 = vadd.f32 %v7974_v20, %v7926_v12  ;;  %v19516_v20 = vld [vmem:[#allocation26_spill] sm:$0xff]  ;;  %v19517_v52 = vld [vmem:[#allocation27_spill] sm:$0xff] }
 0x9ad   : > { %v8035_v59 = vpop.f32.mrf.mxu1 }
 0x9ae   : > { %v8036_v16 = vadd.f32 %v8035_v59, %v7987_v30  ;;  %8181 = vmatmul.bf16.vlgmr.msrb.gmra.mxu0 %v14402_v49  ;;  %v8495_v36 = vmax.f32 %v7975_v28, 0.0  ;;  %8279 = vmatmul.bf16.vlgmr.msrb.gmra.mxu2 %v19510_v22  ;;  %v13119_v49 = vld [vmem:[%s19109_s5 + $0xe8] sm:$0xff]  ;;  %v19518_v30 = vld [vmem:[#allocation42_spill] sm:$0xff]  ;;  %v13109_v28 = vld [vmem:[%s19109_s5 + $0x98] sm:$0xff] }
 0x9af   : > { %9226 = vmatpush.bf16.msra.mxu3 %v13119_v49  ;;  %v19519_v59 = vld [vmem:[#allocation43_spill] sm:$0xff]  ;;  %9179 = vmatpush.bf16.msra.mxu2 %v13109_v28 }
 0x9b0   : > { %8230 = vmatmul.bf16.vlgmr.msrb.gmra.mxu1 %v19509_v54  ;;  %8328 = vmatmul.bf16.vlgmr.msrb.gmra.mxu3 %v19511_v25  ;;  %v18677_v45 = vpack.c.bf16 %v8495_v36, %v8487_v53  ;;  %v13117_v53 = vld [vmem:[%s19109_s5 + $0xd8] sm:$0xff] }
 0x9b1   : > { %v8084_v11 = vpop.f32.mrf.mxu2 }
 0x9b2   : > { %v8085_v1 = vadd.f32 %v8084_v11, %v8036_v16  ;;  %v13093_v16 = vld [vmem:[%s19109_s5 + $0x18] sm:$0xff] }
 0x9b3   : > { %v8133_v23 = vpop.f32.mrf.mxu3  ;;  %v7988_v62 = vpop.f32.mrf.mxu0  ;;  %9227 = vmatpush.bf16.msra.mxu3 %v13118_v5  ;;  %9081 = vmatpush.bf16.msra.mxu0 %v13093_v16  ;;  %v13101_v11 = vld [vmem:[%s19109_s5 + $0x58] sm:$0xff] }
 0x9b4   : > { %v7989_v40 = vadd.f32 %v7988_v62, %v18661_v41  ;;  %v18680_v15 = vadd.f32 %v8133_v23, %v8085_v1  ;;  %9130 = vmatpush.bf16.msra.mxu1 %v13101_v11 }
 0x9b5   : > { %v8037_v37 = vpop.f32.mrf.mxu1 }
 0x9b6   : > { %v8038_v39 = vadd.f32 %v8037_v37, %v7989_v40 }
 0x9b7   : > { %9228 = vmatpush.bf16.msra.mxu3 %v13117_v53 }
 0x9b9   : > { %v8086_v51 = vpop.f32.mrf.mxu2 }
 0x9ba   : > { %v8087_v3 = vadd.f32 %v8086_v51, %v8038_v39 }
 0x9bb   : > { %v8135_v35 = vpop.f32.mrf.mxu3  ;;  %v7991_v42 = vpop.f32.mrf.mxu0 }
 0x9bc   : > { %v7992_v47 = vadd.f32 %v7991_v42, %v18661_v41  ;;  %v18686_v48 = vadd.f32 %v8135_v35, %v8087_v3  ;;  %v19520_v35 = vld [vmem:[#allocation28_spill] sm:$0xff]  ;;  %v19521_v42 = vld [vmem:[#allocation29_spill] sm:$0xff] }
 0x9bd   : > { %v8040_v13 = vpop.f32.mrf.mxu1 }
 0x9be   : > { %v8041_v17 = vadd.f32 %v8040_v13, %v7992_v47  ;;  %8186 = vmatmul.bf16.gmra.mxu0 %v19512_v63  ;;  %8284 = vmatmul.bf16.gmra.mxu2 %v19514_v6  ;;  %v19522_v47 = vld [vmem:[#allocation44_spill] sm:$0xff]  ;;  %v19523_v13 = vld [vmem:[#allocation45_spill] sm:$0xff] }
 0x9bf   : > { %v13092_v63 = vld [vmem:[%s19109_s5 + $0x10] sm:$0xff] }
 0x9c0   : > { %8235 = vmatmul.bf16.gmra.mxu1 %v19513_v31  ;;  %8333 = vmatmul.bf16.gmra.mxu3 %v19515_v21  ;;  %v13116_v31 = vld [vmem:[%s19109_s5 + $0xd0] sm:$0xff] }
 0x9c1   : > { %v8089_v14 = vpop.f32.mrf.mxu2  ;;  %9082 = vmatpush.bf16.msra.mxu0 %v13092_v63  ;;  %9229 = vmatpush.bf16.msra.mxu3 %v13116_v31  ;;  %v13114_v63 = vld [vmem:[%s19109_s5 + $0xc0] sm:$0xff] }
 0x9c2   : > { %v8090_v18 = vadd.f32 %v8089_v14, %v8041_v17  ;;  %v13108_v17 = vld [vmem:[%s19109_s5 + $0x90] sm:$0xff] }
 0x9c3   : > { %v8138_v32 = vpop.f32.mrf.mxu3  ;;  %v7993_v8 = vpop.f32.mrf.mxu0  ;;  %9180 = vmatpush.bf16.msra.mxu2 %v13108_v17  ;;  %v13090_v17 = vld [vmem:[%s19109_s5] sm:$0xff] }
 0x9c4   : > { %v7994_v44 = vadd.f32 %v7993_v8, %v18661_v41  ;;  %v18702_v60 = vadd.f32 %v8138_v32, %v8090_v18  ;;  %v13100_v32 = vld [vmem:[%s19109_s5 + $0x50] sm:$0xff] }
 0x9c5   : > { %v8042_v46 = vpop.f32.mrf.mxu1  ;;  %9131 = vmatpush.bf16.msra.mxu1 %v13100_v32  ;;  %v13098_v32 = vld [vmem:[%s19109_s5 + $0x40] sm:$0xff] }
 0x9c6   : > { %v8043_v24 = vadd.f32 %v8042_v46, %v7994_v44 }
 0x9c9   : > { %v8091_v2 = vpop.f32.mrf.mxu2 }
 0x9ca   : > { %v8092_v27 = vadd.f32 %v8091_v2, %v8043_v24 }
 0x9cb   : > { %v8140_v0 = vpop.f32.mrf.mxu3  ;;  %v7996_v38 = vpop.f32.mrf.mxu0 }
 0x9cc   : > { %v7997_v29 = vadd.f32 %v7996_v38, %v18661_v41  ;;  %v18708_v61 = vadd.f32 %v8140_v0, %v8092_v27 }
 0x9cd   : > { %v8045_v4 = vpop.f32.mrf.mxu1 }
 0x9ce   : > { %v8046_v12 = vadd.f32 %v8045_v4, %v7997_v29  ;;  %8191 = vmatmul.bf16.gmra.mxu0 %v19516_v20  ;;  %8289 = vmatmul.bf16.gmra.mxu2 %v19518_v30  ;;  %v19524_v29 = vld [vmem:[#allocation30_spill] sm:$0xff]  ;;  %v19525_v4 = vld [vmem:[#allocation31_spill] sm:$0xff] }
 0x9cf   : > { %v19527_v20 = vld [vmem:[#allocation47_spill] sm:$0xff] }
 0x9d0   : > { %8240 = vmatmul.bf16.gmra.mxu1 %v19517_v52  ;;  %8338 = vmatmul.bf16.gmra.mxu3 %v19519_v59  ;;  %v13107_v52 = vld [vmem:[%s19109_s5 + $0x88] sm:$0xff] }
 0x9d1   : > { %v8094_v36 = vpop.f32.mrf.mxu2  ;;  %v13091_v30 = vld [vmem:[%s19109_s5 + $0x8] sm:$0xff]  ;;  %9181 = vmatpush.bf16.msra.mxu2 %v13107_v52 }
 0x9d2   : > { %v8095_v54 = vadd.f32 %v8094_v36, %v8046_v12  ;;  %v19526_v12 = vld [vmem:[#allocation46_spill] sm:$0xff]  ;;  %v13115_v59 = vld [vmem:[%s19109_s5 + $0xc8] sm:$0xff]  ;;  %9083 = vmatpush.bf16.msra.mxu0 %v13091_v30  ;;  %v13145_v30 = vld [vmem:[%s19109_s5 + $0x1b8] sm:$0xff] }
 0x9d3   : > { %v8143_v22 = vpop.f32.mrf.mxu3  ;;  %v7998_v25 = vpop.f32.mrf.mxu0  ;;  %9230 = vmatpush.bf16.msra.mxu3 %v13115_v59  ;;  %v19535_v52 = vld [vmem:[#allocation51_spill] sm:$0xff]  ;;  %v13129_v59 = vld [vmem:[%s19109_s5 + $0x138] sm:$0xff] }
 0x9d4   : > { %v7999_v50 = vadd.f32 %v7998_v25, %v18661_v41  ;;  %v18724_v49 = vadd.f32 %v8143_v22, %v8095_v54 }
 0x9d5   : > { %v8047_v7 = vpop.f32.mrf.mxu1 }
 0x9d6   : > { %v8048_v1 = vadd.f32 %v8047_v7, %v7999_v50  ;;  %v13099_v50 = vld [vmem:[%s19109_s5 + $0x48] sm:$0xff]  ;;  %9084 = vmatpush.bf16.msra.mxu0 %v13090_v17  ;;  %v19538_v17 = vld [vmem:[#allocation52_spill] sm:$0xff] }
 0x9d7   : > { %9132 = vmatpush.bf16.msra.mxu1 %v13099_v50  ;;  %9231 = vmatpush.bf16.msra.mxu3 %v13114_v63  ;;  %v19539_v63 = vld [vmem:[#allocation53_spill] sm:$0xff] }
 0x9d9   : > { %v8096_v23 = vpop.f32.mrf.mxu2 }
 0x9da   : > { %v8097_v62 = vadd.f32 %v8096_v23, %v8048_v1  ;;  %9273 = vmatpush.bf16.msrb.mxu0 %v13129_v59  ;;  %v19541_v59 = vld [vmem:[#allocation4_spill] sm:$0xff] }
 0x9db   : > { %v8145_v40 = vpop.f32.mrf.mxu3  ;;  %v8001_v37 = vpop.f32.mrf.mxu0  ;;  %9133 = vmatpush.bf16.msra.mxu1 %v13098_v32 }
 0x9dc   : > { %v8002_v43 = vadd.f32 %v8001_v37, %v18661_v41  ;;  %v18730_v51 = vadd.f32 %v8145_v40, %v8097_v62 }
 0x9dd   : > { %v8050_v39 = vpop.f32.mrf.mxu1 }
 0x9de   : > { %v8051_v3 = vadd.f32 %v8050_v39, %v8002_v43  ;;  %8196 = vmatmul.bf16.gmra.mxu0 %v19520_v35  ;;  %8294 = vmatmul.bf16.gmra.mxu2 %v19522_v47  ;;  %v19529_v35 = vld [vmem:[#allocation33_spill] sm:$0xff] }
 0x9df   : > { %v19531_v47 = vld [vmem:[#allocation49_spill] sm:$0xff] }
 0x9e0   : > { %8245 = vmatmul.bf16.gmra.mxu1 %v19521_v42  ;;  %8343 = vmatmul.bf16.gmra.mxu3 %v19523_v13  ;;  %v19530_v42 = vld [vmem:[#allocation48_spill] sm:$0xff]  ;;  %v13106_v13 = vld [vmem:[%s19109_s5 + $0x80] sm:$0xff] }
 0x9e1   : > { %v8099_v6 = vpop.f32.mrf.mxu2  ;;  %9182 = vmatpush.bf16.msra.mxu2 %v13106_v13  ;;  %v19537_v13 = vld [vmem:[#allocation37_spill] sm:$0xff] }
 0x9e2   : > { %v8100_v21 = vadd.f32 %v8099_v6, %v8051_v3  ;;  %v19528_v3 = vld [vmem:[#allocation32_spill] sm:$0xff] }
 0x9e3   : > { %v8148_v33 = vpop.f32.mrf.mxu3  ;;  %v8003_v19 = vpop.f32.mrf.mxu0 }
 0x9e4   : > { %v8004_v5 = vadd.f32 %v8003_v19, %v18661_v41  ;;  %v18746_v18 = vadd.f32 %v8148_v33, %v8100_v21 }
 0x9e5   : > { %v8052_v14 = vpop.f32.mrf.mxu1  ;;  %9371 = vmatpush.bf16.msrb.mxu2 %v13145_v30  ;;  %v19540_v30 = vld [vmem:[#allocation9_spill] sm:$0xff] }
 0x9e6   : > { %v8053_v8 = vadd.f32 %v8052_v14, %v8004_v5 }
 0x9e9   : > { %v8101_v44 = vpop.f32.mrf.mxu2 }
 0x9ea   : > { %v8102_v46 = vadd.f32 %v8101_v44, %v8053_v8 }
 0x9eb   : > { %v8150_v34 = vpop.f32.mrf.mxu3  ;;  %v8006_v24 = vpop.f32.mrf.mxu0 }
 0x9ec   : > { %v8007_v2 = vadd.f32 %v8006_v24, %v18661_v41  ;;  %v18752_v0 = vadd.f32 %v8150_v34, %v8102_v46 }
 0x9ed   : > { %v8055_v27 = vpop.f32.mrf.mxu1 }
 0x9ee   : > { %v8056_v38 = vadd.f32 %v8055_v27, %v8007_v2  ;;  %8201 = vmatmul.bf16.gmra.mxu0 %v19524_v29  ;;  %8299 = vmatmul.bf16.gmra.mxu2 %v19526_v12  ;;  %v19533_v12 = vld [vmem:[#allocation35_spill] sm:$0xff] }
 0x9f0   : > { %8250 = vmatmul.bf16.gmra.mxu1 %v19525_v4  ;;  %8348 = vmatmul.bf16.gmra.mxu3 %v19527_v20  ;;  %v19532_v4 = vld [vmem:[#allocation34_spill] sm:$0xff] }
 0x9f1   : > { %v8104_v28 = vpop.f32.mrf.mxu2  ;;  %v19534_v20 = vld [vmem:[#allocation50_spill] sm:$0xff] }
 0x9f2   : > { %v8105_v16 = vadd.f32 %v8104_v28, %v8056_v38  ;;  %v13153_v28 = vld [vmem:[%s19109_s5 + $0x1f8] sm:$0xff] }
 0x9f3   : > { %v8153_v53 = vpop.f32.mrf.mxu3  ;;  %v8008_v36 = vpop.f32.mrf.mxu0  ;;  %9420 = vmatpush.bf16.msrb.mxu3 %v13153_v28  ;;  %v19542_v28 = vld [vmem:[#allocation21_spill] sm:$0xff] }
 0x9f4   : > { %v8009_v54 = vadd.f32 %v8008_v36, %v18661_v41  ;;  %v18768_v25 = vadd.f32 %v8153_v53, %v8105_v16 }
 0x9f5   : > { %v8057_v22 = vpop.f32.mrf.mxu1 }
 0x9f6   : > { %v8058_v7 = vadd.f32 %v8057_v22, %v8009_v54 }
 0x9f9   : > { %v8106_v11 = vpop.f32.mrf.mxu2 }
 0x9fa   : > { %v8107_v1 = vadd.f32 %v8106_v11, %v8058_v7 }
 0x9fb   : > { %v8155_v23 = vpop.f32.mrf.mxu3  ;;  %v8011_v62 = vpop.f32.mrf.mxu0 }
 0x9fc   : > { %v8012_v40 = vadd.f32 %v8011_v62, %v18661_v41  ;;  %v18774_v43 = vadd.f32 %v8155_v23, %v8107_v1  ;;  %v13137_v1 = vld [vmem:[%s19109_s5 + $0x178] sm:$0xff] }
 0x9fd   : > { %v8060_v37 = vpop.f32.mrf.mxu1  ;;  %9322 = vmatpush.bf16.msrb.mxu1 %v13137_v1 }
 0x9fe   : > { %v8061_v39 = vadd.f32 %v8060_v37, %v8012_v40  ;;  %8206 = vmatmul.bf16.gmra.mxu0 %v19528_v3  ;;  %8304 = vmatmul.bf16.gmra.mxu2 %v19530_v42 }
 0xa00   : > { %8255 = vmatmul.bf16.gmra.mxu1 %v19529_v35  ;;  %8353 = vmatmul.bf16.gmra.mxu3 %v19531_v47  ;;  %v19536_v47 = vld [vmem:[#allocation36_spill] sm:$0xff] }
 0xa01   : > { %v8109_v31 = vpop.f32.mrf.mxu2 }
 0xa02   : > { %v8110_v6 = vadd.f32 %v8109_v31, %v8061_v39  ;;  %v13144_v31 = vld [vmem:[%s19109_s5 + $0x1b0] sm:$0xff] }
 0xa03   : > { %v8158_v21 = vpop.f32.mrf.mxu3  ;;  %v8013_v33 = vpop.f32.mrf.mxu0  ;;  %9372 = vmatpush.bf16.msrb.mxu2 %v13144_v31 }
 0xa04   : > { %v8014_v19 = vadd.f32 %v8013_v33, %v18661_v41  ;;  %v18790_v14 = vadd.f32 %v8158_v21, %v8110_v6  ;;  %v13128_v6 = vld [vmem:[%s19109_s5 + $0x130] sm:$0xff] }
 0xa05   : > { %v8062_v5 = vpop.f32.mrf.mxu1  ;;  %v13152_v21 = vld [vmem:[%s19109_s5 + $0x1f0] sm:$0xff]  ;;  %9274 = vmatpush.bf16.msrb.mxu0 %v13128_v6  ;;  %v19544_v6 = vld [vmem:[#allocation10_spill] sm:$0xff] }
 0xa06   : > { %v8063_v8 = vadd.f32 %v8062_v5, %v8014_v19  ;;  %9421 = vmatpush.bf16.msrb.mxu3 %v13152_v21 }
 0xa09   : > { %v8111_v44 = vpop.f32.mrf.mxu2 }
 0xa0a   : > { %v8112_v46 = vadd.f32 %v8111_v44, %v8063_v8 }
 0xa0b   : > { %v8160_v34 = vpop.f32.mrf.mxu3  ;;  %v8016_v24 = vpop.f32.mrf.mxu0 }
 0xa0c   : > { %v8017_v2 = vadd.f32 %v8016_v24, %v18661_v41  ;;  %v18796_v38 = vadd.f32 %v8160_v34, %v8112_v46  ;;  %v13136_v24 = vld [vmem:[%s19109_s5 + $0x170] sm:$0xff] }
 0xa0d   : > { %v8065_v27 = vpop.f32.mrf.mxu1  ;;  %9323 = vmatpush.bf16.msrb.mxu1 %v13136_v24 }
 0xa0e   : > { %v8066_v29 = vadd.f32 %v8065_v27, %v8017_v2  ;;  %8211 = vmatmul.bf16.gmra.mxu0 %v19532_v4  ;;  %8309 = vmatmul.bf16.gmra.mxu2 %v19534_v20 }
 0xa10   : > { %8260 = vmatmul.bf16.gmra.mxu1 %v19533_v12  ;;  %8358 = vmatmul.bf16.gmra.mxu3 %v19535_v52 }
 0xa11   : > { %v8114_v16 = vpop.f32.mrf.mxu2 }
 0xa12   : > { %v8115_v53 = vadd.f32 %v8114_v16, %v8066_v29  ;;  %v19543_v16 = vld [vmem:[#allocation59_spill] sm:$0xff] }
 0xa13   : > { %v8163_v36 = vpop.f32.mrf.mxu3  ;;  %v8018_v54 = vpop.f32.mrf.mxu0 }
 0xa14   : > { %v8019_v22 = vadd.f32 %v8018_v54, %v18661_v41  ;;  %v18812_v7 = vadd.f32 %v8163_v36, %v8115_v53  ;;  %v13143_v53 = vld [vmem:[%s19109_s5 + $0x1a8] sm:$0xff] }
 0xa15   : > { %v8067_v50 = vpop.f32.mrf.mxu1  ;;  %v13151_v36 = vld [vmem:[%s19109_s5 + $0x1e8] sm:$0xff]  ;;  %9373 = vmatpush.bf16.msrb.mxu2 %v13143_v53 }
 0xa16   : > { %v8068_v11 = vadd.f32 %v8067_v50, %v8019_v22  ;;  %9422 = vmatpush.bf16.msrb.mxu3 %v13151_v36 }
 0xa19   : > { %v8116_v23 = vpop.f32.mrf.mxu2 }
 0xa1a   : > { %v8117_v62 = vadd.f32 %v8116_v23, %v8068_v11 }
 0xa1b   : > { %v8165_v40 = vpop.f32.mrf.mxu3  ;;  %v8021_v37 = vpop.f32.mrf.mxu0 }
 0xa1c   : > { %v8022_v39 = vadd.f32 %v8021_v37, %v18661_v41  ;;  %v18818_v35 = vadd.f32 %v8165_v40, %v8117_v62  ;;  %v13135_v37 = vld [vmem:[%s19109_s5 + $0x168] sm:$0xff] }
 0xa1d   : > { %v8070_v3 = vpop.f32.mrf.mxu1  ;;  %9324 = vmatpush.bf16.msrb.mxu1 %v13135_v37 }
 0xa1e   : > { %v8071_v42 = vadd.f32 %v8070_v3, %v8022_v39  ;;  %8216 = vmatmul.bf16.gmra.mxu0 %v19536_v47  ;;  %8314 = vmatmul.bf16.gmra.mxu2 %v19538_v17 }
 0xa20   : > { %8265 = vmatmul.bf16.gmra.mxu1 %v19537_v13  ;;  %8363 = vmatmul.bf16.gmra.mxu3 %v19539_v63 }
 0xa21   : > { %v8119_v33 = vpop.f32.mrf.mxu2 }
 0xa22   : > { %v8120_v19 = vadd.f32 %v8119_v33, %v8071_v42  ;;  %v19545_v33 = vld [vmem:[#allocation5_spill] sm:$0xff] }
 0xa23   : > { %v8168_v5 = vpop.f32.mrf.mxu3  ;;  %v8023_v32 = vpop.f32.mrf.mxu0 }
 0xa24   : > { %v8024_v8 = vadd.f32 %v8023_v32, %v18661_v41  ;;  %v18834_v46 = vadd.f32 %v8168_v5, %v8120_v19  ;;  %v19546_v19 = vld [vmem:[#allocation22_spill] sm:$0xff]  ;;  %v19547_v5 = vld [vmem:[#allocation12_spill] sm:$0xff] }
 0xa25   : > { %v8072_v44 = vpop.f32.mrf.mxu1  ;;  %v13142_v32 = vld [vmem:[%s19109_s5 + $0x1a0] sm:$0xff] }
 0xa26   : > { %v8073_v34 = vadd.f32 %v8072_v44, %v8024_v8  ;;  %v13150_v8 = vld [vmem:[%s19109_s5 + $0x1e0] sm:$0xff]  ;;  %9374 = vmatpush.bf16.msrb.mxu2 %v13142_v32 }
 0xa27   : > { %9423 = vmatpush.bf16.msrb.mxu3 %v13150_v8 }
 0xa29   : > { %v8121_v2 = vpop.f32.mrf.mxu2 }
 0xa2a   : > { %v8122_v27 = vadd.f32 %v8121_v2, %v8073_v34 }
 0xa2b   : > { %v8170_v29 = vpop.f32.mrf.mxu3  ;;  %v8182_v4 = vpop.f32.mrf.mxu0 }
 0xa2c   : > { %v8183_v12 = vadd.f32 %v8182_v4, %v18680_v15  ;;  %v18840_v52 = vadd.f32 %v8170_v29, %v8122_v27  ;;  %v13127_v15 = vld [vmem:[%s19109_s5 + $0x128] sm:$0xff] }
 0xa2d   : > { %v8231_v20 = vpop.f32.mrf.mxu1  ;;  %9275 = vmatpush.bf16.msrb.mxu0 %v13127_v15 }
 0xa2e   : > { %v8232_v41 = vadd.f32 %v8231_v20, %v8183_v12  ;;  %9085 = vmatmul.bf16.vlgmr.msra.gmra.mxu0 %v19540_v30  ;;  %9183 = vmatmul.bf16.vlgmr.msra.gmra.mxu2 %v19542_v28 }
 0xa30   : > { %9134 = vmatmul.bf16.vlgmr.msra.gmra.mxu1 %v19541_v59  ;;  %9232 = vmatmul.bf16.vlgmr.msra.gmra.mxu3 %v19543_v16 }
 0xa31   : > { %v8280_v54 = vpop.f32.mrf.mxu2 }
 0xa32   : > { %v8281_v22 = vadd.f32 %v8280_v54, %v8232_v41  ;;  %v13134_v41 = vld [vmem:[%s19109_s5 + $0x160] sm:$0xff] }
 0xa33   : > { %v8329_v50 = vpop.f32.mrf.mxu3  ;;  %v8184_v11 = vpop.f32.mrf.mxu0  ;;  %9325 = vmatpush.bf16.msrb.mxu1 %v13134_v41 }
 0xa34   : > { %v8185_v1 = vadd.f32 %v8184_v11, %v18686_v48  ;;  %v8330_v62 = vadd.f32 %v8329_v50, %v8281_v22  ;;  %v19548_v22 = vld [vmem:[#allocation13_spill] sm:$0xff]  ;;  %v19549_v11 = vld [vmem:[#allocation19_spill] sm:$0xff] }
 0xa35   : > { %v8233_v23 = vpop.f32.mrf.mxu1 }
 0xa36   : > { %v8234_v40 = vadd.f32 %v8233_v23, %v8185_v1  ;;  %v8376_v48 = vmax.f32 %v8330_v62, 0.0  ;;  %v19550_v1 = vld [vmem:[#allocation11_spill] sm:$0xff]  ;;  %v19551_v23 = vld [vmem:[#allocation60_spill] sm:$0xff]  ;;  %v13141_v62 = vld [vmem:[%s19109_s5 + $0x198] sm:$0xff] }
 0xa37   : > { %9375 = vmatpush.bf16.msrb.mxu2 %v13141_v62 }
 0xa39   : > { %v8282_v39 = vpop.f32.mrf.mxu2 }
 0xa3a   : > { %v8283_v3 = vadd.f32 %v8282_v39, %v8234_v40  ;;  %v13149_v40 = vld [vmem:[%s19109_s5 + $0x1d8] sm:$0xff] }
 0xa3b   : > { %v8331_v42 = vpop.f32.mrf.mxu3  ;;  %v8187_v47 = vpop.f32.mrf.mxu0  ;;  %9424 = vmatpush.bf16.msrb.mxu3 %v13149_v40  ;;  %v19556_v40 = vld [vmem:[#allocation15_spill] sm:$0xff] }
 0xa3c   : > { %v8188_v13 = vadd.f32 %v8187_v47, %v18702_v60  ;;  %v8332_v63 = vadd.f32 %v8331_v42, %v8283_v3  ;;  %v13126_v60 = vld [vmem:[%s19109_s5 + $0x120] sm:$0xff] }
 0xa3d   : > { %v8236_v17 = vpop.f32.mrf.mxu1  ;;  %9276 = vmatpush.bf16.msrb.mxu0 %v13126_v60 }
 0xa3e   : > { %v8237_v31 = vadd.f32 %v8236_v17, %v8188_v13  ;;  %9090 = vmatmul.bf16.gmra.mxu0 %v19544_v6  ;;  %v8384_v21 = vmax.f32 %v8332_v63, 0.0  ;;  %9188 = vmatmul.bf16.gmra.mxu2 %v19546_v19  ;;  %v13133_v6 = vld [vmem:[%s19109_s5 + $0x158] sm:$0xff] }
 0xa3f   : > { %9326 = vmatpush.bf16.msrb.mxu1 %v13133_v6 }
 0xa40   : > { %9139 = vmatmul.bf16.gmra.mxu1 %v19545_v33  ;;  %9237 = vmatmul.bf16.gmra.mxu3 %v19547_v5  ;;  %v18873_v44 = vpack.c.bf16 %v8384_v21, %v8376_v48 }
 0xa41   : > { %v8285_v34 = vpop.f32.mrf.mxu2 }
 0xa42   : > { %v8286_v24 = vadd.f32 %v8285_v34, %v8237_v31  ;;  %v19552_v34 = vld [vmem:[#allocation14_spill] sm:$0xff] }
 0xa43   : > { %v8334_v2 = vpop.f32.mrf.mxu3  ;;  %v8189_v27 = vpop.f32.mrf.mxu0 }
 0xa44   : > { %v8190_v29 = vadd.f32 %v8189_v27, %v18708_v61  ;;  %v8335_v12 = vadd.f32 %v8334_v2, %v8286_v24  ;;  %v19553_v2 = vld [vmem:[#allocation6_spill] sm:$0xff] }
 0xa45   : > { %v8238_v4 = vpop.f32.mrf.mxu1  ;;  %v19554_v27 = vld [vmem:[#allocation54_spill] sm:$0xff] }
 0xa46   : > { %v8239_v20 = vadd.f32 %v8238_v4, %v8190_v29  ;;  %v8392_v61 = vmax.f32 %v8335_v12, 0.0  ;;  %v19555_v29 = vld [vmem:[#allocation61_spill] sm:$0xff]  ;;  %v13140_v4 = vld [vmem:[%s19109_s5 + $0x190] sm:$0xff] }
 0xa47   : > { %v13148_v12 = vld [vmem:[%s19109_s5 + $0x1d0] sm:$0xff]  ;;  %9376 = vmatpush.bf16.msrb.mxu2 %v13140_v4 }
 0xa48   : > { %9425 = vmatpush.bf16.msrb.mxu3 %v13148_v12 }
 0xa49   : > { %v8287_v30 = vpop.f32.mrf.mxu2 }
 0xa4a   : > { %v8288_v59 = vadd.f32 %v8287_v30, %v8239_v20 }
 0xa4b   : > { %v8336_v28 = vpop.f32.mrf.mxu3  ;;  %v8192_v16 = vpop.f32.mrf.mxu0 }
 0xa4c   : > { %v8193_v53 = vadd.f32 %v8192_v16, %v18724_v49  ;;  %v8337_v36 = vadd.f32 %v8336_v28, %v8288_v59  ;;  %v13125_v49 = vld [vmem:[%s19109_s5 + $0x118] sm:$0xff] }
 0xa4d   : > { %v8241_v15 = vpop.f32.mrf.mxu1  ;;  %9277 = vmatpush.bf16.msrb.mxu0 %v13125_v49 }
 0xa4e   : > { %v8242_v54 = vadd.f32 %v8241_v15, %v8193_v53  ;;  %9095 = vmatmul.bf16.gmra.mxu0 %v19548_v22  ;;  %v8400_v50 = vmax.f32 %v8337_v36, 0.0  ;;  %9193 = vmatmul.bf16.gmra.mxu2 %v19550_v1 }
 0xa50   : > { %9144 = vmatmul.bf16.gmra.mxu1 %v19549_v11  ;;  %9242 = vmatmul.bf16.gmra.mxu3 %v19551_v23  ;;  %v18893_v37 = vpack.c.bf16 %v8400_v50, %v8392_v61 }
 0xa51   : > { %v8290_v39 = vpop.f32.mrf.mxu2 }
 0xa52   : > { %v8291_v3 = vadd.f32 %v8290_v39, %v8242_v54  ;;  %v13132_v54 = vld [vmem:[%s19109_s5 + $0x150] sm:$0xff] }
 0xa53   : > { %v8339_v42 = vpop.f32.mrf.mxu3  ;;  %v8194_v47 = vpop.f32.mrf.mxu0  ;;  %9327 = vmatpush.bf16.msrb.mxu1 %v13132_v54 }
 0xa54   : > { %v8195_v13 = vadd.f32 %v8194_v47, %v18730_v51  ;;  %v8340_v63 = vadd.f32 %v8339_v42, %v8291_v3  ;;  %v19557_v3 = vld [vmem:[#allocation7_spill] sm:$0xff]  ;;  %v19559_v47 = vld [vmem:[#allocation62_spill] sm:$0xff] }
 0xa55   : > { %v8243_v17 = vpop.f32.mrf.mxu1  ;;  %v19558_v42 = vld [vmem:[#allocation55_spill] sm:$0xff] }
 0xa56   : > { %v8244_v31 = vadd.f32 %v8243_v17, %v8195_v13  ;;  %v8408_v51 = vmax.f32 %v8340_v63, 0.0  ;;  %v13139_v13 = vld [vmem:[%s19109_s5 + $0x188] sm:$0xff] }
 0xa57   : > { %v13147_v17 = vld [vmem:[%s19109_s5 + $0x1c8] sm:$0xff]  ;;  %9377 = vmatpush.bf16.msrb.mxu2 %v13139_v13 }
 0xa58   : > { %9426 = vmatpush.bf16.msrb.mxu3 %v13147_v17  ;;  %v19564_v13 = vld [vmem:[#allocation3_spill] sm:$0xff]  ;;  %v19565_v17 = vld [vmem:[#allocation18_spill] sm:$0xff] }
 0xa59   : > { %v8292_v48 = vpop.f32.mrf.mxu2 }
 0xa5a   : > { %v8293_v21 = vadd.f32 %v8292_v48, %v8244_v31 }
 0xa5b   : > { %v8341_v33 = vpop.f32.mrf.mxu3  ;;  %v8197_v19 = vpop.f32.mrf.mxu0 }
 0xa5c   : > { %v8198_v5 = vadd.f32 %v8197_v19, %v18746_v18  ;;  %v8342_v60 = vadd.f32 %v8341_v33, %v8293_v21  ;;  %v13124_v18 = vld [vmem:[%s19109_s5 + $0x110] sm:$0xff] }
 0xa5d   : > { %v8246_v32 = vpop.f32.mrf.mxu1  ;;  %9278 = vmatpush.bf16.msrb.mxu0 %v13124_v18  ;;  %v19560_v18 = vld [vmem:[#allocation16_spill] sm:$0xff] }
 0xa5e   : > { %v8247_v8 = vadd.f32 %v8246_v32, %v8198_v5  ;;  %9100 = vmatmul.bf16.gmra.mxu0 %v19552_v34  ;;  %v8416_v24 = vmax.f32 %v8342_v60, 0.0  ;;  %9198 = vmatmul.bf16.gmra.mxu2 %v19554_v27  ;;  %v13131_v60 = vld [vmem:[%s19109_s5 + $0x148] sm:$0xff] }
 0xa5f   : > { %9328 = vmatpush.bf16.msrb.mxu1 %v13131_v60 }
 0xa60   : > { %9149 = vmatmul.bf16.gmra.mxu1 %v19553_v2  ;;  %9247 = vmatmul.bf16.gmra.mxu3 %v19555_v29  ;;  %v18913_v20 = vpack.c.bf16 %v8416_v24, %v8408_v51 }
 0xa61   : > { %v8295_v41 = vpop.f32.mrf.mxu2 }
 0xa62   : > { %v8296_v30 = vadd.f32 %v8295_v41, %v8247_v8  ;;  %v19561_v41 = vld [vmem:[#allocation2_spill] sm:$0xff] }
 0xa63   : > { %v8344_v59 = vpop.f32.mrf.mxu3  ;;  %v8199_v28 = vpop.f32.mrf.mxu0 }
 0xa64   : > { %v8200_v16 = vadd.f32 %v8199_v28, %v18752_v0  ;;  %v8345_v15 = vadd.f32 %v8344_v59, %v8296_v30  ;;  %v19562_v30 = vld [vmem:[#allocation56_spill] sm:$0xff]  ;;  %v19563_v59 = vld [vmem:[#allocation63_spill] sm:$0xff]  ;;  %v13138_v28 = vld [vmem:[%s19109_s5 + $0x180] sm:$0xff] }
 0xa65   : > { %v8248_v53 = vpop.f32.mrf.mxu1  ;;  %9378 = vmatpush.bf16.msrb.mxu2 %v13138_v28 }
 0xa66   : > { %v8249_v36 = vadd.f32 %v8248_v53, %v8200_v16  ;;  %v8424_v0 = vmax.f32 %v8345_v15, 0.0  ;;  %v13146_v16 = vld [vmem:[%s19109_s5 + $0x1c0] sm:$0xff] }
 0xa67   : > { %9427 = vmatpush.bf16.msrb.mxu3 %v13146_v16 }
 0xa69   : > { %v8297_v22 = vpop.f32.mrf.mxu2 }
 0xa6a   : > { %v8298_v61 = vadd.f32 %v8297_v22, %v8249_v36 }
 0xa6b   : > { %v8346_v50 = vpop.f32.mrf.mxu3  ;;  %v8202_v11 = vpop.f32.mrf.mxu0 }
 0xa6c   : > { %v8203_v1 = vadd.f32 %v8202_v11, %v18768_v25  ;;  %v8347_v62 = vadd.f32 %v8346_v50, %v8298_v61  ;;  %v13123_v25 = vld [vmem:[%s19109_s5 + $0x108] sm:$0xff] }
 0xa6d   : > { %v8251_v23 = vpop.f32.mrf.mxu1  ;;  %9279 = vmatpush.bf16.msrb.mxu0 %v13123_v25 }
 0xa6e   : > { %v8252_v49 = vadd.f32 %v8251_v23, %v8203_v1  ;;  %9105 = vmatmul.bf16.gmra.mxu0 %v19556_v40  ;;  %v8432_v39 = vmax.f32 %v8347_v62, 0.0  ;;  %9203 = vmatmul.bf16.gmra.mxu2 %v19558_v42  ;;  %v13130_v23 = vld [vmem:[%s19109_s5 + $0x140] sm:$0xff] }
 0xa6f   : > { %9329 = vmatpush.bf16.msrb.mxu1 %v13130_v23 }
 0xa70   : > { %9154 = vmatmul.bf16.gmra.mxu1 %v19557_v3  ;;  %9252 = vmatmul.bf16.gmra.mxu3 %v19559_v47  ;;  %v18933_v63 = vpack.c.bf16 %v8432_v39, %v8424_v0 }
 0xa71   : > { %v8300_v31 = vpop.f32.mrf.mxu2 }
 0xa72   : > { %v8301_v6 = vadd.f32 %v8300_v31, %v8252_v49  ;;  %v19566_v31 = vld [vmem:[#allocation57_spill] sm:$0xff] }
 0xa73   : > { %v8349_v48 = vpop.f32.mrf.mxu3  ;;  %v8204_v21 = vpop.f32.mrf.mxu0 }
 0xa74   : > { %v8205_v33 = vadd.f32 %v8204_v21, %v18774_v43  ;;  %v8350_v5 = vadd.f32 %v8349_v48, %v8301_v6  ;;  %v19567_v6 = vld [vmem:[#allocation64_spill] sm:$0xff] }
 0xa75   : > { %v8253_v19 = vpop.f32.mrf.mxu1 }
 0xa76   : > { %v8254_v32 = vadd.f32 %v8253_v19, %v8205_v33  ;;  %v8440_v43 = vmax.f32 %v8350_v5, 0.0 }
 0xa79   : > { %v8302_v8 = vpop.f32.mrf.mxu2 }
 0xa7a   : > { %v8303_v34 = vadd.f32 %v8302_v8, %v8254_v32 }
 0xa7b   : > { %v8351_v51 = vpop.f32.mrf.mxu3  ;;  %v8207_v24 = vpop.f32.mrf.mxu0 }
 0xa7c   : > { %v8208_v2 = vadd.f32 %v8207_v24, %v18790_v14  ;;  %v8352_v29 = vadd.f32 %v8351_v51, %v8303_v34  ;;  %v13122_v14 = vld [vmem:[%s19109_s5 + $0x100] sm:$0xff] }
 0xa7d   : > { %v8256_v27 = vpop.f32.mrf.mxu1  ;;  %9280 = vmatpush.bf16.msrb.mxu0 %v13122_v14 }
 0xa7e   : > { %v8257_v4 = vadd.f32 %v8256_v27, %v8208_v2  ;;  %9110 = vmatmul.bf16.gmra.mxu0 %v19560_v18  ;;  %v8448_v12 = vmax.f32 %v8352_v29, 0.0  ;;  %9208 = vmatmul.bf16.gmra.mxu2 %v19562_v30  ;;  %v19569_v30 = vld [vmem:[#allocation20_spill] sm:$0xff] }
 0xa80   : > { %9159 = vmatmul.bf16.gmra.mxu1 %v19561_v41  ;;  %9257 = vmatmul.bf16.gmra.mxu3 %v19563_v59  ;;  %v18953_v53 = vpack.c.bf16 %v8448_v12, %v8440_v43  ;;  %v19568_v43 = vld [vmem:[#allocation17_spill] sm:$0xff]  ;;  %v19570_v59 = vld [vmem:[#allocation58_spill] sm:$0xff] }
 0xa81   : > { %v8305_v15 = vpop.f32.mrf.mxu2 }
 0xa82   : > { %v8306_v36 = vadd.f32 %v8305_v15, %v8257_v4 }
 0xa83   : > { %v8354_v54 = vpop.f32.mrf.mxu3  ;;  %v8209_v22 = vpop.f32.mrf.mxu0 }
 0xa84   : > { %v8210_v61 = vadd.f32 %v8209_v22, %v18796_v38  ;;  %v8355_v11 = vadd.f32 %v8354_v54, %v8306_v36 }
 0xa85   : > { %v8258_v50 = vpop.f32.mrf.mxu1 }
 0xa86   : > { %v8259_v1 = vadd.f32 %v8258_v50, %v8210_v61  ;;  %v8456_v38 = vmax.f32 %v8355_v11, 0.0  ;;  %v18978_v50 = vld [vmem:[%s19110_s6] ss:$0 sm:$0xff] }
 0xa89   : > { %v8307_v62 = vpop.f32.mrf.mxu2 }
 0xa8a   : > { %v8308_v49 = vadd.f32 %v8307_v62, %v8259_v1 }
 0xa8b   : > { %v8356_v40 = vpop.f32.mrf.mxu3  ;;  %v8212_v0 = vpop.f32.mrf.mxu0 }
 0xa8c   : > { %v8213_v39 = vadd.f32 %v8212_v0, %v18812_v7  ;;  %v8357_v42 = vadd.f32 %v8356_v40, %v8308_v49 }
 0xa8d   : > { %v8261_v3 = vpop.f32.mrf.mxu1 }
 0xa8e   : > { %v8262_v47 = vadd.f32 %v8261_v3, %v8213_v39  ;;  %9115 = vmatmul.bf16.gmra.mxu0 %v19564_v13  ;;  %v8464_v25 = vmax.f32 %v8357_v42, 0.0  ;;  %9213 = vmatmul.bf16.gmra.mxu2 %v19566_v31  ;;  %v19572_v3 = vld [vmem:[#allocation66_spill] sm:$0xff] }
 0xa90   : > { %9164 = vmatmul.bf16.gmra.mxu1 %v19565_v17  ;;  %9262 = vmatmul.bf16.gmra.mxu3 %v19567_v6  ;;  %v18964_v48 = vpack.c.bf16 %v8464_v25, %v8456_v38 }
 0xa91   : > { %v8310_v21 = vpop.f32.mrf.mxu2 }
 0xa92   : > { %v8311_v33 = vadd.f32 %v8310_v21, %v8262_v47  ;;  %v19573_v47 = vld [vmem:[#allocation74_spill] sm:$0xff] }
 0xa93   : > { %v8359_v19 = vpop.f32.mrf.mxu3  ;;  %v8214_v5 = vpop.f32.mrf.mxu0 }
 0xa94   : > { %v8215_v7 = vadd.f32 %v8214_v5, %v18818_v35  ;;  %v8360_v60 = vadd.f32 %v8359_v19, %v8311_v33  ;;  %v19571_v35 = vld [vmem:[#allocation65_spill] sm:$0xff] }
 0xa95   : > { %v8263_v32 = vpop.f32.mrf.mxu1 }
 0xa96   : > { %v8264_v8 = vadd.f32 %v8263_v32, %v8215_v7  ;;  %v8472_v12 = vmax.f32 %v8360_v60, 0.0 }
 0xa99   : > { %v8312_v34 = vpop.f32.mrf.mxu2 }
 0xa9a   : > { %v8313_v51 = vadd.f32 %v8312_v34, %v8264_v8 }
 0xa9b   : > { %v8361_v24 = vpop.f32.mrf.mxu3  ;;  %v8217_v2 = vpop.f32.mrf.mxu0 }
 0xa9c   : > { %v8218_v27 = vadd.f32 %v8217_v2, %v18834_v46  ;;  %v8362_v4 = vadd.f32 %v8361_v24, %v8313_v51  ;;  %v19574_v51 = vld [vmem:[#allocation67_spill] sm:$0xff] }
 0xa9d   : > { %v8266_v29 = vpop.f32.mrf.mxu1  ;;  %v19575_v24 = vld [vmem:[#allocation75_spill] sm:$0xff] }
 0xa9e   : > { %v8267_v18 = vadd.f32 %v8266_v29, %v8218_v27  ;;  %9120 = vmatmul.bf16.gmra.mxu0 %v19568_v43  ;;  %v8480_v41 = vmax.f32 %v8362_v4, 0.0  ;;  %9218 = vmatmul.bf16.gmra.mxu2 %v19570_v59 }
 0xaa0   : > { %9169 = vmatmul.bf16.gmra.mxu1 %v19569_v30  ;;  %9267 = vmatmul.bf16.gmra.mxu3 %v19571_v35  ;;  %v18972_v28 = vpack.c.bf16 %v8480_v41, %v8472_v12 }
 0xaa1   : > { %v8315_v14 = vpop.f32.mrf.mxu2 }
 0xaa2   : > { %v8316_v16 = vadd.f32 %v8315_v14, %v8267_v18 }
 0xaa3   : > { %v8364_v15 = vpop.f32.mrf.mxu3  ;;  %v8219_v36 = vpop.f32.mrf.mxu0 }
 0xaa4   : > { %v8220_v46 = vadd.f32 %v8219_v36, %v18840_v52  ;;  %v8365_v22 = vadd.f32 %v8364_v15, %v8316_v16  ;;  %v19576_v36 = vld [vmem:[#allocation68_spill] sm:$0xff] }
 0xaa5   : > { %v8268_v54 = vpop.f32.mrf.mxu1 }
 0xaa6   : > { %v8269_v61 = vadd.f32 %v8268_v54, %v8220_v46  ;;  %v8488_v52 = vmax.f32 %v8365_v22, 0.0  ;;  %v19577_v46 = vld [vmem:[#allocation76_spill] sm:$0xff] }
 0xaa9   : > { %v8317_v11 = vpop.f32.mrf.mxu2 }
 0xaaa   : > { %v8318_v1 = vadd.f32 %v8317_v11, %v8269_v61 }
 0xaab   : > { %v8366_v23 = vpop.f32.mrf.mxu3  ;;  %v9086_v62 = vpop.f32.mrf.mxu0 }
 0xaac   : > { %v9087_v49 = vadd.f32 %v18978_v50, %v9086_v62  ;;  %v8367_v0 = vadd.f32 %v8366_v23, %v8318_v1 }
 0xaad   : > { %v9135_v40 = vpop.f32.mrf.mxu1 }
 0xaae   : > { %v9136_v39 = vadd.f32 %v9135_v40, %v9087_v49  ;;  %9281 = vmatmul.bf16.vlgmr.msrb.gmra.mxu0 %v19572_v3  ;;  %v8496_v42 = vmax.f32 %v8367_v0, 0.0  ;;  %9379 = vmatmul.bf16.vlgmr.msrb.gmra.mxu2 %v18472_v58 }
 0xab0   : > { %9330 = vmatmul.bf16.vlgmr.msrb.gmra.mxu1 %v19573_v47  ;;  %9428 = vmatmul.bf16.vlgmr.msrb.gmra.mxu3 %v18873_v44  ;;  %v18985_v13 = vpack.c.bf16 %v8496_v42, %v8488_v52  ;;  %v19578_v47 = vld [vmem:[#allocation69_spill] sm:$0xff] }
 0xab1   : > { %v9184_v38 = vpop.f32.mrf.mxu2 }
 0xab2   : > { %v9185_v25 = vadd.f32 %v9184_v38, %v9136_v39  ;;  %v19579_v38 = vld [vmem:[#allocation77_spill] sm:$0xff] }
 0xab3   : > { %v9233_v17 = vpop.f32.mrf.mxu3  ;;  %v9088_v31 = vpop.f32.mrf.mxu0 }
 0xab4   : > { %v9089_v6 = vadd.f32 %v18978_v50, %v9088_v31  ;;  %v18988_v33 = vadd.f32 %v9233_v17, %v9185_v25 }
 0xab5   : > { %v9137_v21 = vpop.f32.mrf.mxu1 }
 0xab6   : > { %v9138_v19 = vadd.f32 %v9137_v21, %v9089_v6 }
 0xab9   : > { %v9186_v5 = vpop.f32.mrf.mxu2 }
 0xaba   : > { %v9187_v7 = vadd.f32 %v9186_v5, %v9138_v19 }
 0xabb   : > { %v9235_v32 = vpop.f32.mrf.mxu3  ;;  %v9091_v60 = vpop.f32.mrf.mxu0 }
 0xabc   : > { %v9092_v58 = vadd.f32 %v18978_v50, %v9091_v60  ;;  %v18991_v44 = vadd.f32 %v9235_v32, %v9187_v7 }
 0xabd   : > { %v9140_v8 = vpop.f32.mrf.mxu1 }
 0xabe   : > { %v9141_v34 = vadd.f32 %v9140_v8, %v9092_v58  ;;  %9286 = vmatmul.bf16.gmra.mxu0 %v19574_v51  ;;  %9384 = vmatmul.bf16.gmra.mxu2 %v18513_v55 }
 0xac0   : > { %9335 = vmatmul.bf16.gmra.mxu1 %v19575_v24  ;;  %9433 = vmatmul.bf16.gmra.mxu3 %v18893_v37  ;;  %v19580_v24 = vld [vmem:[#allocation70_spill] sm:$0xff] }
 0xac1   : > { %v9189_v2 = vpop.f32.mrf.mxu2 }
 0xac2   : > { %v9190_v27 = vadd.f32 %v9189_v2, %v9141_v34  ;;  %v19581_v2 = vld [vmem:[#allocation78_spill] sm:$0xff] }
 0xac3   : > { %v9238_v29 = vpop.f32.mrf.mxu3  ;;  %v9093_v4 = vpop.f32.mrf.mxu0 }
 0xac4   : > { %v9094_v18 = vadd.f32 %v18978_v50, %v9093_v4  ;;  %v18998_v12 = vadd.f32 %v9238_v29, %v9190_v27 }
 0xac5   : > { %v9142_v43 = vpop.f32.mrf.mxu1 }
 0xac6   : > { %v9143_v41 = vadd.f32 %v9142_v43, %v9094_v18 }
 0xac9   : > { %v9191_v30 = vpop.f32.mrf.mxu2 }
 0xaca   : > { %v9192_v59 = vadd.f32 %v9191_v30, %v9143_v41 }
 0xacb   : > { %v9240_v35 = vpop.f32.mrf.mxu3  ;;  %v9096_v14 = vpop.f32.mrf.mxu0 }
 0xacc   : > { %v9097_v16 = vadd.f32 %v18978_v50, %v9096_v14  ;;  %v19001_v55 = vadd.f32 %v9240_v35, %v9192_v59 }
 0xacd   : > { %v9145_v15 = vpop.f32.mrf.mxu1 }
 0xace   : > { %v9146_v37 = vadd.f32 %v9145_v15, %v9097_v16  ;;  %9291 = vmatmul.bf16.gmra.mxu0 %v19576_v36  ;;  %9389 = vmatmul.bf16.gmra.mxu2 %v18545_v26 }
 0xad0   : > { %9340 = vmatmul.bf16.gmra.mxu1 %v19577_v46  ;;  %9438 = vmatmul.bf16.gmra.mxu3 %v18913_v20  ;;  %v19582_v46 = vld [vmem:[#allocation71_spill] sm:$0xff] }
 0xad1   : > { %v9194_v54 = vpop.f32.mrf.mxu2 }
 0xad2   : > { %v9195_v22 = vadd.f32 %v9194_v54, %v9146_v37  ;;  %v19583_v54 = vld [vmem:[#allocation79_spill] sm:$0xff] }
 0xad3   : > { %v9243_v61 = vpop.f32.mrf.mxu3  ;;  %v9098_v11 = vpop.f32.mrf.mxu0 }
 0xad4   : > { %v9099_v1 = vadd.f32 %v18978_v50, %v9098_v11  ;;  %v19008_v62 = vadd.f32 %v9243_v61, %v9195_v22 }
 0xad5   : > { %v9147_v23 = vpop.f32.mrf.mxu1 }
 0xad6   : > { %v9148_v49 = vadd.f32 %v9147_v23, %v9099_v1 }
 0xad9   : > { %v9196_v40 = vpop.f32.mrf.mxu2 }
 0xada   : > { %v9197_v0 = vadd.f32 %v9196_v40, %v9148_v49 }
 0xadb   : > { %v9245_v39 = vpop.f32.mrf.mxu3  ;;  %v9101_v3 = vpop.f32.mrf.mxu0 }
 0xadc   : > { %v9102_v52 = vadd.f32 %v18978_v50, %v9101_v3  ;;  %v19011_v26 = vadd.f32 %v9245_v39, %v9197_v0 }
 0xadd   : > { %v9150_v42 = vpop.f32.mrf.mxu1 }
 0xade   : > { %v9151_v20 = vadd.f32 %v9150_v42, %v9102_v52  ;;  %9296 = vmatmul.bf16.gmra.mxu0 %v19578_v47  ;;  %9394 = vmatmul.bf16.gmra.mxu2 %v18577_v57 }
 0xae0   : > { %9345 = vmatmul.bf16.gmra.mxu1 %v19579_v38  ;;  %9443 = vmatmul.bf16.gmra.mxu3 %v18933_v63  ;;  %v19584_v38 = vld [vmem:[#allocation72_spill] sm:$0xff] }
 0xae1   : > { %v9199_v25 = vpop.f32.mrf.mxu2 }
 0xae2   : > { %v9200_v17 = vadd.f32 %v9199_v25, %v9151_v20  ;;  %v19585_v25 = vld [vmem:[#allocation80_spill] sm:$0xff] }
 0xae3   : > { %v9248_v31 = vpop.f32.mrf.mxu3  ;;  %v9103_v6 = vpop.f32.mrf.mxu0 }
 0xae4   : > { %v9104_v21 = vadd.f32 %v18978_v50, %v9103_v6  ;;  %v19018_v5 = vadd.f32 %v9248_v31, %v9200_v17 }
 0xae5   : > { %v9152_v19 = vpop.f32.mrf.mxu1 }
 0xae6   : > { %v9153_v7 = vadd.f32 %v9152_v19, %v9104_v21 }
 0xae9   : > { %v9201_v32 = vpop.f32.mrf.mxu2 }
 0xaea   : > { %v9202_v60 = vadd.f32 %v9201_v32, %v9153_v7 }
 0xaeb   : > { %v9250_v58 = vpop.f32.mrf.mxu3  ;;  %v9106_v8 = vpop.f32.mrf.mxu0 }
 0xaec   : > { %v9107_v34 = vadd.f32 %v18978_v50, %v9106_v8  ;;  %v19021_v57 = vadd.f32 %v9250_v58, %v9202_v60 }
 0xaed   : > { %v9155_v51 = vpop.f32.mrf.mxu1 }
 0xaee   : > { %v9156_v63 = vadd.f32 %v9155_v51, %v9107_v34  ;;  %9301 = vmatmul.bf16.gmra.mxu0 %v19580_v24  ;;  %9399 = vmatmul.bf16.gmra.mxu2 %v18609_v56 }
 0xaf0   : > { %9350 = vmatmul.bf16.gmra.mxu1 %v19581_v2  ;;  %9448 = vmatmul.bf16.gmra.mxu3 %v18953_v53  ;;  %v19586_v2 = vld [vmem:[#allocation73_spill] sm:$0xff] }
 0xaf1   : > { %v9204_v27 = vpop.f32.mrf.mxu2 }
 0xaf2   : > { %v9205_v29 = vadd.f32 %v9204_v27, %v9156_v63  ;;  %v19587_v27 = vld [vmem:[#allocation81_spill] sm:$0xff] }
 0xaf3   : > { %v9253_v4 = vpop.f32.mrf.mxu3  ;;  %v9108_v18 = vpop.f32.mrf.mxu0 }
 0xaf4   : > { %v9109_v43 = vadd.f32 %v18978_v50, %v9108_v18  ;;  %v19028_v30 = vadd.f32 %v9253_v4, %v9205_v29 }
 0xaf5   : > { %v9157_v41 = vpop.f32.mrf.mxu1 }
 0xaf6   : > { %v9158_v59 = vadd.f32 %v9157_v41, %v9109_v43 }
 0xaf9   : > { %v9206_v35 = vpop.f32.mrf.mxu2 }
 0xafa   : > { %v9207_v14 = vadd.f32 %v9206_v35, %v9158_v59 }
 0xafb   : > { %v9255_v16 = vpop.f32.mrf.mxu3  ;;  %v9111_v15 = vpop.f32.mrf.mxu0 }
 0xafc   : > { %v9112_v37 = vadd.f32 %v18978_v50, %v9111_v15  ;;  %v19031_v56 = vadd.f32 %v9255_v16, %v9207_v14 }
 0xafd   : > { %v9160_v36 = vpop.f32.mrf.mxu1 }
 0xafe   : > { %v9161_v53 = vadd.f32 %v9160_v36, %v9112_v37  ;;  %9306 = vmatmul.bf16.gmra.mxu0 %v19582_v46  ;;  %9404 = vmatmul.bf16.gmra.mxu2 %v18632_v9 }
 0xb00   : > { %9355 = vmatmul.bf16.gmra.mxu1 %v19583_v54  ;;  %9453 = vmatmul.bf16.gmra.mxu3 %v18964_v48 }
 0xb01   : > { %v9209_v22 = vpop.f32.mrf.mxu2 }
 0xb02   : > { %v9210_v61 = vadd.f32 %v9209_v22, %v9161_v53 }
 0xb03   : > { %v9258_v11 = vpop.f32.mrf.mxu3  ;;  %v9113_v1 = vpop.f32.mrf.mxu0 }
 0xb04   : > { %v9114_v23 = vadd.f32 %v18978_v50, %v9113_v1  ;;  %v19038_v40 = vadd.f32 %v9258_v11, %v9210_v61 }
 0xb05   : > { %v9162_v49 = vpop.f32.mrf.mxu1 }
 0xb06   : > { %v9163_v0 = vadd.f32 %v9162_v49, %v9114_v23 }
 0xb09   : > { %v9211_v39 = vpop.f32.mrf.mxu2 }
 0xb0a   : > { %v9212_v3 = vadd.f32 %v9211_v39, %v9163_v0 }
 0xb0b   : > { %v9260_v52 = vpop.f32.mrf.mxu3  ;;  %v9116_v42 = vpop.f32.mrf.mxu0 }
 0xb0c   : > { %v9117_v20 = vadd.f32 %v18978_v50, %v9116_v42  ;;  %v19041_v9 = vadd.f32 %v9260_v52, %v9212_v3 }
 0xb0d   : > { %v9165_v47 = vpop.f32.mrf.mxu1 }
 0xb0e   : > { %v9166_v48 = vadd.f32 %v9165_v47, %v9117_v20  ;;  %9311 = vmatmul.bf16.gmra.mxu0 %v19584_v38  ;;  %9409 = vmatmul.bf16.gmra.mxu2 %v18652_v10 }
 0xb10   : > { %9360 = vmatmul.bf16.gmra.mxu1 %v19585_v25  ;;  %9458 = vmatmul.bf16.gmra.mxu3 %v18972_v28 }
 0xb11   : > { %v9214_v17 = vpop.f32.mrf.mxu2 }
 0xb12   : > { %v9215_v31 = vadd.f32 %v9214_v17, %v9166_v48 }
 0xb13   : > { %v9263_v6 = vpop.f32.mrf.mxu3  ;;  %v9118_v21 = vpop.f32.mrf.mxu0 }
 0xb14   : > { %v9119_v19 = vadd.f32 %v18978_v50, %v9118_v21  ;;  %v19048_v32 = vadd.f32 %v9263_v6, %v9215_v31 }
 0xb15   : > { %v9167_v7 = vpop.f32.mrf.mxu1 }
 0xb16   : > { %v9168_v60 = vadd.f32 %v9167_v7, %v9119_v19 }
 0xb19   : > { %v9216_v58 = vpop.f32.mrf.mxu2 }
 0xb1a   : > { %v9217_v8 = vadd.f32 %v9216_v58, %v9168_v60 }
 0xb1b   : > { %v9265_v34 = vpop.f32.mrf.mxu3  ;;  %v9121_v51 = vpop.f32.mrf.mxu0 }
 0xb1c   : > { %v9122_v63 = vadd.f32 %v18978_v50, %v9121_v51  ;;  %v19051_v10 = vadd.f32 %v9265_v34, %v9217_v8 }
 0xb1d   : > { %v9170_v24 = vpop.f32.mrf.mxu1 }
 0xb1e   : > { %v9171_v28 = vadd.f32 %v9170_v24, %v9122_v63  ;;  %9316 = vmatmul.bf16.gmra.mxu0 %v19586_v2  ;;  %9414 = vmatmul.bf16.gmra.mxu2 %v18677_v45 }
 0xb20   : > { %9365 = vmatmul.bf16.gmra.mxu1 %v19587_v27  ;;  %9463 = vmatmul.bf16.gmra.mxu3 %v18985_v13 }
 0xb21   : > { %v9219_v29 = vpop.f32.mrf.mxu2 }
 0xb22   : > { %v9220_v4 = vadd.f32 %v9219_v29, %v9171_v28 }
 0xb23   : > { %v9268_v18 = vpop.f32.mrf.mxu3  ;;  %v9123_v43 = vpop.f32.mrf.mxu0 }
 0xb24   : > { %v9124_v41 = vadd.f32 %v18978_v50, %v9123_v43  ;;  %v19058_v35 = vadd.f32 %v9268_v18, %v9220_v4 }
 0xb25   : > { %v9172_v59 = vpop.f32.mrf.mxu1 }
 0xb26   : > { %v9173_v14 = vadd.f32 %v9172_v59, %v9124_v41 }
 0xb29   : > { %v9221_v16 = vpop.f32.mrf.mxu2 }
 0xb2a   : > { %v9222_v15 = vadd.f32 %v9221_v16, %v9173_v14 }
 0xb2b   : > { %v9270_v37 = vpop.f32.mrf.mxu3  ;;  %v9282_v36 = vpop.f32.mrf.mxu0 }
 0xb2c   : > { %v19060_v46 = vadd.f32 %v9270_v37, %v9222_v15  ;;  %v9283_v45 = vadd.f32 %v9282_v36, %v18988_v33 }
 0xb2d   : > { %v9331_v53 = vpop.f32.mrf.mxu1 }
 0xb2e   : > { %v9332_v13 = vadd.f32 %v9331_v53, %v9283_v45 }
 0xb31   : > { %v9380_v54 = vpop.f32.mrf.mxu2 }
 0xb32   : > { %v9381_v22 = vadd.f32 %v9380_v54, %v9332_v13 }
 0xb33   : > { %v9429_v61 = vpop.f32.mrf.mxu3  ;;  %v9284_v11 = vpop.f32.mrf.mxu0 }
 0xb34   : > { %v9430_v1 = vadd.f32 %v9429_v61, %v9381_v22  ;;  %v9285_v23 = vadd.f32 %v9284_v11, %v18991_v44 }
 0xb35   : > { %v9333_v50 = vpop.f32.mrf.mxu1 }
 0xb36   : > { %9469 = vst [vmem:[%s19068_s20] sm:$0xff] %v9430_v1  ;;  %v9334_v49 = vadd.f32 %v9333_v50, %v9285_v23 }
 0xb39   : > { %v9382_v33 = vpop.f32.mrf.mxu2 }
 0xb3a   : > { %v9383_v0 = vadd.f32 %v9382_v33, %v9334_v49 }
 0xb3b   : > { %v9431_v39 = vpop.f32.mrf.mxu3  ;;  %v9287_v3 = vpop.f32.mrf.mxu0 }
 0xb3c   : > { %v9432_v42 = vadd.f32 %v9431_v39, %v9383_v0  ;;  %v9288_v20 = vadd.f32 %v9287_v3, %v18998_v12 }
 0xb3d   : > { %v9336_v52 = vpop.f32.mrf.mxu1 }
 0xb3e   : > { %9470 = vst [vmem:[%s19068_s20 + $0x8] sm:$0xff] %v9432_v42  ;;  %v9337_v47 = vadd.f32 %v9336_v52, %v9288_v20 }
 0xb41   : > { %v9385_v48 = vpop.f32.mrf.mxu2 }
 0xb42   : > { %v9386_v38 = vadd.f32 %v9385_v48, %v9337_v47 }
 0xb43   : > { %v9434_v25 = vpop.f32.mrf.mxu3  ;;  %v9289_v17 = vpop.f32.mrf.mxu0 }
 0xb44   : > { %v9435_v44 = vadd.f32 %v9434_v25, %v9386_v38  ;;  %v9290_v6 = vadd.f32 %v9289_v17, %v19001_v55 }
 0xb45   : > { %v9338_v31 = vpop.f32.mrf.mxu1 }
 0xb46   : > { %9471 = vst [vmem:[%s19068_s20 + $0x10] sm:$0xff] %v9435_v44  ;;  %v9339_v21 = vadd.f32 %v9338_v31, %v9290_v6 }
 0xb49   : > { %v9387_v19 = vpop.f32.mrf.mxu2 }
 0xb4a   : > { %v9388_v7 = vadd.f32 %v9387_v19, %v9339_v21 }
 0xb4b   : > { %v9436_v60 = vpop.f32.mrf.mxu3  ;;  %v9292_v58 = vpop.f32.mrf.mxu0 }
 0xb4c   : > { %v9437_v12 = vadd.f32 %v9436_v60, %v9388_v7  ;;  %v9293_v34 = vadd.f32 %v9292_v58, %v19008_v62 }
 0xb4d   : > { %v9341_v8 = vpop.f32.mrf.mxu1 }
 0xb4e   : > { %9472 = vst [vmem:[%s19068_s20 + $0x18] sm:$0xff] %v9437_v12  ;;  %v9342_v51 = vadd.f32 %v9341_v8, %v9293_v34 }
 0xb51   : > { %v9390_v63 = vpop.f32.mrf.mxu2 }
 0xb52   : > { %v9391_v24 = vadd.f32 %v9390_v63, %v9342_v51 }
 0xb53   : > { %v9439_v28 = vpop.f32.mrf.mxu3  ;;  %v9294_v2 = vpop.f32.mrf.mxu0 }
 0xb54   : > { %v9440_v55 = vadd.f32 %v9439_v28, %v9391_v24  ;;  %v9295_v29 = vadd.f32 %v9294_v2, %v19011_v26 }
 0xb55   : > { %v9343_v27 = vpop.f32.mrf.mxu1 }
 0xb56   : > { %9473 = vst [vmem:[%s19068_s20 + $0x20] sm:$0xff] %v9440_v55  ;;  %v9344_v4 = vadd.f32 %v9343_v27, %v9295_v29 }
 0xb59   : > { %v9392_v18 = vpop.f32.mrf.mxu2 }
 0xb5a   : > { %v9393_v43 = vadd.f32 %v9392_v18, %v9344_v4 }
 0xb5b   : > { %v9441_v41 = vpop.f32.mrf.mxu3  ;;  %v9297_v59 = vpop.f32.mrf.mxu0 }
 0xb5c   : > { %v9442_v62 = vadd.f32 %v9441_v41, %v9393_v43  ;;  %v9298_v16 = vadd.f32 %v9297_v59, %v19018_v5 }
 0xb5d   : > { %v9346_v14 = vpop.f32.mrf.mxu1 }
 0xb5e   : > { %9474 = vst [vmem:[%s19068_s20 + $0x28] sm:$0xff] %v9442_v62  ;;  %v9347_v15 = vadd.f32 %v9346_v14, %v9298_v16 }
 0xb61   : > { %v9395_v37 = vpop.f32.mrf.mxu2 }
 0xb62   : > { %v9396_v36 = vadd.f32 %v9395_v37, %v9347_v15 }
 0xb63   : > { %v9444_v53 = vpop.f32.mrf.mxu3  ;;  %v9299_v45 = vpop.f32.mrf.mxu0 }
 0xb64   : > { %v9445_v26 = vadd.f32 %v9444_v53, %v9396_v36  ;;  %v9300_v54 = vadd.f32 %v9299_v45, %v19021_v57 }
 0xb65   : > { %v9348_v13 = vpop.f32.mrf.mxu1 }
 0xb66   : > { %9475 = vst [vmem:[%s19068_s20 + $0x30] sm:$0xff] %v9445_v26  ;;  %v9349_v22 = vadd.f32 %v9348_v13, %v9300_v54 }
 0xb69   : > { %v9397_v61 = vpop.f32.mrf.mxu2 }
 0xb6a   : > { %v9398_v11 = vadd.f32 %v9397_v61, %v9349_v22 }
 0xb6b   : > { %v9446_v50 = vpop.f32.mrf.mxu3  ;;  %v9302_v1 = vpop.f32.mrf.mxu0 }
 0xb6c   : > { %v9447_v5 = vadd.f32 %v9446_v50, %v9398_v11  ;;  %v9303_v49 = vadd.f32 %v9302_v1, %v19028_v30 }
 0xb6d   : > { %v9351_v23 = vpop.f32.mrf.mxu1 }
 0xb6e   : > { %9476 = vst [vmem:[%s19068_s20 + $0x38] sm:$0xff] %v9447_v5  ;;  %v9352_v33 = vadd.f32 %v9351_v23, %v9303_v49 }
 0xb71   : > { %v9400_v0 = vpop.f32.mrf.mxu2 }
 0xb72   : > { %v9401_v39 = vadd.f32 %v9400_v0, %v9352_v33 }
 0xb73   : > { %v9449_v3 = vpop.f32.mrf.mxu3  ;;  %v9304_v52 = vpop.f32.mrf.mxu0 }
 0xb74   : > { %v9450_v57 = vadd.f32 %v9449_v3, %v9401_v39  ;;  %v9305_v20 = vadd.f32 %v9304_v52, %v19031_v56 }
 0xb75   : > { %v9353_v42 = vpop.f32.mrf.mxu1 }
 0xb76   : > { %9477 = vst [vmem:[%s19068_s20 + $0x40] sm:$0xff] %v9450_v57  ;;  %v9354_v47 = vadd.f32 %v9353_v42, %v9305_v20 }
 0xb79   : > { %v9402_v48 = vpop.f32.mrf.mxu2 }
 0xb7a   : > { %v9403_v38 = vadd.f32 %v9402_v48, %v9354_v47 }
 0xb7b   : > { %v9451_v25 = vpop.f32.mrf.mxu3  ;;  %v9307_v17 = vpop.f32.mrf.mxu0 }
 0xb7c   : > { %v9452_v30 = vadd.f32 %v9451_v25, %v9403_v38  ;;  %v9308_v44 = vadd.f32 %v9307_v17, %v19038_v40 }
 0xb7d   : > { %v9356_v31 = vpop.f32.mrf.mxu1 }
 0xb7e   : > { %9478 = vst [vmem:[%s19068_s20 + $0x48] sm:$0xff] %v9452_v30  ;;  %v9357_v6 = vadd.f32 %v9356_v31, %v9308_v44 }
 0xb81   : > { %v9405_v21 = vpop.f32.mrf.mxu2 }
 0xb82   : > { %v9406_v19 = vadd.f32 %v9405_v21, %v9357_v6 }
 0xb83   : > { %v9454_v7 = vpop.f32.mrf.mxu3  ;;  %v9309_v60 = vpop.f32.mrf.mxu0 }
 0xb84   : > { %v9455_v56 = vadd.f32 %v9454_v7, %v9406_v19  ;;  %v9310_v8 = vadd.f32 %v9309_v60, %v19041_v9 }
 0xb85   : > { %v9358_v58 = vpop.f32.mrf.mxu1 }
 0xb86   : > { %9479 = vst [vmem:[%s19068_s20 + $0x50] sm:$0xff] %v9455_v56  ;;  %v9359_v12 = vadd.f32 %v9358_v58, %v9310_v8 }
 0xb89   : > { %v9407_v34 = vpop.f32.mrf.mxu2 }
 0xb8a   : > { %v9408_v51 = vadd.f32 %v9407_v34, %v9359_v12 }
 0xb8b   : > { %v9456_v63 = vpop.f32.mrf.mxu3  ;;  %v9312_v24 = vpop.f32.mrf.mxu0 }
 0xb8c   : > { %v9457_v40 = vadd.f32 %v9456_v63, %v9408_v51  ;;  %v9313_v2 = vadd.f32 %v9312_v24, %v19048_v32 }
 0xb8d   : > { %v9361_v28 = vpop.f32.mrf.mxu1 }
 0xb8e   : > { %9480 = vst [vmem:[%s19068_s20 + $0x58] sm:$0xff] %v9457_v40  ;;  %v9362_v27 = vadd.f32 %v9361_v28, %v9313_v2 }
 0xb91   : > { %v9410_v55 = vpop.f32.mrf.mxu2 }
 0xb92   : > { %v9411_v29 = vadd.f32 %v9410_v55, %v9362_v27 }
 0xb93   : > { %v9459_v4 = vpop.f32.mrf.mxu3  ;;  %v9314_v18 = vpop.f32.mrf.mxu0 }
 0xb94   : > { %v9460_v9 = vadd.f32 %v9459_v4, %v9411_v29  ;;  %v9315_v41 = vadd.f32 %v9314_v18, %v19051_v10 }
 0xb95   : > { %v9363_v43 = vpop.f32.mrf.mxu1 }
 0xb96   : > { %9481 = vst [vmem:[%s19068_s20 + $0x60] sm:$0xff] %v9460_v9  ;;  %v9364_v59 = vadd.f32 %v9363_v43, %v9315_v41 }
 0xb99   : > { %v9412_v14 = vpop.f32.mrf.mxu2 }
 0xb9a   : > { %v9413_v62 = vadd.f32 %v9412_v14, %v9364_v59 }
 0xb9b   : > { %v9461_v16 = vpop.f32.mrf.mxu3  ;;  %v9317_v15 = vpop.f32.mrf.mxu0 }
 0xb9c   : > { %v9462_v37 = vadd.f32 %v9461_v16, %v9413_v62  ;;  %v9318_v32 = vadd.f32 %v9317_v15, %v19058_v35 }
 0xb9d   : > { %v9366_v36 = vpop.f32.mrf.mxu1 }
 0xb9e   : > { %9482 = vst [vmem:[%s19068_s20 + $0x68] sm:$0xff] %v9462_v37  ;;  %v9367_v53 = vadd.f32 %v9366_v36, %v9318_v32 }
 0xba1   : > { %v9415_v45 = vpop.f32.mrf.mxu2 }
 0xba2   : > { %v9416_v13 = vadd.f32 %v9415_v45, %v9367_v53 }
 0xba3   : > { %v9464_v26 = vpop.f32.mrf.mxu3  ;;  %v9319_v54 = vpop.f32.mrf.mxu0 }
 0xba4   : > { %v9465_v22 = vadd.f32 %v9464_v26, %v9416_v13  ;;  %v9320_v10 = vadd.f32 %v9319_v54, %v19060_v46 }
 0xba5   : > { %v9368_v61 = vpop.f32.mrf.mxu1 }
 0xba6   : > { %9483 = vst [vmem:[%s19068_s20 + $0x70] sm:$0xff] %v9465_v22  ;;  %v9369_v11 = vadd.f32 %v9368_v61, %v9320_v10 }
 0xba9   : > { %v9417_v50 = vpop.f32.mrf.mxu2 }
 0xbaa   : > { %v9418_v1 = vadd.f32 %v9417_v50, %v9369_v11 }
 0xbab   : > { %v9466_v23 = vpop.f32.mrf.mxu3 }
 0xbac   : > { %v9467_v5 = vadd.f32 %v9466_v23, %v9418_v1 }
 0xbae   : > { %9484 = vst [vmem:[%s19068_s20 + $0x78] sm:$0xff] %v9467_v5 }
 0xbaf PF: > { %s17_s24 = sadd.s32 1, %s13177_s24  }
 0xbb0   : > { %p14_p4 = scmp.ge.s32.totalorder %s17_s24, 4  }
 0xbb2   :  { %16 = sbr.rel (!%p14_p4) target bundleno = 1 (0x1), region = 78 }

</bundles_post_ra>
